<compile_context>
chip_gen: v7x
topology: tpu7x:2x2x1
jax: 0.10.0
libtpu: 0.0.40
codegen_flags: <defaults>
</compile_context>

<pallas_src>
import functools

import jax
import jax.numpy as jnp
from jax.experimental import pallas as pl
from jax.experimental.pallas import tpu as pltpu


# ---------------------------------------------------------------------------
# In-kernel helpers (everything VMEM / vreg resident)
# ---------------------------------------------------------------------------
def _zero_halo(pad_ref):
    """Zero only the 1-pixel halo strips of a (B, H+2, W+2, C) pad scratch."""
    B, Hp, Wp, C = pad_ref.shape
    dt = pad_ref.dtype
    pad_ref[:, 0:1, :, :] = jnp.zeros((B, 1, Wp, C), dt)
    pad_ref[:, Hp - 1:Hp, :, :] = jnp.zeros((B, 1, Wp, C), dt)
    pad_ref[:, :, 0:1, :] = jnp.zeros((B, Hp, 1, C), dt)
    pad_ref[:, :, Wp - 1:Wp, :] = jnp.zeros((B, Hp, 1, C), dt)


def _conv3x3_bn_relu(pad_ref, w_ref, s_ref, h_ref):
    """Shift-and-accumulate 3x3 'same' conv + folded BatchNorm + ReLU.

    pad_ref: (B, H+2, W+2, Cin) bf16 padded activations (halo already zero)
    w_ref:   (9, Cin, Cout) bf16 weights, tap-major (t = kh*3 + kw)
    s_ref:   (1, Cout) f32   gamma / sqrt(var + eps)
    h_ref:   (1, Cout) f32   scale * (conv_bias - mean) + beta
    Returns  (B*H*W, Cout) f32 post-BN+ReLU (rows (b, h, w)-major).
    """
    B, Hp, Wp, Cin = pad_ref.shape
    H, W = Hp - 2, Wp - 2
    Cout = w_ref.shape[-1]
    acc = jnp.zeros((B * H * W, Cout), jnp.float32)
    for t in range(9):                       # 9 taps -> 9 MXU matmuls, no im2col scratch
        kh, kw = t // 3, t % 3
        lhs = pad_ref[:, kh:kh + H, kw:kw + W, :].reshape(B * H * W, Cin)
        acc = acc + jnp.dot(lhs, w_ref[t], preferred_element_type=jnp.float32)
    y = acc * s_ref[...] + h_ref[...]        # folded BatchNorm
    return jnp.maximum(y, 0.0)               # ReLU


def _maxpool_into_pad(y, B, H, W, nxt_pad_ref):
    """y: (B*H*W, C) f32 -> 2x2 maxpool -> bf16 interior of next pad scratch."""
    C = y.shape[-1]
    t = y.reshape(B * (H // 2), 2, W // 2, 2, C)
    p = jnp.max(jnp.max(t, axis=3), axis=1)                    # (B*(H//2), W//2, C)
    nxt_pad_ref[:, 1:H // 2 + 1, 1:W // 2 + 1, :] = (
        p.reshape(B, H // 2, W // 2, C).astype(nxt_pad_ref.dtype))


# ---------------------------------------------------------------------------
# The fused kernel: one grid step == B images
# ---------------------------------------------------------------------------
def _fused_cnn_kernel(
    col1_ref,                                           # (B*H*W, 27) bf16 im2col (from wrapper)
    w1_ref, s1_ref, h1_ref,                             # conv1 (27,32) + folded BN
    w2_ref, s2_ref, h2_ref,                             # conv2 (9,32,64)
    w3_ref, s3_ref, h3_ref,                             # conv3 (9,64,128)
    w4_ref, s4_ref, h4_ref,                             # conv4 (9,128,256)
    fw1_ref, fb1_ref, fw2_ref, fb2_ref,                 # classifier head (fw2 lane-padded)
    o_ref,                                              # (1, B, 128) f32
    pad2, pad3, pad4,                                   # bf16 padded-activation scratch
    *, B, H, W,
):
    # 'same' padding halos: zero only the strips (interiors fully overwritten).
    _zero_halo(pad2)
    _zero_halo(pad3)
    _zero_halo(pad4)

    # Stage 1: conv1 as one big im2col matmul (patch matrix built in wrapper).
    y = jnp.dot(col1_ref[...], w1_ref[...], preferred_element_type=jnp.float32)
    y = jnp.maximum(y * s1_ref[...] + h1_ref[...], 0.0)          # (B*H*W, 32)
    _maxpool_into_pad(y, B, H, W, pad2)

    # Stages 2-3: conv + BN + ReLU + MaxPool2x2, all in VMEM.
    y = _conv3x3_bn_relu(pad2, w2_ref, s2_ref, h2_ref)           # (B*(H/2)*(W/2), 64)
    _maxpool_into_pad(y, B, H // 2, W // 2, pad3)
    y = _conv3x3_bn_relu(pad3, w3_ref, s3_ref, h3_ref)           # (B*(H/4)*(W/4), 128)
    _maxpool_into_pad(y, B, H // 4, W // 4, pad4)

    # Stage 4: conv + BN + ReLU + AdaptiveAvgPool2d(1) (global mean).
    y = _conv3x3_bn_relu(pad4, w4_ref, s4_ref, h4_ref)           # (B*(H/8)*(W/8), 256)
    hw = (H // 8) * (W // 8)
    feat = jnp.mean(y.reshape(B, hw, y.shape[-1]), axis=1)       # (B, 256)

    # Classifier: Linear(256,128) -> ReLU -> Linear(128, num_classes[padded to 128]).
    # TODO(synk): Dropout layers are eval-mode identity, omitted.
    h = jnp.dot(feat.astype(jnp.bfloat16), fw1_ref[...],
                preferred_element_type=jnp.float32) + fb1_ref[...]
    h = jnp.maximum(h, 0.0)
    out = jnp.dot(h.astype(jnp.bfloat16), fw2_ref[...],
                  preferred_element_type=jnp.float32) + fb2_ref[...]
    o_ref[0] = out                                               # lane-dense (B, 128) store


# ---------------------------------------------------------------------------
# Wrapper
# ---------------------------------------------------------------------------
def _im2col_3x3(x):
    """x: (N, H, W, C) -> (N*H*W, 9*C); rows (n,h,w)-major, cols (kh,kw,c)-major."""
    N, H, W, C = x.shape
    xp = jnp.pad(x, ((0, 0), (1, 1), (1, 1), (0, 0)))
    taps = [xp[:, kh:kh + H, kw:kw + W, :] for kh in range(3) for kw in range(3)]
    col = jnp.concatenate(taps, axis=-1)                 # (N, H, W, 9*C)
    return col.reshape(N * H * W, 9 * C)


def _full_spec(shape):
    rank = len(shape)
    return pl.BlockSpec(shape, lambda n, _r=rank: (0,) * _r)


def _pick_batch_tile(n, cap=8):
    # Whole batch per step when small (best on v5e/v6e single-TC: grid steps are
    # a serial loop).  The cap keeps the f32 accumulators vreg-friendly and the
    # per-step scratch well inside v7x's 64 MiB VMEM, and leaves >=2 parallel
    # grid steps for its two TensorCores once N > cap.
    if n <= cap:
        return n
    for b in range(cap, 0, -1):
        if n % b == 0:
            return b
    return 1


def fused_cnn_forward_nhwc(x, params):
    """x: (N, H, W, 3) f32 NHWC.  Returns (N, num_classes) f32."""
    N, H, W, _ = x.shape
    assert H % 8 == 0 and W % 8 == 0, "needs three rounds of 2x2 maxpool"
    w1, s1, h1 = params["conv1"]
    (w2, s2, h2), (w3, s3, h3), (w4, s4, h4) = params["convs"]
    fw1, fb1, fw2, fb2 = params["mlp"]
    num_classes = fw2.shape[1]

    # Stage-1 im2col in XLA (Cin=3 would waste 125/128 lanes inside the kernel).
    col1 = _im2col_3x3(x).astype(jnp.bfloat16)           # (N*H*W, 27)

    # Lane-dense classifier output: pad the final Linear to 128 columns.
    fw2p = jnp.pad(fw2, ((0, 0), (0, 128 - num_classes)))
    fb2p = jnp.pad(fb2, ((0, 0), (0, 128 - num_classes)))

    B = _pick_batch_tile(N)
    grid = (N // B,)
    kernel = functools.partial(_fused_cnn_kernel, B=B, H=H, W=W)

    in_specs = [pl.BlockSpec((B * H * W, 27), lambda n: (n, 0))]
    args = [col1]
    for t in (w1, s1, h1, w2, s2, h2, w3, s3, h3, w4, s4, h4,
              fw1, fb1, fw2p, fb2p):
        in_specs.append(_full_spec(t.shape))
        args.append(t)

    scratch = [
        pltpu.VMEM((B, H // 2 + 2, W // 2 + 2, 32), jnp.bfloat16),   # pad2
        pltpu.VMEM((B, H // 4 + 2, W // 4 + 2, 64), jnp.bfloat16),   # pad3
        pltpu.VMEM((B, H // 8 + 2, W // 8 + 2, 128), jnp.bfloat16),  # pad4
    ]

    out = pl.pallas_call(
        kernel,
        out_shape=jax.ShapeDtypeStruct((N // B, B, 128), jnp.float32),
        grid=grid,
        in_specs=in_specs,
        out_specs=pl.BlockSpec((1, B, 128), lambda n: (n, 0, 0)),
        scratch_shapes=scratch,
        compiler_params=pltpu.CompilerParams(
            dimension_semantics=("parallel",)),
    )(*args)
    return out.reshape(N, 128)[:, :num_classes]


@jax.jit
def simple_cnn_forward(x_nchw, params):
    # PyTorch NCHW -> NHWC glue (channels onto the lane axis).
    x = jnp.transpose(x_nchw, (0, 2, 3, 1)).astype(jnp.float32)
    return fused_cnn_forward_nhwc(x, params)


# ---------------------------------------------------------------------------
# Deterministic parameters (SimpleCNN shapes); BN folded for inference.
# Conv1 weights pre-reshaped to the im2col (27, 32) layout, conv2-4 to the
# tap-major (9, Cin, Cout) layout used by the shift-and-accumulate kernel.
# ---------------------------------------------------------------------------
def init_params(key, num_classes=2):
    eps = 1e-5  # nn.BatchNorm2d default
    chans = [(3, 32), (32, 64), (64, 128), (128, 256)]
    folded = []
    for cin, cout in chans:
        key, kw_, kb, kg, kbt, km, kv = jax.random.split(key, 7)
        w = 0.1 * jax.random.normal(kw_, (3, 3, cin, cout), jnp.float32)   # HWIO
        b = 0.05 * jax.random.normal(kb, (cout,), jnp.float32)
        gamma = 1.0 + 0.1 * jax.random.normal(kg, (cout,), jnp.float32)
        beta = 0.05 * jax.random.normal(kbt, (cout,), jnp.float32)
        mean = 0.05 * jax.random.normal(km, (cout,), jnp.float32)
        var = 1.0 + 0.1 * jax.random.uniform(kv, (cout,), jnp.float32)
        scale = gamma / jnp.sqrt(var + eps)
        shift = scale * (b - mean) + beta
        folded.append((w, scale.reshape(1, cout), shift.reshape(1, cout)))

    w1, s1, h1 = folded[0]
    conv1 = (w1.reshape(9 * 3, 32).astype(jnp.bfloat16), s1, h1)   # (kh,kw,cin)-major rows
    convs = [(w.reshape(9, cin, cout).astype(jnp.bfloat16), s, h)
             for (w, s, h), (cin, cout) in zip(folded[1:], chans[1:])]

    key, k1, kb1, k2, kb2 = jax.random.split(key, 5)
    fw1 = (0.05 * jax.random.normal(k1, (256, 128), jnp.float32)).astype(jnp.bfloat16)
    fb1 = 0.05 * jax.random.normal(kb1, (1, 128), jnp.float32)
    fw2 = (0.05 * jax.random.normal(k2, (128, num_classes), jnp.float32)).astype(jnp.bfloat16)
    fb2 = 0.05 * jax.random.normal(kb2, (1, num_classes), jnp.float32)
    return {"conv1": conv1, "convs": convs, "mlp": (fw1, fb1, fw2, fb2)}


if __name__ == "__main__":
    key = jax.random.PRNGKey(0)
    kx, kp = jax.random.split(key)
    # Small NCHW input consistent with the module: batch=2, 3 channels, 16x16.
    x = jax.random.normal(kx, (2, 3, 16, 16), jnp.float32)
    params = init_params(kp, num_classes=2)
    out = simple_cnn_forward(x, params)
    out = jax.block_until_ready(out)
    assert out.shape == (2, 2) and out.dtype == jnp.float32
    print("KERNEL_OK")
</pallas_src>

<mosaic_0001>
module attributes {stable_mosaic.version = 11 : i64} {
  func.func @_fused_cnn_kernel(%arg0: i32, %arg1: memref<512x27xbf16, #tpu.memory_space<vmem>>, %arg2: memref<27x32xbf16, #tpu.memory_space<vmem>>, %arg3: memref<1x32xf32, #tpu.memory_space<vmem>>, %arg4: memref<1x32xf32, #tpu.memory_space<vmem>>, %arg5: memref<9x32x64xbf16, #tpu.memory_space<vmem>>, %arg6: memref<1x64xf32, #tpu.memory_space<vmem>>, %arg7: memref<1x64xf32, #tpu.memory_space<vmem>>, %arg8: memref<9x64x128xbf16, #tpu.memory_space<vmem>>, %arg9: memref<1x128xf32, #tpu.memory_space<vmem>>, %arg10: memref<1x128xf32, #tpu.memory_space<vmem>>, %arg11: memref<9x128x256xbf16, #tpu.memory_space<vmem>>, %arg12: memref<1x256xf32, #tpu.memory_space<vmem>>, %arg13: memref<1x256xf32, #tpu.memory_space<vmem>>, %arg14: memref<256x128xbf16, #tpu.memory_space<vmem>>, %arg15: memref<1x128xf32, #tpu.memory_space<vmem>>, %arg16: memref<128x128xbf16, #tpu.memory_space<vmem>>, %arg17: memref<1x128xf32, #tpu.memory_space<vmem>>, %arg18: memref<1x2x128xf32, #tpu.memory_space<vmem>>, %arg19: memref<2x10x10x32xbf16, #tpu.memory_space<vmem>>, %arg20: memref<2x6x6x64xbf16, #tpu.memory_space<vmem>>, %arg21: memref<2x4x4x128xbf16, #tpu.memory_space<vmem>>) attributes {dimension_semantics = [#tpu.dimension_semantics<parallel>], iteration_bounds = array<i64: 1>, scalar_prefetch = 0 : i64, scratch_operands = 3 : i64, tpu.core_type = #tpu.core_type<tc>, window_params = [{transform_indices = @transform_0, window_bounds = array<i64: 512, 27>}, {pipeline_mode = #tpu.pipeline_mode<synchronous>, transform_indices = @transform_1, window_bounds = array<i64: 27, 32>}, {pipeline_mode = #tpu.pipeline_mode<synchronous>, transform_indices = @transform_2, window_bounds = array<i64: 1, 32>}, {pipeline_mode = #tpu.pipeline_mode<synchronous>, transform_indices = @transform_3, window_bounds = array<i64: 1, 32>}, {pipeline_mode = #tpu.pipeline_mode<synchronous>, transform_indices = @transform_4, window_bounds = array<i64: 9, 32, 64>}, {pipeline_mode = #tpu.pipeline_mode<synchronous>, transform_indices = @transform_5, window_bounds = array<i64: 1, 64>}, {pipeline_mode = #tpu.pipeline_mode<synchronous>, transform_indices = @transform_6, window_bounds = array<i64: 1, 64>}, {pipeline_mode = #tpu.pipeline_mode<synchronous>, transform_indices = @transform_7, window_bounds = array<i64: 9, 64, 128>}, {pipeline_mode = #tpu.pipeline_mode<synchronous>, transform_indices = @transform_8, window_bounds = array<i64: 1, 128>}, {pipeline_mode = #tpu.pipeline_mode<synchronous>, transform_indices = @transform_9, window_bounds = array<i64: 1, 128>}, {pipeline_mode = #tpu.pipeline_mode<synchronous>, transform_indices = @transform_10, window_bounds = array<i64: 9, 128, 256>}, {pipeline_mode = #tpu.pipeline_mode<synchronous>, transform_indices = @transform_11, window_bounds = array<i64: 1, 256>}, {pipeline_mode = #tpu.pipeline_mode<synchronous>, transform_indices = @transform_12, window_bounds = array<i64: 1, 256>}, {pipeline_mode = #tpu.pipeline_mode<synchronous>, transform_indices = @transform_13, window_bounds = array<i64: 256, 128>}, {pipeline_mode = #tpu.pipeline_mode<synchronous>, transform_indices = @transform_14, window_bounds = array<i64: 1, 128>}, {pipeline_mode = #tpu.pipeline_mode<synchronous>, transform_indices = @transform_15, window_bounds = array<i64: 128, 128>}, {pipeline_mode = #tpu.pipeline_mode<synchronous>, transform_indices = @transform_16, window_bounds = array<i64: 1, 128>}, {transform_indices = @transform_17, window_bounds = array<i64: 1, 2, 128>}]} {
    %cst = arith.constant 0.000000e+00 : bf16
    %0 = vector.broadcast %cst : bf16 to vector<2x1x10x32xbf16>
    %c0 = arith.constant 0 : index
    %c0_0 = arith.constant 0 : index
    %c0_1 = arith.constant 0 : index
    %c0_2 = arith.constant 0 : index
    %1 = vector.load %arg19[%c0, %c0_0, %c0_1, %c0_2] : memref<2x10x10x32xbf16, #tpu.memory_space<vmem>>, vector<2x1x10x32xbf16>
    tpu.vector_store %arg19[%c0, %c0_0, %c0_1, %c0_2], %0 {strides = array<i32>} : memref<2x10x10x32xbf16, #tpu.memory_space<vmem>>, vector<2x1x10x32xbf16>,
    %cst_3 = arith.constant 0.000000e+00 : bf16
    %2 = vector.broadcast %cst_3 : bf16 to vector<2x1x10x32xbf16>
    %c0_4 = arith.constant 0 : index
    %c9 = arith.constant 9 : index
    %c0_5 = arith.constant 0 : index
    %c0_6 = arith.constant 0 : index
    %3 = vector.load %arg19[%c0_4, %c9, %c0_5, %c0_6] : memref<2x10x10x32xbf16, #tpu.memory_space<vmem>>, vector<2x1x10x32xbf16>
    tpu.vector_store %arg19[%c0_4, %c9, %c0_5, %c0_6], %2 {strides = array<i32>} : memref<2x10x10x32xbf16, #tpu.memory_space<vmem>>, vector<2x1x10x32xbf16>,
    %cst_7 = arith.constant 0.000000e+00 : bf16
    %4 = vector.broadcast %cst_7 : bf16 to vector<2x10x1x32xbf16>
    %c0_8 = arith.constant 0 : index
    %c0_9 = arith.constant 0 : index
    %c0_10 = arith.constant 0 : index
    %c0_11 = arith.constant 0 : index
    %5 = vector.load %arg19[%c0_8, %c0_9, %c0_10, %c0_11] : memref<2x10x10x32xbf16, #tpu.memory_space<vmem>>, vector<2x10x1x32xbf16>
    tpu.vector_store %arg19[%c0_8, %c0_9, %c0_10, %c0_11], %4 {strides = array<i32>} : memref<2x10x10x32xbf16, #tpu.memory_space<vmem>>, vector<2x10x1x32xbf16>,
    %cst_12 = arith.constant 0.000000e+00 : bf16
    %6 = vector.broadcast %cst_12 : bf16 to vector<2x10x1x32xbf16>
    %c0_13 = arith.constant 0 : index
    %c0_14 = arith.constant 0 : index
    %c9_15 = arith.constant 9 : index
    %c0_16 = arith.constant 0 : index
    %7 = vector.load %arg19[%c0_13, %c0_14, %c9_15, %c0_16] : memref<2x10x10x32xbf16, #tpu.memory_space<vmem>>, vector<2x10x1x32xbf16>
    tpu.vector_store %arg19[%c0_13, %c0_14, %c9_15, %c0_16], %6 {strides = array<i32>} : memref<2x10x10x32xbf16, #tpu.memory_space<vmem>>, vector<2x10x1x32xbf16>,
    %cst_17 = arith.constant 0.000000e+00 : bf16
    %8 = vector.broadcast %cst_17 : bf16 to vector<2x1x6x64xbf16>
    %c0_18 = arith.constant 0 : index
    %c0_19 = arith.constant 0 : index
    %c0_20 = arith.constant 0 : index
    %c0_21 = arith.constant 0 : index
    %9 = vector.load %arg20[%c0_18, %c0_19, %c0_20, %c0_21] : memref<2x6x6x64xbf16, #tpu.memory_space<vmem>>, vector<2x1x6x64xbf16>
    tpu.vector_store %arg20[%c0_18, %c0_19, %c0_20, %c0_21], %8 {strides = array<i32>} : memref<2x6x6x64xbf16, #tpu.memory_space<vmem>>, vector<2x1x6x64xbf16>,
    %cst_22 = arith.constant 0.000000e+00 : bf16
    %10 = vector.broadcast %cst_22 : bf16 to vector<2x1x6x64xbf16>
    %c0_23 = arith.constant 0 : index
    %c5 = arith.constant 5 : index
    %c0_24 = arith.constant 0 : index
    %c0_25 = arith.constant 0 : index
    %11 = vector.load %arg20[%c0_23, %c5, %c0_24, %c0_25] : memref<2x6x6x64xbf16, #tpu.memory_space<vmem>>, vector<2x1x6x64xbf16>
    tpu.vector_store %arg20[%c0_23, %c5, %c0_24, %c0_25], %10 {strides = array<i32>} : memref<2x6x6x64xbf16, #tpu.memory_space<vmem>>, vector<2x1x6x64xbf16>,
    %cst_26 = arith.constant 0.000000e+00 : bf16
    %12 = vector.broadcast %cst_26 : bf16 to vector<2x6x1x64xbf16>
    %c0_27 = arith.constant 0 : index
    %c0_28 = arith.constant 0 : index
    %c0_29 = arith.constant 0 : index
    %c0_30 = arith.constant 0 : index
    %13 = vector.load %arg20[%c0_27, %c0_28, %c0_29, %c0_30] : memref<2x6x6x64xbf16, #tpu.memory_space<vmem>>, vector<2x6x1x64xbf16>
    tpu.vector_store %arg20[%c0_27, %c0_28, %c0_29, %c0_30], %12 {strides = array<i32>} : memref<2x6x6x64xbf16, #tpu.memory_space<vmem>>, vector<2x6x1x64xbf16>,
    %cst_31 = arith.constant 0.000000e+00 : bf16
    %14 = vector.broadcast %cst_31 : bf16 to vector<2x6x1x64xbf16>
    %c0_32 = arith.constant 0 : index
    %c0_33 = arith.constant 0 : index
    %c5_34 = arith.constant 5 : index
    %c0_35 = arith.constant 0 : index
    %15 = vector.load %arg20[%c0_32, %c0_33, %c5_34, %c0_35] : memref<2x6x6x64xbf16, #tpu.memory_space<vmem>>, vector<2x6x1x64xbf16>
    tpu.vector_store %arg20[%c0_32, %c0_33, %c5_34, %c0_35], %14 {strides = array<i32>} : memref<2x6x6x64xbf16, #tpu.memory_space<vmem>>, vector<2x6x1x64xbf16>,
    %cst_36 = arith.constant 0.000000e+00 : bf16
    %16 = vector.broadcast %cst_36 : bf16 to vector<2x1x4x128xbf16>
    %c0_37 = arith.constant 0 : index
    %c0_38 = arith.constant 0 : index
    %c0_39 = arith.constant 0 : index
    %c0_40 = arith.constant 0 : index
    %17 = vector.load %arg21[%c0_37, %c0_38, %c0_39, %c0_40] : memref<2x4x4x128xbf16, #tpu.memory_space<vmem>>, vector<2x1x4x128xbf16>
    tpu.vector_store %arg21[%c0_37, %c0_38, %c0_39, %c0_40], %16 {strides = array<i32>} : memref<2x4x4x128xbf16, #tpu.memory_space<vmem>>, vector<2x1x4x128xbf16>,
    %cst_41 = arith.constant 0.000000e+00 : bf16
    %18 = vector.broadcast %cst_41 : bf16 to vector<2x1x4x128xbf16>
    %c0_42 = arith.constant 0 : index
    %c3 = arith.constant 3 : index
    %c0_43 = arith.constant 0 : index
    %c0_44 = arith.constant 0 : index
    %19 = vector.load %arg21[%c0_42, %c3, %c0_43, %c0_44] : memref<2x4x4x128xbf16, #tpu.memory_space<vmem>>, vector<2x1x4x128xbf16>
    tpu.vector_store %arg21[%c0_42, %c3, %c0_43, %c0_44], %18 {strides = array<i32>} : memref<2x4x4x128xbf16, #tpu.memory_space<vmem>>, vector<2x1x4x128xbf16>,
    %cst_45 = arith.constant 0.000000e+00 : bf16
    %20 = vector.broadcast %cst_45 : bf16 to vector<2x4x1x128xbf16>
    %c0_46 = arith.constant 0 : index
    %c0_47 = arith.constant 0 : index
    %c0_48 = arith.constant 0 : index
    %c0_49 = arith.constant 0 : index
    %21 = vector.load %arg21[%c0_46, %c0_47, %c0_48, %c0_49] : memref<2x4x4x128xbf16, #tpu.memory_space<vmem>>, vector<2x4x1x128xbf16>
    tpu.vector_store %arg21[%c0_46, %c0_47, %c0_48, %c0_49], %20 {strides = array<i32>} : memref<2x4x4x128xbf16, #tpu.memory_space<vmem>>, vector<2x4x1x128xbf16>,
    %cst_50 = arith.constant 0.000000e+00 : bf16
    %22 = vector.broadcast %cst_50 : bf16 to vector<2x4x1x128xbf16>
    %c0_51 = arith.constant 0 : index
    %c0_52 = arith.constant 0 : index
    %c3_53 = arith.constant 3 : index
    %c0_54 = arith.constant 0 : index
    %23 = vector.load %arg21[%c0_51, %c0_52, %c3_53, %c0_54] : memref<2x4x4x128xbf16, #tpu.memory_space<vmem>>, vector<2x4x1x128xbf16>
    tpu.vector_store %arg21[%c0_51, %c0_52, %c3_53, %c0_54], %22 {strides = array<i32>} : memref<2x4x4x128xbf16, #tpu.memory_space<vmem>>, vector<2x4x1x128xbf16>,
    %c0_55 = arith.constant 0 : index
    %c0_56 = arith.constant 0 : index
    %24 = vector.load %arg1[%c0_55, %c0_56] : memref<512x27xbf16, #tpu.memory_space<vmem>>, vector<512x27xbf16>
    %c0_57 = arith.constant 0 : index
    %c0_58 = arith.constant 0 : index
    %25 = vector.load %arg2[%c0_57, %c0_58] : memref<27x32xbf16, #tpu.memory_space<vmem>>, vector<27x32xbf16>
    %cst_59 = arith.constant dense<0.000000e+00> : vector<512x32xf32>
    %26 = tpu.matmul %24, %25, %cst_59 {dimension_numbers = #tpu.dot_dimension_numbers<[1], [0], [0], [1], [0, 0, 1, 1], [], []>} : vector<512x27xbf16>, vector<27x32xbf16>, vector<512x32xf32> -> vector<512x32xf32>
    %c0_60 = arith.constant 0 : index
    %c0_61 = arith.constant 0 : index
    %27 = vector.load %arg3[%c0_60, %c0_61] : memref<1x32xf32, #tpu.memory_space<vmem>>, vector<1x32xf32>
    %28 = vector.broadcast %27 : vector<1x32xf32> to vector<512x32xf32>
    %29 = arith.mulf %26, %28 : vector<512x32xf32>
    %c0_62 = arith.constant 0 : index
    %c0_63 = arith.constant 0 : index
    %30 = vector.load %arg4[%c0_62, %c0_63] : memref<1x32xf32, #tpu.memory_space<vmem>>, vector<1x32xf32>
    %31 = vector.broadcast %30 : vector<1x32xf32> to vector<512x32xf32>
    %32 = arith.addf %29, %31 : vector<512x32xf32>
    %cst_64 = arith.constant 0.000000e+00 : f32
    %33 = vector.broadcast %cst_64 : f32 to vector<512x32xf32>
    %34 = arith.maximumf %32, %33 : vector<512x32xf32>
    %35 = vector.shape_cast %34 : vector<512x32xf32> to vector<16x2x8x2x32xf32>
    %cst_65 = arith.constant dense<0xFF800000> : vector<16x2x8x32xf32>
    %36 = vector.multi_reduction <maximumf>, %35, %cst_65 [3] : vector<16x2x8x2x32xf32> to vector<16x2x8x32xf32>
    %cst_66 = arith.constant dense<0xFF800000> : vector<16x8x32xf32>
    %37 = vector.multi_reduction <maximumf>, %36, %cst_66 [1] : vector<16x2x8x32xf32> to vector<16x8x32xf32>
    %38 = vector.shape_cast %37 : vector<16x8x32xf32> to vector<2x8x8x32xf32>
    %39 = arith.truncf %38 : vector<2x8x8x32xf32> to vector<2x8x8x32xbf16>
    %c0_67 = arith.constant 0 : index
    %c1 = arith.constant 1 : index
    %c1_68 = arith.constant 1 : index
    %c0_69 = arith.constant 0 : index
    %40 = vector.load %arg19[%c0_67, %c1, %c1_68, %c0_69] : memref<2x10x10x32xbf16, #tpu.memory_space<vmem>>, vector<2x8x8x32xbf16>
    tpu.vector_store %arg19[%c0_67, %c1, %c1_68, %c0_69], %39 {strides = array<i32>} : memref<2x10x10x32xbf16, #tpu.memory_space<vmem>>, vector<2x8x8x32xbf16>,
    %cst_70 = arith.constant 0.000000e+00 : f32
    %41 = vector.broadcast %cst_70 : f32 to vector<128x64xf32>
    %c0_71 = arith.constant 0 : index
    %c0_72 = arith.constant 0 : index
    %c0_73 = arith.constant 0 : index
    %c0_74 = arith.constant 0 : index
    %42 = vector.load %arg19[%c0_71, %c0_72, %c0_73, %c0_74] : memref<2x10x10x32xbf16, #tpu.memory_space<vmem>>, vector<2x8x8x32xbf16>
    %43 = vector.shape_cast %42 : vector<2x8x8x32xbf16> to vector<128x32xbf16>
    %c0_75 = arith.constant 0 : index
    %c0_76 = arith.constant 0 : index
    %c0_77 = arith.constant 0 : index
    %44 = vector.load %arg5[%c0_75, %c0_76, %c0_77] : memref<9x32x64xbf16, #tpu.memory_space<vmem>>, vector<1x32x64xbf16>
    %45 = vector.shape_cast %44 : vector<1x32x64xbf16> to vector<32x64xbf16>
    %cst_78 = arith.constant dense<0.000000e+00> : vector<128x64xf32>
    %46 = tpu.matmul %43, %45, %cst_78 {dimension_numbers = #tpu.dot_dimension_numbers<[1], [0], [0], [1], [0, 0, 1, 1], [], []>} : vector<128x32xbf16>, vector<32x64xbf16>, vector<128x64xf32> -> vector<128x64xf32>
    %47 = arith.addf %41, %46 : vector<128x64xf32>
    %c0_79 = arith.constant 0 : index
    %c0_80 = arith.constant 0 : index
    %c1_81 = arith.constant 1 : index
    %c0_82 = arith.constant 0 : index
    %48 = vector.load %arg19[%c0_79, %c0_80, %c1_81, %c0_82] : memref<2x10x10x32xbf16, #tpu.memory_space<vmem>>, vector<2x8x8x32xbf16>
    %49 = vector.shape_cast %48 : vector<2x8x8x32xbf16> to vector<128x32xbf16>
    %c1_83 = arith.constant 1 : index
    %c0_84 = arith.constant 0 : index
    %c0_85 = arith.constant 0 : index
    %50 = vector.load %arg5[%c1_83, %c0_84, %c0_85] : memref<9x32x64xbf16, #tpu.memory_space<vmem>>, vector<1x32x64xbf16>
    %51 = vector.shape_cast %50 : vector<1x32x64xbf16> to vector<32x64xbf16>
    %cst_86 = arith.constant dense<0.000000e+00> : vector<128x64xf32>
    %52 = tpu.matmul %49, %51, %cst_86 {dimension_numbers = #tpu.dot_dimension_numbers<[1], [0], [0], [1], [0, 0, 1, 1], [], []>} : vector<128x32xbf16>, vector<32x64xbf16>, vector<128x64xf32> -> vector<128x64xf32>
    %53 = arith.addf %47, %52 : vector<128x64xf32>
    %c0_87 = arith.constant 0 : index
    %c0_88 = arith.constant 0 : index
    %c2 = arith.constant 2 : index
    %c0_89 = arith.constant 0 : index
    %54 = vector.load %arg19[%c0_87, %c0_88, %c2, %c0_89] : memref<2x10x10x32xbf16, #tpu.memory_space<vmem>>, vector<2x8x8x32xbf16>
    %55 = vector.shape_cast %54 : vector<2x8x8x32xbf16> to vector<128x32xbf16>
    %c2_90 = arith.constant 2 : index
    %c0_91 = arith.constant 0 : index
    %c0_92 = arith.constant 0 : index
    %56 = vector.load %arg5[%c2_90, %c0_91, %c0_92] : memref<9x32x64xbf16, #tpu.memory_space<vmem>>, vector<1x32x64xbf16>
    %57 = vector.shape_cast %56 : vector<1x32x64xbf16> to vector<32x64xbf16>
    %cst_93 = arith.constant dense<0.000000e+00> : vector<128x64xf32>
    %58 = tpu.matmul %55, %57, %cst_93 {dimension_numbers = #tpu.dot_dimension_numbers<[1], [0], [0], [1], [0, 0, 1, 1], [], []>} : vector<128x32xbf16>, vector<32x64xbf16>, vector<128x64xf32> -> vector<128x64xf32>
    %59 = arith.addf %53, %58 : vector<128x64xf32>
    %c0_94 = arith.constant 0 : index
    %c1_95 = arith.constant 1 : index
    %c0_96 = arith.constant 0 : index
    %c0_97 = arith.constant 0 : index
    %60 = vector.load %arg19[%c0_94, %c1_95, %c0_96, %c0_97] : memref<2x10x10x32xbf16, #tpu.memory_space<vmem>>, vector<2x8x8x32xbf16>
    %61 = vector.shape_cast %60 : vector<2x8x8x32xbf16> to vector<128x32xbf16>
    %c3_98 = arith.constant 3 : index
    %c0_99 = arith.constant 0 : index
    %c0_100 = arith.constant 0 : index
    %62 = vector.load %arg5[%c3_98, %c0_99, %c0_100] : memref<9x32x64xbf16, #tpu.memory_space<vmem>>, vector<1x32x64xbf16>
    %63 = vector.shape_cast %62 : vector<1x32x64xbf16> to vector<32x64xbf16>
    %cst_101 = arith.constant dense<0.000000e+00> : vector<128x64xf32>
    %64 = tpu.matmul %61, %63, %cst_101 {dimension_numbers = #tpu.dot_dimension_numbers<[1], [0], [0], [1], [0, 0, 1, 1], [], []>} : vector<128x32xbf16>, vector<32x64xbf16>, vector<128x64xf32> -> vector<128x64xf32>
    %65 = arith.addf %59, %64 : vector<128x64xf32>
    %c0_102 = arith.constant 0 : index
    %c1_103 = arith.constant 1 : index
    %c1_104 = arith.constant 1 : index
    %c0_105 = arith.constant 0 : index
    %66 = vector.load %arg19[%c0_102, %c1_103, %c1_104, %c0_105] : memref<2x10x10x32xbf16, #tpu.memory_space<vmem>>, vector<2x8x8x32xbf16>
    %67 = vector.shape_cast %66 : vector<2x8x8x32xbf16> to vector<128x32xbf16>
    %c4 = arith.constant 4 : index
    %c0_106 = arith.constant 0 : index
    %c0_107 = arith.constant 0 : index
    %68 = vector.load %arg5[%c4, %c0_106, %c0_107] : memref<9x32x64xbf16, #tpu.memory_space<vmem>>, vector<1x32x64xbf16>
    %69 = vector.shape_cast %68 : vector<1x32x64xbf16> to vector<32x64xbf16>
    %cst_108 = arith.constant dense<0.000000e+00> : vector<128x64xf32>
    %70 = tpu.matmul %67, %69, %cst_108 {dimension_numbers = #tpu.dot_dimension_numbers<[1], [0], [0], [1], [0, 0, 1, 1], [], []>} : vector<128x32xbf16>, vector<32x64xbf16>, vector<128x64xf32> -> vector<128x64xf32>
    %71 = arith.addf %65, %70 : vector<128x64xf32>
    %c0_109 = arith.constant 0 : index
    %c1_110 = arith.constant 1 : index
    %c2_111 = arith.constant 2 : index
    %c0_112 = arith.constant 0 : index
    %72 = vector.load %arg19[%c0_109, %c1_110, %c2_111, %c0_112] : memref<2x10x10x32xbf16, #tpu.memory_space<vmem>>, vector<2x8x8x32xbf16>
    %73 = vector.shape_cast %72 : vector<2x8x8x32xbf16> to vector<128x32xbf16>
    %c5_113 = arith.constant 5 : index
    %c0_114 = arith.constant 0 : index
    %c0_115 = arith.constant 0 : index
    %74 = vector.load %arg5[%c5_113, %c0_114, %c0_115] : memref<9x32x64xbf16, #tpu.memory_space<vmem>>, vector<1x32x64xbf16>
    %75 = vector.shape_cast %74 : vector<1x32x64xbf16> to vector<32x64xbf16>
    %cst_116 = arith.constant dense<0.000000e+00> : vector<128x64xf32>
    %76 = tpu.matmul %73, %75, %cst_116 {dimension_numbers = #tpu.dot_dimension_numbers<[1], [0], [0], [1], [0, 0, 1, 1], [], []>} : vector<128x32xbf16>, vector<32x64xbf16>, vector<128x64xf32> -> vector<128x64xf32>
    %77 = arith.addf %71, %76 : vector<128x64xf32>
    %c0_117 = arith.constant 0 : index
    %c2_118 = arith.constant 2 : index
    %c0_119 = arith.constant 0 : index
    %c0_120 = arith.constant 0 : index
    %78 = vector.load %arg19[%c0_117, %c2_118, %c0_119, %c0_120] : memref<2x10x10x32xbf16, #tpu.memory_space<vmem>>, vector<2x8x8x32xbf16>
    %79 = vector.shape_cast %78 : vector<2x8x8x32xbf16> to vector<128x32xbf16>
    %c6 = arith.constant 6 : index
    %c0_121 = arith.constant 0 : index
    %c0_122 = arith.constant 0 : index
    %80 = vector.load %arg5[%c6, %c0_121, %c0_122] : memref<9x32x64xbf16, #tpu.memory_space<vmem>>, vector<1x32x64xbf16>
    %81 = vector.shape_cast %80 : vector<1x32x64xbf16> to vector<32x64xbf16>
    %cst_123 = arith.constant dense<0.000000e+00> : vector<128x64xf32>
    %82 = tpu.matmul %79, %81, %cst_123 {dimension_numbers = #tpu.dot_dimension_numbers<[1], [0], [0], [1], [0, 0, 1, 1], [], []>} : vector<128x32xbf16>, vector<32x64xbf16>, vector<128x64xf32> -> vector<128x64xf32>
    %83 = arith.addf %77, %82 : vector<128x64xf32>
    %c0_124 = arith.constant 0 : index
    %c2_125 = arith.constant 2 : index
    %c1_126 = arith.constant 1 : index
    %c0_127 = arith.constant 0 : index
    %84 = vector.load %arg19[%c0_124, %c2_125, %c1_126, %c0_127] : memref<2x10x10x32xbf16, #tpu.memory_space<vmem>>, vector<2x8x8x32xbf16>
    %85 = vector.shape_cast %84 : vector<2x8x8x32xbf16> to vector<128x32xbf16>
    %c7 = arith.constant 7 : index
    %c0_128 = arith.constant 0 : index
    %c0_129 = arith.constant 0 : index
    %86 = vector.load %arg5[%c7, %c0_128, %c0_129] : memref<9x32x64xbf16, #tpu.memory_space<vmem>>, vector<1x32x64xbf16>
    %87 = vector.shape_cast %86 : vector<1x32x64xbf16> to vector<32x64xbf16>
    %cst_130 = arith.constant dense<0.000000e+00> : vector<128x64xf32>
    %88 = tpu.matmul %85, %87, %cst_130 {dimension_numbers = #tpu.dot_dimension_numbers<[1], [0], [0], [1], [0, 0, 1, 1], [], []>} : vector<128x32xbf16>, vector<32x64xbf16>, vector<128x64xf32> -> vector<128x64xf32>
    %89 = arith.addf %83, %88 : vector<128x64xf32>
    %c0_131 = arith.constant 0 : index
    %c2_132 = arith.constant 2 : index
    %c2_133 = arith.constant 2 : index
    %c0_134 = arith.constant 0 : index
    %90 = vector.load %arg19[%c0_131, %c2_132, %c2_133, %c0_134] : memref<2x10x10x32xbf16, #tpu.memory_space<vmem>>, vector<2x8x8x32xbf16>
    %91 = vector.shape_cast %90 : vector<2x8x8x32xbf16> to vector<128x32xbf16>
    %c8 = arith.constant 8 : index
    %c0_135 = arith.constant 0 : index
    %c0_136 = arith.constant 0 : index
    %92 = vector.load %arg5[%c8, %c0_135, %c0_136] : memref<9x32x64xbf16, #tpu.memory_space<vmem>>, vector<1x32x64xbf16>
    %93 = vector.shape_cast %92 : vector<1x32x64xbf16> to vector<32x64xbf16>
    %cst_137 = arith.constant dense<0.000000e+00> : vector<128x64xf32>
    %94 = tpu.matmul %91, %93, %cst_137 {dimension_numbers = #tpu.dot_dimension_numbers<[1], [0], [0], [1], [0, 0, 1, 1], [], []>} : vector<128x32xbf16>, vector<32x64xbf16>, vector<128x64xf32> -> vector<128x64xf32>
    %95 = arith.addf %89, %94 : vector<128x64xf32>
    %c0_138 = arith.constant 0 : index
    %c0_139 = arith.constant 0 : index
    %96 = vector.load %arg6[%c0_138, %c0_139] : memref<1x64xf32, #tpu.memory_space<vmem>>, vector<1x64xf32>
    %97 = vector.broadcast %96 : vector<1x64xf32> to vector<128x64xf32>
    %98 = arith.mulf %95, %97 : vector<128x64xf32>
    %c0_140 = arith.constant 0 : index
    %c0_141 = arith.constant 0 : index
    %99 = vector.load %arg7[%c0_140, %c0_141] : memref<1x64xf32, #tpu.memory_space<vmem>>, vector<1x64xf32>
    %100 = vector.broadcast %99 : vector<1x64xf32> to vector<128x64xf32>
    %101 = arith.addf %98, %100 : vector<128x64xf32>
    %cst_142 = arith.constant 0.000000e+00 : f32
    %102 = vector.broadcast %cst_142 : f32 to vector<128x64xf32>
    %103 = arith.maximumf %101, %102 : vector<128x64xf32>
    %104 = vector.shape_cast %103 : vector<128x64xf32> to vector<8x2x4x2x64xf32>
    %cst_143 = arith.constant dense<0xFF800000> : vector<8x2x4x64xf32>
    %105 = vector.multi_reduction <maximumf>, %104, %cst_143 [3] : vector<8x2x4x2x64xf32> to vector<8x2x4x64xf32>
    %cst_144 = arith.constant dense<0xFF800000> : vector<8x4x64xf32>
    %106 = vector.multi_reduction <maximumf>, %105, %cst_144 [1] : vector<8x2x4x64xf32> to vector<8x4x64xf32>
    %107 = vector.shape_cast %106 : vector<8x4x64xf32> to vector<2x4x4x64xf32>
    %108 = arith.truncf %107 : vector<2x4x4x64xf32> to vector<2x4x4x64xbf16>
    %c0_145 = arith.constant 0 : index
    %c1_146 = arith.constant 1 : index
    %c1_147 = arith.constant 1 : index
    %c0_148 = arith.constant 0 : index
    %109 = vector.load %arg20[%c0_145, %c1_146, %c1_147, %c0_148] : memref<2x6x6x64xbf16, #tpu.memory_space<vmem>>, vector<2x4x4x64xbf16>
    tpu.vector_store %arg20[%c0_145, %c1_146, %c1_147, %c0_148], %108 {strides = array<i32>} : memref<2x6x6x64xbf16, #tpu.memory_space<vmem>>, vector<2x4x4x64xbf16>,
    %cst_149 = arith.constant 0.000000e+00 : f32
    %110 = vector.broadcast %cst_149 : f32 to vector<32x128xf32>
    %c0_150 = arith.constant 0 : index
    %c0_151 = arith.constant 0 : index
    %c0_152 = arith.constant 0 : index
    %c0_153 = arith.constant 0 : index
    %111 = vector.load %arg20[%c0_150, %c0_151, %c0_152, %c0_153] : memref<2x6x6x64xbf16, #tpu.memory_space<vmem>>, vector<2x4x4x64xbf16>
    %112 = vector.shape_cast %111 : vector<2x4x4x64xbf16> to vector<32x64xbf16>
    %c0_154 = arith.constant 0 : index
    %c0_155 = arith.constant 0 : index
    %c0_156 = arith.constant 0 : index
    %113 = vector.load %arg8[%c0_154, %c0_155, %c0_156] : memref<9x64x128xbf16, #tpu.memory_space<vmem>>, vector<1x64x128xbf16>
    %114 = vector.shape_cast %113 : vector<1x64x128xbf16> to vector<64x128xbf16>
    %cst_157 = arith.constant dense<0.000000e+00> : vector<32x128xf32>
    %115 = tpu.matmul %112, %114, %cst_157 {dimension_numbers = #tpu.dot_dimension_numbers<[1], [0], [0], [1], [0, 0, 1, 1], [], []>} : vector<32x64xbf16>, vector<64x128xbf16>, vector<32x128xf32> -> vector<32x128xf32>
    %116 = arith.addf %110, %115 : vector<32x128xf32>
    %c0_158 = arith.constant 0 : index
    %c0_159 = arith.constant 0 : index
    %c1_160 = arith.constant 1 : index
    %c0_161 = arith.constant 0 : index
    %117 = vector.load %arg20[%c0_158, %c0_159, %c1_160, %c0_161] : memref<2x6x6x64xbf16, #tpu.memory_space<vmem>>, vector<2x4x4x64xbf16>
    %118 = vector.shape_cast %117 : vector<2x4x4x64xbf16> to vector<32x64xbf16>
    %c1_162 = arith.constant 1 : index
    %c0_163 = arith.constant 0 : index
    %c0_164 = arith.constant 0 : index
    %119 = vector.load %arg8[%c1_162, %c0_163, %c0_164] : memref<9x64x128xbf16, #tpu.memory_space<vmem>>, vector<1x64x128xbf16>
    %120 = vector.shape_cast %119 : vector<1x64x128xbf16> to vector<64x128xbf16>
    %cst_165 = arith.constant dense<0.000000e+00> : vector<32x128xf32>
    %121 = tpu.matmul %118, %120, %cst_165 {dimension_numbers = #tpu.dot_dimension_numbers<[1], [0], [0], [1], [0, 0, 1, 1], [], []>} : vector<32x64xbf16>, vector<64x128xbf16>, vector<32x128xf32> -> vector<32x128xf32>
    %122 = arith.addf %116, %121 : vector<32x128xf32>
    %c0_166 = arith.constant 0 : index
    %c0_167 = arith.constant 0 : index
    %c2_168 = arith.constant 2 : index
    %c0_169 = arith.constant 0 : index
    %123 = vector.load %arg20[%c0_166, %c0_167, %c2_168, %c0_169] : memref<2x6x6x64xbf16, #tpu.memory_space<vmem>>, vector<2x4x4x64xbf16>
    %124 = vector.shape_cast %123 : vector<2x4x4x64xbf16> to vector<32x64xbf16>
    %c2_170 = arith.constant 2 : index
    %c0_171 = arith.constant 0 : index
    %c0_172 = arith.constant 0 : index
    %125 = vector.load %arg8[%c2_170, %c0_171, %c0_172] : memref<9x64x128xbf16, #tpu.memory_space<vmem>>, vector<1x64x128xbf16>
    %126 = vector.shape_cast %125 : vector<1x64x128xbf16> to vector<64x128xbf16>
    %cst_173 = arith.constant dense<0.000000e+00> : vector<32x128xf32>
    %127 = tpu.matmul %124, %126, %cst_173 {dimension_numbers = #tpu.dot_dimension_numbers<[1], [0], [0], [1], [0, 0, 1, 1], [], []>} : vector<32x64xbf16>, vector<64x128xbf16>, vector<32x128xf32> -> vector<32x128xf32>
    %128 = arith.addf %122, %127 : vector<32x128xf32>
    %c0_174 = arith.constant 0 : index
    %c1_175 = arith.constant 1 : index
    %c0_176 = arith.constant 0 : index
    %c0_177 = arith.constant 0 : index
    %129 = vector.load %arg20[%c0_174, %c1_175, %c0_176, %c0_177] : memref<2x6x6x64xbf16, #tpu.memory_space<vmem>>, vector<2x4x4x64xbf16>
    %130 = vector.shape_cast %129 : vector<2x4x4x64xbf16> to vector<32x64xbf16>
    %c3_178 = arith.constant 3 : index
    %c0_179 = arith.constant 0 : index
    %c0_180 = arith.constant 0 : index
    %131 = vector.load %arg8[%c3_178, %c0_179, %c0_180] : memref<9x64x128xbf16, #tpu.memory_space<vmem>>, vector<1x64x128xbf16>
    %132 = vector.shape_cast %131 : vector<1x64x128xbf16> to vector<64x128xbf16>
    %cst_181 = arith.constant dense<0.000000e+00> : vector<32x128xf32>
    %133 = tpu.matmul %130, %132, %cst_181 {dimension_numbers = #tpu.dot_dimension_numbers<[1], [0], [0], [1], [0, 0, 1, 1], [], []>} : vector<32x64xbf16>, vector<64x128xbf16>, vector<32x128xf32> -> vector<32x128xf32>
    %134 = arith.addf %128, %133 : vector<32x128xf32>
    %c0_182 = arith.constant 0 : index
    %c1_183 = arith.constant 1 : index
    %c1_184 = arith.constant 1 : index
    %c0_185 = arith.constant 0 : index
    %135 = vector.load %arg20[%c0_182, %c1_183, %c1_184, %c0_185] : memref<2x6x6x64xbf16, #tpu.memory_space<vmem>>, vector<2x4x4x64xbf16>
    %136 = vector.shape_cast %135 : vector<2x4x4x64xbf16> to vector<32x64xbf16>
    %c4_186 = arith.constant 4 : index
    %c0_187 = arith.constant 0 : index
    %c0_188 = arith.constant 0 : index
    %137 = vector.load %arg8[%c4_186, %c0_187, %c0_188] : memref<9x64x128xbf16, #tpu.memory_space<vmem>>, vector<1x64x128xbf16>
    %138 = vector.shape_cast %137 : vector<1x64x128xbf16> to vector<64x128xbf16>
    %cst_189 = arith.constant dense<0.000000e+00> : vector<32x128xf32>
    %139 = tpu.matmul %136, %138, %cst_189 {dimension_numbers = #tpu.dot_dimension_numbers<[1], [0], [0], [1], [0, 0, 1, 1], [], []>} : vector<32x64xbf16>, vector<64x128xbf16>, vector<32x128xf32> -> vector<32x128xf32>
    %140 = arith.addf %134, %139 : vector<32x128xf32>
    %c0_190 = arith.constant 0 : index
    %c1_191 = arith.constant 1 : index
    %c2_192 = arith.constant 2 : index
    %c0_193 = arith.constant 0 : index
    %141 = vector.load %arg20[%c0_190, %c1_191, %c2_192, %c0_193] : memref<2x6x6x64xbf16, #tpu.memory_space<vmem>>, vector<2x4x4x64xbf16>
    %142 = vector.shape_cast %141 : vector<2x4x4x64xbf16> to vector<32x64xbf16>
    %c5_194 = arith.constant 5 : index
    %c0_195 = arith.constant 0 : index
    %c0_196 = arith.constant 0 : index
    %143 = vector.load %arg8[%c5_194, %c0_195, %c0_196] : memref<9x64x128xbf16, #tpu.memory_space<vmem>>, vector<1x64x128xbf16>
    %144 = vector.shape_cast %143 : vector<1x64x128xbf16> to vector<64x128xbf16>
    %cst_197 = arith.constant dense<0.000000e+00> : vector<32x128xf32>
    %145 = tpu.matmul %142, %144, %cst_197 {dimension_numbers = #tpu.dot_dimension_numbers<[1], [0], [0], [1], [0, 0, 1, 1], [], []>} : vector<32x64xbf16>, vector<64x128xbf16>, vector<32x128xf32> -> vector<32x128xf32>
    %146 = arith.addf %140, %145 : vector<32x128xf32>
    %c0_198 = arith.constant 0 : index
    %c2_199 = arith.constant 2 : index
    %c0_200 = arith.constant 0 : index
    %c0_201 = arith.constant 0 : index
    %147 = vector.load %arg20[%c0_198, %c2_199, %c0_200, %c0_201] : memref<2x6x6x64xbf16, #tpu.memory_space<vmem>>, vector<2x4x4x64xbf16>
    %148 = vector.shape_cast %147 : vector<2x4x4x64xbf16> to vector<32x64xbf16>
    %c6_202 = arith.constant 6 : index
    %c0_203 = arith.constant 0 : index
    %c0_204 = arith.constant 0 : index
    %149 = vector.load %arg8[%c6_202, %c0_203, %c0_204] : memref<9x64x128xbf16, #tpu.memory_space<vmem>>, vector<1x64x128xbf16>
    %150 = vector.shape_cast %149 : vector<1x64x128xbf16> to vector<64x128xbf16>
    %cst_205 = arith.constant dense<0.000000e+00> : vector<32x128xf32>
    %151 = tpu.matmul %148, %150, %cst_205 {dimension_numbers = #tpu.dot_dimension_numbers<[1], [0], [0], [1], [0, 0, 1, 1], [], []>} : vector<32x64xbf16>, vector<64x128xbf16>, vector<32x128xf32> -> vector<32x128xf32>
    %152 = arith.addf %146, %151 : vector<32x128xf32>
    %c0_206 = arith.constant 0 : index
    %c2_207 = arith.constant 2 : index
    %c1_208 = arith.constant 1 : index
    %c0_209 = arith.constant 0 : index
    %153 = vector.load %arg20[%c0_206, %c2_207, %c1_208, %c0_209] : memref<2x6x6x64xbf16, #tpu.memory_space<vmem>>, vector<2x4x4x64xbf16>
    %154 = vector.shape_cast %153 : vector<2x4x4x64xbf16> to vector<32x64xbf16>
    %c7_210 = arith.constant 7 : index
    %c0_211 = arith.constant 0 : index
    %c0_212 = arith.constant 0 : index
    %155 = vector.load %arg8[%c7_210, %c0_211, %c0_212] : memref<9x64x128xbf16, #tpu.memory_space<vmem>>, vector<1x64x128xbf16>
    %156 = vector.shape_cast %155 : vector<1x64x128xbf16> to vector<64x128xbf16>
    %cst_213 = arith.constant dense<0.000000e+00> : vector<32x128xf32>
    %157 = tpu.matmul %154, %156, %cst_213 {dimension_numbers = #tpu.dot_dimension_numbers<[1], [0], [0], [1], [0, 0, 1, 1], [], []>} : vector<32x64xbf16>, vector<64x128xbf16>, vector<32x128xf32> -> vector<32x128xf32>
    %158 = arith.addf %152, %157 : vector<32x128xf32>
    %c0_214 = arith.constant 0 : index
    %c2_215 = arith.constant 2 : index
    %c2_216 = arith.constant 2 : index
    %c0_217 = arith.constant 0 : index
    %159 = vector.load %arg20[%c0_214, %c2_215, %c2_216, %c0_217] : memref<2x6x6x64xbf16, #tpu.memory_space<vmem>>, vector<2x4x4x64xbf16>
    %160 = vector.shape_cast %159 : vector<2x4x4x64xbf16> to vector<32x64xbf16>
    %c8_218 = arith.constant 8 : index
    %c0_219 = arith.constant 0 : index
    %c0_220 = arith.constant 0 : index
    %161 = vector.load %arg8[%c8_218, %c0_219, %c0_220] : memref<9x64x128xbf16, #tpu.memory_space<vmem>>, vector<1x64x128xbf16>
    %162 = vector.shape_cast %161 : vector<1x64x128xbf16> to vector<64x128xbf16>
    %cst_221 = arith.constant dense<0.000000e+00> : vector<32x128xf32>
    %163 = tpu.matmul %160, %162, %cst_221 {dimension_numbers = #tpu.dot_dimension_numbers<[1], [0], [0], [1], [0, 0, 1, 1], [], []>} : vector<32x64xbf16>, vector<64x128xbf16>, vector<32x128xf32> -> vector<32x128xf32>
    %164 = arith.addf %158, %163 : vector<32x128xf32>
    %c0_222 = arith.constant 0 : index
    %c0_223 = arith.constant 0 : index
    %165 = vector.load %arg9[%c0_222, %c0_223] : memref<1x128xf32, #tpu.memory_space<vmem>>, vector<1x128xf32>
    %166 = vector.broadcast %165 : vector<1x128xf32> to vector<32x128xf32>
    %167 = arith.mulf %164, %166 : vector<32x128xf32>
    %c0_224 = arith.constant 0 : index
    %c0_225 = arith.constant 0 : index
    %168 = vector.load %arg10[%c0_224, %c0_225] : memref<1x128xf32, #tpu.memory_space<vmem>>, vector<1x128xf32>
    %169 = vector.broadcast %168 : vector<1x128xf32> to vector<32x128xf32>
    %170 = arith.addf %167, %169 : vector<32x128xf32>
    %cst_226 = arith.constant 0.000000e+00 : f32
    %171 = vector.broadcast %cst_226 : f32 to vector<32x128xf32>
    %172 = arith.maximumf %170, %171 : vector<32x128xf32>
    %173 = vector.shape_cast %172 : vector<32x128xf32> to vector<4x2x2x2x128xf32>
    %cst_227 = arith.constant dense<0xFF800000> : vector<4x2x2x128xf32>
    %174 = vector.multi_reduction <maximumf>, %173, %cst_227 [3] : vector<4x2x2x2x128xf32> to vector<4x2x2x128xf32>
    %cst_228 = arith.constant dense<0xFF800000> : vector<4x2x128xf32>
    %175 = vector.multi_reduction <maximumf>, %174, %cst_228 [1] : vector<4x2x2x128xf32> to vector<4x2x128xf32>
    %176 = vector.shape_cast %175 : vector<4x2x128xf32> to vector<2x2x2x128xf32>
    %177 = arith.truncf %176 : vector<2x2x2x128xf32> to vector<2x2x2x128xbf16>
    %c0_229 = arith.constant 0 : index
    %c1_230 = arith.constant 1 : index
    %c1_231 = arith.constant 1 : index
    %c0_232 = arith.constant 0 : index
    %178 = vector.load %arg21[%c0_229, %c1_230, %c1_231, %c0_232] : memref<2x4x4x128xbf16, #tpu.memory_space<vmem>>, vector<2x2x2x128xbf16>
    tpu.vector_store %arg21[%c0_229, %c1_230, %c1_231, %c0_232], %177 {strides = array<i32>} : memref<2x4x4x128xbf16, #tpu.memory_space<vmem>>, vector<2x2x2x128xbf16>,
    %cst_233 = arith.constant 0.000000e+00 : f32
    %179 = vector.broadcast %cst_233 : f32 to vector<8x256xf32>
    %c0_234 = arith.constant 0 : index
    %c0_235 = arith.constant 0 : index
    %c0_236 = arith.constant 0 : index
    %c0_237 = arith.constant 0 : index
    %180 = vector.load %arg21[%c0_234, %c0_235, %c0_236, %c0_237] : memref<2x4x4x128xbf16, #tpu.memory_space<vmem>>, vector<2x2x2x128xbf16>
    %181 = vector.shape_cast %180 : vector<2x2x2x128xbf16> to vector<8x128xbf16>
    %c0_238 = arith.constant 0 : index
    %c0_239 = arith.constant 0 : index
    %c0_240 = arith.constant 0 : index
    %182 = vector.load %arg11[%c0_238, %c0_239, %c0_240] : memref<9x128x256xbf16, #tpu.memory_space<vmem>>, vector<1x128x256xbf16>
    %183 = vector.shape_cast %182 : vector<1x128x256xbf16> to vector<128x256xbf16>
    %cst_241 = arith.constant dense<0.000000e+00> : vector<8x256xf32>
    %184 = tpu.matmul %181, %183, %cst_241 {dimension_numbers = #tpu.dot_dimension_numbers<[1], [0], [0], [1], [0, 0, 1, 1], [], []>} : vector<8x128xbf16>, vector<128x256xbf16>, vector<8x256xf32> -> vector<8x256xf32>
    %185 = arith.addf %179, %184 : vector<8x256xf32>
    %c0_242 = arith.constant 0 : index
    %c0_243 = arith.constant 0 : index
    %c1_244 = arith.constant 1 : index
    %c0_245 = arith.constant 0 : index
    %186 = vector.load %arg21[%c0_242, %c0_243, %c1_244, %c0_245] : memref<2x4x4x128xbf16, #tpu.memory_space<vmem>>, vector<2x2x2x128xbf16>
    %187 = vector.shape_cast %186 : vector<2x2x2x128xbf16> to vector<8x128xbf16>
    %c1_246 = arith.constant 1 : index
    %c0_247 = arith.constant 0 : index
    %c0_248 = arith.constant 0 : index
    %188 = vector.load %arg11[%c1_246, %c0_247, %c0_248] : memref<9x128x256xbf16, #tpu.memory_space<vmem>>, vector<1x128x256xbf16>
    %189 = vector.shape_cast %188 : vector<1x128x256xbf16> to vector<128x256xbf16>
    %cst_249 = arith.constant dense<0.000000e+00> : vector<8x256xf32>
    %190 = tpu.matmul %187, %189, %cst_249 {dimension_numbers = #tpu.dot_dimension_numbers<[1], [0], [0], [1], [0, 0, 1, 1], [], []>} : vector<8x128xbf16>, vector<128x256xbf16>, vector<8x256xf32> -> vector<8x256xf32>
    %191 = arith.addf %185, %190 : vector<8x256xf32>
    %c0_250 = arith.constant 0 : index
    %c0_251 = arith.constant 0 : index
    %c2_252 = arith.constant 2 : index
    %c0_253 = arith.constant 0 : index
    %192 = vector.load %arg21[%c0_250, %c0_251, %c2_252, %c0_253] : memref<2x4x4x128xbf16, #tpu.memory_space<vmem>>, vector<2x2x2x128xbf16>
    %193 = vector.shape_cast %192 : vector<2x2x2x128xbf16> to vector<8x128xbf16>
    %c2_254 = arith.constant 2 : index
    %c0_255 = arith.constant 0 : index
    %c0_256 = arith.constant 0 : index
    %194 = vector.load %arg11[%c2_254, %c0_255, %c0_256] : memref<9x128x256xbf16, #tpu.memory_space<vmem>>, vector<1x128x256xbf16>
    %195 = vector.shape_cast %194 : vector<1x128x256xbf16> to vector<128x256xbf16>
    %cst_257 = arith.constant dense<0.000000e+00> : vector<8x256xf32>
    %196 = tpu.matmul %193, %195, %cst_257 {dimension_numbers = #tpu.dot_dimension_numbers<[1], [0], [0], [1], [0, 0, 1, 1], [], []>} : vector<8x128xbf16>, vector<128x256xbf16>, vector<8x256xf32> -> vector<8x256xf32>
    %197 = arith.addf %191, %196 : vector<8x256xf32>
    %c0_258 = arith.constant 0 : index
    %c1_259 = arith.constant 1 : index
    %c0_260 = arith.constant 0 : index
    %c0_261 = arith.constant 0 : index
    %198 = vector.load %arg21[%c0_258, %c1_259, %c0_260, %c0_261] : memref<2x4x4x128xbf16, #tpu.memory_space<vmem>>, vector<2x2x2x128xbf16>
    %199 = vector.shape_cast %198 : vector<2x2x2x128xbf16> to vector<8x128xbf16>
    %c3_262 = arith.constant 3 : index
    %c0_263 = arith.constant 0 : index
    %c0_264 = arith.constant 0 : index
    %200 = vector.load %arg11[%c3_262, %c0_263, %c0_264] : memref<9x128x256xbf16, #tpu.memory_space<vmem>>, vector<1x128x256xbf16>
    %201 = vector.shape_cast %200 : vector<1x128x256xbf16> to vector<128x256xbf16>
    %cst_265 = arith.constant dense<0.000000e+00> : vector<8x256xf32>
    %202 = tpu.matmul %199, %201, %cst_265 {dimension_numbers = #tpu.dot_dimension_numbers<[1], [0], [0], [1], [0, 0, 1, 1], [], []>} : vector<8x128xbf16>, vector<128x256xbf16>, vector<8x256xf32> -> vector<8x256xf32>
    %203 = arith.addf %197, %202 : vector<8x256xf32>
    %c0_266 = arith.constant 0 : index
    %c1_267 = arith.constant 1 : index
    %c1_268 = arith.constant 1 : index
    %c0_269 = arith.constant 0 : index
    %204 = vector.load %arg21[%c0_266, %c1_267, %c1_268, %c0_269] : memref<2x4x4x128xbf16, #tpu.memory_space<vmem>>, vector<2x2x2x128xbf16>
    %205 = vector.shape_cast %204 : vector<2x2x2x128xbf16> to vector<8x128xbf16>
    %c4_270 = arith.constant 4 : index
    %c0_271 = arith.constant 0 : index
    %c0_272 = arith.constant 0 : index
    %206 = vector.load %arg11[%c4_270, %c0_271, %c0_272] : memref<9x128x256xbf16, #tpu.memory_space<vmem>>, vector<1x128x256xbf16>
    %207 = vector.shape_cast %206 : vector<1x128x256xbf16> to vector<128x256xbf16>
    %cst_273 = arith.constant dense<0.000000e+00> : vector<8x256xf32>
    %208 = tpu.matmul %205, %207, %cst_273 {dimension_numbers = #tpu.dot_dimension_numbers<[1], [0], [0], [1], [0, 0, 1, 1], [], []>} : vector<8x128xbf16>, vector<128x256xbf16>, vector<8x256xf32> -> vector<8x256xf32>
    %209 = arith.addf %203, %208 : vector<8x256xf32>
    %c0_274 = arith.constant 0 : index
    %c1_275 = arith.constant 1 : index
    %c2_276 = arith.constant 2 : index
    %c0_277 = arith.constant 0 : index
    %210 = vector.load %arg21[%c0_274, %c1_275, %c2_276, %c0_277] : memref<2x4x4x128xbf16, #tpu.memory_space<vmem>>, vector<2x2x2x128xbf16>
    %211 = vector.shape_cast %210 : vector<2x2x2x128xbf16> to vector<8x128xbf16>
    %c5_278 = arith.constant 5 : index
    %c0_279 = arith.constant 0 : index
    %c0_280 = arith.constant 0 : index
    %212 = vector.load %arg11[%c5_278, %c0_279, %c0_280] : memref<9x128x256xbf16, #tpu.memory_space<vmem>>, vector<1x128x256xbf16>
    %213 = vector.shape_cast %212 : vector<1x128x256xbf16> to vector<128x256xbf16>
    %cst_281 = arith.constant dense<0.000000e+00> : vector<8x256xf32>
    %214 = tpu.matmul %211, %213, %cst_281 {dimension_numbers = #tpu.dot_dimension_numbers<[1], [0], [0], [1], [0, 0, 1, 1], [], []>} : vector<8x128xbf16>, vector<128x256xbf16>, vector<8x256xf32> -> vector<8x256xf32>
    %215 = arith.addf %209, %214 : vector<8x256xf32>
    %c0_282 = arith.constant 0 : index
    %c2_283 = arith.constant 2 : index
    %c0_284 = arith.constant 0 : index
    %c0_285 = arith.constant 0 : index
    %216 = vector.load %arg21[%c0_282, %c2_283, %c0_284, %c0_285] : memref<2x4x4x128xbf16, #tpu.memory_space<vmem>>, vector<2x2x2x128xbf16>
    %217 = vector.shape_cast %216 : vector<2x2x2x128xbf16> to vector<8x128xbf16>
    %c6_286 = arith.constant 6 : index
    %c0_287 = arith.constant 0 : index
    %c0_288 = arith.constant 0 : index
    %218 = vector.load %arg11[%c6_286, %c0_287, %c0_288] : memref<9x128x256xbf16, #tpu.memory_space<vmem>>, vector<1x128x256xbf16>
    %219 = vector.shape_cast %218 : vector<1x128x256xbf16> to vector<128x256xbf16>
    %cst_289 = arith.constant dense<0.000000e+00> : vector<8x256xf32>
    %220 = tpu.matmul %217, %219, %cst_289 {dimension_numbers = #tpu.dot_dimension_numbers<[1], [0], [0], [1], [0, 0, 1, 1], [], []>} : vector<8x128xbf16>, vector<128x256xbf16>, vector<8x256xf32> -> vector<8x256xf32>
    %221 = arith.addf %215, %220 : vector<8x256xf32>
    %c0_290 = arith.constant 0 : index
    %c2_291 = arith.constant 2 : index
    %c1_292 = arith.constant 1 : index
    %c0_293 = arith.constant 0 : index
    %222 = vector.load %arg21[%c0_290, %c2_291, %c1_292, %c0_293] : memref<2x4x4x128xbf16, #tpu.memory_space<vmem>>, vector<2x2x2x128xbf16>
    %223 = vector.shape_cast %222 : vector<2x2x2x128xbf16> to vector<8x128xbf16>
    %c7_294 = arith.constant 7 : index
    %c0_295 = arith.constant 0 : index
    %c0_296 = arith.constant 0 : index
    %224 = vector.load %arg11[%c7_294, %c0_295, %c0_296] : memref<9x128x256xbf16, #tpu.memory_space<vmem>>, vector<1x128x256xbf16>
    %225 = vector.shape_cast %224 : vector<1x128x256xbf16> to vector<128x256xbf16>
    %cst_297 = arith.constant dense<0.000000e+00> : vector<8x256xf32>
    %226 = tpu.matmul %223, %225, %cst_297 {dimension_numbers = #tpu.dot_dimension_numbers<[1], [0], [0], [1], [0, 0, 1, 1], [], []>} : vector<8x128xbf16>, vector<128x256xbf16>, vector<8x256xf32> -> vector<8x256xf32>
    %227 = arith.addf %221, %226 : vector<8x256xf32>
    %c0_298 = arith.constant 0 : index
    %c2_299 = arith.constant 2 : index
    %c2_300 = arith.constant 2 : index
    %c0_301 = arith.constant 0 : index
    %228 = vector.load %arg21[%c0_298, %c2_299, %c2_300, %c0_301] : memref<2x4x4x128xbf16, #tpu.memory_space<vmem>>, vector<2x2x2x128xbf16>
    %229 = vector.shape_cast %228 : vector<2x2x2x128xbf16> to vector<8x128xbf16>
    %c8_302 = arith.constant 8 : index
    %c0_303 = arith.constant 0 : index
    %c0_304 = arith.constant 0 : index
    %230 = vector.load %arg11[%c8_302, %c0_303, %c0_304] : memref<9x128x256xbf16, #tpu.memory_space<vmem>>, vector<1x128x256xbf16>
    %231 = vector.shape_cast %230 : vector<1x128x256xbf16> to vector<128x256xbf16>
    %cst_305 = arith.constant dense<0.000000e+00> : vector<8x256xf32>
    %232 = tpu.matmul %229, %231, %cst_305 {dimension_numbers = #tpu.dot_dimension_numbers<[1], [0], [0], [1], [0, 0, 1, 1], [], []>} : vector<8x128xbf16>, vector<128x256xbf16>, vector<8x256xf32> -> vector<8x256xf32>
    %233 = arith.addf %227, %232 : vector<8x256xf32>
    %c0_306 = arith.constant 0 : index
    %c0_307 = arith.constant 0 : index
    %234 = vector.load %arg12[%c0_306, %c0_307] : memref<1x256xf32, #tpu.memory_space<vmem>>, vector<1x256xf32>
    %235 = vector.broadcast %234 : vector<1x256xf32> to vector<8x256xf32>
    %236 = arith.mulf %233, %235 : vector<8x256xf32>
    %c0_308 = arith.constant 0 : index
    %c0_309 = arith.constant 0 : index
    %237 = vector.load %arg13[%c0_308, %c0_309] : memref<1x256xf32, #tpu.memory_space<vmem>>, vector<1x256xf32>
    %238 = vector.broadcast %237 : vector<1x256xf32> to vector<8x256xf32>
    %239 = arith.addf %236, %238 : vector<8x256xf32>
    %cst_310 = arith.constant 0.000000e+00 : f32
    %240 = vector.broadcast %cst_310 : f32 to vector<8x256xf32>
    %241 = arith.maximumf %239, %240 : vector<8x256xf32>
    %242 = vector.shape_cast %241 : vector<8x256xf32> to vector<2x4x256xf32>
    %cst_311 = arith.constant dense<0.000000e+00> : vector<2x256xf32>
    %243 = vector.multi_reduction <add>, %242, %cst_311 [1] : vector<2x4x256xf32> to vector<2x256xf32>
    %cst_312 = arith.constant 4.000000e+00 : f32
    %244 = vector.broadcast %cst_312 : f32 to vector<2x256xf32>
    %245 = arith.divf %243, %244 : vector<2x256xf32>
    %246 = arith.truncf %245 : vector<2x256xf32> to vector<2x256xbf16>
    %c0_313 = arith.constant 0 : index
    %c0_314 = arith.constant 0 : index
    %247 = vector.load %arg14[%c0_313, %c0_314] : memref<256x128xbf16, #tpu.memory_space<vmem>>, vector<256x128xbf16>
    %cst_315 = arith.constant dense<0.000000e+00> : vector<2x128xf32>
    %248 = tpu.matmul %246, %247, %cst_315 {dimension_numbers = #tpu.dot_dimension_numbers<[1], [0], [0], [1], [0, 0, 1, 1], [], []>} : vector<2x256xbf16>, vector<256x128xbf16>, vector<2x128xf32> -> vector<2x128xf32>
    %c0_316 = arith.constant 0 : index
    %c0_317 = arith.constant 0 : index
    %249 = vector.load %arg15[%c0_316, %c0_317] : memref<1x128xf32, #tpu.memory_space<vmem>>, vector<1x128xf32>
    %250 = vector.broadcast %249 : vector<1x128xf32> to vector<2x128xf32>
    %251 = arith.addf %248, %250 : vector<2x128xf32>
    %cst_318 = arith.constant 0.000000e+00 : f32
    %252 = vector.broadcast %cst_318 : f32 to vector<2x128xf32>
    %253 = arith.maximumf %251, %252 : vector<2x128xf32>
    %254 = arith.truncf %253 : vector<2x128xf32> to vector<2x128xbf16>
    %c0_319 = arith.constant 0 : index
    %c0_320 = arith.constant 0 : index
    %255 = vector.load %arg16[%c0_319, %c0_320] : memref<128x128xbf16, #tpu.memory_space<vmem>>, vector<128x128xbf16>
    %cst_321 = arith.constant dense<0.000000e+00> : vector<2x128xf32>
    %256 = tpu.matmul %254, %255, %cst_321 {dimension_numbers = #tpu.dot_dimension_numbers<[1], [0], [0], [1], [0, 0, 1, 1], [], []>} : vector<2x128xbf16>, vector<128x128xbf16>, vector<2x128xf32> -> vector<2x128xf32>
    %c0_322 = arith.constant 0 : index
    %c0_323 = arith.constant 0 : index
    %257 = vector.load %arg17[%c0_322, %c0_323] : memref<1x128xf32, #tpu.memory_space<vmem>>, vector<1x128xf32>
    %258 = vector.broadcast %257 : vector<1x128xf32> to vector<2x128xf32>
    %259 = arith.addf %256, %258 : vector<2x128xf32>
    %c0_324 = arith.constant 0 : index
    %c0_325 = arith.constant 0 : index
    %c0_326 = arith.constant 0 : index
    %260 = vector.load %arg18[%c0_324, %c0_325, %c0_326] : memref<1x2x128xf32, #tpu.memory_space<vmem>>, vector<1x2x128xf32>
    %261 = vector.shape_cast %260 : vector<1x2x128xf32> to vector<2x128xf32>
    %262 = vector.shape_cast %259 : vector<2x128xf32> to vector<1x2x128xf32>
    tpu.vector_store %arg18[%c0_324, %c0_325, %c0_326], %262 {strides = array<i32>} : memref<1x2x128xf32, #tpu.memory_space<vmem>>, vector<1x2x128xf32>,
    return
  }
  func.func @transform_0(%arg0: i32) -> (i32, i32) {
    %c0_i32 = arith.constant 0 : i32
    %c0_i32_0 = arith.constant 0 : i32
    return %arg0, %c0_i32 : i32, i32
  }
  func.func @transform_1(%arg0: i32) -> (i32, i32) {
    %c0_i32 = arith.constant 0 : i32
    %c0_i32_0 = arith.constant 0 : i32
    %c0_i32_1 = arith.constant 0 : i32
    return %c0_i32, %c0_i32_0 : i32, i32
  }
  func.func @transform_2(%arg0: i32) -> (i32, i32) {
    %c0_i32 = arith.constant 0 : i32
    %c0_i32_0 = arith.constant 0 : i32
    %c0_i32_1 = arith.constant 0 : i32
    return %c0_i32, %c0_i32_0 : i32, i32
  }
  func.func @transform_3(%arg0: i32) -> (i32, i32) {
    %c0_i32 = arith.constant 0 : i32
    %c0_i32_0 = arith.constant 0 : i32
    %c0_i32_1 = arith.constant 0 : i32
    return %c0_i32, %c0_i32_0 : i32, i32
  }
  func.func @transform_4(%arg0: i32) -> (i32, i32, i32) {
    %c0_i32 = arith.constant 0 : i32
    %c0_i32_0 = arith.constant 0 : i32
    %c0_i32_1 = arith.constant 0 : i32
    %c0_i32_2 = arith.constant 0 : i32
    return %c0_i32, %c0_i32_0, %c0_i32_1 : i32, i32, i32
  }
  func.func @transform_5(%arg0: i32) -> (i32, i32) {
    %c0_i32 = arith.constant 0 : i32
    %c0_i32_0 = arith.constant 0 : i32
    %c0_i32_1 = arith.constant 0 : i32
    return %c0_i32, %c0_i32_0 : i32, i32
  }
  func.func @transform_6(%arg0: i32) -> (i32, i32) {
    %c0_i32 = arith.constant 0 : i32
    %c0_i32_0 = arith.constant 0 : i32
    %c0_i32_1 = arith.constant 0 : i32
    return %c0_i32, %c0_i32_0 : i32, i32
  }
  func.func @transform_7(%arg0: i32) -> (i32, i32, i32) {
    %c0_i32 = arith.constant 0 : i32
    %c0_i32_0 = arith.constant 0 : i32
    %c0_i32_1 = arith.constant 0 : i32
    %c0_i32_2 = arith.constant 0 : i32
    return %c0_i32, %c0_i32_0, %c0_i32_1 : i32, i32, i32
  }
  func.func @transform_8(%arg0: i32) -> (i32, i32) {
    %c0_i32 = arith.constant 0 : i32
    %c0_i32_0 = arith.constant 0 : i32
    %c0_i32_1 = arith.constant 0 : i32
    return %c0_i32, %c0_i32_0 : i32, i32
  }
  func.func @transform_9(%arg0: i32) -> (i32, i32) {
    %c0_i32 = arith.constant 0 : i32
    %c0_i32_0 = arith.constant 0 : i32
    %c0_i32_1 = arith.constant 0 : i32
    return %c0_i32, %c0_i32_0 : i32, i32
  }
  func.func @transform_10(%arg0: i32) -> (i32, i32, i32) {
    %c0_i32 = arith.constant 0 : i32
    %c0_i32_0 = arith.constant 0 : i32
    %c0_i32_1 = arith.constant 0 : i32
    %c0_i32_2 = arith.constant 0 : i32
    return %c0_i32, %c0_i32_0, %c0_i32_1 : i32, i32, i32
  }
  func.func @transform_11(%arg0: i32) -> (i32, i32) {
    %c0_i32 = arith.constant 0 : i32
    %c0_i32_0 = arith.constant 0 : i32
    %c0_i32_1 = arith.constant 0 : i32
    return %c0_i32, %c0_i32_0 : i32, i32
  }
  func.func @transform_12(%arg0: i32) -> (i32, i32) {
    %c0_i32 = arith.constant 0 : i32
    %c0_i32_0 = arith.constant 0 : i32
    %c0_i32_1 = arith.constant 0 : i32
    return %c0_i32, %c0_i32_0 : i32, i32
  }
  func.func @transform_13(%arg0: i32) -> (i32, i32) {
    %c0_i32 = arith.constant 0 : i32
    %c0_i32_0 = arith.constant 0 : i32
    %c0_i32_1 = arith.constant 0 : i32
    return %c0_i32, %c0_i32_0 : i32, i32
  }
  func.func @transform_14(%arg0: i32) -> (i32, i32) {
    %c0_i32 = arith.constant 0 : i32
    %c0_i32_0 = arith.constant 0 : i32
    %c0_i32_1 = arith.constant 0 : i32
    return %c0_i32, %c0_i32_0 : i32, i32
  }
  func.func @transform_15(%arg0: i32) -> (i32, i32) {
    %c0_i32 = arith.constant 0 : i32
    %c0_i32_0 = arith.constant 0 : i32
    %c0_i32_1 = arith.constant 0 : i32
    return %c0_i32, %c0_i32_0 : i32, i32
  }
  func.func @transform_16(%arg0: i32) -> (i32, i32) {
    %c0_i32 = arith.constant 0 : i32
    %c0_i32_0 = arith.constant 0 : i32
    %c0_i32_1 = arith.constant 0 : i32
    return %c0_i32, %c0_i32_0 : i32, i32
  }
  func.func @transform_17(%arg0: i32) -> (i32, i32, i32) {
    %c0_i32 = arith.constant 0 : i32
    %c0_i32_0 = arith.constant 0 : i32
    %c0_i32_1 = arith.constant 0 : i32
    return %arg0, %c0_i32, %c0_i32_0 : i32, i32, i32
  }
}

</mosaic_0001>

<bundles_post_ra>
// kernel: simple_cnn_forward.1
= control target key start
LH: loop header
LB: loop body
LE: loop exit
PB: predicated region body
PF: predicated region fallthrough
CT: control target
= control target key end

     0   :  { %s21026_s0 = inlined_call_operand.vmem [shape: bf16[512,27], index: 0, kind: input, shape index: {}]   ;;  %s21027_s1 = inlined_call_operand.vmem [shape: bf16[27,32], index: 1, kind: input, shape index: {}]   ;;  %s21028_s2 = inlined_call_operand.vmem [shape: f32[1,32], index: 2, kind: input, shape index: {}]   ;;  %s21029_s3 = inlined_call_operand.vmem [shape: f32[1,32], index: 3, kind: input, shape index: {}]   ;;  %s21030_s4 = inlined_call_operand.vmem [shape: bf16[9,32,64], index: 4, kind: input, shape index: {}]   ;;  %s21031_s5 = inlined_call_operand.vmem [shape: f32[1,64], index: 5, kind: input, shape index: {}]   ;;  %s21032_s6 = inlined_call_operand.vmem [shape: f32[1,64], index: 6, kind: input, shape index: {}]   ;;  %s21033_s7 = inlined_call_operand.vmem [shape: bf16[9,64,128], index: 7, kind: input, shape index: {}]   ;;  %s21034_s8 = inlined_call_operand.vmem [shape: f32[1,128], index: 8, kind: input, shape index: {}]   ;;  %s21035_s9 = inlined_call_operand.vmem [shape: f32[1,128], index: 9, kind: input, shape index: {}]   ;;  %s21036_s10 = inlined_call_operand.vmem [shape: bf16[9,128,256], index: 10, kind: input, shape index: {}]   ;;  %s21037_s11 = inlined_call_operand.vmem [shape: f32[1,256], index: 11, kind: input, shape index: {}]   ;;  %s21038_s12 = inlined_call_operand.vmem [shape: f32[1,256], index: 12, kind: input, shape index: {}]   ;;  %s21039_s13 = inlined_call_operand.vmem [shape: bf16[256,128], index: 13, kind: input, shape index: {}]   ;;  %s21040_s14 = inlined_call_operand.vmem [shape: f32[1,128], index: 14, kind: input, shape index: {}]   ;;  %s21041_s15 = inlined_call_operand.vmem [shape: bf16[128,128], index: 15, kind: input, shape index: {}]   ;;  %s21042_s16 = inlined_call_operand.vmem [shape: f32[1,128], index: 16, kind: input, shape index: {}]   ;;  %s21043_s17 = inlined_call_operand.hbm [shape: f32[1,2,128], index: 17, kind: output, shape index: {}]  }
   0x1   :  { %21046 = sst [smem:[#allocation8_spill]] %s21026_s0 }
   0x2   :  { %21047 = sst [smem:[#allocation9_spill]] %s21027_s1 }
   0x3   :  { %s21048_s26 = sld [smem:[#allocation9_spill]]  ;;  %vm671_vm0 = vcmask 1044480   ;;  %vm672_vm1 = vcmask 1045504   ;;  %v16826_v2 = vmov 65535   ;;  %s21049_s30 = sld [smem:[#allocation8_spill]]  ;;  %vm574_vm2 = vcmask 220160  }
   0x4   :  { %v673_v3 = vsel %vm671_vm0, 4294967295, %v16826_v2  ;;  %vm60_vm3 = vcmask 253952   ;;  %vm132_vm4 = vsmask.f32 7938  ;;  %v143_v39 = vld [vmem:[#allocation2 + $0x1c] sm:$0x1] }
   0x5   :  { %v674_v6 = vsel %vm672_vm1, %v673_v3, 0  ;;  %vm17059_vm5 = vmand %vm60_vm3, %vm132_vm4 }
   0x6   :  { %v144_v40 = vsel %vm17059_vm5, 0, %v143_v39 }
   0x9   :  { %v16395_v0 = vld [vmem:[%s21048_s26] sm:$0xff]   ;;  %v16396_v1 = vld [vmem:[%s21048_s26 + $0x8] sm:$0x3f]   ;;  %v16401_v10 = vld [vmem:[%s21049_s30 + $0x10] sm:$0xff]  }
   0xa   :  { %15816 = vmatprep.subr.bf16.mxu0 %v16395_v0  ;;  %16192 = vmatprep.subr.bf16.mxu1 %v16395_v0  ;;  %v16397_v4 = vld [vmem:[%s21049_s30] sm:$0xff]   ;;  %v676_v7 = vand.u32 %v16396_v1, %v674_v6  ;;  %v16399_v8 = vld [vmem:[%s21049_s30 + $0x8] sm:$0xff]   ;;  %v16402_v11 = vld [vmem:[%s21049_s30 + $0x30] sm:$0xff]  }
   0xb   :  { %15817 = vmatpush3.bf16.msra.mxu0 %v16395_v0  ;;  %16194 = vmatpush3.bf16.msra.mxu1 %v16395_v0  ;;  %v16398_v5 = vld [vmem:[%s21049_s30 + $0x20] sm:$0xff]   ;;  %v16400_v9 = vld [vmem:[%s21049_s30 + $0x28] sm:$0xff]   ;;  %v16403_v12 = vld [vmem:[%s21049_s30 + $0x18] sm:$0xff]  }
   0xc   :  { %15820 = vmatprep.mubr.msk.bf16.mxu0 %vm574_vm2, %v16397_v4  ;;  %15828 = vmatprep.mubr.msk.bf16.mxu1 %vm574_vm2, %v16398_v5  ;;  %v16404_v13 = vld [vmem:[%s21049_s30 + $0x38] sm:$0xff]   ;;  %v16405_v14 = vld [vmem:[%s21049_s30 + $0x40] sm:$0xff]   ;;  %v16406_v15 = vld [vmem:[%s21049_s30 + $0x48] sm:$0xff]  }
   0xd   :  { %15818 = vmatprep.subr.bf16.mxu0 %v676_v7  ;;  %16193 = vmatprep.subr.bf16.mxu1 %v676_v7  ;;  %v16407_v16 = vld [vmem:[%s21049_s30 + $0x50] sm:$0xff]   ;;  %v16408_v17 = vld [vmem:[%s21049_s30 + $0x58] sm:$0xff]   ;;  %v16409_v18 = vld [vmem:[%s21049_s30 + $0x60] sm:$0xff]  }
   0xe   :  { %v16410_v19 = vld [vmem:[%s21049_s30 + $0x68] sm:$0xff]   ;;  %v16411_v20 = vld [vmem:[%s21049_s30 + $0x70] sm:$0xff]   ;;  %v16412_v21 = vld [vmem:[%s21049_s30 + $0x78] sm:$0xff]  }
   0xf   :  { %15819 = vmatpush3.bf16.msra.mxu0 %v676_v7  ;;  %16195 = vmatpush3.bf16.msra.mxu1 %v676_v7  ;;  %v16413_v22 = vld [vmem:[%s21049_s30 + $0x80] sm:$0xff]   ;;  %v16414_v23 = vld [vmem:[%s21049_s30 + $0x88] sm:$0xff]   ;;  %v16415_v24 = vld [vmem:[%s21049_s30 + $0x90] sm:$0xff]  }
  0x10   :  { %v16416_v25 = vld [vmem:[%s21049_s30 + $0x98] sm:$0xff]   ;;  %v16417_v26 = vld [vmem:[%s21049_s30 + $0xa0] sm:$0xff]   ;;  %v16418_v27 = vld [vmem:[%s21049_s30 + $0xa8] sm:$0xff]  }
  0x11   :  { %v16419_v28 = vld [vmem:[%s21049_s30 + $0xb0] sm:$0xff]   ;;  %v16420_v29 = vld [vmem:[%s21049_s30 + $0xb8] sm:$0xff]   ;;  %v16421_v30 = vld [vmem:[%s21049_s30 + $0xc0] sm:$0xff]  }
  0x12   :  { %15821 = vmatmul.mubr.msk.bf16.vlgmr.msra.gmra.mrb[0].mxu0 %vm574_vm2, %v16399_v8  ;;  %15829 = vmatmul.mubr.msk.bf16.vlgmr.msra.gmra.mrb[0].mxu1 %vm574_vm2, %v16400_v9  ;;  %v16422_v31 = vld [vmem:[%s21049_s30 + $0xc8] sm:$0xff]   ;;  %v16423_v32 = vld [vmem:[%s21049_s30 + $0xd0] sm:$0xff]   ;;  %v16424_v33 = vld [vmem:[%s21049_s30 + $0xd8] sm:$0xff]  }
  0x13   :  { %15824 = vmatprep.mubr.msk.bf16.mxu0 %vm574_vm2, %v16401_v10  ;;  %15832 = vmatprep.mubr.msk.bf16.mxu1 %vm574_vm2, %v16402_v11  ;;  %v16425_v34 = vld [vmem:[%s21049_s30 + $0xe0] sm:$0xff]   ;;  %v16426_v35 = vld [vmem:[%s21049_s30 + $0xe8] sm:$0xff]   ;;  %v16427_v36 = vld [vmem:[%s21049_s30 + $0xf0] sm:$0xff]  }
  0x14   :  { %v16428_v37 = vld [vmem:[%s21049_s30 + $0xf8] sm:$0xff]  }
  0x1a   :  { %15825 = vmatmul.mubr.msk.bf16.gmra.mrb[4].mxu0 %vm574_vm2, %v16403_v12  ;;  %15833 = vmatmul.mubr.msk.bf16.gmra.mrb[4].mxu1 %vm574_vm2, %v16404_v13 }
  0x1b   :  { %15836 = vmatprep.mubr.msk.bf16.mxu1 %vm574_vm2, %v16405_v14 }
  0x22   :  { %15837 = vmatmul.mubr.msk.bf16.gmra.mrb[8].mxu1 %vm574_vm2, %v16406_v15 }
  0x23   :  { %15840 = vmatprep.mubr.msk.bf16.mxu1 %vm574_vm2, %v16407_v16 }
  0x2a   :  { %15841 = vmatmul.mubr.msk.bf16.gmra.mrb[12].mxu1 %vm574_vm2, %v16408_v17 }
  0x2b   :  { %15844 = vmatprep.mubr.msk.bf16.mxu1 %vm574_vm2, %v16409_v18 }
  0x32   :  { %15845 = vmatmul.mubr.msk.bf16.gmra.mrb[16].mxu1 %vm574_vm2, %v16410_v19 }
  0x33   :  { %15848 = vmatprep.mubr.msk.bf16.mxu1 %vm574_vm2, %v16411_v20 }
  0x3a   :  { %15849 = vmatmul.mubr.msk.bf16.gmra.mrb[20].mxu1 %vm574_vm2, %v16412_v21 }
  0x3b   :  { %15852 = vmatprep.mubr.msk.bf16.mxu1 %vm574_vm2, %v16413_v22 }
  0x42   :  { %15853 = vmatmul.mubr.msk.bf16.gmra.mrb[24].mxu1 %vm574_vm2, %v16414_v23 }
  0x43   :  { %15856 = vmatprep.mubr.msk.bf16.mxu1 %vm574_vm2, %v16415_v24 }
  0x4a   :  { %15857 = vmatmul.mubr.msk.bf16.gmra.mrb[28].mxu1 %vm574_vm2, %v16416_v25 }
  0x4b   :  { %15860 = vmatprep.mubr.msk.bf16.mxu1 %vm574_vm2, %v16417_v26 }
  0x52   :  { %15861 = vmatmul.mubr.msk.bf16.gmra.mrb[32].mxu1 %vm574_vm2, %v16418_v27 }
  0x53   :  { %15864 = vmatprep.mubr.msk.bf16.mxu1 %vm574_vm2, %v16419_v28 }
  0x5a   :  { %15865 = vmatmul.mubr.msk.bf16.gmra.mrb[36].mxu1 %vm574_vm2, %v16420_v29 }
  0x5b   :  { %15868 = vmatprep.mubr.msk.bf16.mxu1 %vm574_vm2, %v16421_v30 }
  0x62   :  { %15869 = vmatmul.mubr.msk.bf16.gmra.mrb[40].mxu1 %vm574_vm2, %v16422_v31 }
  0x63   :  { %15872 = vmatprep.mubr.msk.bf16.mxu1 %vm574_vm2, %v16423_v32 }
  0x6a   :  { %15873 = vmatmul.mubr.msk.bf16.gmra.mrb[44].mxu1 %vm574_vm2, %v16424_v33 }
  0x6b   :  { %15876 = vmatprep.mubr.msk.bf16.mxu1 %vm574_vm2, %v16425_v34 }
  0x72   :  { %15877 = vmatmul.mubr.msk.bf16.gmra.mrb[48].mxu1 %vm574_vm2, %v16426_v35 }
  0x73   :  { %15880 = vmatprep.mubr.msk.bf16.mxu1 %vm574_vm2, %v16427_v36 }
  0x7a   :  { %15881 = vmatmul.mubr.msk.bf16.gmra.mrb[52].mxu1 %vm574_vm2, %v16428_v37 }
  0x7b   :  { %22 = vsyncpa [#allocation6], 0  ;;  %145 = vst [vmem:[#allocation2 + $0x1c] sm:$0x1] %v144_v40  ;;  %vm70_vm6 = vsmask.f32 256  ;;  %v1241_v50 = vlaneseq }
  0x7c   :  { %v81_v41 = vld [vmem:[#allocation2 + $0x18] sm:$0x1]  ;;  %vm17067_vm7 = vmand %vm60_vm3, %vm70_vm6  ;;  %v75_v44 = vld [vmem:[#allocation2 + $0x8] sm:$0x1]  ;;  %v16827_v48 = vmov 1983009808  }
  0x7d   :  { %v82_v43 = vsel %vm17067_vm7, 0, %v81_v41  ;;  %v137_v45 = vld [vmem:[#allocation2 + $0xc] sm:$0x1]  ;;  %v76_v46 = vsel %vm17067_vm7, 0, %v75_v44  ;;  %v1239_v49 = vunpack.c.l.s4 %v16827_v48  ;;  %v17080_v51 = vld [vmem:[%s21028_s2] ss:$0 sm:$0xff] }
  0x7e   :  { %83 = vst [vmem:[#allocation2 + $0x18] sm:$0x1] %v82_v43  ;;  %v138_v47 = vsel %vm17059_vm5, 0, %v137_v45  ;;  %77 = vst [vmem:[#allocation2 + $0x8] sm:$0x1] %v76_v46  ;;  %v17082_v53 = vshrl.u32 %v1241_v50, 7 }
  0x7f   :  { %139 = vst [vmem:[#allocation2 + $0xc] sm:$0x1] %v138_v47  ;;  %v1240_v52 = vunpack.c.0.s8 %v1239_v49  ;;  %v17087_v55 = vld [vmem:[%s21029_s3] ss:$0 sm:$0xff]  ;;  %vm2581_vm8 = vcmask 254976   ;;  %vm4374_vm9 = vcmask 261120  }
  0x80   :  { %vm5399_vm10 = vcmask 1042434   ;;  %vm5401_vm11 = vcmask 1043459   ;;  %vm5403_vm12 = vcmask 1044484   ;;  %vm5405_vm13 = vcmask 1045509  }
  0x81   :  { %v17092_v61 = vsub.s32 %v1240_v52, %v17082_v53  ;;  %vm5407_vm14 = vcmask 1046534   ;;  %vm58_vm15 = vcmask 257024   ;;  %vm5409_vm0 = vcmask 1047559  }
  0x82   :  { %vm17218_vm1 = vmand %vm58_vm15, %vm132_vm4  ;;  %vm5700_vm2 = vsmask.f32 3328  ;;  %vm5701_vm4 = vsmask.f32 7440 }
  0xe5   :  { %v15830_v54 = vpop.f32.mrb[0].mxu1  ;;  %v15822_v56 = vpop.f32.mrb[0].mxu0 }
  0xe6   :  { %v984_v57 = vmul.f32 %v15830_v54, %v17080_v51  ;;  %v744_v58 = vpop.f32.mrb[1].mxu1  ;;  %v976_v59 = vmul.f32 %v15822_v56, %v17080_v51  ;;  %v712_v60 = vpop.f32.mrb[1].mxu0 }
  0xe7   :  { %v982_v62 = vmul.f32 %v17080_v51, %v744_v58  ;;  %v15831_v63 = vpop.f32.mrb[2].mxu1  ;;  %v974_v0 = vmul.f32 %v17080_v51, %v712_v60  ;;  %v15823_v1 = vpop.f32.mrb[2].mxu0 }
  0xe8   :  { %v1055_v2 = vadd.f32 %v17087_v55, %v984_v57  ;;  %v985_v3 = vmul.f32 %v15831_v63, %v17080_v51  ;;  %v747_v4 = vpop.f32.mrb[3].mxu1  ;;  %v1047_v5 = vadd.f32 %v17087_v55, %v976_v59  ;;  %v977_v6 = vmul.f32 %v15823_v1, %v17080_v51  ;;  %v715_v7 = vpop.f32.mrb[3].mxu0 }
  0xe9   :  { %v1053_v8 = vadd.f32 %v17087_v55, %v982_v62  ;;  %v983_v9 = vmul.f32 %v17080_v51, %v747_v4  ;;  %v1045_v10 = vadd.f32 %v17087_v55, %v974_v0  ;;  %v975_v11 = vmul.f32 %v17080_v51, %v715_v7 }
  0xea   :  { %v1119_v12 = vmax.f32 %v1055_v2, 0.0  ;;  %v1056_v13 = vadd.f32 %v17087_v55, %v985_v3  ;;  %v17105_v14 = vmax.f32 %v1047_v5, 0.0  ;;  %v17108_v15 = vadd.f32 %v17087_v55, %v977_v6 }
  0xeb   :  { %v1117_v16 = vmax.f32 %v1053_v8, 0.0  ;;  %v1054_v17 = vadd.f32 %v17087_v55, %v983_v9  ;;  %v17111_v18 = vmax.f32 %v1045_v10, 0.0  ;;  %v17114_v19 = vadd.f32 %v17087_v55, %v975_v11 }
  0xec   :  { %v1407_v20 = vcombine.high %v1119_v12, %v1119_v12  ;;  %v1414_v21 = vrot.slane %v1119_v12, %v17092_v61  ;;  %v17117_v22 = vmax.f32 %v1056_v13, 0.0  ;;  %v1271_v23 = vcombine.high %v17105_v14, %v17105_v14 }
  0xed   :  { %v1373_v24 = vcombine.high %v1117_v16, %v1117_v16  ;;  %v1380_v25 = vrot.slane %v1117_v16, %v17092_v61  ;;  %v17122_v26 = vmax.f32 %v1054_v17, 0.0  ;;  %v17126_v27 = vrot.slane %v17105_v14, %v17092_v61  ;;  %v17128_v28 = vpop.f32.mrb[4].mxu0  ;;  %v17130_v29 = vpop.f32.mrb[4].mxu1 }
  0xee   :  { %v1421_v30 = vrot.slane %v1407_v20, %v17092_v61  ;;  %v1422_v31 = vcombine.high %v1414_v21, %v1414_v21  ;;  %v2862_v32 = vsel %vm2581_vm8, %v1414_v21, -inf  ;;  %v1424_v33 = vcombine.high %v17117_v22, %v17117_v22  ;;  %v17136_v34 = vpop.f32.mrb[5].mxu0  ;;  %v17138_v35 = vpop.f32.mrb[5].mxu1 }
  0xef   :  { %v2863_v36 = vrot.slane %v2862_v32, 4  ;;  %v1387_v37 = vrot.slane %v1373_v24, %v17092_v61  ;;  %v1388_v39 = vcombine.high %v1380_v25, %v1380_v25  ;;  %v2806_v40 = vsel %vm2581_vm8, %v1380_v25, -inf  ;;  %v17142_v41 = vpop.f32.mrb[6].mxu1 }
  0xf0   :  { %v1423_v43 = vcombine.high %v1421_v30, %v1421_v30  ;;  %v2869_v44 = vsel %vm2581_vm8, %v1422_v31, -inf  ;;  %v2876_v45 = vsel %vm2581_vm8, %v1421_v30, -inf  ;;  %v2807_v46 = vrot.slane %v2806_v40, 4  ;;  %v17146_v47 = vpop.f32.mrb[7].mxu1 }
  0xf1   :  { %v2864_v48 = vmax.f32 %v2862_v32, %v2863_v36  ;;  %v2870_v49 = vrot.slane %v2869_v44, 4  ;;  %v2877_v50 = vrot.slane %v2876_v45, 4  ;;  %v1389_v52 = vcombine.high %v1387_v37, %v1387_v37 }
  0xf2   :  { %v2883_v54 = vsel %vm2581_vm8, %v1423_v43, -inf  ;;  %v2808_v56 = vmax.f32 %v2806_v40, %v2807_v46  ;;  %v2813_v57 = vsel %vm2581_vm8, %v1388_v39, -inf  ;;  %v2820_v58 = vsel %vm2581_vm8, %v1387_v37, -inf }
  0xf3   :  { %v2865_v59 = vrot.slane %v2864_v48, 2  ;;  %v2871_v60 = vmax.f32 %v2869_v44, %v2870_v49  ;;  %v2878_v62 = vmax.f32 %v2876_v45, %v2877_v50  ;;  %v2884_v63 = vrot.slane %v2883_v54, 4  ;;  %v17153_v49 = vpop.f32.mrb[6].mxu0 }
  0xf4   :  { %v2809_v0 = vrot.slane %v2808_v56, 2  ;;  %v2814_v1 = vrot.slane %v2813_v57, 4  ;;  %v2821_v2 = vrot.slane %v2820_v58, 4  ;;  %v2827_v3 = vsel %vm2581_vm8, %v1389_v52, -inf }
  0xf5   :  { %v2866_v4 = vmax.f32 %v2864_v48, %v2865_v59  ;;  %v2872_v5 = vrot.slane %v2871_v60, 2  ;;  %v2879_v6 = vrot.slane %v2878_v62, 2  ;;  %v2885_v7 = vmax.f32 %v2883_v54, %v2884_v63 }
  0xf6   :  { %v2810_v8 = vmax.f32 %v2808_v56, %v2809_v0  ;;  %v2815_v9 = vmax.f32 %v2813_v57, %v2814_v1  ;;  %v2822_v10 = vmax.f32 %v2820_v58, %v2821_v2  ;;  %v2828_v11 = vrot.slane %v2827_v3, 4 }
  0xf7   :  { %v2867_v12 = vrot.slane %v2866_v4, 1  ;;  %v2873_v13 = vmax.f32 %v2871_v60, %v2872_v5  ;;  %v2880_v16 = vmax.f32 %v2878_v62, %v2879_v6  ;;  %v2886_v17 = vrot.slane %v2885_v7, 2 }
  0xf8   :  { %v2811_v20 = vrot.slane %v2810_v8, 1  ;;  %v2816_v21 = vrot.slane %v2815_v9, 2  ;;  %v2823_v24 = vrot.slane %v2822_v10, 2  ;;  %v2829_v25 = vmax.f32 %v2827_v3, %v2828_v11 }
  0xf9   :  { %v2868_v30 = vmax.f32 %v2866_v4, %v2867_v12  ;;  %v2874_v31 = vrot.slane %v2873_v13, 1  ;;  %v2881_v32 = vrot.slane %v2880_v16, 1  ;;  %v2887_v36 = vmax.f32 %v2885_v7, %v2886_v17 }
  0xfa   :  { %v2812_v37 = vmax.f32 %v2810_v8, %v2811_v20  ;;  %v2817_v39 = vmax.f32 %v2815_v9, %v2816_v21  ;;  %v2824_v40 = vmax.f32 %v2822_v10, %v2823_v24  ;;  %v2830_v43 = vrot.slane %v2829_v25, 2  ;;  %v17169_v10 = vpop.f32.mrb[7].mxu0 }
  0xfb   :  { %v2875_v44 = vmax.f32 %v2873_v13, %v2874_v31  ;;  %v2882_v45 = vmax.f32 %v2880_v16, %v2881_v32  ;;  %v2888_v46 = vrot.slane %v2887_v36, 1  ;;  %v4424_v48 = vsel %vm4374_vm9, %v2868_v30, -inf }
  0xfc   :  { %v2818_v50 = vrot.slane %v2817_v39, 1  ;;  %v2825_v52 = vrot.slane %v2824_v40, 1  ;;  %v2831_v54 = vmax.f32 %v2829_v25, %v2830_v43  ;;  %v4423_v56 = vsel %vm4374_vm9, %v2812_v37, -inf }
  0xfd   :  { %v2889_v57 = vmax.f32 %v2887_v36, %v2888_v46  ;;  %v4427_v58 = vsel %vm4374_vm9, %v2875_v44, -inf  ;;  %v4430_v59 = vsel %vm4374_vm9, %v2882_v45, -inf  ;;  %v4425_v60 = vmax.f32 %v4423_v56, %v4424_v48 }
  0xfe   :  { %v2819_v62 = vmax.f32 %v2817_v39, %v2818_v50  ;;  %v2826_v63 = vmax.f32 %v2824_v40, %v2825_v52  ;;  %v2832_v0 = vrot.slane %v2831_v54, 1  ;;  %v1431_v1 = vrot.slane %v17117_v22, %v17092_v61 }
  0xff   :  { %v4433_v2 = vsel %vm4374_vm9, %v2889_v57, -inf  ;;  %v15447_v3 = vpack.c.bf16 %v4425_v60, %v4425_v60  ;;  %v1438_v4 = vrot.slane %v1424_v33, %v17092_v61  ;;  %v1390_v5 = vcombine.high %v17122_v26, %v17122_v26 }
 0x100   :  { %v2833_v6 = vmax.f32 %v2831_v54, %v2832_v0  ;;  %v4426_v7 = vsel %vm4374_vm9, %v2819_v62, -inf  ;;  %v4429_v8 = vsel %vm4374_vm9, %v2826_v63, -inf  ;;  %v1439_v9 = vcombine.high %v1431_v1, %v1431_v1 }
 0x101   :  { %v4428_v11 = vmax.f32 %v4426_v7, %v4427_v58  ;;  %v4431_v12 = vmax.f32 %v4429_v8, %v4430_v59  ;;  %v5287_v13 = vunpack.c.l.b16 %v15447_v3  ;;  %v1440_v16 = vcombine.high %v1438_v4, %v1438_v4 }
 0x102   :  { %v4432_v17 = vsel %vm4374_vm9, %v2833_v6, -inf  ;;  %v2890_v22 = vsel %vm2581_vm8, %v1431_v1, -inf  ;;  %v2897_v33 = vsel %vm2581_vm8, %v1439_v9, -inf  ;;  %v2904_v20 = vsel %vm2581_vm8, %v1438_v4, -inf }
 0x103   :  { %v4434_v21 = vmax.f32 %v4432_v17, %v4433_v2  ;;  %v15448_v24 = vpack.c.bf16 %v4428_v11, %v4428_v11  ;;  %v15449_v25 = vpack.c.bf16 %v4431_v12, %v4431_v12  ;;  %v2891_v30 = vrot.slane %v2890_v22, 4 }
 0x104   :  { %v2898_v31 = vrot.slane %v2897_v33, 4  ;;  %v2905_v32 = vrot.slane %v2904_v20, 4  ;;  %v2911_v36 = vsel %vm2581_vm8, %v1440_v16, -inf  ;;  %v1397_v37 = vrot.slane %v17122_v26, %v17092_v61 }
 0x105   :  { %v15450_v39 = vpack.c.bf16 %v4434_v21, %v4434_v21  ;;  %v5288_v40 = vunpack.c.l.b16 %v15448_v24  ;;  %v5289_v43 = vunpack.c.l.b16 %v15449_v25  ;;  %v2892_v44 = vmax.f32 %v2890_v22, %v2891_v30 }
 0x106   :  { %v2899_v45 = vmax.f32 %v2897_v33, %v2898_v31  ;;  %v2906_v46 = vmax.f32 %v2904_v20, %v2905_v32  ;;  %v2912_v48 = vrot.slane %v2911_v36, 4  ;;  %v1404_v50 = vrot.slane %v1390_v5, %v17092_v61 }
 0x107   :  { %v5290_v52 = vunpack.c.l.b16 %v15450_v39  ;;  %v5417_v54 = vsel %vm5399_vm10, %v5288_v40, %v5287_v13  ;;  %v2893_v56 = vrot.slane %v2892_v44, 2  ;;  %v1405_v57 = vcombine.high %v1397_v37, %v1397_v37 }
 0x108   :  { %v5418_v58 = vsel %vm5401_vm11, %v5289_v43, %v5417_v54  ;;  %v2900_v59 = vrot.slane %v2899_v45, 2  ;;  %v2907_v60 = vrot.slane %v2906_v46, 2  ;;  %v2913_v26 = vmax.f32 %v2911_v36, %v2912_v48 }
 0x109   :  { %v2894_v62 = vmax.f32 %v2892_v44, %v2893_v56  ;;  %v1406_v63 = vcombine.high %v1404_v50, %v1404_v50  ;;  %v2834_v0 = vsel %vm2581_vm8, %v1397_v37, -inf  ;;  %v2841_v1 = vsel %vm2581_vm8, %v1405_v57, -inf }
 0x10a   :  { %v2901_v2 = vmax.f32 %v2899_v45, %v2900_v59  ;;  %v2908_v3 = vmax.f32 %v2906_v46, %v2907_v60  ;;  %v2914_v4 = vrot.slane %v2913_v26, 2  ;;  %v2835_v5 = vrot.slane %v2834_v0, 4 }
 0x10b   :  { %v2895_v6 = vrot.slane %v2894_v62, 1  ;;  %v2842_v7 = vrot.slane %v2841_v1, 4  ;;  %v2848_v8 = vsel %vm2581_vm8, %v1404_v50, -inf  ;;  %v2855_v9 = vsel %vm2581_vm8, %v1406_v63, -inf }
 0x10c   :  { %v2902_v11 = vrot.slane %v2901_v2, 1  ;;  %v2909_v12 = vrot.slane %v2908_v3, 1  ;;  %v2915_v13 = vmax.f32 %v2913_v26, %v2914_v4  ;;  %v2836_v16 = vmax.f32 %v2834_v0, %v2835_v5 }
 0x10d   :  { %v2896_v17 = vmax.f32 %v2894_v62, %v2895_v6  ;;  %v2843_v22 = vmax.f32 %v2841_v1, %v2842_v7  ;;  %v2849_v33 = vrot.slane %v2848_v8, 4  ;;  %v2856_v20 = vrot.slane %v2855_v9, 4 }
 0x10e   :  { %v2903_v21 = vmax.f32 %v2901_v2, %v2902_v11  ;;  %v2910_v24 = vmax.f32 %v2908_v3, %v2909_v12  ;;  %v2916_v25 = vrot.slane %v2915_v13, 1  ;;  %v2837_v30 = vrot.slane %v2836_v16, 2 }
 0x10f   :  { %v4436_v31 = vsel %vm4374_vm9, %v2896_v17, -inf  ;;  %v2844_v32 = vrot.slane %v2843_v22, 2  ;;  %v2850_v36 = vmax.f32 %v2848_v8, %v2849_v33  ;;  %v2857_v37 = vmax.f32 %v2855_v9, %v2856_v20 }
 0x110   :  { %v2917_v39 = vmax.f32 %v2915_v13, %v2916_v25  ;;  %v4439_v40 = vsel %vm4374_vm9, %v2903_v21, -inf  ;;  %v4442_v43 = vsel %vm4374_vm9, %v2910_v24, -inf  ;;  %v2838_v44 = vmax.f32 %v2836_v16, %v2837_v30 }
 0x111   :  { %v2845_v45 = vmax.f32 %v2843_v22, %v2844_v32  ;;  %v2851_v46 = vrot.slane %v2850_v36, 2  ;;  %v2858_v48 = vrot.slane %v2857_v37, 2  ;;  %v5419_v50 = vsel %vm5403_vm12, %v5290_v52, %v5418_v58 }
 0x112   :  { %v4445_v54 = vsel %vm4374_vm9, %v2917_v39, -inf  ;;  %v2839_v56 = vrot.slane %v2838_v44, 1  ;;  %v1285_v57 = vrot.slane %v1271_v23, %v17092_v61  ;;  %v1286_v59 = vcombine.high %v17126_v27, %v17126_v27 }
 0x113   :  { %v2846_v60 = vrot.slane %v2845_v45, 1  ;;  %v2852_v26 = vmax.f32 %v2850_v36, %v2851_v46  ;;  %v2859_v62 = vmax.f32 %v2857_v37, %v2858_v48  ;;  %v2638_v63 = vsel %vm2581_vm8, %v17126_v27, -inf  ;;  %v17205_v36 = vpop.f32.mrb[8].mxu1 }
 0x114   :  { %v2840_v52 = vmax.f32 %v2838_v44, %v2839_v56  ;;  %v1287_v58 = vcombine.high %v1285_v57, %v1285_v57  ;;  %v2639_v0 = vrot.slane %v2638_v63, 4  ;;  %v2645_v1 = vsel %vm2581_vm8, %v1286_v59, -inf }
 0x115   :  { %v2847_v2 = vmax.f32 %v2845_v45, %v2846_v60  ;;  %v2853_v3 = vrot.slane %v2852_v26, 1  ;;  %v2860_v14 = vrot.slane %v2859_v62, 1  ;;  %v2646_v23 = vrot.slane %v2645_v1, 4 }
 0x116   :  { %v4435_v4 = vsel %vm4374_vm9, %v2840_v52, -inf  ;;  %v2640_v5 = vmax.f32 %v2638_v63, %v2639_v0  ;;  %v2652_v6 = vsel %vm2581_vm8, %v1285_v57, -inf  ;;  %v2659_v7 = vsel %vm2581_vm8, %v1287_v58, -inf  ;;  %v17207_v57 = vpop.f32.mrb[9].mxu1 }
 0x117   :  { %v2854_v8 = vmax.f32 %v2852_v26, %v2853_v3  ;;  %v2861_v27 = vmax.f32 %v2859_v62, %v2860_v14  ;;  %v4437_v9 = vmax.f32 %v4435_v4, %v4436_v31  ;;  %v4438_v11 = vsel %vm4374_vm9, %v2847_v2, -inf  ;;  %v5583_v31 = vld [vmem:[#allocation2 + $0x1c] sm:$0x1]  ;;  %v5580_v14 = vld [vmem:[#allocation2 + $0x18] sm:$0xf] }
 0x118   :  { %v4440_v12 = vmax.f32 %v4438_v11, %v4439_v40  ;;  %v2641_v13 = vrot.slane %v2640_v5, 2  ;;  %v2647_v16 = vmax.f32 %v2645_v1, %v2646_v23  ;;  %v2653_v17 = vrot.slane %v2652_v6, 4 }
 0x119   :  { %v4441_v22 = vsel %vm4374_vm9, %v2854_v8, -inf  ;;  %v4444_v33 = vsel %vm4374_vm9, %v2861_v27, -inf  ;;  %v15451_v20 = vpack.c.bf16 %v4437_v9, %v4437_v9  ;;  %v2660_v21 = vrot.slane %v2659_v7, 4 }
 0x11a   :  { %v4443_v24 = vmax.f32 %v4441_v22, %v4442_v43  ;;  %v4446_v25 = vmax.f32 %v4444_v33, %v4445_v54  ;;  %v15452_v30 = vpack.c.bf16 %v4440_v12, %v4440_v12  ;;  %v2642_v32 = vmax.f32 %v2640_v5, %v2641_v13 }
 0x11b   :  { %v5291_v37 = vunpack.c.l.b16 %v15451_v20  ;;  %v2648_v39 = vrot.slane %v2647_v16, 2  ;;  %v2654_v44 = vmax.f32 %v2652_v6, %v2653_v17  ;;  %v2661_v40 = vmax.f32 %v2659_v7, %v2660_v21 }
 0x11c   :  { %v15453_v45 = vpack.c.bf16 %v4443_v24, %v4443_v24  ;;  %v5292_v46 = vunpack.c.l.b16 %v15452_v30  ;;  %v15561_v48 = vpack.c.bf16 %v4446_v25, %v4446_v25  ;;  %v2643_v56 = vrot.slane %v2642_v32, 1 }
 0x11d   :  { %v5420_v59 = vsel %vm5405_vm13, %v5291_v37, %v5419_v50  ;;  %v2649_v60 = vmax.f32 %v2647_v16, %v2648_v39  ;;  %v2655_v43 = vrot.slane %v2654_v44, 2  ;;  %v2662_v54 = vrot.slane %v2661_v40, 2 }
 0x11e   :  { %v5293_v26 = vunpack.c.l.b16 %v15453_v45  ;;  %v5421_v62 = vsel %vm5407_vm14, %v5292_v46, %v5420_v59  ;;  %v5584_v63 = vsel %vm17067_vm7, %v15561_v48, %v5583_v31  ;;  %v2644_v52 = vmax.f32 %v2642_v32, %v2643_v56 }
 0x11f   :  { %5585 = vst [vmem:[#allocation2 + $0x1c] sm:$0x1] %v5584_v63  ;;  %v2650_v58 = vrot.slane %v2649_v60, 1  ;;  %v2656_v0 = vmax.f32 %v2654_v44, %v2655_v43  ;;  %v2663_v1 = vmax.f32 %v2661_v40, %v2662_v54  ;;  %v1237_v2 = vcombine.high %v17111_v18, %v17111_v18 }
 0x120   :  { %v5422_v3 = vsel %vm5409_vm0, %v5293_v26, %v5421_v62  ;;  %v17223_v23 = vsel %vm4374_vm9, %v2644_v52, -inf  ;;  %v1244_v4 = vrot.slane %v17111_v18, %v17092_v61  ;;  %v1112_v5 = vmax.f32 %v17108_v15, 0.0 }
 0x121   :  { %v5505_v6 = vpack.c.b16 %v5422_v3, %v5422_v3  ;;  %v2651_v7 = vmax.f32 %v2649_v60, %v2650_v58  ;;  %v2657_v8 = vrot.slane %v2656_v0, 1  ;;  %v2664_v27 = vrot.slane %v2663_v1, 1 }
 0x122   :  { %v1251_v9 = vrot.slane %v1237_v2, %v17092_v61  ;;  %v1252_v11 = vcombine.high %v1244_v4, %v1244_v4  ;;  %v2582_v12 = vsel %vm2581_vm8, %v1244_v4, -inf  ;;  %v1288_v13 = vcombine.high %v1112_v5, %v1112_v5 }
 0x123   :  { %v5581_v16 = vsel %vm17218_vm1, %v5505_v6, %v5580_v14  ;;  %v2658_v17 = vmax.f32 %v2656_v0, %v2657_v8  ;;  %v2665_v22 = vmax.f32 %v2663_v1, %v2664_v27  ;;  %v4379_v33 = vsel %vm4374_vm9, %v2651_v7, -inf }
 0x124   :  { %5582 = vst [vmem:[#allocation2 + $0x18] sm:$0xf] %v5581_v16  ;;  %v1253_v18 = vcombine.high %v1251_v9, %v1251_v9  ;;  %v2583_v15 = vrot.slane %v2582_v12, 4  ;;  %v2589_v20 = vsel %vm2581_vm8, %v1252_v11, -inf  ;;  %v2596_v21 = vsel %vm2581_vm8, %v1251_v9, -inf }
 0x125   :  { %v4382_v24 = vsel %vm4374_vm9, %v2658_v17, -inf  ;;  %v4385_v25 = vsel %vm4374_vm9, %v2665_v22, -inf  ;;  %v2590_v30 = vrot.slane %v2589_v20, 4  ;;  %v2597_v32 = vrot.slane %v2596_v21, 4 }
 0x126   :  { %v2584_v37 = vmax.f32 %v2582_v12, %v2583_v15  ;;  %v2603_v31 = vsel %vm2581_vm8, %v1253_v18, -inf  ;;  %v1295_v39 = vrot.slane %v1112_v5, %v17092_v61  ;;  %v1302_v44 = vrot.slane %v1288_v13, %v17092_v61  ;;  %v17247_v12 = vpop.f32.mrb[10].mxu1 }
 0x127   :  { %v2591_v40 = vmax.f32 %v2589_v20, %v2590_v30  ;;  %v2598_v45 = vmax.f32 %v2596_v21, %v2597_v32  ;;  %v2604_v46 = vrot.slane %v2603_v31, 4  ;;  %v17241_v48 = vmax.f32 %v17114_v19, 0.0 }
 0x128   :  { %v2585_v56 = vrot.slane %v2584_v37, 2  ;;  %v1303_v59 = vcombine.high %v1295_v39, %v1295_v39  ;;  %v1304_v60 = vcombine.high %v1302_v44, %v1302_v44  ;;  %v2666_v43 = vsel %vm2581_vm8, %v1295_v39, -inf }
 0x129   :  { %v2592_v54 = vrot.slane %v2591_v40, 2  ;;  %v2599_v26 = vrot.slane %v2598_v45, 2  ;;  %v2605_v62 = vmax.f32 %v2603_v31, %v2604_v46  ;;  %v2667_v63 = vrot.slane %v2666_v43, 4 }
 0x12a   :  { %v2586_v52 = vmax.f32 %v2584_v37, %v2585_v56  ;;  %v2673_v58 = vsel %vm2581_vm8, %v1303_v59, -inf  ;;  %v2680_v0 = vsel %vm2581_vm8, %v1302_v44, -inf  ;;  %v2687_v1 = vsel %vm2581_vm8, %v1304_v60, -inf }
 0x12b   :  { %v2593_v2 = vmax.f32 %v2591_v40, %v2592_v54  ;;  %v2600_v3 = vmax.f32 %v2598_v45, %v2599_v26  ;;  %v2606_v19 = vrot.slane %v2605_v62, 2  ;;  %v2668_v14 = vmax.f32 %v2666_v43, %v2667_v63 }
 0x12c   :  { %v2587_v4 = vrot.slane %v2586_v52, 1  ;;  %v2674_v5 = vrot.slane %v2673_v58, 4  ;;  %v2681_v6 = vrot.slane %v2680_v0, 4  ;;  %v2688_v7 = vrot.slane %v2687_v1, 4 }
 0x12d   :  { %v2594_v8 = vrot.slane %v2593_v2, 1  ;;  %v2601_v27 = vrot.slane %v2600_v3, 1  ;;  %v2607_v9 = vmax.f32 %v2605_v62, %v2606_v19  ;;  %v2669_v11 = vrot.slane %v2668_v14, 2  ;;  %v17254_v19 = vpop.f32.mrb[11].mxu1 }
 0x12e   :  { %v2588_v13 = vmax.f32 %v2586_v52, %v2587_v4  ;;  %v2675_v16 = vmax.f32 %v2673_v58, %v2674_v5  ;;  %v2682_v17 = vmax.f32 %v2680_v0, %v2681_v6  ;;  %v2689_v22 = vmax.f32 %v2687_v1, %v2688_v7 }
 0x12f   :  { %v2595_v18 = vmax.f32 %v2593_v2, %v2594_v8  ;;  %v2602_v15 = vmax.f32 %v2600_v3, %v2601_v27  ;;  %v2608_v20 = vrot.slane %v2607_v9, 1  ;;  %v2670_v21 = vmax.f32 %v2668_v14, %v2669_v11 }
 0x130   :  { %v4375_v30 = vsel %vm4374_vm9, %v2588_v13, -inf  ;;  %v2676_v32 = vrot.slane %v2675_v16, 2  ;;  %v2683_v37 = vrot.slane %v2682_v17, 2  ;;  %v2690_v31 = vrot.slane %v2689_v22, 2 }
 0x131   :  { %v2609_v39 = vmax.f32 %v2607_v9, %v2608_v20  ;;  %v4377_v44 = vmax.f32 %v4375_v30, %v17223_v23  ;;  %v4378_v40 = vsel %vm4374_vm9, %v2595_v18, -inf  ;;  %v4381_v45 = vsel %vm4374_vm9, %v2602_v15, -inf }
 0x132   :  { %v4380_v46 = vmax.f32 %v4378_v40, %v4379_v33  ;;  %v4383_v56 = vmax.f32 %v4381_v45, %v4382_v24  ;;  %v2671_v59 = vrot.slane %v2670_v21, 1  ;;  %v2677_v60 = vmax.f32 %v2675_v16, %v2676_v32 }
 0x133   :  { %v4384_v43 = vsel %vm4374_vm9, %v2609_v39, -inf  ;;  %v15431_v54 = vpack.c.bf16 %v4377_v44, %v4377_v44  ;;  %v2684_v26 = vmax.f32 %v2682_v17, %v2683_v37  ;;  %v2691_v62 = vmax.f32 %v2689_v22, %v2690_v31 }
 0x134   :  { %v4386_v63 = vmax.f32 %v4384_v43, %v4385_v25  ;;  %v15432_v52 = vpack.c.bf16 %v4380_v46, %v4380_v46  ;;  %v15433_v58 = vpack.c.bf16 %v4383_v56, %v4383_v56  ;;  %v2672_v0 = vmax.f32 %v2670_v21, %v2671_v59 }
 0x135   :  { %v5271_v1 = vunpack.c.l.b16 %v15431_v54  ;;  %v2678_v2 = vrot.slane %v2677_v60, 1  ;;  %v2685_v23 = vrot.slane %v2684_v26, 1  ;;  %v2692_v3 = vrot.slane %v2691_v62, 1 }
 0x136   :  { %v15434_v14 = vpack.c.bf16 %v4386_v63, %v4386_v63  ;;  %v5272_v33 = vunpack.c.l.b16 %v15432_v52  ;;  %v5273_v24 = vunpack.c.l.b16 %v15433_v58  ;;  %v17257_v4 = vsel %vm4374_vm9, %v2672_v0, -inf }
 0x137   :  { %v2679_v5 = vmax.f32 %v2677_v60, %v2678_v2  ;;  %v2686_v6 = vmax.f32 %v2684_v26, %v2685_v23  ;;  %v2693_v7 = vmax.f32 %v2691_v62, %v2692_v3  ;;  %v1254_v25 = vcombine.high %v17241_v48, %v17241_v48 }
 0x138   :  { %v5274_v8 = vunpack.c.l.b16 %v15434_v14  ;;  %v5400_v27 = vsel %vm5399_vm10, %v5272_v33, %v5271_v1  ;;  %v1261_v9 = vrot.slane %v17241_v48, %v17092_v61  ;;  %v980_v11 = vmul.f32 %v17128_v28, %v17080_v51 }
 0x139   :  { %v5402_v13 = vsel %vm5401_vm11, %v5273_v24, %v5400_v27  ;;  %v17268_v16 = vsel %vm4374_vm9, %v2679_v5, -inf  ;;  %v17271_v17 = vsel %vm4374_vm9, %v2686_v6, -inf  ;;  %v17274_v22 = vsel %vm4374_vm9, %v2693_v7, -inf }
 0x13a   :  { %v1268_v18 = vrot.slane %v1254_v25, %v17092_v61  ;;  %v1269_v15 = vcombine.high %v1261_v9, %v1261_v9  ;;  %v2610_v20 = vsel %vm2581_vm8, %v1261_v9, -inf  ;;  %v17279_v48 = vsel %vm5403_vm12, %v5274_v8, %v5402_v13 }
 0x13b   :  { %v2611_v28 = vrot.slane %v2610_v20, 4  ;;  %v1051_v21 = vadd.f32 %v17087_v55, %v980_v11  ;;  %v988_v30 = vmul.f32 %v17130_v29, %v17080_v51  ;;  %v978_v32 = vmul.f32 %v17080_v51, %v17136_v34 }
 0x13c   :  { %v1270_v37 = vcombine.high %v1268_v18, %v1268_v18  ;;  %v2617_v31 = vsel %vm2581_vm8, %v1269_v15, -inf  ;;  %v2624_v39 = vsel %vm2581_vm8, %v1268_v18, -inf  ;;  %v986_v44 = vmul.f32 %v17080_v51, %v17138_v35 }
 0x13d   :  { %v2612_v40 = vmax.f32 %v2610_v20, %v2611_v28  ;;  %v2618_v45 = vrot.slane %v2617_v31, 4  ;;  %v2625_v46 = vrot.slane %v2624_v39, 4  ;;  %v1115_v56 = vmax.f32 %v1051_v21, 0.0 }
 0x13e   :  { %v2631_v59 = vsel %vm2581_vm8, %v1270_v37, -inf  ;;  %v1059_v60 = vadd.f32 %v17087_v55, %v988_v30  ;;  %v1049_v29 = vadd.f32 %v17087_v55, %v978_v32  ;;  %v17294_v34 = vadd.f32 %v17087_v55, %v986_v44  ;;  %v17309_v44 = vpop.f32.mrb[12].mxu1 }
 0x13f   :  { %v2613_v43 = vrot.slane %v2612_v40, 2  ;;  %v2619_v54 = vmax.f32 %v2617_v31, %v2618_v45  ;;  %v2626_v26 = vmax.f32 %v2624_v39, %v2625_v46  ;;  %v2632_v62 = vrot.slane %v2631_v59, 4 }
 0x140   :  { %v1339_v63 = vcombine.high %v1115_v56, %v1115_v56  ;;  %v1346_v35 = vrot.slane %v1115_v56, %v17092_v61  ;;  %v17297_v52 = vmax.f32 %v1059_v60, 0.0  ;;  %v17299_v58 = vmax.f32 %v1049_v29, 0.0 }
 0x141   :  { %v2614_v0 = vmax.f32 %v2612_v40, %v2613_v43  ;;  %v2620_v1 = vrot.slane %v2619_v54, 2  ;;  %v2627_v2 = vrot.slane %v2626_v26, 2  ;;  %v2633_v23 = vmax.f32 %v2631_v59, %v2632_v62 }
 0x142   :  { %v1353_v3 = vrot.slane %v1339_v63, %v17092_v61  ;;  %v1354_v14 = vcombine.high %v1346_v35, %v1346_v35  ;;  %v2750_v55 = vsel %vm2581_vm8, %v1346_v35, -inf  ;;  %v1475_v33 = vcombine.high %v17297_v52, %v17297_v52 }
 0x143   :  { %v2615_v24 = vrot.slane %v2614_v0, 1  ;;  %v2621_v5 = vmax.f32 %v2619_v54, %v2620_v1  ;;  %v2628_v6 = vmax.f32 %v2626_v26, %v2627_v2  ;;  %v2634_v7 = vrot.slane %v2633_v23, 2 }
 0x144   :  { %v1355_v25 = vcombine.high %v1353_v3, %v1353_v3  ;;  %v2751_v8 = vrot.slane %v2750_v55, 4  ;;  %v2757_v27 = vsel %vm2581_vm8, %v1354_v14, -inf  ;;  %v2764_v9 = vsel %vm2581_vm8, %v1353_v3, -inf }
 0x145   :  { %v2616_v11 = vmax.f32 %v2614_v0, %v2615_v24  ;;  %v2622_v13 = vrot.slane %v2621_v5, 1  ;;  %v2629_v18 = vrot.slane %v2628_v6, 1  ;;  %v2635_v15 = vmax.f32 %v2633_v23, %v2634_v7 }
 0x146   :  { %v2752_v20 = vmax.f32 %v2750_v55, %v2751_v8  ;;  %v2758_v28 = vrot.slane %v2757_v27, 4  ;;  %v2765_v21 = vrot.slane %v2764_v9, 4  ;;  %v2771_v30 = vsel %vm2581_vm8, %v1355_v25, -inf  ;;  %v5571_v55 = vld [vmem:[#allocation2 + $0xc] sm:$0x1] }
 0x147   :  { %v2623_v32 = vmax.f32 %v2621_v5, %v2622_v13  ;;  %v2630_v37 = vmax.f32 %v2628_v6, %v2629_v18  ;;  %v2636_v31 = vrot.slane %v2635_v15, 1  ;;  %v4387_v39 = vsel %vm4374_vm9, %v2616_v11, -inf }
 0x148   :  { %v4389_v40 = vmax.f32 %v4387_v39, %v17257_v4  ;;  %v2753_v45 = vrot.slane %v2752_v20, 2  ;;  %v2759_v46 = vmax.f32 %v2757_v27, %v2758_v28  ;;  %v2766_v56 = vmax.f32 %v2764_v9, %v2765_v21  ;;  %v17320_v27 = vpop.f32.mrb[13].mxu1 }
 0x149   :  { %v2637_v59 = vmax.f32 %v2635_v15, %v2636_v31  ;;  %v4390_v60 = vsel %vm4374_vm9, %v2623_v32, -inf  ;;  %v4393_v29 = vsel %vm4374_vm9, %v2630_v37, -inf  ;;  %v2772_v43 = vrot.slane %v2771_v30, 4 }
 0x14a   :  { %v4392_v54 = vmax.f32 %v4390_v60, %v17268_v16  ;;  %v4395_v26 = vmax.f32 %v4393_v29, %v17271_v17  ;;  %v15435_v62 = vpack.c.bf16 %v4389_v40, %v4389_v40  ;;  %v2754_v63 = vmax.f32 %v2752_v20, %v2753_v45 }
 0x14b   :  { %v4396_v35 = vsel %vm4374_vm9, %v2637_v59, -inf  ;;  %v2760_v0 = vrot.slane %v2759_v46, 2  ;;  %v2767_v1 = vrot.slane %v2766_v56, 2  ;;  %v2773_v4 = vmax.f32 %v2771_v30, %v2772_v43 }
 0x14c   :  { %v4398_v2 = vmax.f32 %v4396_v35, %v17274_v22  ;;  %v15436_v23 = vpack.c.bf16 %v4392_v54, %v4392_v54  ;;  %v15437_v3 = vpack.c.bf16 %v4395_v26, %v4395_v26  ;;  %v5275_v14 = vunpack.c.l.b16 %v15435_v62 }
 0x14d   :  { %v2755_v24 = vrot.slane %v2754_v63, 1  ;;  %v2761_v5 = vmax.f32 %v2759_v46, %v2760_v0  ;;  %v2768_v6 = vmax.f32 %v2766_v56, %v2767_v1  ;;  %v2774_v7 = vrot.slane %v2773_v4, 2 }
 0x14e   :  { %v5276_v16 = vunpack.c.l.b16 %v15436_v23  ;;  %v5277_v25 = vunpack.c.l.b16 %v15437_v3  ;;  %v5406_v17 = vsel %vm5405_vm13, %v5275_v14, %v17279_v48  ;;  %v15559_v8 = vpack.c.bf16 %v4398_v2, %v4398_v2  ;;  %v5568_v48 = vld [vmem:[#allocation2 + $0x8] sm:$0xf] }
 0x14f   :  { %v2756_v9 = vmax.f32 %v2754_v63, %v2755_v24  ;;  %v2762_v11 = vrot.slane %v2761_v5, 1  ;;  %v2769_v13 = vrot.slane %v2768_v6, 1  ;;  %v2775_v22 = vmax.f32 %v2773_v4, %v2774_v7 }
 0x150   :  { %v5408_v18 = vsel %vm5407_vm14, %v5276_v16, %v5406_v17  ;;  %v5572_v15 = vsel %vm17067_vm7, %v15559_v8, %v5571_v55  ;;  %v1482_v20 = vrot.slane %v17297_v52, %v17092_v61  ;;  %v1489_v28 = vrot.slane %v1475_v33, %v17092_v61 }
 0x151   :  { %v5410_v21 = vsel %vm5409_vm0, %v5277_v25, %v5408_v18  ;;  %5573 = vst [vmem:[#allocation2 + $0xc] sm:$0x1] %v5572_v15  ;;  %v2763_v30 = vmax.f32 %v2761_v5, %v2762_v11  ;;  %v2770_v32 = vmax.f32 %v2768_v6, %v2769_v13  ;;  %v2776_v37 = vrot.slane %v2775_v22, 1 }
 0x152   :  { %v5501_v31 = vpack.c.b16 %v5410_v21, %v5410_v21  ;;  %v17330_v39 = vsel %vm4374_vm9, %v2756_v9, -inf  ;;  %v1490_v40 = vcombine.high %v1482_v20, %v1482_v20  ;;  %v1491_v45 = vcombine.high %v1489_v28, %v1489_v28 }
 0x153   :  { %v2777_v46 = vmax.f32 %v2775_v22, %v2776_v37  ;;  %v17333_v56 = vsel %vm4374_vm9, %v2763_v30, -inf  ;;  %v17336_v52 = vsel %vm4374_vm9, %v2770_v32, -inf  ;;  %v2974_v33 = vsel %vm2581_vm8, %v1482_v20, -inf }
 0x154   :  { %v5569_v59 = vsel %vm17218_vm1, %v5501_v31, %v5568_v48  ;;  %v2975_v60 = vrot.slane %v2974_v33, 4  ;;  %v2981_v29 = vsel %vm2581_vm8, %v1490_v40, -inf  ;;  %v2988_v43 = vsel %vm2581_vm8, %v1489_v28, -inf }
 0x155   :  { %5570 = vst [vmem:[#allocation2 + $0x8] sm:$0xf] %v5569_v59  ;;  %v17344_v54 = vsel %vm4374_vm9, %v2777_v46, -inf  ;;  %v2982_v26 = vrot.slane %v2981_v29, 4  ;;  %v2989_v62 = vrot.slane %v2988_v43, 4  ;;  %v2995_v63 = vsel %vm2581_vm8, %v1491_v45, -inf }
 0x156   :  { %v2976_v35 = vmax.f32 %v2974_v33, %v2975_v60  ;;  %v2996_v0 = vrot.slane %v2995_v63, 4  ;;  %v1305_v1 = vcombine.high %v17299_v58, %v17299_v58  ;;  %v1312_v4 = vrot.slane %v17299_v58, %v17092_v61 }
 0x157   :  { %v2983_v2 = vmax.f32 %v2981_v29, %v2982_v26  ;;  %v2990_v23 = vmax.f32 %v2988_v43, %v2989_v62  ;;  %v1121_v3 = vmax.f32 %v17294_v34, 0.0  ;;  %v989_v14 = vmul.f32 %v17142_v41, %v17080_v51  ;;  %v17358_v41 = vpop.f32.mrb[14].mxu1 }
 0x158   :  { %v2977_v55 = vrot.slane %v2976_v35, 2  ;;  %v2997_v24 = vmax.f32 %v2995_v63, %v2996_v0  ;;  %v1319_v5 = vrot.slane %v1305_v1, %v17092_v61  ;;  %v1320_v6 = vcombine.high %v1312_v4, %v1312_v4 }
 0x159   :  { %v2984_v7 = vrot.slane %v2983_v2, 2  ;;  %v2991_v16 = vrot.slane %v2990_v23, 2  ;;  %v2694_v25 = vsel %vm2581_vm8, %v1312_v4, -inf  ;;  %v1441_v17 = vcombine.high %v1121_v3, %v1121_v3 }
 0x15a   :  { %v2978_v8 = vmax.f32 %v2976_v35, %v2977_v55  ;;  %v2998_v9 = vrot.slane %v2997_v24, 2  ;;  %v1321_v58 = vcombine.high %v1319_v5, %v1319_v5  ;;  %v2695_v11 = vrot.slane %v2694_v25, 4 }
 0x15b   :  { %v2985_v13 = vmax.f32 %v2983_v2, %v2984_v7  ;;  %v2992_v22 = vmax.f32 %v2990_v23, %v2991_v16  ;;  %v2701_v34 = vsel %vm2581_vm8, %v1320_v6, -inf  ;;  %v2708_v51 = vsel %vm2581_vm8, %v1319_v5, -inf  ;;  %v17378_v7 = vld [vmem:[%s21029_s3] ss:$0 sm:$0xff] }
 0x15c   :  { %v2979_v18 = vrot.slane %v2978_v8, 1  ;;  %v2999_v15 = vmax.f32 %v2997_v24, %v2998_v9  ;;  %v2696_v20 = vmax.f32 %v2694_v25, %v2695_v11  ;;  %v2702_v28 = vrot.slane %v2701_v34, 4 }
 0x15d   :  { %v2986_v21 = vrot.slane %v2985_v13, 1  ;;  %v2993_v48 = vrot.slane %v2992_v22, 1  ;;  %v2709_v30 = vrot.slane %v2708_v51, 4  ;;  %v2715_v32 = vsel %vm2581_vm8, %v1321_v58, -inf }
 0x15e   :  { %v2980_v37 = vmax.f32 %v2978_v8, %v2979_v18  ;;  %v3000_v31 = vrot.slane %v2999_v15, 1  ;;  %v2697_v40 = vrot.slane %v2696_v20, 2  ;;  %v2703_v45 = vmax.f32 %v2701_v34, %v2702_v28 }
 0x15f   :  { %v2987_v46 = vmax.f32 %v2985_v13, %v2986_v21  ;;  %v2994_v33 = vmax.f32 %v2992_v22, %v2993_v48  ;;  %v2710_v59 = vmax.f32 %v2708_v51, %v2709_v30  ;;  %v2716_v60 = vrot.slane %v2715_v32, 4 }
 0x160   :  { %v3001_v29 = vmax.f32 %v2999_v15, %v3000_v31  ;;  %v17362_v43 = vsel %vm4374_vm9, %v2980_v37, -inf  ;;  %v2698_v26 = vmax.f32 %v2696_v20, %v2697_v40  ;;  %v2704_v62 = vrot.slane %v2703_v45, 2 }
 0x161   :  { %v17365_v63 = vsel %vm4374_vm9, %v2987_v46, -inf  ;;  %v17368_v35 = vsel %vm4374_vm9, %v2994_v33, -inf  ;;  %v2711_v0 = vrot.slane %v2710_v59, 2  ;;  %v2717_v1 = vmax.f32 %v2715_v32, %v2716_v60  ;;  %v17393_v33 = vpop.f32.mrb[15].mxu1 }
 0x162   :  { %v17371_v4 = vsel %vm4374_vm9, %v3001_v29, -inf  ;;  %v2699_v2 = vrot.slane %v2698_v26, 1  ;;  %v2705_v23 = vmax.f32 %v2703_v45, %v2704_v62  ;;  %v1448_v55 = vrot.slane %v1121_v3, %v17092_v61 }
 0x163   :  { %v2712_v24 = vmax.f32 %v2710_v59, %v2711_v0  ;;  %v2718_v5 = vrot.slane %v2717_v1, 2  ;;  %v1455_v6 = vrot.slane %v1441_v17, %v17092_v61  ;;  %v1060_v16 = vadd.f32 %v17378_v7, %v989_v14  ;;  %v16429_v14 = vld [vmem:[%s21030_s4 + $0x10] sm:$0xff]  }
 0x164   :  { %v2700_v25 = vmax.f32 %v2698_v26, %v2699_v2  ;;  %v2706_v8 = vrot.slane %v2705_v23, 1  ;;  %v1456_v9 = vcombine.high %v1448_v55, %v1448_v55  ;;  %v2918_v58 = vsel %vm2581_vm8, %v1448_v55, -inf  ;;  %15884 = vmatprep.subr.bf16.mxu1 %v16429_v14 }
 0x165   :  { %v2713_v11 = vrot.slane %v2712_v24, 1  ;;  %v2719_v13 = vmax.f32 %v2717_v1, %v2718_v5  ;;  %v1457_v22 = vcombine.high %v1455_v6, %v1455_v6  ;;  %v2919_v3 = vrot.slane %v2918_v58, 4  ;;  %15885 = vmatpush3.bf16.msra.mxu1 %v16429_v14 }
 0x166   :  { %v2707_v34 = vmax.f32 %v2705_v23, %v2706_v8  ;;  %v4399_v51 = vsel %vm4374_vm9, %v2700_v25, -inf  ;;  %v2925_v17 = vsel %vm2581_vm8, %v1456_v9, -inf  ;;  %v2932_v18 = vsel %vm2581_vm8, %v1455_v6, -inf }
 0x167   :  { %v2714_v15 = vmax.f32 %v2712_v24, %v2713_v11  ;;  %v2720_v20 = vrot.slane %v2719_v13, 1  ;;  %v4401_v28 = vmax.f32 %v4399_v51, %v17330_v39  ;;  %v2920_v21 = vmax.f32 %v2918_v58, %v2919_v3  ;;  %v146_v51 = vld [vmem:[#allocation2 + $0x24] sm:$0x1] }
 0x168   :  { %v4402_v48 = vsel %vm4374_vm9, %v2707_v34, -inf  ;;  %v2926_v30 = vrot.slane %v2925_v17, 4  ;;  %v2933_v32 = vrot.slane %v2932_v18, 4  ;;  %v2939_v37 = vsel %vm2581_vm8, %v1457_v22, -inf  ;;  %v84_v34 = vld [vmem:[#allocation2 + $0x20] sm:$0x1] }
 0x169   :  { %v2721_v31 = vmax.f32 %v2719_v13, %v2720_v20  ;;  %v4404_v40 = vmax.f32 %v4402_v48, %v17333_v56  ;;  %v4405_v45 = vsel %vm4374_vm9, %v2714_v15, -inf  ;;  %v15439_v46 = vpack.c.bf16 %v4401_v28, %v4401_v28 }
 0x16a   :  { %v4407_v59 = vmax.f32 %v4405_v45, %v17336_v52  ;;  %v2921_v39 = vrot.slane %v2920_v21, 2  ;;  %v2927_v60 = vmax.f32 %v2925_v17, %v2926_v30  ;;  %v2934_v29 = vmax.f32 %v2932_v18, %v2933_v32 }
 0x16b   :  { %v4408_v26 = vsel %vm4374_vm9, %v2721_v31, -inf  ;;  %v15440_v62 = vpack.c.bf16 %v4404_v40, %v4404_v40  ;;  %v5279_v0 = vunpack.c.l.b16 %v15439_v46  ;;  %v2940_v1 = vrot.slane %v2939_v37, 4 }
 0x16c   :  { %v4410_v2 = vmax.f32 %v4408_v26, %v17344_v54  ;;  %v15441_v23 = vpack.c.bf16 %v4407_v59, %v4407_v59  ;;  %v2922_v56 = vmax.f32 %v2920_v21, %v2921_v39  ;;  %v2928_v55 = vrot.slane %v2927_v60, 2 }
 0x16d   :  { %v5280_v24 = vunpack.c.l.b16 %v15440_v62  ;;  %v2935_v5 = vrot.slane %v2934_v29, 2  ;;  %v2941_v6 = vmax.f32 %v2939_v37, %v2940_v1  ;;  %v1124_v25 = vmax.f32 %v1060_v16, 0.0 }
 0x16e   :  { %v15442_v8 = vpack.c.bf16 %v4410_v2, %v4410_v2  ;;  %v5281_v9 = vunpack.c.l.b16 %v15441_v23  ;;  %v2923_v52 = vrot.slane %v2922_v56, 1  ;;  %v2929_v58 = vmax.f32 %v2927_v60, %v2928_v55 }
 0x16f   :  { %v5411_v11 = vsel %vm5399_vm10, %v5280_v24, %v5279_v0  ;;  %v2936_v13 = vmax.f32 %v2934_v29, %v2935_v5  ;;  %v2942_v22 = vrot.slane %v2941_v6, 2  ;;  %v1492_v3 = vcombine.high %v1124_v25, %v1124_v25 }
 0x170   :  { %v17399_v17 = vunpack.c.l.b16 %v15442_v8  ;;  %v17402_v54 = vsel %vm5401_vm11, %v5281_v9, %v5411_v11  ;;  %v2924_v18 = vmax.f32 %v2922_v56, %v2923_v52  ;;  %v2930_v14 = vrot.slane %v2929_v58, 1  ;;  %v17427_v11 = vld [vmem:[%s21028_s2] ss:$0 sm:$0xff] }
 0x171   :  { %v2937_v15 = vrot.slane %v2936_v13, 1  ;;  %v2943_v16 = vmax.f32 %v2941_v6, %v2942_v22  ;;  %v1499_v20 = vrot.slane %v1124_v25, %v17092_v61  ;;  %v1506_v28 = vrot.slane %v1492_v3, %v17092_v61  ;;  %v17420_v6 = vpop.f32.mrb[16].mxu1 }
 0x172   :  { %v2931_v21 = vmax.f32 %v2929_v58, %v2930_v14  ;;  %v4447_v48 = vsel %vm4374_vm9, %v2924_v18, -inf  ;;  %v85_v30 = vsel %vm17067_vm7, 0, %v84_v34  ;;  %v147_v32 = vsel %vm17059_vm5, 0, %v146_v51 }
 0x173   :  { %v2938_v37 = vmax.f32 %v2936_v13, %v2937_v15  ;;  %v2944_v31 = vrot.slane %v2943_v16, 1  ;;  %v4449_v40 = vmax.f32 %v4447_v48, %v17362_v43  ;;  %v1507_v45 = vcombine.high %v1499_v20, %v1499_v20  ;;  %86 = vst [vmem:[#allocation2 + $0x20] sm:$0x1] %v85_v30  ;;  %148 = vst [vmem:[#allocation2 + $0x24] sm:$0x1] %v147_v32 }
 0x174   :  { %v4450_v46 = vsel %vm4374_vm9, %v2931_v21, -inf  ;;  %v1508_v59 = vcombine.high %v1506_v28, %v1506_v28  ;;  %v3002_v39 = vsel %vm2581_vm8, %v1499_v20, -inf  ;;  %v3016_v60 = vsel %vm2581_vm8, %v1506_v28, -inf }
 0x175   :  { %v2945_v29 = vmax.f32 %v2943_v16, %v2944_v31  ;;  %v4452_v26 = vmax.f32 %v4450_v46, %v17365_v63  ;;  %v4453_v62 = vsel %vm4374_vm9, %v2938_v37, -inf  ;;  %v15455_v0 = vpack.c.bf16 %v4449_v40, %v4449_v40  ;;  %v78_v16 = vld [vmem:[#allocation2 + $0x10] sm:$0x1]  ;;  %v140_v31 = vld [vmem:[#allocation2 + $0x14] sm:$0x1] }
 0x176   :  { %v4455_v1 = vmax.f32 %v4453_v62, %v17368_v35  ;;  %v3003_v2 = vrot.slane %v3002_v39, 4  ;;  %v3009_v43 = vsel %vm2581_vm8, %v1507_v45, -inf  ;;  %v3017_v23 = vrot.slane %v3016_v60, 4 }
 0x177   :  { %v4456_v56 = vsel %vm4374_vm9, %v2945_v29, -inf  ;;  %v15456_v55 = vpack.c.bf16 %v4452_v26, %v4452_v26  ;;  %v5295_v24 = vunpack.c.l.b16 %v15455_v0  ;;  %v3010_v5 = vrot.slane %v3009_v43, 4 }
 0x178   :  { %v4458_v25 = vmax.f32 %v4456_v56, %v17371_v4  ;;  %v15457_v8 = vpack.c.bf16 %v4455_v1, %v4455_v1  ;;  %v3004_v63 = vmax.f32 %v3002_v39, %v3003_v2  ;;  %v3018_v9 = vmax.f32 %v3016_v60, %v3017_v23  ;;  %v17445_v2 = vpop.f32.mrb[17].mxu1 }
 0x179   :  { %v5296_v52 = vunpack.c.l.b16 %v15456_v55  ;;  %v3011_v58 = vmax.f32 %v3009_v43, %v3010_v5  ;;  %v3023_v35 = vsel %vm2581_vm8, %v1508_v59, -inf  ;;  %v987_v13 = vmul.f32 %v17427_v11, %v17146_v47 }
 0x17a   :  { %v15458_v22 = vpack.c.bf16 %v4458_v25, %v4458_v25  ;;  %v5297_v3 = vunpack.c.l.b16 %v15457_v8  ;;  %v3005_v34 = vrot.slane %v3004_v63, 2  ;;  %v3019_v51 = vrot.slane %v3018_v9, 2 }
 0x17b   :  { %v5423_v4 = vsel %vm5399_vm10, %v5296_v52, %v5295_v24  ;;  %v3012_v18 = vrot.slane %v3011_v58, 2  ;;  %v3024_v14 = vrot.slane %v3023_v35, 4  ;;  %v1058_v15 = vadd.f32 %v17378_v7, %v987_v13 }
 0x17c   :  { %v5298_v20 = vunpack.c.l.b16 %v15458_v22  ;;  %v5424_v28 = vsel %vm5401_vm11, %v5297_v3, %v5423_v4  ;;  %v3006_v21 = vmax.f32 %v3004_v63, %v3005_v34  ;;  %v3020_v48 = vmax.f32 %v3018_v9, %v3019_v51 }
 0x17d   :  { %v3013_v30 = vmax.f32 %v3011_v58, %v3012_v18  ;;  %v3025_v32 = vmax.f32 %v3023_v35, %v3024_v14  ;;  %v1122_v37 = vmax.f32 %v1058_v15, 0.0  ;;  %v981_v47 = vmul.f32 %v17427_v11, %v17153_v49 }
 0x17e   :  { %v3007_v40 = vrot.slane %v3006_v21, 1  ;;  %v3021_v45 = vrot.slane %v3020_v48, 1  ;;  %v17437_v46 = vsel %vm5403_vm12, %v5298_v20, %v5424_v28  ;;  %v79_v59 = vsel %vm17067_vm7, 0, %v78_v16 }
 0x17f   :  { %v3014_v39 = vrot.slane %v3013_v30, 1  ;;  %v3026_v60 = vrot.slane %v3025_v32, 2  ;;  %v1458_v29 = vcombine.high %v1122_v37, %v1122_v37  ;;  %v1465_v26 = vrot.slane %v1122_v37, %v17092_v61  ;;  %80 = vst [vmem:[#allocation2 + $0x10] sm:$0x1] %v79_v59 }
 0x180   :  { %v3008_v62 = vmax.f32 %v3006_v21, %v3007_v40  ;;  %v3022_v0 = vmax.f32 %v3020_v48, %v3021_v45  ;;  %v1052_v1 = vadd.f32 %v17378_v7, %v981_v47  ;;  %v141_v49 = vsel %vm17059_vm5, 0, %v140_v31 }
 0x181   :  { %v3015_v43 = vmax.f32 %v3013_v30, %v3014_v39  ;;  %v3027_v23 = vmax.f32 %v3025_v32, %v3026_v60  ;;  %v1472_v56 = vrot.slane %v1458_v29, %v17092_v61  ;;  %v1473_v55 = vcombine.high %v1465_v26, %v1465_v26  ;;  %142 = vst [vmem:[#allocation2 + $0x14] sm:$0x1] %v141_v49 }
 0x182   :  { %v4460_v24 = vsel %vm4374_vm9, %v3008_v62, -inf  ;;  %v17450_v5 = vsel %vm4374_vm9, %v3022_v0, -inf  ;;  %v2946_v25 = vsel %vm2581_vm8, %v1465_v26, -inf  ;;  %v1116_v8 = vmax.f32 %v1052_v1, 0.0 }
 0x183   :  { %v3028_v63 = vrot.slane %v3027_v23, 1  ;;  %v4463_v9 = vsel %vm4374_vm9, %v3015_v43, -inf  ;;  %v1474_v52 = vcombine.high %v1472_v56, %v1472_v56  ;;  %v2947_v58 = vrot.slane %v2946_v25, 4 }
 0x184   :  { %v2953_v35 = vsel %vm2581_vm8, %v1473_v55, -inf  ;;  %v2960_v13 = vsel %vm2581_vm8, %v1472_v56, -inf  ;;  %v1356_v22 = vcombine.high %v1116_v8, %v1116_v8  ;;  %v1363_v3 = vrot.slane %v1116_v8, %v17092_v61 }
 0x185   :  { %v3029_v34 = vmax.f32 %v3027_v23, %v3028_v63  ;;  %v2948_v51 = vmax.f32 %v2946_v25, %v2947_v58  ;;  %v2954_v4 = vrot.slane %v2953_v35, 4  ;;  %v2961_v18 = vrot.slane %v2960_v13, 4  ;;  %v17464_v23 = vpop.f32.mrb[18].mxu1 }
 0x186   :  { %v2967_v14 = vsel %vm2581_vm8, %v1474_v52, -inf  ;;  %v1370_v15 = vrot.slane %v1356_v22, %v17092_v61  ;;  %v1371_v16 = vcombine.high %v1363_v3, %v1363_v3  ;;  %v2778_v20 = vsel %vm2581_vm8, %v1363_v3, -inf }
 0x187   :  { %v4469_v28 = vsel %vm4374_vm9, %v3029_v34, -inf  ;;  %v2949_v21 = vrot.slane %v2948_v51, 2  ;;  %v2955_v48 = vmax.f32 %v2953_v35, %v2954_v4  ;;  %v2962_v30 = vmax.f32 %v2960_v13, %v2961_v18 }
 0x188   :  { %v2968_v32 = vrot.slane %v2967_v14, 4  ;;  %v1372_v37 = vcombine.high %v1370_v15, %v1370_v15  ;;  %v2779_v47 = vrot.slane %v2778_v20, 4  ;;  %v2785_v31 = vsel %vm2581_vm8, %v1371_v16, -inf }
 0x189   :  { %v2950_v40 = vmax.f32 %v2948_v51, %v2949_v21  ;;  %v2956_v45 = vrot.slane %v2955_v48, 2  ;;  %v2963_v59 = vrot.slane %v2962_v30, 2  ;;  %v2786_v39 = vrot.slane %v2785_v31, 4 }
 0x18a   :  { %v2969_v60 = vmax.f32 %v2967_v14, %v2968_v32  ;;  %v2780_v29 = vmax.f32 %v2778_v20, %v2779_v47  ;;  %v2792_v26 = vsel %vm2581_vm8, %v1370_v15, -inf  ;;  %v2799_v62 = vsel %vm2581_vm8, %v1372_v37, -inf }
 0x18b   :  { %v2951_v0 = vrot.slane %v2950_v40, 1  ;;  %v2957_v1 = vmax.f32 %v2955_v48, %v2956_v45  ;;  %v2964_v49 = vmax.f32 %v2962_v30, %v2963_v59  ;;  %v2787_v43 = vmax.f32 %v2785_v31, %v2786_v39 }
 0x18c   :  { %v2970_v56 = vrot.slane %v2969_v60, 2  ;;  %v2781_v55 = vrot.slane %v2780_v29, 2  ;;  %v2793_v25 = vrot.slane %v2792_v26, 4  ;;  %v2800_v8 = vrot.slane %v2799_v62, 4 }
 0x18d   :  { %v2952_v63 = vmax.f32 %v2950_v40, %v2951_v0  ;;  %v2958_v52 = vrot.slane %v2957_v1, 1  ;;  %v2965_v58 = vrot.slane %v2964_v49, 1  ;;  %v2788_v35 = vrot.slane %v2787_v43, 2 }
 0x18e   :  { %v2971_v13 = vmax.f32 %v2969_v60, %v2970_v56  ;;  %v2782_v22 = vmax.f32 %v2780_v29, %v2781_v55  ;;  %v2794_v3 = vmax.f32 %v2792_v26, %v2793_v25  ;;  %v2801_v34 = vmax.f32 %v2799_v62, %v2800_v8  ;;  %v5589_v25 = vld [vmem:[#allocation2 + $0x24] sm:$0x1] }
 0x18f   :  { %v2959_v51 = vmax.f32 %v2957_v1, %v2958_v52  ;;  %v2966_v4 = vmax.f32 %v2964_v49, %v2965_v58  ;;  %v4459_v18 = vsel %vm4374_vm9, %v2952_v63, -inf  ;;  %v2789_v14 = vmax.f32 %v2787_v43, %v2788_v35 }
 0x190   :  { %v2972_v15 = vrot.slane %v2971_v13, 1  ;;  %v4461_v16 = vmax.f32 %v4459_v18, %v4460_v24  ;;  %v2783_v20 = vrot.slane %v2782_v22, 1  ;;  %v2795_v21 = vrot.slane %v2794_v3, 2 }
 0x191   :  { %v4462_v48 = vsel %vm4374_vm9, %v2959_v51, -inf  ;;  %v4465_v30 = vsel %vm4374_vm9, %v2966_v4, -inf  ;;  %v2790_v32 = vrot.slane %v2789_v14, 1  ;;  %v2802_v37 = vrot.slane %v2801_v34, 2  ;;  %v5586_v4 = vld [vmem:[#allocation2 + $0x20] sm:$0xf] }
 0x192   :  { %v2973_v47 = vmax.f32 %v2971_v13, %v2972_v15  ;;  %v4464_v31 = vmax.f32 %v4462_v48, %v4463_v9  ;;  %v4467_v40 = vmax.f32 %v4465_v30, %v17450_v5  ;;  %v15459_v45 = vpack.c.bf16 %v4461_v16, %v4461_v16  ;;  %v17503_v15 = vpop.f32.mrb[19].mxu1 }
 0x193   :  { %v2784_v59 = vmax.f32 %v2782_v22, %v2783_v20  ;;  %v2791_v39 = vmax.f32 %v2789_v14, %v2790_v32  ;;  %v2796_v60 = vmax.f32 %v2794_v3, %v2795_v21  ;;  %v2803_v29 = vmax.f32 %v2801_v34, %v2802_v37  ;;  %v87_v3 = vld [vmem:[#allocation2 + $0x28] sm:$0x1]  ;;  %v149_v34 = vld [vmem:[#allocation2 + $0x2c] sm:$0x1] }
 0x194   :  { %v4468_v26 = vsel %vm4374_vm9, %v2973_v47, -inf  ;;  %v15460_v24 = vpack.c.bf16 %v4464_v31, %v4464_v31  ;;  %v15461_v62 = vpack.c.bf16 %v4467_v40, %v4467_v40  ;;  %v5299_v0 = vunpack.c.l.b16 %v15459_v45 }
 0x195   :  { %v4470_v1 = vmax.f32 %v4468_v26, %v4469_v28  ;;  %v2797_v49 = vrot.slane %v2796_v60, 1  ;;  %v2804_v43 = vrot.slane %v2803_v29, 1  ;;  %v17472_v56 = vsel %vm4374_vm9, %v2784_v59, -inf }
 0x196   :  { %v5300_v55 = vunpack.c.l.b16 %v15460_v24  ;;  %v5301_v9 = vunpack.c.l.b16 %v15461_v62  ;;  %v5426_v5 = vsel %vm5405_vm13, %v5299_v0, %v17437_v46  ;;  %v17477_v8 = vsel %vm4374_vm9, %v2791_v39, -inf }
 0x197   :  { %v15562_v63 = vpack.c.bf16 %v4470_v1, %v4470_v1  ;;  %v2798_v52 = vmax.f32 %v2796_v60, %v2797_v49  ;;  %v2805_v58 = vmax.f32 %v2803_v29, %v2804_v43  ;;  %v979_v28 = vmul.f32 %v17427_v11, %v17169_v10 }
 0x198   :  { %v5427_v35 = vsel %vm5407_vm14, %v5300_v55, %v5426_v5  ;;  %v17485_v13 = vsel %vm5403_vm12, %v17399_v17, %v17402_v54  ;;  %v992_v46 = vmul.f32 %v17427_v11, %v17205_v36  ;;  %v990_v22 = vmul.f32 %v17427_v11, %v17207_v57 }
 0x199   :  { %v5428_v51 = vsel %vm5409_vm0, %v5301_v9, %v5427_v35  ;;  %v5590_v10 = vsel %vm17067_vm7, %v15562_v63, %v5589_v25  ;;  %v17495_v18 = vsel %vm4374_vm9, %v2798_v52, -inf  ;;  %v17498_v17 = vsel %vm4374_vm9, %v2805_v58, -inf }
 0x19a   :  { %v5507_v54 = vpack.c.b16 %v5428_v51, %v5428_v51  ;;  %5591 = vst [vmem:[#allocation2 + $0x24] sm:$0x1] %v5590_v10  ;;  %v1050_v36 = vadd.f32 %v17378_v7, %v979_v28  ;;  %v1063_v57 = vadd.f32 %v17378_v7, %v992_v46  ;;  %v1061_v14 = vadd.f32 %v17378_v7, %v990_v22 }
 0x19b   :  { %v993_v16 = vmul.f32 %v17427_v11, %v17247_v12  ;;  %v88_v20 = vsel %vm17067_vm7, 0, %v87_v3  ;;  %v150_v21 = vsel %vm17059_vm5, 0, %v149_v34  ;;  %v991_v48 = vmul.f32 %v17427_v11, %v17254_v19 }
 0x19c   :  { %v5587_v30 = vsel %vm17218_vm1, %v5507_v54, %v5586_v4  ;;  %v1114_v32 = vmax.f32 %v1050_v36, 0.0  ;;  %v1127_v37 = vmax.f32 %v1063_v57, 0.0  ;;  %v1125_v47 = vmax.f32 %v1061_v14, 0.0  ;;  %89 = vst [vmem:[#allocation2 + $0x28] sm:$0x1] %v88_v20 }
 0x19d   :  { %151 = vst [vmem:[#allocation2 + $0x2c] sm:$0x1] %v150_v21  ;;  %5588 = vst [vmem:[#allocation2 + $0x20] sm:$0xf] %v5587_v30  ;;  %v1064_v12 = vadd.f32 %v17378_v7, %v993_v16  ;;  %v1062_v31 = vadd.f32 %v17378_v7, %v991_v48  ;;  %v17519_v40 = vmul.f32 %v17427_v11, %v17309_v44 }
 0x19e   :  { %v17523_v19 = vmul.f32 %v17427_v11, %v17320_v27  ;;  %v1322_v45 = vcombine.high %v1114_v32, %v1114_v32  ;;  %v1329_v59 = vrot.slane %v1114_v32, %v17092_v61  ;;  %v1543_v39 = vcombine.high %v1127_v37, %v1127_v37 }
 0x19f   :  { %v1550_v60 = vrot.slane %v1127_v37, %v17092_v61  ;;  %v1509_v29 = vcombine.high %v1125_v47, %v1125_v47  ;;  %v17528_v26 = vrot.slane %v1125_v47, %v17092_v61  ;;  %v17530_v24 = vmax.f32 %v1064_v12, 0.0  ;;  %v17547_v37 = vpop.f32.mrb[20].mxu1 }
 0x1a0   :  { %v17532_v62 = vmax.f32 %v1062_v31, 0.0  ;;  %v1336_v44 = vrot.slane %v1322_v45, %v17092_v61  ;;  %v1337_v0 = vcombine.high %v1329_v59, %v1329_v59  ;;  %v2722_v27 = vsel %vm2581_vm8, %v1329_v59, -inf }
 0x1a1   :  { %v1557_v1 = vrot.slane %v1543_v39, %v17092_v61  ;;  %v2723_v49 = vrot.slane %v2722_v27, 4  ;;  %v1558_v43 = vcombine.high %v1550_v60, %v1550_v60  ;;  %v3086_v55 = vsel %vm2581_vm8, %v1550_v60, -inf }
 0x1a2   :  { %v17539_v9 = vrot.slane %v1509_v29, %v17092_v61  ;;  %v1338_v5 = vcombine.high %v1336_v44, %v1336_v44  ;;  %v2729_v25 = vsel %vm2581_vm8, %v1337_v0, -inf  ;;  %v2736_v63 = vsel %vm2581_vm8, %v1336_v44, -inf }
 0x1a3   :  { %v1559_v52 = vcombine.high %v1557_v1, %v1557_v1  ;;  %v2724_v58 = vmax.f32 %v2722_v27, %v2723_v49  ;;  %v2730_v28 = vrot.slane %v2729_v25, 4  ;;  %v2737_v35 = vrot.slane %v2736_v63, 4 }
 0x1a4   :  { %v3087_v46 = vrot.slane %v3086_v55, 4  ;;  %v2743_v22 = vsel %vm2581_vm8, %v1338_v5, -inf  ;;  %v3093_v3 = vsel %vm2581_vm8, %v1558_v43, -inf  ;;  %v3100_v34 = vsel %vm2581_vm8, %v1557_v1, -inf }
 0x1a5   :  { %v3107_v51 = vsel %vm2581_vm8, %v1559_v52, -inf  ;;  %v2725_v4 = vrot.slane %v2724_v58, 2  ;;  %v2731_v10 = vmax.f32 %v2729_v25, %v2730_v28  ;;  %v2738_v54 = vmax.f32 %v2736_v63, %v2737_v35 }
 0x1a6   :  { %v2744_v36 = vrot.slane %v2743_v22, 4  ;;  %v3088_v57 = vmax.f32 %v3086_v55, %v3087_v46  ;;  %v3094_v14 = vrot.slane %v3093_v3, 4  ;;  %v3101_v16 = vrot.slane %v3100_v34, 4 }
 0x1a7   :  { %v3108_v20 = vrot.slane %v3107_v51, 4  ;;  %v2726_v21 = vmax.f32 %v2724_v58, %v2725_v4  ;;  %v2732_v48 = vrot.slane %v2731_v10, 2  ;;  %v2739_v30 = vrot.slane %v2738_v54, 2 }
 0x1a8   :  { %v2745_v32 = vmax.f32 %v2743_v22, %v2744_v36  ;;  %v3089_v47 = vrot.slane %v3088_v57, 2  ;;  %v3095_v12 = vmax.f32 %v3093_v3, %v3094_v14  ;;  %v3102_v31 = vmax.f32 %v3100_v34, %v3101_v16 }
 0x1a9   :  { %v3109_v45 = vmax.f32 %v3107_v51, %v3108_v20  ;;  %v2727_v59 = vrot.slane %v2726_v21, 1  ;;  %v2733_v39 = vmax.f32 %v2731_v10, %v2732_v48  ;;  %v2740_v60 = vmax.f32 %v2738_v54, %v2739_v30 }
 0x1aa   :  { %v2746_v29 = vrot.slane %v2745_v32, 2  ;;  %v3090_v44 = vmax.f32 %v3088_v57, %v3089_v47  ;;  %v3096_v0 = vrot.slane %v3095_v12, 2  ;;  %v3103_v27 = vrot.slane %v3102_v31, 2 }
 0x1ab   :  { %v3110_v1 = vrot.slane %v3109_v45, 2  ;;  %v2728_v49 = vmax.f32 %v2726_v21, %v2727_v59  ;;  %v2734_v43 = vrot.slane %v2733_v39, 1  ;;  %v2741_v55 = vrot.slane %v2740_v60, 1  ;;  %v17560_v59 = vpop.f32.mrb[21].mxu1 }
 0x1ac   :  { %v2747_v5 = vmax.f32 %v2745_v32, %v2746_v29  ;;  %v3091_v25 = vrot.slane %v3090_v44, 1  ;;  %v3097_v63 = vmax.f32 %v3095_v12, %v3096_v0  ;;  %v3104_v52 = vmax.f32 %v3102_v31, %v3103_v27 }
 0x1ad   :  { %v3111_v58 = vmax.f32 %v3109_v45, %v3110_v1  ;;  %v2735_v28 = vmax.f32 %v2733_v39, %v2734_v43  ;;  %v2742_v35 = vmax.f32 %v2740_v60, %v2741_v55  ;;  %v4411_v22 = vsel %vm4374_vm9, %v2728_v49, -inf  ;;  %v5577_v39 = vld [vmem:[#allocation2 + $0x14] sm:$0x1] }
 0x1ae   :  { %v2748_v46 = vrot.slane %v2747_v5, 1  ;;  %v4413_v3 = vmax.f32 %v4411_v22, %v17472_v56  ;;  %v3092_v34 = vmax.f32 %v3090_v44, %v3091_v25  ;;  %v3098_v51 = vrot.slane %v3097_v63, 1 }
 0x1af   :  { %v3105_v4 = vrot.slane %v3104_v52, 1  ;;  %v4414_v54 = vsel %vm4374_vm9, %v2735_v28, -inf  ;;  %v4417_v36 = vsel %vm4374_vm9, %v2742_v35, -inf  ;;  %v3112_v57 = vrot.slane %v3111_v58, 1 }
 0x1b0   :  { %v2749_v10 = vmax.f32 %v2747_v5, %v2748_v46  ;;  %v4416_v14 = vmax.f32 %v4414_v54, %v17477_v8  ;;  %v4419_v16 = vmax.f32 %v4417_v36, %v17495_v18  ;;  %v15443_v20 = vpack.c.bf16 %v4413_v3, %v4413_v3 }
 0x1b1   :  { %v3099_v21 = vmax.f32 %v3097_v63, %v3098_v51  ;;  %v3106_v30 = vmax.f32 %v3104_v52, %v3105_v4  ;;  %v3113_v32 = vmax.f32 %v3111_v58, %v3112_v57  ;;  %v17557_v56 = vsel %vm4374_vm9, %v3092_v34, -inf  ;;  %v5574_v58 = vld [vmem:[#allocation2 + $0x10] sm:$0xf] }
 0x1b2   :  { %v4420_v48 = vsel %vm4374_vm9, %v2749_v10, -inf  ;;  %v15444_v12 = vpack.c.bf16 %v4416_v14, %v4416_v14  ;;  %v15445_v31 = vpack.c.bf16 %v4419_v16, %v4419_v16  ;;  %v5283_v45 = vunpack.c.l.b16 %v15443_v20 }
 0x1b3   :  { %v4422_v47 = vmax.f32 %v4420_v48, %v17498_v17  ;;  %v17563_v8 = vsel %vm4374_vm9, %v3099_v21, -inf  ;;  %v17566_v18 = vsel %vm4374_vm9, %v3106_v30, -inf  ;;  %v17569_v60 = vsel %vm4374_vm9, %v3113_v32, -inf }
 0x1b4   :  { %v1524_v29 = vcombine.high %v17528_v26, %v17528_v26  ;;  %v5284_v44 = vunpack.c.l.b16 %v15444_v12  ;;  %v5285_v17 = vunpack.c.l.b16 %v15445_v31  ;;  %v5414_v0 = vsel %vm5405_vm13, %v5283_v45, %v17485_v13  ;;  %v17597_v12 = vpop.f32.mrb[22].mxu1 }
 0x1b5   :  { %v15560_v27 = vpack.c.bf16 %v4422_v47, %v4422_v47  ;;  %v1525_v1 = vcombine.high %v17539_v9, %v17539_v9  ;;  %v3030_v49 = vsel %vm2581_vm8, %v17528_v26, -inf  ;;  %v3044_v55 = vsel %vm2581_vm8, %v17539_v9, -inf }
 0x1b6   :  { %v3037_v43 = vsel %vm2581_vm8, %v1524_v29, -inf  ;;  %v5415_v5 = vsel %vm5407_vm14, %v5284_v44, %v5414_v0  ;;  %v3031_v63 = vrot.slane %v3030_v49, 4  ;;  %v3045_v28 = vrot.slane %v3044_v55, 4 }
 0x1b7   :  { %v5578_v25 = vsel %vm17067_vm7, %v15560_v27, %v5577_v39  ;;  %v3038_v52 = vrot.slane %v3037_v43, 4  ;;  %v5416_v13 = vsel %vm5409_vm0, %v5285_v17, %v5415_v5  ;;  %v3051_v35 = vsel %vm2581_vm8, %v1525_v1, -inf }
 0x1b8   :  { %5579 = vst [vmem:[#allocation2 + $0x14] sm:$0x1] %v5578_v25  ;;  %v1560_v26 = vcombine.high %v17530_v24, %v17530_v24  ;;  %v5503_v46 = vpack.c.b16 %v5416_v13, %v5416_v13  ;;  %v3032_v22 = vmax.f32 %v3030_v49, %v3031_v63  ;;  %v3052_v3 = vrot.slane %v3051_v35, 4 }
 0x1b9   :  { %v3039_v9 = vmax.f32 %v3037_v43, %v3038_v52  ;;  %v3046_v34 = vmax.f32 %v3044_v55, %v3045_v28  ;;  %v1567_v51 = vrot.slane %v17530_v24, %v17092_v61  ;;  %v1526_v10 = vcombine.high %v17532_v62, %v17532_v62 }
 0x1ba   :  { %v1574_v4 = vrot.slane %v1560_v26, %v17092_v61  ;;  %v5575_v54 = vsel %vm17218_vm1, %v5503_v46, %v5574_v58  ;;  %v3033_v36 = vrot.slane %v3032_v22, 2  ;;  %v3053_v14 = vmax.f32 %v3051_v35, %v3052_v3 }
 0x1bb   :  { %v3040_v57 = vrot.slane %v3039_v9, 2  ;;  %5576 = vst [vmem:[#allocation2 + $0x10] sm:$0xf] %v5575_v54  ;;  %v3047_v16 = vrot.slane %v3046_v34, 2  ;;  %v1575_v20 = vcombine.high %v1567_v51, %v1567_v51  ;;  %v3114_v48 = vsel %vm2581_vm8, %v1567_v51, -inf }
 0x1bc   :  { %v1576_v21 = vcombine.high %v1574_v4, %v1574_v4  ;;  %v3034_v30 = vmax.f32 %v3032_v22, %v3033_v36  ;;  %v3054_v24 = vrot.slane %v3053_v14, 2  ;;  %v3115_v47 = vrot.slane %v3114_v48, 4 }
 0x1bd   :  { %v3041_v32 = vmax.f32 %v3039_v9, %v3040_v57  ;;  %v3048_v31 = vmax.f32 %v3046_v34, %v3047_v16  ;;  %v3121_v45 = vsel %vm2581_vm8, %v1575_v20, -inf  ;;  %v3128_v39 = vsel %vm2581_vm8, %v1574_v4, -inf }
 0x1be   :  { %v3135_v29 = vsel %vm2581_vm8, %v1576_v21, -inf  ;;  %v3035_v44 = vrot.slane %v3034_v30, 1  ;;  %v3055_v0 = vmax.f32 %v3053_v14, %v3054_v24  ;;  %v3116_v27 = vmax.f32 %v3114_v48, %v3115_v47 }
 0x1bf   :  { %v3042_v17 = vrot.slane %v3041_v32, 1  ;;  %v3049_v1 = vrot.slane %v3048_v31, 1  ;;  %v3122_v49 = vrot.slane %v3121_v45, 4  ;;  %v3129_v43 = vrot.slane %v3128_v39, 4 }
 0x1c0   :  { %v3136_v55 = vrot.slane %v3135_v29, 4  ;;  %v3036_v5 = vmax.f32 %v3034_v30, %v3035_v44  ;;  %v3056_v63 = vrot.slane %v3055_v0, 1  ;;  %v3117_v52 = vrot.slane %v3116_v27, 2 }
 0x1c1   :  { %v3043_v25 = vmax.f32 %v3041_v32, %v3042_v17  ;;  %v3050_v13 = vmax.f32 %v3048_v31, %v3049_v1  ;;  %v3123_v58 = vmax.f32 %v3121_v45, %v3122_v49  ;;  %v3130_v28 = vmax.f32 %v3128_v39, %v3129_v43  ;;  %v17613_v17 = vpop.f32.mrb[23].mxu1 }
 0x1c2   :  { %v3137_v35 = vmax.f32 %v3135_v29, %v3136_v55  ;;  %v3057_v26 = vmax.f32 %v3055_v0, %v3056_v63  ;;  %v4471_v46 = vsel %vm4374_vm9, %v3036_v5, -inf  ;;  %v3118_v9 = vmax.f32 %v3116_v27, %v3117_v52 }
 0x1c3   :  { %v4474_v22 = vsel %vm4374_vm9, %v3043_v25, -inf  ;;  %v4473_v3 = vmax.f32 %v4471_v46, %v17557_v56  ;;  %v4477_v51 = vsel %vm4374_vm9, %v3050_v13, -inf  ;;  %v3124_v4 = vrot.slane %v3123_v58, 2 }
 0x1c4   :  { %v4476_v34 = vmax.f32 %v4474_v22, %v17563_v8  ;;  %v4479_v54 = vmax.f32 %v4477_v51, %v17566_v18  ;;  %v4480_v36 = vsel %vm4374_vm9, %v3057_v26, -inf  ;;  %v3119_v57 = vrot.slane %v3118_v9, 1 }
 0x1c5   :  { %v3131_v14 = vrot.slane %v3130_v28, 2  ;;  %v4482_v16 = vmax.f32 %v4480_v36, %v17569_v60  ;;  %v15463_v20 = vpack.c.bf16 %v4473_v3, %v4473_v3  ;;  %v3125_v48 = vmax.f32 %v3123_v58, %v3124_v4 }
 0x1c6   :  { %v15464_v21 = vpack.c.bf16 %v4476_v34, %v4476_v34  ;;  %v15465_v30 = vpack.c.bf16 %v4479_v54, %v4479_v54  ;;  %v3120_v32 = vmax.f32 %v3118_v9, %v3119_v57  ;;  %v3138_v56 = vrot.slane %v3137_v35, 2 }
 0x1c7   :  { %v3132_v24 = vmax.f32 %v3130_v28, %v3131_v14  ;;  %v15466_v47 = vpack.c.bf16 %v4482_v16, %v4482_v16  ;;  %v5303_v8 = vunpack.c.l.b16 %v15463_v20  ;;  %v3126_v45 = vrot.slane %v3125_v48, 1 }
 0x1c8   :  { %v5304_v31 = vunpack.c.l.b16 %v15464_v21  ;;  %v5305_v39 = vunpack.c.l.b16 %v15465_v30  ;;  %v3139_v18 = vmax.f32 %v3137_v35, %v3138_v56  ;;  %v17611_v44 = vsel %vm4374_vm9, %v3120_v32, -inf }
 0x1c9   :  { %v3133_v29 = vrot.slane %v3132_v24, 1  ;;  %v5306_v60 = vunpack.c.l.b16 %v15466_v47  ;;  %v3127_v27 = vmax.f32 %v3125_v48, %v3126_v45  ;;  %v1533_v1 = vrot.slane %v17532_v62, %v17092_v61 }
 0x1ca   :  { %v5429_v0 = vsel %vm5399_vm10, %v5304_v31, %v5303_v8  ;;  %v3140_v55 = vrot.slane %v3139_v18, 1  ;;  %v1540_v5 = vrot.slane %v1526_v10, %v17092_v61  ;;  %v1067_v62 = vadd.f32 %v17378_v7, %v17519_v40 }
 0x1cb   :  { %v5430_v49 = vsel %vm5401_vm11, %v5305_v39, %v5429_v0  ;;  %v3134_v43 = vmax.f32 %v3132_v24, %v3133_v29  ;;  %v17624_v25 = vsel %vm4374_vm9, %v3127_v27, -inf  ;;  %v1541_v63 = vcombine.high %v1533_v1, %v1533_v1 }
 0x1cc   :  { %v3058_v52 = vsel %vm2581_vm8, %v1533_v1, -inf  ;;  %v17628_v13 = vsel %vm5403_vm12, %v5306_v60, %v5430_v49  ;;  %v3141_v58 = vmax.f32 %v3139_v18, %v3140_v55  ;;  %v1542_v35 = vcombine.high %v1540_v5, %v1540_v5 }
 0x1cd   :  { %v4490_v28 = vsel %vm4374_vm9, %v3134_v43, -inf  ;;  %v3059_v26 = vrot.slane %v3058_v52, 4  ;;  %v3065_v46 = vsel %vm2581_vm8, %v1541_v63, -inf  ;;  %v3072_v22 = vsel %vm2581_vm8, %v1540_v5, -inf }
 0x1ce   :  { %v1065_v10 = vadd.f32 %v17378_v7, %v17523_v19  ;;  %v4493_v9 = vsel %vm4374_vm9, %v3141_v58, -inf  ;;  %v3066_v34 = vrot.slane %v3065_v46, 4  ;;  %v3073_v51 = vrot.slane %v3072_v22, 4 }
 0x1cf   :  { %v3060_v3 = vmax.f32 %v3058_v52, %v3059_v26  ;;  %v3079_v4 = vsel %vm2581_vm8, %v1542_v35, -inf  ;;  %v1131_v54 = vmax.f32 %v1067_v62, 0.0  ;;  %v17641_v57 = vmul.f32 %v17427_v11, %v17358_v41  ;;  %v17655_v26 = vpop.f32.mrb[24].mxu1 }
 0x1d0   :  { %v1129_v36 = vmax.f32 %v1065_v10, 0.0  ;;  %v3067_v16 = vmax.f32 %v3065_v46, %v3066_v34  ;;  %v3074_v20 = vmax.f32 %v3072_v22, %v3073_v51  ;;  %v3080_v40 = vrot.slane %v3079_v4, 4 }
 0x1d1   :  { %v3061_v14 = vrot.slane %v3060_v3, 2  ;;  %v1611_v21 = vcombine.high %v1131_v54, %v1131_v54  ;;  %v1618_v7 = vrot.slane %v1131_v54, %v17092_v61 }
 0x1d2   :  { %v1577_v19 = vcombine.high %v1129_v36, %v1129_v36  ;;  %v17645_v48 = vrot.slane %v1129_v36, %v17092_v61  ;;  %v3068_v32 = vrot.slane %v3067_v16, 2  ;;  %v3075_v24 = vrot.slane %v3074_v20, 2 }
 0x1d3   :  { %v3062_v30 = vmax.f32 %v3060_v3, %v3061_v14  ;;  %v3081_v56 = vmax.f32 %v3079_v4, %v3080_v40  ;;  %v1625_v47 = vrot.slane %v1611_v21, %v17092_v61  ;;  %v1626_v8 = vcombine.high %v1618_v7, %v1618_v7 }
 0x1d4   :  { %v3198_v41 = vsel %vm2581_vm8, %v1618_v7, -inf  ;;  %v17650_v31 = vrot.slane %v1577_v19, %v17092_v61  ;;  %v3069_v39 = vmax.f32 %v3067_v16, %v3068_v32  ;;  %v3076_v29 = vmax.f32 %v3074_v20, %v3075_v24 }
 0x1d5   :  { %v3063_v45 = vrot.slane %v3062_v30, 1  ;;  %v3082_v18 = vrot.slane %v3081_v56, 2  ;;  %v1627_v60 = vcombine.high %v1625_v47, %v1625_v47  ;;  %v3199_v0 = vrot.slane %v3198_v41, 4 }
 0x1d6   :  { %v3205_v27 = vsel %vm2581_vm8, %v1626_v8, -inf  ;;  %v3212_v1 = vsel %vm2581_vm8, %v1625_v47, -inf  ;;  %v3070_v43 = vrot.slane %v3069_v39, 1  ;;  %v3077_v55 = vrot.slane %v3076_v29, 1 }
 0x1d7   :  { %v3064_v49 = vmax.f32 %v3062_v30, %v3063_v45  ;;  %v3083_v5 = vmax.f32 %v3081_v56, %v3082_v18  ;;  %v3200_v63 = vmax.f32 %v3198_v41, %v3199_v0  ;;  %v3206_v52 = vrot.slane %v3205_v27, 4  ;;  %v5595_v41 = vld [vmem:[#allocation2 + $0x2c] sm:$0x1] }
 0x1d8   :  { %v3213_v58 = vrot.slane %v3212_v1, 4  ;;  %v3219_v35 = vsel %vm2581_vm8, %v1627_v60, -inf  ;;  %v3071_v46 = vmax.f32 %v3069_v39, %v3070_v43  ;;  %v3078_v22 = vmax.f32 %v3076_v29, %v3077_v55 }
 0x1d9   :  { %v3084_v62 = vrot.slane %v3083_v5, 1  ;;  %v4483_v10 = vsel %vm4374_vm9, %v3064_v49, -inf  ;;  %v3201_v34 = vrot.slane %v3200_v63, 2  ;;  %v3207_v51 = vmax.f32 %v3205_v27, %v3206_v52 }
 0x1da   :  { %v4485_v3 = vmax.f32 %v4483_v10, %v17611_v44  ;;  %v3214_v4 = vmax.f32 %v3212_v1, %v3213_v58  ;;  %v4486_v36 = vsel %vm4374_vm9, %v3071_v46, -inf  ;;  %v4489_v14 = vsel %vm4374_vm9, %v3078_v22, -inf  ;;  %v5592_v58 = vld [vmem:[#allocation2 + $0x28] sm:$0xf] }
 0x1db   :  { %v3085_v54 = vmax.f32 %v3083_v5, %v3084_v62  ;;  %v3220_v16 = vrot.slane %v3219_v35, 4  ;;  %v4488_v20 = vmax.f32 %v4486_v36, %v17624_v25  ;;  %v4491_v40 = vmax.f32 %v4489_v14, %v4490_v28  ;;  %v90_v14 = vld [vmem:[#allocation2 + $0x30] sm:$0x1] }
 0x1dc   :  { %v15467_v21 = vpack.c.bf16 %v4485_v3, %v4485_v3  ;;  %v3202_v7 = vmax.f32 %v3200_v63, %v3201_v34  ;;  %v3208_v30 = vrot.slane %v3207_v51, 2  ;;  %v3215_v32 = vrot.slane %v3214_v4, 2  ;;  %v152_v34 = vld [vmem:[#allocation2 + $0x34] sm:$0x1] }
 0x1dd   :  { %v4492_v19 = vsel %vm4374_vm9, %v3085_v54, -inf  ;;  %v3221_v24 = vmax.f32 %v3219_v35, %v3220_v16  ;;  %v15468_v56 = vpack.c.bf16 %v4488_v20, %v4488_v20  ;;  %v15469_v47 = vpack.c.bf16 %v4491_v40, %v4491_v40  ;;  %v17683_v16 = vpop.f32.mrb[25].mxu1 }
 0x1de   :  { %v4494_v44 = vmax.f32 %v4492_v19, %v4493_v9  ;;  %v5307_v8 = vunpack.c.l.b16 %v15467_v21  ;;  %v3203_v45 = vrot.slane %v3202_v7, 1  ;;  %v3209_v39 = vmax.f32 %v3207_v51, %v3208_v30 }
 0x1df   :  { %v3216_v29 = vmax.f32 %v3214_v4, %v3215_v32  ;;  %v3222_v18 = vrot.slane %v3221_v24, 2  ;;  %v5308_v60 = vunpack.c.l.b16 %v15468_v56  ;;  %v5309_v0 = vunpack.c.l.b16 %v15469_v47 }
 0x1e0   :  { %v5432_v25 = vsel %vm5405_vm13, %v5307_v8, %v17628_v13  ;;  %v15563_v28 = vpack.c.bf16 %v4494_v44, %v4494_v44  ;;  %v3204_v27 = vmax.f32 %v3202_v7, %v3203_v45  ;;  %v3210_v1 = vrot.slane %v3209_v39, 1  ;;  %v17694_v44 = vld [vmem:[%s21029_s3] ss:$0 sm:$0xff] }
 0x1e1   :  { %v3217_v49 = vrot.slane %v3216_v29, 1  ;;  %v3223_v43 = vmax.f32 %v3221_v24, %v3222_v18  ;;  %v5433_v9 = vsel %vm5407_vm14, %v5308_v60, %v5432_v25  ;;  %v1592_v5 = vcombine.high %v17645_v48, %v17645_v48 }
 0x1e2   :  { %v5596_v55 = vsel %vm17067_vm7, %v15563_v28, %v5595_v41  ;;  %v1593_v63 = vcombine.high %v17650_v31, %v17650_v31  ;;  %v5434_v52 = vsel %vm5409_vm0, %v5309_v0, %v5433_v9  ;;  %v3211_v13 = vmax.f32 %v3209_v39, %v3210_v1 }
 0x1e3   :  { %5597 = vst [vmem:[#allocation2 + $0x2c] sm:$0x1] %v5596_v55  ;;  %v3218_v35 = vmax.f32 %v3216_v29, %v3217_v49  ;;  %v3224_v46 = vrot.slane %v3223_v43, 1  ;;  %v5509_v22 = vpack.c.b16 %v5434_v52, %v5434_v52  ;;  %v17674_v62 = vsel %vm4374_vm9, %v3204_v27, -inf }
 0x1e4   :  { %v3142_v10 = vsel %vm2581_vm8, %v17645_v48, -inf  ;;  %v3149_v3 = vsel %vm2581_vm8, %v1592_v5, -inf  ;;  %v4499_v4 = vsel %vm4374_vm9, %v3211_v13, -inf  ;;  %v3156_v48 = vsel %vm2581_vm8, %v17650_v31, -inf }
 0x1e5   :  { %v3225_v51 = vmax.f32 %v3223_v43, %v3224_v46  ;;  %v17681_v54 = vsel %vm4374_vm9, %v3218_v35, -inf  ;;  %v3143_v36 = vrot.slane %v3142_v10, 4  ;;  %v5593_v20 = vsel %vm17218_vm1, %v5509_v22, %v5592_v58  ;;  %v17717_v58 = vpop.f32.mrb[26].mxu1 }
 0x1e6   :  { %v3150_v40 = vrot.slane %v3149_v3, 4  ;;  %v3163_v21 = vsel %vm2581_vm8, %v1593_v63, -inf  ;;  %5594 = vst [vmem:[#allocation2 + $0x28] sm:$0xf] %v5593_v20  ;;  %v3157_v30 = vrot.slane %v3156_v48, 4  ;;  %v1068_v56 = vadd.f32 %v17694_v44, %v17641_v57 }
 0x1e7   :  { %v4505_v7 = vsel %vm4374_vm9, %v3225_v51, -inf  ;;  %v3144_v19 = vmax.f32 %v3142_v10, %v3143_v36  ;;  %v3164_v32 = vrot.slane %v3163_v21, 4  ;;  %v91_v31 = vsel %vm17067_vm7, 0, %v90_v14 }
 0x1e8   :  { %v3151_v24 = vmax.f32 %v3149_v3, %v3150_v40  ;;  %v153_v47 = vsel %vm17059_vm5, 0, %v152_v34  ;;  %v3158_v41 = vmax.f32 %v3156_v48, %v3157_v30  ;;  %92 = vst [vmem:[#allocation2 + $0x30] sm:$0x1] %v91_v31  ;;  %v995_v39 = vmul.f32 %v17427_v11, %v17393_v33 }
 0x1e9   :  { %v3145_v8 = vrot.slane %v3144_v19, 2  ;;  %v3165_v45 = vmax.f32 %v3163_v21, %v3164_v32  ;;  %154 = vst [vmem:[#allocation2 + $0x34] sm:$0x1] %v153_v47  ;;  %v1132_v18 = vmax.f32 %v1068_v56, 0.0  ;;  %v1000_v60 = vmul.f32 %v17427_v11, %v17420_v6 }
 0x1ea   :  { %v3152_v29 = vrot.slane %v3151_v24, 2  ;;  %v17708_v57 = vmul.f32 %v17427_v11, %v17445_v2  ;;  %v3159_v25 = vrot.slane %v3158_v41, 2  ;;  %v1066_v27 = vadd.f32 %v17694_v44, %v995_v39 }
 0x1eb   :  { %v3146_v0 = vmax.f32 %v3144_v19, %v3145_v8  ;;  %v3166_v28 = vrot.slane %v3165_v45, 2  ;;  %v1628_v49 = vcombine.high %v1132_v18, %v1132_v18  ;;  %v1635_v43 = vrot.slane %v1132_v18, %v17092_v61 }
 0x1ec   :  { %v3153_v1 = vmax.f32 %v3151_v24, %v3152_v29  ;;  %v17713_v33 = vadd.f32 %v17694_v44, %v1000_v60  ;;  %v3160_v55 = vmax.f32 %v3158_v41, %v3159_v25  ;;  %v1130_v6 = vmax.f32 %v1066_v27, 0.0 }
 0x1ed   :  { %v3147_v9 = vrot.slane %v3146_v0, 1  ;;  %v3167_v5 = vmax.f32 %v3165_v45, %v3166_v28  ;;  %v1642_v11 = vrot.slane %v1628_v49, %v17092_v61  ;;  %v1643_v2 = vcombine.high %v1635_v43, %v1635_v43 }
 0x1ee   :  { %v3154_v63 = vrot.slane %v3153_v1, 1  ;;  %v3226_v52 = vsel %vm2581_vm8, %v1635_v43, -inf  ;;  %v3161_v35 = vrot.slane %v3160_v55, 1  ;;  %v17728_v43 = vpop.f32.mrb[27].mxu1 }
 0x1ef   :  { %v3148_v13 = vmax.f32 %v3146_v0, %v3147_v9  ;;  %v3168_v46 = vrot.slane %v3167_v5, 1  ;;  %v3227_v22 = vrot.slane %v3226_v52, 4  ;;  %v1644_v3 = vcombine.high %v1642_v11, %v1642_v11 }
 0x1f0   :  { %v3155_v10 = vmax.f32 %v3153_v1, %v3154_v63  ;;  %v3233_v34 = vsel %vm2581_vm8, %v1643_v2, -inf  ;;  %v3240_v51 = vsel %vm2581_vm8, %v1642_v11, -inf  ;;  %v3162_v36 = vmax.f32 %v3160_v55, %v3161_v35 }
 0x1f1   :  { %v3169_v14 = vmax.f32 %v3167_v5, %v3168_v46  ;;  %v4495_v20 = vsel %vm4374_vm9, %v3148_v13, -inf  ;;  %v3228_v40 = vmax.f32 %v3226_v52, %v3227_v22  ;;  %v3234_v19 = vrot.slane %v3233_v34, 4 }
 0x1f2   :  { %v4497_v48 = vmax.f32 %v4495_v20, %v17674_v62  ;;  %v4498_v21 = vsel %vm4374_vm9, %v3155_v10, -inf  ;;  %v3241_v30 = vrot.slane %v3240_v51, 4  ;;  %v4501_v24 = vsel %vm4374_vm9, %v3162_v36, -inf }
 0x1f3   :  { %v4500_v32 = vmax.f32 %v4498_v21, %v4499_v4  ;;  %v4504_v56 = vsel %vm4374_vm9, %v3169_v14, -inf  ;;  %v3229_v31 = vrot.slane %v3228_v40, 2  ;;  %v4503_v47 = vmax.f32 %v4501_v24, %v17681_v54 }
 0x1f4   :  { %v4506_v8 = vmax.f32 %v4504_v56, %v4505_v7  ;;  %v15471_v41 = vpack.c.bf16 %v4497_v48, %v4497_v48  ;;  %v3235_v45 = vmax.f32 %v3233_v34, %v3234_v19  ;;  %v3242_v18 = vmax.f32 %v3240_v51, %v3241_v30 }
 0x1f5   :  { %v15472_v39 = vpack.c.bf16 %v4500_v32, %v4500_v32  ;;  %v3230_v29 = vmax.f32 %v3228_v40, %v3229_v31  ;;  %v3247_v62 = vsel %vm2581_vm8, %v1644_v3, -inf  ;;  %v15473_v60 = vpack.c.bf16 %v4503_v47, %v4503_v47 }
 0x1f6   :  { %v15474_v0 = vpack.c.bf16 %v4506_v8, %v4506_v8  ;;  %v5311_v25 = vunpack.c.l.b16 %v15471_v41  ;;  %v3236_v28 = vrot.slane %v3235_v45, 2  ;;  %v3243_v1 = vrot.slane %v3242_v18, 2 }
 0x1f7   :  { %v5312_v4 = vunpack.c.l.b16 %v15472_v39  ;;  %v3231_v27 = vrot.slane %v3230_v29, 1  ;;  %v3248_v49 = vrot.slane %v3247_v62, 4  ;;  %v5313_v9 = vunpack.c.l.b16 %v15473_v60 }
 0x1f8   :  { %v5314_v54 = vunpack.c.l.b16 %v15474_v0  ;;  %v3237_v7 = vmax.f32 %v3235_v45, %v3236_v28  ;;  %v1594_v55 = vcombine.high %v1130_v6, %v1130_v6  ;;  %v3244_v11 = vmax.f32 %v3242_v18, %v3243_v1  ;;  %v17750_v0 = vld [vmem:[%s21028_s2] ss:$0 sm:$0xff] }
 0x1f9   :  { %v5435_v5 = vsel %vm5399_vm10, %v5312_v4, %v5311_v25  ;;  %v3232_v63 = vmax.f32 %v3230_v29, %v3231_v27  ;;  %v3249_v2 = vmax.f32 %v3247_v62, %v3248_v49  ;;  %v1601_v35 = vrot.slane %v1130_v6, %v17092_v61 }
 0x1fa   :  { %v5436_v52 = vsel %vm5401_vm11, %v5313_v9, %v5435_v5  ;;  %v3238_v13 = vrot.slane %v3237_v7, 1  ;;  %v1608_v46 = vrot.slane %v1594_v55, %v17092_v61  ;;  %v3245_v22 = vrot.slane %v3244_v11, 1 }
 0x1fb   :  { %v3250_v10 = vrot.slane %v3249_v2, 2  ;;  %v4508_v3 = vsel %vm4374_vm9, %v3232_v63, -inf  ;;  %v17736_v34 = vsel %vm5403_vm12, %v5314_v54, %v5436_v52  ;;  %v1609_v36 = vcombine.high %v1601_v35, %v1601_v35 }
 0x1fc   :  { %v3239_v51 = vmax.f32 %v3237_v7, %v3238_v13  ;;  %v1610_v14 = vcombine.high %v1608_v46, %v1608_v46  ;;  %v3170_v20 = vsel %vm2581_vm8, %v1601_v35, -inf  ;;  %v3246_v40 = vmax.f32 %v3244_v11, %v3245_v22 }
 0x1fd   :  { %v3251_v48 = vmax.f32 %v3249_v2, %v3250_v10  ;;  %v3171_v21 = vrot.slane %v3170_v20, 4  ;;  %v3184_v19 = vsel %vm2581_vm8, %v1608_v46, -inf  ;;  %v3177_v30 = vsel %vm2581_vm8, %v1609_v36, -inf }
 0x1fe   :  { %v4511_v6 = vsel %vm4374_vm9, %v3239_v51, -inf  ;;  %v3185_v32 = vrot.slane %v3184_v19, 4  ;;  %v3191_v24 = vsel %vm2581_vm8, %v1610_v14, -inf  ;;  %v4514_v31 = vsel %vm4374_vm9, %v3246_v40, -inf }
 0x1ff   :  { %v3252_v56 = vrot.slane %v3251_v48, 1  ;;  %v3172_v47 = vmax.f32 %v3170_v20, %v3171_v21  ;;  %v3178_v8 = vrot.slane %v3177_v30, 4  ;;  %v3192_v45 = vrot.slane %v3191_v24, 4 }
 0x200   :  { %v3186_v41 = vmax.f32 %v3184_v19, %v3185_v32  ;;  %v1135_v39 = vmax.f32 %v17713_v33, 0.0  ;;  %v1069_v29 = vadd.f32 %v17694_v44, %v17708_v57  ;;  %v17754_v25 = vmul.f32 %v17750_v0, %v17464_v23 }
 0x201   :  { %v3253_v18 = vmax.f32 %v3251_v48, %v3252_v56  ;;  %v3173_v62 = vrot.slane %v3172_v47, 2  ;;  %v3179_v60 = vmax.f32 %v3177_v30, %v3178_v8  ;;  %v3193_v4 = vmax.f32 %v3191_v24, %v3192_v45 }
 0x202   :  { %v3187_v28 = vrot.slane %v3186_v41, 2  ;;  %v1679_v27 = vcombine.high %v1135_v39, %v1135_v39  ;;  %v1686_v33 = vrot.slane %v1135_v39, %v17092_v61  ;;  %v17758_v9 = vmax.f32 %v1069_v29, 0.0 }
 0x203   :  { %v4517_v1 = vsel %vm4374_vm9, %v3253_v18, -inf  ;;  %v3174_v57 = vmax.f32 %v3172_v47, %v3173_v62  ;;  %v3180_v49 = vrot.slane %v3179_v60, 2  ;;  %v3194_v7 = vrot.slane %v3193_v4, 2 }
 0x204   :  { %v3188_v54 = vmax.f32 %v3186_v41, %v3187_v28  ;;  %v1693_v55 = vrot.slane %v1679_v27, %v17092_v61  ;;  %v1694_v5 = vcombine.high %v1686_v33, %v1686_v33  ;;  %v3310_v23 = vsel %vm2581_vm8, %v1686_v33, -inf }
 0x205   :  { %v3175_v63 = vrot.slane %v3174_v57, 1  ;;  %v3181_v11 = vmax.f32 %v3179_v60, %v3180_v49  ;;  %v1645_v2 = vcombine.high %v17758_v9, %v17758_v9  ;;  %v3195_v13 = vmax.f32 %v3193_v4, %v3194_v7  ;;  %v17771_v49 = vpop.f32.mrb[28].mxu1  ;;  %v5601_v7 = vld [vmem:[#allocation2 + $0x34] sm:$0x1] }
 0x206   :  { %v3189_v52 = vrot.slane %v3188_v54, 1  ;;  %v1695_v35 = vcombine.high %v1693_v55, %v1693_v55  ;;  %v3311_v46 = vrot.slane %v3310_v23, 4  ;;  %v3317_v51 = vsel %vm2581_vm8, %v1694_v5, -inf }
 0x207   :  { %v3176_v22 = vmax.f32 %v3174_v57, %v3175_v63  ;;  %v3182_v10 = vrot.slane %v3181_v11, 1  ;;  %v3324_v36 = vsel %vm2581_vm8, %v1693_v55, -inf  ;;  %v3196_v20 = vrot.slane %v3195_v13, 1 }
 0x208   :  { %v3190_v14 = vmax.f32 %v3188_v54, %v3189_v52  ;;  %v3312_v40 = vmax.f32 %v3310_v23, %v3311_v46  ;;  %v3318_v48 = vrot.slane %v3317_v51, 4  ;;  %v3325_v30 = vrot.slane %v3324_v36, 4 }
 0x209   :  { %v3183_v21 = vmax.f32 %v3181_v11, %v3182_v10  ;;  %v4507_v19 = vsel %vm4374_vm9, %v3176_v22, -inf  ;;  %v3331_v32 = vsel %vm2581_vm8, %v1695_v35, -inf  ;;  %v3197_v24 = vmax.f32 %v3195_v13, %v3196_v20 }
 0x20a   :  { %v4509_v56 = vmax.f32 %v4507_v19, %v4508_v3  ;;  %v4513_v47 = vsel %vm4374_vm9, %v3190_v14, -inf  ;;  %v3313_v8 = vrot.slane %v3312_v40, 2  ;;  %v3319_v39 = vmax.f32 %v3317_v51, %v3318_v48  ;;  %v5598_v48 = vld [vmem:[#allocation2 + $0x30] sm:$0xf] }
 0x20b   :  { %v4510_v41 = vsel %vm4374_vm9, %v3183_v21, -inf  ;;  %v4515_v45 = vmax.f32 %v4513_v47, %v4514_v31  ;;  %v3326_v29 = vmax.f32 %v3324_v36, %v3325_v30  ;;  %v4516_v62 = vsel %vm4374_vm9, %v3197_v24, -inf }
 0x20c   :  { %v4512_v18 = vmax.f32 %v4510_v41, %v4511_v6  ;;  %v15475_v60 = vpack.c.bf16 %v4509_v56, %v4509_v56  ;;  %v3314_v28 = vmax.f32 %v3312_v40, %v3313_v8  ;;  %v4518_v4 = vmax.f32 %v4516_v62, %v4517_v1  ;;  %v17773_v6 = vpop.f32.mrb[29].mxu1 }
 0x20d   :  { %v15477_v27 = vpack.c.bf16 %v4515_v45, %v4515_v45  ;;  %v3320_v33 = vrot.slane %v3319_v39, 2  ;;  %v3327_v57 = vrot.slane %v3326_v29, 2  ;;  %v3332_v5 = vrot.slane %v3331_v32, 4 }
 0x20e   :  { %v15476_v3 = vpack.c.bf16 %v4512_v18, %v4512_v18  ;;  %v5315_v54 = vunpack.c.l.b16 %v15475_v60  ;;  %v3315_v55 = vrot.slane %v3314_v28, 1  ;;  %v15564_v31 = vpack.c.bf16 %v4518_v4, %v4518_v4  ;;  %v155_v60 = vld [vmem:[#allocation2 + $0x3c] sm:$0x1] }
 0x20f   :  { %v5317_v63 = vunpack.c.l.b16 %v15477_v27  ;;  %v3321_v11 = vmax.f32 %v3319_v39, %v3320_v33  ;;  %v3328_v23 = vmax.f32 %v3326_v29, %v3327_v57  ;;  %v3333_v35 = vmax.f32 %v3331_v32, %v3332_v5 }
 0x210   :  { %v5316_v52 = vunpack.c.l.b16 %v15476_v3  ;;  %v5438_v1 = vsel %vm5405_vm13, %v5315_v54, %v17736_v34  ;;  %v3316_v13 = vmax.f32 %v3314_v28, %v3315_v55  ;;  %v5602_v46 = vsel %vm17067_vm7, %v15564_v31, %v5601_v7 }
 0x211   :  { %v3322_v22 = vrot.slane %v3321_v11, 1  ;;  %v3329_v10 = vrot.slane %v3328_v23, 1  ;;  %v1652_v51 = vrot.slane %v17758_v9, %v17092_v61  ;;  %5603 = vst [vmem:[#allocation2 + $0x34] sm:$0x1] %v5602_v46  ;;  %v3334_v14 = vrot.slane %v3333_v35, 2 }
 0x212   :  { %v5439_v36 = vsel %vm5407_vm14, %v5316_v52, %v5438_v1  ;;  %v17783_v20 = vsel %vm4374_vm9, %v3316_v13, -inf  ;;  %v1659_v40 = vrot.slane %v1645_v2, %v17092_v61  ;;  %v93_v2 = vld [vmem:[#allocation2 + $0x38] sm:$0x1]  ;;  %v1072_v33 = vadd.f32 %v17694_v44, %v17754_v25 }
 0x213   :  { %v5440_v34 = vsel %vm5409_vm0, %v5317_v63, %v5439_v36  ;;  %v3323_v21 = vmax.f32 %v3321_v11, %v3322_v22  ;;  %v3330_v19 = vmax.f32 %v3328_v23, %v3329_v10  ;;  %v1660_v30 = vcombine.high %v1652_v51, %v1652_v51 }
 0x214   :  { %v5511_v32 = vpack.c.b16 %v5440_v34, %v5440_v34  ;;  %v3335_v24 = vmax.f32 %v3333_v35, %v3334_v14  ;;  %v1661_v56 = vcombine.high %v1659_v40, %v1659_v40  ;;  %v3254_v9 = vsel %vm2581_vm8, %v1652_v51, -inf }
 0x215   :  { %v4523_v47 = vsel %vm4374_vm9, %v3323_v21, -inf  ;;  %v17790_v8 = vsel %vm4374_vm9, %v3330_v19, -inf  ;;  %v3255_v41 = vrot.slane %v3254_v9, 4  ;;  %v3261_v45 = vsel %vm2581_vm8, %v1660_v30, -inf }
 0x216   :  { %v5599_v39 = vsel %vm17218_vm1, %v5511_v32, %v5598_v48  ;;  %v3336_v29 = vrot.slane %v3335_v24, 1  ;;  %v3262_v18 = vrot.slane %v3261_v45, 4  ;;  %v3268_v62 = vsel %vm2581_vm8, %v1659_v40, -inf }
 0x217   :  { %5600 = vst [vmem:[#allocation2 + $0x30] sm:$0xf] %v5599_v39  ;;  %v3256_v28 = vmax.f32 %v3254_v9, %v3255_v41  ;;  %v3269_v4 = vrot.slane %v3268_v62, 4  ;;  %v3275_v27 = vsel %vm2581_vm8, %v1661_v56, -inf  ;;  %v94_v7 = vsel %vm17067_vm7, 0, %v93_v2  ;;  %v17816_v39 = vpop.f32.mrb[30].mxu1 }
 0x218   :  { %v3337_v57 = vmax.f32 %v3335_v24, %v3336_v29  ;;  %v3263_v3 = vmax.f32 %v3261_v45, %v3262_v18  ;;  %v3276_v54 = vrot.slane %v3275_v27, 4  ;;  %v1136_v63 = vmax.f32 %v1072_v33, 0.0  ;;  %95 = vst [vmem:[#allocation2 + $0x38] sm:$0x1] %v94_v7 }
 0x219   :  { %v3257_v55 = vrot.slane %v3256_v28, 2  ;;  %v3270_v5 = vmax.f32 %v3268_v62, %v3269_v4  ;;  %v156_v31 = vsel %vm17059_vm5, 0, %v155_v60  ;;  %v999_v25 = vmul.f32 %v17750_v0, %v17503_v15 }
 0x21a   :  { %v4529_v11 = vsel %vm4374_vm9, %v3337_v57, -inf  ;;  %v3264_v23 = vrot.slane %v3263_v3, 2  ;;  %v3277_v52 = vmax.f32 %v3275_v27, %v3276_v54  ;;  %157 = vst [vmem:[#allocation2 + $0x3c] sm:$0x1] %v156_v31  ;;  %v1696_v35 = vcombine.high %v1136_v63, %v1136_v63 }
 0x21b   :  { %v3258_v1 = vmax.f32 %v3256_v28, %v3257_v55  ;;  %v3271_v13 = vrot.slane %v3270_v5, 2  ;;  %v1703_v46 = vrot.slane %v1136_v63, %v17092_v61  ;;  %v1070_v51 = vadd.f32 %v17694_v44, %v999_v25 }
 0x21c   :  { %v3265_v22 = vmax.f32 %v3263_v3, %v3264_v23  ;;  %v3278_v10 = vrot.slane %v3277_v52, 2  ;;  %v17810_v36 = vmul.f32 %v17750_v0, %v17547_v37  ;;  %v1710_v34 = vrot.slane %v1696_v35, %v17092_v61 }
 0x21d   :  { %v3259_v14 = vrot.slane %v3258_v1, 1  ;;  %v3272_v40 = vmax.f32 %v3270_v5, %v3271_v13  ;;  %v1711_v48 = vcombine.high %v1703_v46, %v1703_v46  ;;  %v3338_v19 = vsel %vm2581_vm8, %v1703_v46, -inf }
 0x21e   :  { %v3266_v21 = vrot.slane %v3265_v22, 1  ;;  %v3279_v15 = vmax.f32 %v3277_v52, %v3278_v10  ;;  %v1134_v30 = vmax.f32 %v1070_v51, 0.0  ;;  %v1712_v56 = vcombine.high %v1710_v34, %v1710_v34 }
 0x21f   :  { %v3260_v32 = vmax.f32 %v3258_v1, %v3259_v14  ;;  %v3273_v24 = vrot.slane %v3272_v40, 1  ;;  %v3339_v9 = vrot.slane %v3338_v19, 4  ;;  %v3345_v2 = vsel %vm2581_vm8, %v1711_v48, -inf }
 0x220   :  { %v3267_v41 = vmax.f32 %v3265_v22, %v3266_v21  ;;  %v3280_v45 = vrot.slane %v3279_v15, 1  ;;  %v3352_v37 = vsel %vm2581_vm8, %v1710_v34, -inf  ;;  %v3346_v60 = vrot.slane %v3345_v2, 4 }
 0x221   :  { %v3274_v29 = vmax.f32 %v3272_v40, %v3273_v24  ;;  %v4519_v18 = vsel %vm4374_vm9, %v3260_v32, -inf  ;;  %v3340_v62 = vmax.f32 %v3338_v19, %v3339_v9  ;;  %v3353_v33 = vrot.slane %v3352_v37, 4 }
 0x222   :  { %v3281_v28 = vmax.f32 %v3279_v15, %v3280_v45  ;;  %v4521_v4 = vmax.f32 %v4519_v18, %v17783_v20  ;;  %v4522_v27 = vsel %vm4374_vm9, %v3267_v41, -inf  ;;  %v3347_v7 = vmax.f32 %v3345_v2, %v3346_v60 }
 0x223   :  { %v4524_v57 = vmax.f32 %v4522_v27, %v4523_v47  ;;  %v4525_v3 = vsel %vm4374_vm9, %v3274_v29, -inf  ;;  %v3341_v54 = vrot.slane %v3340_v62, 2  ;;  %v3354_v31 = vmax.f32 %v3352_v37, %v3353_v33  ;;  %v17825_v47 = vpop.f32.mrb[31].mxu1 }
 0x224   :  { %v4527_v55 = vmax.f32 %v4525_v3, %v17790_v8  ;;  %v4528_v5 = vsel %vm4374_vm9, %v3281_v28, -inf  ;;  %v15479_v63 = vpack.c.bf16 %v4521_v4, %v4521_v4  ;;  %v3348_v1 = vrot.slane %v3347_v7, 2 }
 0x225   :  { %v4530_v23 = vmax.f32 %v4528_v5, %v4529_v11  ;;  %v15480_v52 = vpack.c.bf16 %v4524_v57, %v4524_v57  ;;  %v3342_v25 = vmax.f32 %v3340_v62, %v3341_v54  ;;  %v3355_v35 = vrot.slane %v3354_v31, 2 }
 0x226   :  { %v15481_v13 = vpack.c.bf16 %v4527_v55, %v4527_v55  ;;  %v5319_v20 = vunpack.c.l.b16 %v15479_v63  ;;  %v3359_v46 = vsel %vm2581_vm8, %v1712_v56, -inf  ;;  %v3349_v14 = vmax.f32 %v3347_v7, %v3348_v1 }
 0x227   :  { %v15482_v22 = vpack.c.bf16 %v4530_v23, %v4530_v23  ;;  %v5320_v10 = vunpack.c.l.b16 %v15480_v52  ;;  %v3343_v51 = vrot.slane %v3342_v25, 1  ;;  %v3356_v40 = vmax.f32 %v3354_v31, %v3355_v35 }
 0x228   :  { %v5321_v8 = vunpack.c.l.b16 %v15481_v13  ;;  %v3360_v34 = vrot.slane %v3359_v46, 4  ;;  %v1662_v48 = vcombine.high %v1134_v30, %v1134_v30  ;;  %v3350_v19 = vrot.slane %v3349_v14, 1 }
 0x229   :  { %v5322_v21 = vunpack.c.l.b16 %v15482_v22  ;;  %v5441_v11 = vsel %vm5399_vm10, %v5320_v10, %v5319_v20  ;;  %v3344_v15 = vmax.f32 %v3342_v25, %v3343_v51  ;;  %v3357_v24 = vrot.slane %v3356_v40, 1 }
 0x22a   :  { %v5442_v32 = vsel %vm5401_vm11, %v5321_v8, %v5441_v11  ;;  %v3361_v9 = vmax.f32 %v3359_v46, %v3360_v34  ;;  %v1669_v56 = vrot.slane %v1134_v30, %v17092_v61  ;;  %v3351_v41 = vmax.f32 %v3349_v14, %v3350_v19 }
 0x22b   :  { %v4532_v45 = vsel %vm4374_vm9, %v3344_v15, -inf  ;;  %v1676_v2 = vrot.slane %v1662_v48, %v17092_v61  ;;  %v17833_v37 = vsel %vm5403_vm12, %v5322_v21, %v5442_v32  ;;  %v3358_v29 = vmax.f32 %v3356_v40, %v3357_v24 }
 0x22c   :  { %v3362_v18 = vrot.slane %v3361_v9, 2  ;;  %v1677_v62 = vcombine.high %v1669_v56, %v1669_v56  ;;  %v3282_v60 = vsel %vm2581_vm8, %v1669_v56, -inf  ;;  %v4535_v28 = vsel %vm4374_vm9, %v3351_v41, -inf }
 0x22d   :  { %v1678_v4 = vcombine.high %v1676_v2, %v1676_v2  ;;  %v3283_v27 = vrot.slane %v3282_v60, 4  ;;  %v3296_v33 = vsel %vm2581_vm8, %v1676_v2, -inf  ;;  %v4538_v57 = vsel %vm4374_vm9, %v3358_v29, -inf }
 0x22e   :  { %v3363_v30 = vmax.f32 %v3361_v9, %v3362_v18  ;;  %v3289_v3 = vsel %vm2581_vm8, %v1677_v62, -inf  ;;  %v3297_v54 = vrot.slane %v3296_v33, 4  ;;  %v1075_v63 = vadd.f32 %v17694_v44, %v17810_v36 }
 0x22f   :  { %v3284_v7 = vmax.f32 %v3282_v60, %v3283_v27  ;;  %v3290_v55 = vrot.slane %v3289_v3, 4  ;;  %v3303_v5 = vsel %vm2581_vm8, %v1678_v4, -inf  ;;  %v1002_v25 = vmul.f32 %v17750_v0, %v17560_v59 }
 0x230   :  { %v3364_v31 = vrot.slane %v3363_v30, 1  ;;  %v3298_v23 = vmax.f32 %v3296_v33, %v3297_v54  ;;  %v3304_v52 = vrot.slane %v3303_v5, 4  ;;  %v1139_v20 = vmax.f32 %v1075_v63, 0.0 }
 0x231   :  { %v3285_v1 = vrot.slane %v3284_v7, 2  ;;  %v3291_v13 = vmax.f32 %v3289_v3, %v3290_v55  ;;  %v17847_v35 = vmul.f32 %v17750_v0, %v17597_v12  ;;  %v1073_v51 = vadd.f32 %v17694_v44, %v1002_v25 }
 0x232   :  { %v3365_v46 = vmax.f32 %v3363_v30, %v3364_v31  ;;  %v3299_v22 = vrot.slane %v3298_v23, 2  ;;  %v3305_v10 = vmax.f32 %v3303_v5, %v3304_v52  ;;  %v1747_v8 = vcombine.high %v1139_v20, %v1139_v20 }
 0x233   :  { %v3286_v14 = vmax.f32 %v3284_v7, %v3285_v1  ;;  %v3292_v36 = vrot.slane %v3291_v13, 2  ;;  %v1754_v40 = vrot.slane %v1139_v20, %v17092_v61  ;;  %v17852_v21 = vmax.f32 %v1073_v51, 0.0 }
 0x234   :  { %v4541_v34 = vsel %vm4374_vm9, %v3365_v46, -inf  ;;  %v3300_v59 = vmax.f32 %v3298_v23, %v3299_v22  ;;  %v3306_v48 = vrot.slane %v3305_v10, 2  ;;  %v1761_v12 = vrot.slane %v1747_v8, %v17092_v61  ;;  %v16430_v22 = vld [vmem:[%s21030_s4 + $0x18] sm:$0xff]  }
 0x235   :  { %v3287_v11 = vrot.slane %v3286_v14, 1  ;;  %v3293_v15 = vmax.f32 %v3291_v13, %v3292_v36  ;;  %v1762_v19 = vcombine.high %v1754_v40, %v1754_v40  ;;  %v3422_v9 = vsel %vm2581_vm8, %v1754_v40, -inf  ;;  %v17867_v36 = vpop.f32.mrb[32].mxu1  ;;  %15886 = vmatprep.subr.bf16.mxu1 %v16430_v22 }
 0x236   :  { %v3301_v32 = vrot.slane %v3300_v59, 1  ;;  %v3307_v24 = vmax.f32 %v3305_v10, %v3306_v48  ;;  %v1713_v56 = vcombine.high %v17852_v21, %v17852_v21  ;;  %v1763_v29 = vcombine.high %v1761_v12, %v1761_v12  ;;  %15887 = vmatpush3.bf16.msra.mxu1 %v16430_v22 }
 0x237   :  { %v3288_v41 = vmax.f32 %v3286_v14, %v3287_v11  ;;  %v3294_v2 = vrot.slane %v3293_v15, 1  ;;  %v3423_v18 = vrot.slane %v3422_v9, 4  ;;  %v3429_v4 = vsel %vm2581_vm8, %v1762_v19, -inf  ;;  %v17870_v19 = vpop.f32.mrb[33].mxu1 }
 0x238   :  { %v3302_v62 = vmax.f32 %v3300_v59, %v3301_v32  ;;  %v3308_v60 = vrot.slane %v3307_v24, 1  ;;  %v3436_v27 = vsel %vm2581_vm8, %v1761_v12, -inf  ;;  %v3430_v54 = vrot.slane %v3429_v4, 4 }
 0x239   :  { %v3295_v33 = vmax.f32 %v3293_v15, %v3294_v2  ;;  %v4531_v30 = vsel %vm4374_vm9, %v3288_v41, -inf  ;;  %v3424_v3 = vmax.f32 %v3422_v9, %v3423_v18  ;;  %v3437_v63 = vrot.slane %v3436_v27, 4 }
 0x23a   :  { %v3309_v7 = vmax.f32 %v3307_v24, %v3308_v60  ;;  %v4533_v55 = vmax.f32 %v4531_v30, %v4532_v45  ;;  %v4537_v5 = vsel %vm4374_vm9, %v3302_v62, -inf  ;;  %v3431_v25 = vmax.f32 %v3429_v4, %v3430_v54 }
 0x23b   :  { %v4534_v31 = vsel %vm4374_vm9, %v3295_v33, -inf  ;;  %v4539_v23 = vmax.f32 %v4537_v5, %v4538_v57  ;;  %v3425_v52 = vrot.slane %v3424_v3, 2  ;;  %v3438_v46 = vmax.f32 %v3436_v27, %v3437_v63  ;;  %v5607_v57 = vld [vmem:[#allocation2 + $0x3c] sm:$0x1] }
 0x23c   :  { %v4536_v1 = vmax.f32 %v4534_v31, %v4535_v28  ;;  %v4540_v13 = vsel %vm4374_vm9, %v3309_v7, -inf  ;;  %v15483_v20 = vpack.c.bf16 %v4533_v55, %v4533_v55  ;;  %v3432_v14 = vrot.slane %v3431_v25, 2 }
 0x23d   :  { %v4542_v10 = vmax.f32 %v4540_v13, %v4541_v34  ;;  %v15485_v51 = vpack.c.bf16 %v4539_v23, %v4539_v23  ;;  %v3426_v45 = vmax.f32 %v3424_v3, %v3425_v52  ;;  %v3439_v59 = vrot.slane %v3438_v46, 2  ;;  %v96_v52 = vld [vmem:[#allocation2 + $0x40] sm:$0x1] }
 0x23e   :  { %v15484_v8 = vpack.c.bf16 %v4536_v1, %v4536_v1  ;;  %v5323_v40 = vunpack.c.l.b16 %v15483_v20  ;;  %v3443_v28 = vsel %vm2581_vm8, %v1763_v29, -inf  ;;  %v3433_v12 = vmax.f32 %v3431_v25, %v3432_v14 }
 0x23f   :  { %v5325_v48 = vunpack.c.l.b16 %v15485_v51  ;;  %v15565_v11 = vpack.c.bf16 %v4542_v10, %v4542_v10  ;;  %v3427_v15 = vrot.slane %v3426_v45, 1  ;;  %v3440_v24 = vmax.f32 %v3438_v46, %v3439_v59  ;;  %v158_v46 = vld [vmem:[#allocation2 + $0x44] sm:$0x1] }
 0x240   :  { %v5324_v34 = vunpack.c.l.b16 %v15484_v8  ;;  %v5444_v32 = vsel %vm5405_vm13, %v5323_v40, %v17833_v37  ;;  %v3444_v9 = vrot.slane %v3443_v28, 4  ;;  %v3434_v18 = vrot.slane %v3433_v12, 1  ;;  %v5604_v37 = vld [vmem:[#allocation2 + $0x38] sm:$0xf] }
 0x241   :  { %v5608_v41 = vsel %vm17067_vm7, %v15565_v11, %v5607_v57  ;;  %v3428_v2 = vmax.f32 %v3426_v45, %v3427_v15  ;;  %v1720_v29 = vrot.slane %v17852_v21, %v17092_v61  ;;  %v3441_v60 = vrot.slane %v3440_v24, 1 }
 0x242   :  { %v5445_v62 = vsel %vm5407_vm14, %v5324_v34, %v5444_v32  ;;  %5609 = vst [vmem:[#allocation2 + $0x3c] sm:$0x1] %v5608_v41  ;;  %v3445_v4 = vmax.f32 %v3443_v28, %v3444_v9  ;;  %v1727_v27 = vrot.slane %v1713_v56, %v17092_v61  ;;  %v3435_v30 = vmax.f32 %v3433_v12, %v3434_v18 }
 0x243   :  { %v5446_v33 = vsel %vm5409_vm0, %v5325_v48, %v5445_v62  ;;  %v17882_v3 = vsel %vm4374_vm9, %v3428_v2, -inf  ;;  %v1728_v54 = vcombine.high %v1720_v29, %v1720_v29  ;;  %v3442_v55 = vmax.f32 %v3440_v24, %v3441_v60 }
 0x244   :  { %v5513_v7 = vpack.c.b16 %v5446_v33, %v5446_v33  ;;  %v3446_v5 = vrot.slane %v3445_v4, 2  ;;  %v1729_v63 = vcombine.high %v1727_v27, %v1727_v27  ;;  %v17885_v21 = vsel %vm4374_vm9, %v3435_v30, -inf }
 0x245   :  { %v3366_v31 = vsel %vm2581_vm8, %v1720_v29, -inf  ;;  %v3373_v23 = vsel %vm2581_vm8, %v1728_v54, -inf  ;;  %v3380_v56 = vsel %vm2581_vm8, %v1727_v27, -inf  ;;  %v4550_v13 = vsel %vm4374_vm9, %v3442_v55, -inf }
 0x246   :  { %v5605_v25 = vsel %vm17218_vm1, %v5513_v7, %v5604_v37  ;;  %v3447_v1 = vmax.f32 %v3445_v4, %v3446_v5  ;;  %v3367_v20 = vrot.slane %v3366_v31, 4  ;;  %v3374_v22 = vrot.slane %v3373_v23, 4 }
 0x247   :  { %5606 = vst [vmem:[#allocation2 + $0x38] sm:$0xf] %v5605_v25  ;;  %v3381_v10 = vrot.slane %v3380_v56, 4  ;;  %v3387_v51 = vsel %vm2581_vm8, %v1729_v63, -inf  ;;  %v1076_v45 = vadd.f32 %v17694_v44, %v17847_v35  ;;  %v97_v57 = vsel %vm17067_vm7, 0, %v96_v52 }
 0x248   :  { %v3448_v14 = vrot.slane %v3447_v1, 1  ;;  %v3368_v8 = vmax.f32 %v3366_v31, %v3367_v20  ;;  %v3388_v40 = vrot.slane %v3387_v51, 4  ;;  %v3375_v59 = vmax.f32 %v3373_v23, %v3374_v22  ;;  %98 = vst [vmem:[#allocation2 + $0x40] sm:$0x1] %v97_v57  ;;  %v17907_v31 = vpop.f32.mrb[34].mxu1 }
 0x249   :  { %v3382_v28 = vmax.f32 %v3380_v56, %v3381_v10  ;;  %v1140_v48 = vmax.f32 %v1076_v45, 0.0  ;;  %v159_v11 = vsel %vm17059_vm5, 0, %v158_v46  ;;  %v1003_v35 = vmul.f32 %v17750_v0, %v17613_v17 }
 0x24a   :  { %v3449_v15 = vmax.f32 %v3447_v1, %v3448_v14  ;;  %v3369_v12 = vrot.slane %v3368_v8, 2  ;;  %v3389_v34 = vmax.f32 %v3387_v51, %v3388_v40  ;;  %160 = vst [vmem:[#allocation2 + $0x44] sm:$0x1] %v159_v11  ;;  %v3376_v32 = vrot.slane %v3375_v59, 2 }
 0x24b   :  { %v3383_v24 = vrot.slane %v3382_v28, 2  ;;  %v1764_v9 = vcombine.high %v1140_v48, %v1140_v48  ;;  %v1771_v41 = vrot.slane %v1140_v48, %v17092_v61  ;;  %v1074_v62 = vadd.f32 %v17694_v44, %v1003_v35 }
 0x24c   :  { %v4553_v2 = vsel %vm4374_vm9, %v3449_v15, -inf  ;;  %v3370_v18 = vmax.f32 %v3368_v8, %v3369_v12  ;;  %v3390_v29 = vrot.slane %v3389_v34, 2  ;;  %v3377_v60 = vmax.f32 %v3375_v59, %v3376_v32 }
 0x24d   :  { %v3384_v4 = vmax.f32 %v3382_v28, %v3383_v24  ;;  %v1778_v27 = vrot.slane %v1764_v9, %v17092_v61  ;;  %v1779_v33 = vcombine.high %v1771_v41, %v1771_v41  ;;  %v3450_v17 = vsel %vm2581_vm8, %v1771_v41, -inf }
 0x24e   :  { %v3371_v37 = vrot.slane %v3370_v18, 1  ;;  %v3391_v30 = vmax.f32 %v3389_v34, %v3390_v29  ;;  %v1138_v54 = vmax.f32 %v1074_v62, 0.0  ;;  %v3378_v7 = vrot.slane %v3377_v60, 1 }
 0x24f   :  { %v3385_v55 = vrot.slane %v3384_v4, 1  ;;  %v1780_v5 = vcombine.high %v1778_v27, %v1778_v27  ;;  %v3451_v63 = vrot.slane %v3450_v17, 4  ;;  %v3457_v44 = vsel %vm2581_vm8, %v1779_v33, -inf }
 0x250   :  { %v3372_v23 = vmax.f32 %v3370_v18, %v3371_v37  ;;  %v3392_v56 = vrot.slane %v3391_v30, 1  ;;  %v3464_v52 = vsel %vm2581_vm8, %v1778_v27, -inf  ;;  %v3379_v25 = vmax.f32 %v3377_v60, %v3378_v7  ;;  %v17918_v60 = vpop.f32.mrb[35].mxu1 }
 0x251   :  { %v3386_v1 = vmax.f32 %v3384_v4, %v3385_v55  ;;  %v3452_v20 = vmax.f32 %v3450_v17, %v3451_v63  ;;  %v3458_v46 = vrot.slane %v3457_v44, 4  ;;  %v3465_v51 = vrot.slane %v3464_v52, 4 }
 0x252   :  { %v3393_v22 = vmax.f32 %v3391_v30, %v3392_v56  ;;  %v4543_v10 = vsel %vm4374_vm9, %v3372_v23, -inf  ;;  %v3471_v45 = vsel %vm2581_vm8, %v1780_v5, -inf  ;;  %v4546_v8 = vsel %vm4374_vm9, %v3379_v25, -inf }
 0x253   :  { %v4545_v14 = vmax.f32 %v4543_v10, %v17882_v3  ;;  %v4549_v40 = vsel %vm4374_vm9, %v3386_v1, -inf  ;;  %v3453_v57 = vrot.slane %v3452_v20, 2  ;;  %v4548_v59 = vmax.f32 %v4546_v8, %v17885_v21 }
 0x254   :  { %v4551_v28 = vmax.f32 %v4549_v40, %v4550_v13  ;;  %v4552_v48 = vsel %vm4374_vm9, %v3393_v22, -inf  ;;  %v3459_v11 = vmax.f32 %v3457_v44, %v3458_v46  ;;  %v3466_v35 = vmax.f32 %v3464_v52, %v3465_v51 }
 0x255   :  { %v4554_v15 = vmax.f32 %v4552_v48, %v4553_v2  ;;  %v15487_v12 = vpack.c.bf16 %v4545_v14, %v4545_v14  ;;  %v3454_v34 = vmax.f32 %v3452_v20, %v3453_v57  ;;  %v15488_v32 = vpack.c.bf16 %v4548_v59, %v4548_v59 }
 0x256   :  { %v15489_v24 = vpack.c.bf16 %v4551_v28, %v4551_v28  ;;  %v3460_v9 = vrot.slane %v3459_v11, 2  ;;  %v3472_v41 = vrot.slane %v3471_v45, 4  ;;  %v3467_v62 = vrot.slane %v3466_v35, 2 }
 0x257   :  { %v15490_v3 = vpack.c.bf16 %v4554_v15, %v4554_v15  ;;  %v5327_v18 = vunpack.c.l.b16 %v15487_v12  ;;  %v3455_v29 = vrot.slane %v3454_v34, 1  ;;  %v5328_v4 = vunpack.c.l.b16 %v15488_v32 }
 0x258   :  { %v5329_v21 = vunpack.c.l.b16 %v15489_v24  ;;  %v3461_v13 = vmax.f32 %v3459_v11, %v3460_v9  ;;  %v3473_v27 = vmax.f32 %v3471_v45, %v3472_v41  ;;  %v3468_v2 = vmax.f32 %v3466_v35, %v3467_v62  ;;  %v105_v9 = vld [vmem:[#allocation2 + $0x58] sm:$0x1] }
 0x259   :  { %v5330_v33 = vunpack.c.l.b16 %v15490_v3  ;;  %v3456_v37 = vmax.f32 %v3454_v34, %v3455_v29  ;;  %v1730_v30 = vcombine.high %v1138_v54, %v1138_v54  ;;  %v5447_v17 = vsel %vm5399_vm10, %v5328_v4, %v5327_v18 }
 0x25a   :  { %v3462_v7 = vrot.slane %v3461_v13, 1  ;;  %v3474_v55 = vrot.slane %v3473_v27, 2  ;;  %v1737_v5 = vrot.slane %v1138_v54, %v17092_v61  ;;  %v5448_v63 = vsel %vm5401_vm11, %v5329_v21, %v5447_v17  ;;  %v17946_v21 = vld [vmem:[%s21029_s3] ss:$0 sm:$0xff] }
 0x25b   :  { %v3469_v23 = vrot.slane %v3468_v2, 1  ;;  %v17924_v56 = vsel %vm4374_vm9, %v3456_v37, -inf  ;;  %v1744_v44 = vrot.slane %v1730_v30, %v17092_v61  ;;  %v17934_v12 = vsel %vm5403_vm12, %v5330_v33, %v5448_v63 }
 0x25c   :  { %v3463_v52 = vmax.f32 %v3461_v13, %v3462_v7  ;;  %v3475_v25 = vmax.f32 %v3473_v27, %v3474_v55  ;;  %v1745_v1 = vcombine.high %v1737_v5, %v1737_v5  ;;  %v3394_v20 = vsel %vm2581_vm8, %v1737_v5, -inf }
 0x25d   :  { %v3470_v46 = vmax.f32 %v3468_v2, %v3469_v23  ;;  %v1746_v22 = vcombine.high %v1744_v44, %v1744_v44  ;;  %v3395_v10 = vrot.slane %v3394_v20, 4  ;;  %v3408_v51 = vsel %vm2581_vm8, %v1744_v44, -inf }
 0x25e   :  { %v3476_v45 = vrot.slane %v3475_v25, 1  ;;  %v4559_v54 = vsel %vm4374_vm9, %v3463_v52, -inf  ;;  %v3401_v14 = vsel %vm2581_vm8, %v1745_v1, -inf  ;;  %v3409_v8 = vrot.slane %v3408_v51, 4 }
 0x25f   :  { %v4562_v40 = vsel %vm4374_vm9, %v3470_v46, -inf  ;;  %v3396_v57 = vmax.f32 %v3394_v20, %v3395_v10  ;;  %v3402_v59 = vrot.slane %v3401_v14, 4  ;;  %v3415_v28 = vsel %vm2581_vm8, %v1746_v22, -inf }
 0x260   :  { %v3477_v48 = vmax.f32 %v3475_v25, %v3476_v45  ;;  %v3410_v11 = vmax.f32 %v3408_v51, %v3409_v8  ;;  %v3416_v15 = vrot.slane %v3415_v28, 4  ;;  %v1008_v32 = vmul.f32 %v17750_v0, %v17655_v26 }
 0x261   :  { %v3397_v34 = vrot.slane %v3396_v57, 2  ;;  %v3403_v35 = vmax.f32 %v3401_v14, %v3402_v59  ;;  %v1006_v24 = vmul.f32 %v17750_v0, %v17683_v16  ;;  %v1009_v29 = vmul.f32 %v17750_v0, %v17717_v58  ;;  %v167_v16 = vld [vmem:[#allocation2 + $0x5c] sm:$0x1] }
 0x262   :  { %v4565_v41 = vsel %vm4374_vm9, %v3477_v48, -inf  ;;  %v3411_v3 = vrot.slane %v3410_v11, 2  ;;  %v3417_v18 = vmax.f32 %v3415_v28, %v3416_v15  ;;  %v1079_v26 = vadd.f32 %v17946_v21, %v1008_v32 }
 0x263   :  { %v3398_v62 = vmax.f32 %v3396_v57, %v3397_v34  ;;  %v3404_v4 = vrot.slane %v3403_v35, 2  ;;  %v1077_v13 = vadd.f32 %v17946_v21, %v1006_v24  ;;  %v1080_v37 = vadd.f32 %v17946_v21, %v1009_v29 }
 0x264   :  { %v3412_v27 = vmax.f32 %v3410_v11, %v3411_v3  ;;  %v3418_v33 = vrot.slane %v3417_v18, 2  ;;  %v106_v2 = vsel %vm17067_vm7, 0, %v105_v9  ;;  %v1143_v30 = vmax.f32 %v1079_v26, 0.0  ;;  %v5613_v26 = vld [vmem:[#allocation2 + $0x44] sm:$0x1] }
 0x265   :  { %v3399_v58 = vrot.slane %v3398_v62, 1  ;;  %v3405_v0 = vmax.f32 %v3403_v35, %v3404_v4  ;;  %v1141_v17 = vmax.f32 %v1077_v13, 0.0  ;;  %107 = vst [vmem:[#allocation2 + $0x58] sm:$0x1] %v106_v2  ;;  %v17953_v5 = vmax.f32 %v1080_v37, 0.0 }
 0x266   :  { %v3413_v7 = vrot.slane %v3412_v27, 1  ;;  %v3419_v55 = vmax.f32 %v3417_v18, %v3418_v33  ;;  %v168_v63 = vsel %vm17059_vm5, 0, %v167_v16  ;;  %v1815_v52 = vcombine.high %v1143_v30, %v1143_v30 }
 0x267   :  { %v3400_v23 = vmax.f32 %v3398_v62, %v3399_v58  ;;  %v3406_v44 = vrot.slane %v3405_v0, 1  ;;  %v1822_v25 = vrot.slane %v1143_v30, %v17092_v61  ;;  %169 = vst [vmem:[#allocation2 + $0x5c] sm:$0x1] %v168_v63  ;;  %v1781_v46 = vcombine.high %v1141_v17, %v1141_v17 }
 0x268   :  { %v3414_v1 = vmax.f32 %v3412_v27, %v3413_v7  ;;  %v3420_v20 = vrot.slane %v3419_v55, 1  ;;  %v1788_v22 = vrot.slane %v1141_v17, %v17092_v61  ;;  %v1829_v45 = vrot.slane %v1815_v52, %v17092_v61 }
 0x269   :  { %v3407_v10 = vmax.f32 %v3405_v0, %v3406_v44  ;;  %v4555_v51 = vsel %vm4374_vm9, %v3400_v23, -inf  ;;  %v1830_v14 = vcombine.high %v1822_v25, %v1822_v25  ;;  %v3534_v28 = vsel %vm2581_vm8, %v1822_v25, -inf  ;;  %v5610_v25 = vld [vmem:[#allocation2 + $0x40] sm:$0xf] }
 0x26a   :  { %v3421_v8 = vmax.f32 %v3419_v55, %v3420_v20  ;;  %v4557_v57 = vmax.f32 %v4555_v51, %v17924_v56  ;;  %v4561_v59 = vsel %vm4374_vm9, %v3414_v1, -inf  ;;  %v1831_v15 = vcombine.high %v1829_v45, %v1829_v45 }
 0x26b   :  { %v4558_v48 = vsel %vm4374_vm9, %v3407_v10, -inf  ;;  %v4563_v11 = vmax.f32 %v4561_v59, %v4562_v40  ;;  %v3535_v34 = vrot.slane %v3534_v28, 4  ;;  %v3541_v9 = vsel %vm2581_vm8, %v1830_v14, -inf }
 0x26c   :  { %v4560_v35 = vmax.f32 %v4558_v48, %v4559_v54  ;;  %v4564_v32 = vsel %vm4374_vm9, %v3421_v8, -inf  ;;  %v15491_v24 = vpack.c.bf16 %v4557_v57, %v4557_v57  ;;  %v3542_v62 = vrot.slane %v3541_v9, 4 }
 0x26d   :  { %v4566_v3 = vmax.f32 %v4564_v32, %v4565_v41  ;;  %v15493_v18 = vpack.c.bf16 %v4563_v11, %v4563_v11  ;;  %v3536_v29 = vmax.f32 %v3534_v28, %v3535_v34  ;;  %v3548_v13 = vsel %vm2581_vm8, %v1829_v45, -inf }
 0x26e   :  { %v15492_v56 = vpack.c.bf16 %v4560_v35, %v4560_v35  ;;  %v5331_v4 = vunpack.c.l.b16 %v15491_v24  ;;  %v3555_v16 = vsel %vm2581_vm8, %v1831_v15, -inf  ;;  %v3543_v54 = vmax.f32 %v3541_v9, %v3542_v62 }
 0x26f   :  { %v5333_v40 = vunpack.c.l.b16 %v15493_v18  ;;  %v15566_v27 = vpack.c.bf16 %v4566_v3, %v4566_v3  ;;  %v3537_v33 = vrot.slane %v3536_v29, 2  ;;  %v3549_v58 = vrot.slane %v3548_v13, 4 }
 0x270   :  { %v5332_v37 = vunpack.c.l.b16 %v15492_v56  ;;  %v5450_v2 = vsel %vm5405_vm13, %v5331_v4, %v17934_v12  ;;  %v3556_v41 = vrot.slane %v3555_v16, 4  ;;  %v3544_v17 = vrot.slane %v3543_v54, 2 }
 0x271   :  { %v5614_v0 = vsel %vm17067_vm7, %v15566_v27, %v5613_v26  ;;  %v3538_v30 = vmax.f32 %v3536_v29, %v3537_v33  ;;  %v1795_v7 = vrot.slane %v1781_v46, %v17092_v61  ;;  %v3550_v63 = vmax.f32 %v3548_v13, %v3549_v58 }
 0x272   :  { %v5451_v55 = vsel %vm5407_vm14, %v5332_v37, %v5450_v2  ;;  %5615 = vst [vmem:[#allocation2 + $0x44] sm:$0x1] %v5614_v0  ;;  %v3557_v23 = vmax.f32 %v3555_v16, %v3556_v41  ;;  %v1796_v44 = vcombine.high %v1788_v22, %v1788_v22  ;;  %v3545_v12 = vmax.f32 %v3543_v54, %v3544_v17 }
 0x273   :  { %v5452_v52 = vsel %vm5409_vm0, %v5333_v40, %v5451_v55  ;;  %v3539_v1 = vrot.slane %v3538_v30, 1  ;;  %v1797_v20 = vcombine.high %v1795_v7, %v1795_v7  ;;  %v3551_v51 = vrot.slane %v3550_v63, 2 }
 0x274   :  { %v5515_v10 = vpack.c.b16 %v5452_v52, %v5452_v52  ;;  %v3558_v45 = vrot.slane %v3557_v23, 2  ;;  %v3478_v14 = vsel %vm2581_vm8, %v1788_v22, -inf  ;;  %v3546_v57 = vrot.slane %v3545_v12, 1 }
 0x275   :  { %v3540_v8 = vmax.f32 %v3538_v30, %v3539_v1  ;;  %v3479_v46 = vrot.slane %v3478_v14, 4  ;;  %v3485_v59 = vsel %vm2581_vm8, %v1796_v44, -inf  ;;  %v3552_v48 = vmax.f32 %v3550_v63, %v3551_v51 }
 0x276   :  { %v5611_v28 = vsel %vm17218_vm1, %v5515_v10, %v5610_v25  ;;  %v3559_v11 = vmax.f32 %v3557_v23, %v3558_v45  ;;  %v3486_v15 = vrot.slane %v3485_v59, 4  ;;  %v3547_v34 = vmax.f32 %v3545_v12, %v3546_v57 }
 0x277   :  { %5612 = vst [vmem:[#allocation2 + $0x40] sm:$0xf] %v5611_v28  ;;  %v4568_v35 = vsel %vm4374_vm9, %v3540_v8, -inf  ;;  %v3480_v32 = vmax.f32 %v3478_v14, %v3479_v46  ;;  %v3492_v24 = vsel %vm2581_vm8, %v1795_v7, -inf  ;;  %v3553_v9 = vrot.slane %v3552_v48, 1 }
 0x278   :  { %v3560_v22 = vrot.slane %v3559_v11, 1  ;;  %v3487_v3 = vmax.f32 %v3485_v59, %v3486_v15  ;;  %v3493_v18 = vrot.slane %v3492_v24, 4  ;;  %v4571_v29 = vsel %vm4374_vm9, %v3547_v34, -inf }
 0x279   :  { %v3481_v62 = vrot.slane %v3480_v32, 2  ;;  %v3499_v56 = vsel %vm2581_vm8, %v1797_v20, -inf  ;;  %v1832_v4 = vcombine.high %v17953_v5, %v17953_v5  ;;  %v3554_v26 = vmax.f32 %v3552_v48, %v3553_v9 }
 0x27a   :  { %v3561_v13 = vmax.f32 %v3559_v11, %v3560_v22  ;;  %v3488_v16 = vrot.slane %v3487_v3, 2  ;;  %v3494_v40 = vmax.f32 %v3492_v24, %v3493_v18  ;;  %v3500_v33 = vrot.slane %v3499_v56, 4 }
 0x27b   :  { %v3482_v27 = vmax.f32 %v3480_v32, %v3481_v62  ;;  %v1839_v54 = vrot.slane %v17953_v5, %v17092_v61  ;;  %v1846_v37 = vrot.slane %v1832_v4, %v17092_v61  ;;  %v4574_v2 = vsel %vm4374_vm9, %v3554_v26, -inf }
 0x27c   :  { %v4577_v58 = vsel %vm4374_vm9, %v3561_v13, -inf  ;;  %v3489_v41 = vmax.f32 %v3487_v3, %v3488_v16  ;;  %v3495_v0 = vrot.slane %v3494_v40, 2  ;;  %v3501_v17 = vmax.f32 %v3499_v56, %v3500_v33 }
 0x27d   :  { %v3483_v30 = vrot.slane %v3482_v27, 1  ;;  %v1847_v7 = vcombine.high %v1839_v54, %v1839_v54  ;;  %v1848_v55 = vcombine.high %v1846_v37, %v1846_v37  ;;  %v3562_v44 = vsel %vm2581_vm8, %v1839_v54, -inf }
 0x27e   :  { %v3490_v63 = vrot.slane %v3489_v41, 1  ;;  %v3496_v23 = vmax.f32 %v3494_v40, %v3495_v0  ;;  %v3576_v52 = vsel %vm2581_vm8, %v1846_v37, -inf  ;;  %v3502_v5 = vrot.slane %v3501_v17, 2 }
 0x27f   :  { %v3484_v25 = vmax.f32 %v3482_v27, %v3483_v30  ;;  %v3563_v1 = vrot.slane %v3562_v44, 4  ;;  %v3569_v12 = vsel %vm2581_vm8, %v1847_v7, -inf  ;;  %v3577_v45 = vrot.slane %v3576_v52, 4 }
 0x280   :  { %v3491_v20 = vmax.f32 %v3489_v41, %v3490_v63  ;;  %v3497_v10 = vrot.slane %v3496_v23, 1  ;;  %v3570_v51 = vrot.slane %v3569_v12, 4  ;;  %v3503_v14 = vmax.f32 %v3501_v17, %v3502_v5 }
 0x281   :  { %v4567_v8 = vsel %vm4374_vm9, %v3484_v25, -inf  ;;  %v3564_v57 = vmax.f32 %v3562_v44, %v3563_v1  ;;  %v3583_v46 = vsel %vm2581_vm8, %v1848_v55, -inf  ;;  %v3578_v24 = vmax.f32 %v3576_v52, %v3577_v45 }
 0x282   :  { %v3498_v59 = vmax.f32 %v3496_v23, %v3497_v10  ;;  %v4569_v28 = vmax.f32 %v4567_v8, %v4568_v35  ;;  %v4570_v48 = vsel %vm4374_vm9, %v3491_v20, -inf  ;;  %v3571_v11 = vmax.f32 %v3569_v12, %v3570_v51  ;;  %v108_v20 = vld [vmem:[#allocation2 + $0x60] sm:$0x1] }
 0x283   :  { %v3504_v15 = vrot.slane %v3503_v14, 1  ;;  %v4572_v34 = vmax.f32 %v4570_v48, %v4571_v29  ;;  %v3565_v32 = vrot.slane %v3564_v57, 2  ;;  %v3584_v18 = vrot.slane %v3583_v46, 4 }
 0x284   :  { %v4573_v9 = vsel %vm4374_vm9, %v3498_v59, -inf  ;;  %v15495_v22 = vpack.c.bf16 %v4569_v28, %v4569_v28  ;;  %v3572_v3 = vrot.slane %v3571_v11, 2  ;;  %v3579_v40 = vrot.slane %v3578_v24, 2  ;;  %v170_v59 = vld [vmem:[#allocation2 + $0x64] sm:$0x1] }
 0x285   :  { %v3505_v62 = vmax.f32 %v3503_v14, %v3504_v15  ;;  %v4575_v56 = vmax.f32 %v4573_v9, %v4574_v2  ;;  %v15496_v4 = vpack.c.bf16 %v4572_v34, %v4572_v34  ;;  %v3566_v26 = vmax.f32 %v3564_v57, %v3565_v32  ;;  %v18003_v2 = vld [vmem:[%s21028_s2] ss:$0 sm:$0xff]  ;;  %v18030_v15 = vpop.f32.mrb[36].mxu1 }
 0x286   :  { %v5335_v13 = vunpack.c.l.b16 %v15495_v22  ;;  %v3573_v16 = vmax.f32 %v3571_v11, %v3572_v3  ;;  %v3585_v35 = vmax.f32 %v3583_v46, %v3584_v18  ;;  %v3580_v0 = vmax.f32 %v3578_v24, %v3579_v40 }
 0x287   :  { %v4576_v27 = vsel %vm4374_vm9, %v3505_v62, -inf  ;;  %v15497_v33 = vpack.c.bf16 %v4575_v56, %v4575_v56  ;;  %v5336_v54 = vunpack.c.l.b16 %v15496_v4  ;;  %v3567_v29 = vrot.slane %v3566_v26, 1 }
 0x288   :  { %v4578_v37 = vmax.f32 %v4576_v27, %v4577_v58  ;;  %v3574_v41 = vrot.slane %v3573_v16, 1  ;;  %v3586_v30 = vrot.slane %v3585_v35, 2  ;;  %v1007_v63 = vmul.f32 %v18003_v2, %v17728_v43 }
 0x289   :  { %v5337_v17 = vunpack.c.l.b16 %v15497_v33  ;;  %v5453_v7 = vsel %vm5399_vm10, %v5336_v54, %v5335_v13  ;;  %v3568_v55 = vmax.f32 %v3566_v26, %v3567_v29  ;;  %v3581_v52 = vrot.slane %v3580_v0, 1 }
 0x28a   :  { %v15498_v23 = vpack.c.bf16 %v4578_v37, %v4578_v37  ;;  %v3575_v44 = vmax.f32 %v3573_v16, %v3574_v41  ;;  %v3587_v25 = vmax.f32 %v3585_v35, %v3586_v30  ;;  %v1078_v1 = vadd.f32 %v17946_v21, %v1007_v63 }
 0x28b   :  { %v5454_v58 = vsel %vm5401_vm11, %v5337_v17, %v5453_v7  ;;  %v18009_v5 = vsel %vm4374_vm9, %v3568_v55, -inf  ;;  %v1012_v12 = vmul.f32 %v18003_v2, %v17771_v49  ;;  %v3582_v51 = vmax.f32 %v3580_v0, %v3581_v52 }
 0x28c   :  { %v5338_v10 = vunpack.c.l.b16 %v15498_v23  ;;  %v3588_v45 = vrot.slane %v3587_v25, 1  ;;  %v18015_v43 = vsel %vm4374_vm9, %v3575_v44, -inf  ;;  %v1142_v14 = vmax.f32 %v1078_v1, 0.0 }
 0x28d   :  { %v1083_v8 = vadd.f32 %v17946_v21, %v1012_v12  ;;  %v1010_v57 = vmul.f32 %v18003_v2, %v17773_v6  ;;  %v1013_v46 = vmul.f32 %v18003_v2, %v17816_v39  ;;  %v18023_v49 = vsel %vm4374_vm9, %v3582_v51, -inf  ;;  %v18059_v12 = vpop.f32.mrb[37].mxu1 }
 0x28e   :  { %v3589_v28 = vmax.f32 %v3587_v25, %v3588_v45  ;;  %v18026_v48 = vsel %vm5403_vm12, %v5338_v10, %v5454_v58  ;;  %v109_v11 = vsel %vm17067_vm7, 0, %v108_v20  ;;  %v1798_v34 = vcombine.high %v1142_v14, %v1142_v14 }
 0x28f   :  { %v1805_v32 = vrot.slane %v1142_v14, %v17092_v61  ;;  %v1147_v6 = vmax.f32 %v1083_v8, 0.0  ;;  %v1081_v24 = vadd.f32 %v17946_v21, %v1010_v57  ;;  %110 = vst [vmem:[#allocation2 + $0x60] sm:$0x1] %v109_v11  ;;  %v1084_v9 = vadd.f32 %v17946_v21, %v1013_v46  ;;  %v18061_v14 = vpop.f32.mrb[38].mxu1 }
 0x290   :  { %v18035_v39 = vsel %vm4374_vm9, %v3589_v28, -inf  ;;  %v171_v22 = vsel %vm17059_vm5, 0, %v170_v59  ;;  %v18042_v3 = vmul.f32 %v18003_v2, %v17825_v47  ;;  %v1812_v18 = vrot.slane %v1798_v34, %v17092_v61  ;;  %v18063_v28 = vpop.f32.mrb[39].mxu1 }
 0x291   :  { %v1813_v62 = vcombine.high %v1805_v32, %v1805_v32  ;;  %v3506_v56 = vsel %vm2581_vm8, %v1805_v32, -inf  ;;  %v1883_v4 = vcombine.high %v1147_v6, %v1147_v6  ;;  %172 = vst [vmem:[#allocation2 + $0x64] sm:$0x1] %v171_v22  ;;  %v1890_v13 = vrot.slane %v1147_v6, %v17092_v61 }
 0x292   :  { %v3507_v26 = vrot.slane %v3506_v56, 4  ;;  %v18047_v16 = vmax.f32 %v1081_v24, 0.0  ;;  %v18049_v40 = vmax.f32 %v1084_v9, 0.0  ;;  %v1814_v35 = vcombine.high %v1812_v18, %v1812_v18 }
 0x293   :  { %v3513_v27 = vsel %vm2581_vm8, %v1813_v62, -inf  ;;  %v3520_v47 = vsel %vm2581_vm8, %v1812_v18, -inf  ;;  %v1897_v33 = vrot.slane %v1883_v4, %v17092_v61  ;;  %v1898_v41 = vcombine.high %v1890_v13, %v1890_v13 }
 0x294   :  { %v3508_v54 = vmax.f32 %v3506_v56, %v3507_v26  ;;  %v3514_v29 = vrot.slane %v3513_v27, 4  ;;  %v3521_v37 = vrot.slane %v3520_v47, 4  ;;  %v3527_v0 = vsel %vm2581_vm8, %v1814_v35, -inf }
 0x295   :  { %v1899_v30 = vcombine.high %v1897_v33, %v1897_v33  ;;  %v3646_v17 = vsel %vm2581_vm8, %v1890_v13, -inf  ;;  %v3660_v7 = vsel %vm2581_vm8, %v1897_v33, -inf  ;;  %v3528_v44 = vrot.slane %v3527_v0, 4 }
 0x296   :  { %v3509_v55 = vrot.slane %v3508_v54, 2  ;;  %v3515_v63 = vmax.f32 %v3513_v27, %v3514_v29  ;;  %v3522_v23 = vmax.f32 %v3520_v47, %v3521_v37  ;;  %v3647_v52 = vrot.slane %v3646_v17, 4 }
 0x297   :  { %v3653_v25 = vsel %vm2581_vm8, %v1898_v41, -inf  ;;  %v3661_v58 = vrot.slane %v3660_v7, 4  ;;  %v3667_v1 = vsel %vm2581_vm8, %v1899_v30, -inf  ;;  %v3529_v45 = vmax.f32 %v3527_v0, %v3528_v44 }
 0x298   :  { %v3510_v20 = vmax.f32 %v3508_v54, %v3509_v55  ;;  %v3516_v10 = vrot.slane %v3515_v63, 2  ;;  %v3523_v51 = vrot.slane %v3522_v23, 2  ;;  %v3648_v8 = vmax.f32 %v3646_v17, %v3647_v52 }
 0x299   :  { %v3654_v57 = vrot.slane %v3653_v25, 4  ;;  %v3662_v46 = vmax.f32 %v3660_v7, %v3661_v58  ;;  %v3668_v59 = vrot.slane %v3667_v1, 4  ;;  %v3530_v6 = vrot.slane %v3529_v45, 2 }
 0x29a   :  { %v3511_v11 = vrot.slane %v3510_v20, 1  ;;  %v3517_v34 = vmax.f32 %v3515_v63, %v3516_v10  ;;  %v3524_v32 = vmax.f32 %v3522_v23, %v3523_v51  ;;  %v3649_v24 = vrot.slane %v3648_v8, 2 }
 0x29b   :  { %v3655_v9 = vmax.f32 %v3653_v25, %v3654_v57  ;;  %v3663_v22 = vrot.slane %v3662_v46, 2  ;;  %v3669_v18 = vmax.f32 %v3667_v1, %v3668_v59  ;;  %v3531_v26 = vmax.f32 %v3529_v45, %v3530_v6 }
 0x29c   :  { %v3512_v62 = vmax.f32 %v3510_v20, %v3511_v11  ;;  %v3518_v56 = vrot.slane %v3517_v34, 1  ;;  %v3525_v4 = vrot.slane %v3524_v32, 1  ;;  %v3650_v13 = vmax.f32 %v3648_v8, %v3649_v24 }
 0x29d   :  { %v3656_v35 = vrot.slane %v3655_v9, 2  ;;  %v3664_v27 = vmax.f32 %v3662_v46, %v3663_v22  ;;  %v3670_v47 = vrot.slane %v3669_v18, 2  ;;  %v3532_v29 = vrot.slane %v3531_v26, 1  ;;  %v5619_v46 = vld [vmem:[#allocation2 + $0x5c] sm:$0x1] }
 0x29e   :  { %v3519_v33 = vmax.f32 %v3517_v34, %v3518_v56  ;;  %v3526_v54 = vmax.f32 %v3524_v32, %v3525_v4  ;;  %v4579_v37 = vsel %vm4374_vm9, %v3512_v62, -inf  ;;  %v3651_v0 = vrot.slane %v3650_v13, 1 }
 0x29f   :  { %v4581_v41 = vmax.f32 %v4579_v37, %v18009_v5  ;;  %v3657_v30 = vmax.f32 %v3655_v9, %v3656_v35  ;;  %v3665_v17 = vrot.slane %v3664_v27, 1  ;;  %v3533_v7 = vmax.f32 %v3531_v26, %v3532_v29 }
 0x2a0   :  { %v4582_v55 = vsel %vm4374_vm9, %v3519_v33, -inf  ;;  %v4585_v63 = vsel %vm4374_vm9, %v3526_v54, -inf  ;;  %v3671_v23 = vmax.f32 %v3669_v18, %v3670_v47  ;;  %v3652_v58 = vmax.f32 %v3650_v13, %v3651_v0  ;;  %v5616_v13 = vld [vmem:[#allocation2 + $0x58] sm:$0xf] }
 0x2a1   :  { %v4584_v44 = vmax.f32 %v4582_v55, %v18015_v43  ;;  %v4587_v52 = vmax.f32 %v4585_v63, %v18023_v49  ;;  %v15499_v25 = vpack.c.bf16 %v4581_v41, %v4581_v41  ;;  %v4588_v1 = vsel %vm4374_vm9, %v3533_v7, -inf }
 0x2a2   :  { %v3658_v20 = vrot.slane %v3657_v30, 1  ;;  %v3666_v10 = vmax.f32 %v3664_v27, %v3665_v17  ;;  %v3672_v5 = vrot.slane %v3671_v23, 1  ;;  %v4590_v51 = vmax.f32 %v4588_v1, %v18035_v39 }
 0x2a3   :  { %v15500_v45 = vpack.c.bf16 %v4584_v44, %v4584_v44  ;;  %v15501_v8 = vpack.c.bf16 %v4587_v52, %v4587_v52  ;;  %v5339_v57 = vunpack.c.l.b16 %v15499_v25  ;;  %v18074_v34 = vsel %vm4374_vm9, %v3652_v58, -inf }
 0x2a4   :  { %v3659_v59 = vmax.f32 %v3657_v30, %v3658_v20  ;;  %v3673_v11 = vmax.f32 %v3671_v23, %v3672_v5  ;;  %v18077_v43 = vsel %vm4374_vm9, %v3666_v10, -inf  ;;  %v15567_v24 = vpack.c.bf16 %v4590_v51, %v4590_v51 }
 0x2a5   :  { %v5340_v49 = vunpack.c.l.b16 %v15500_v45  ;;  %v5341_v32 = vunpack.c.l.b16 %v15501_v8  ;;  %v5456_v6 = vsel %vm5405_vm13, %v5339_v57, %v18026_v48  ;;  %v1849_v22 = vcombine.high %v18047_v16, %v18047_v16 }
 0x2a6   :  { %v18082_v39 = vsel %vm4374_vm9, %v3659_v59, -inf  ;;  %v18085_v9 = vsel %vm4374_vm9, %v3673_v11, -inf  ;;  %v1856_v18 = vrot.slane %v18047_v16, %v17092_v61  ;;  %v5620_v56 = vsel %vm17067_vm7, %v15567_v24, %v5619_v46 }
 0x2a7   :  { %v5457_v62 = vsel %vm5407_vm14, %v5340_v49, %v5456_v6  ;;  %v1900_v48 = vcombine.high %v18049_v40, %v18049_v40  ;;  %v1907_v4 = vrot.slane %v18049_v40, %v17092_v61  ;;  %5621 = vst [vmem:[#allocation2 + $0x5c] sm:$0x1] %v5620_v56  ;;  %v1863_v35 = vrot.slane %v1849_v22, %v17092_v61 }
 0x2a8   :  { %v5458_v26 = vsel %vm5409_vm0, %v5341_v32, %v5457_v62  ;;  %v1864_v27 = vcombine.high %v1856_v18, %v1856_v18  ;;  %v3590_v16 = vsel %vm2581_vm8, %v1856_v18, -inf }
 0x2a9   :  { %v5517_v47 = vpack.c.b16 %v5458_v26, %v5458_v26  ;;  %v3591_v33 = vrot.slane %v3590_v16, 4  ;;  %v1914_v54 = vrot.slane %v1900_v48, %v17092_v61  ;;  %v1915_v29 = vcombine.high %v1907_v4, %v1907_v4 }
 0x2aa   :  { %v1865_v37 = vcombine.high %v1863_v35, %v1863_v35  ;;  %v3597_v41 = vsel %vm2581_vm8, %v1864_v27, -inf  ;;  %v3604_v0 = vsel %vm2581_vm8, %v1863_v35, -inf  ;;  %v3674_v40 = vsel %vm2581_vm8, %v1907_v4, -inf }
 0x2ab   :  { %v5617_v30 = vsel %vm17218_vm1, %v5517_v47, %v5616_v13  ;;  %v3592_v17 = vmax.f32 %v3590_v16, %v3591_v33  ;;  %v3598_v7 = vrot.slane %v3597_v41, 4  ;;  %v3605_v55 = vrot.slane %v3604_v0, 4 }
 0x2ac   :  { %5618 = vst [vmem:[#allocation2 + $0x58] sm:$0xf] %v5617_v30  ;;  %v3611_v63 = vsel %vm2581_vm8, %v1865_v37, -inf  ;;  %v1916_v23 = vcombine.high %v1914_v54, %v1914_v54  ;;  %v3675_v44 = vrot.slane %v3674_v40, 4  ;;  %v3681_v52 = vsel %vm2581_vm8, %v1915_v29, -inf }
 0x2ad   :  { %v3593_v25 = vrot.slane %v3592_v17, 2  ;;  %v3599_v58 = vmax.f32 %v3597_v41, %v3598_v7  ;;  %v3606_v1 = vmax.f32 %v3604_v0, %v3605_v55  ;;  %v3612_v20 = vrot.slane %v3611_v63, 4 }
 0x2ae   :  { %v3676_v10 = vmax.f32 %v3674_v40, %v3675_v44  ;;  %v3682_v5 = vrot.slane %v3681_v52, 4  ;;  %v3688_v51 = vsel %vm2581_vm8, %v1914_v54, -inf  ;;  %v3695_v45 = vsel %vm2581_vm8, %v1916_v23, -inf }
 0x2af   :  { %v3594_v8 = vmax.f32 %v3592_v17, %v3593_v25  ;;  %v3600_v57 = vrot.slane %v3599_v58, 2  ;;  %v3607_v46 = vrot.slane %v3606_v1, 2  ;;  %v3613_v59 = vmax.f32 %v3611_v63, %v3612_v20 }
 0x2b0   :  { %v3677_v11 = vrot.slane %v3676_v10, 2  ;;  %v3683_v49 = vmax.f32 %v3681_v52, %v3682_v5  ;;  %v3689_v32 = vrot.slane %v3688_v51, 4  ;;  %v3696_v6 = vrot.slane %v3695_v45, 4 }
 0x2b1   :  { %v3595_v24 = vrot.slane %v3594_v8, 1  ;;  %v3601_v22 = vmax.f32 %v3599_v58, %v3600_v57  ;;  %v3608_v18 = vmax.f32 %v3606_v1, %v3607_v46  ;;  %v3614_v62 = vrot.slane %v3613_v59, 2 }
 0x2b2   :  { %v3678_v56 = vmax.f32 %v3676_v10, %v3677_v11  ;;  %v3684_v48 = vrot.slane %v3683_v49, 2  ;;  %v3690_v4 = vmax.f32 %v3688_v51, %v3689_v32  ;;  %v3697_v26 = vmax.f32 %v3695_v45, %v3696_v6 }
 0x2b3   :  { %v3596_v13 = vmax.f32 %v3594_v8, %v3595_v24  ;;  %v3602_v35 = vrot.slane %v3601_v22, 1  ;;  %v3609_v27 = vrot.slane %v3608_v18, 1  ;;  %v3615_v16 = vmax.f32 %v3613_v59, %v3614_v62 }
 0x2b4   :  { %v3679_v47 = vrot.slane %v3678_v56, 1  ;;  %v3685_v33 = vmax.f32 %v3683_v49, %v3684_v48  ;;  %v3691_v54 = vrot.slane %v3690_v4, 2  ;;  %v3698_v29 = vrot.slane %v3697_v26, 2 }
 0x2b5   :  { %v3603_v37 = vmax.f32 %v3601_v22, %v3602_v35  ;;  %v3610_v41 = vmax.f32 %v3608_v18, %v3609_v27  ;;  %v3616_v0 = vrot.slane %v3615_v16, 1  ;;  %v4591_v40 = vsel %vm4374_vm9, %v3596_v13, -inf }
 0x2b6   :  { %v4593_v30 = vmax.f32 %v4591_v40, %v18074_v34  ;;  %v3680_v17 = vmax.f32 %v3678_v56, %v3679_v47  ;;  %v3686_v7 = vrot.slane %v3685_v33, 1  ;;  %v3692_v55 = vmax.f32 %v3690_v4, %v3691_v54  ;;  %v111_v56 = vld [vmem:[#allocation2 + $0x68] sm:$0x1] }
 0x2b7   :  { %v3617_v63 = vmax.f32 %v3615_v16, %v3616_v0  ;;  %v4594_v23 = vsel %vm4374_vm9, %v3603_v37, -inf  ;;  %v4597_v44 = vsel %vm4374_vm9, %v3610_v41, -inf  ;;  %v3699_v52 = vmax.f32 %v3697_v26, %v3698_v29 }
 0x2b8   :  { %v4596_v25 = vmax.f32 %v4594_v23, %v18082_v39  ;;  %v4599_v58 = vmax.f32 %v4597_v44, %v18077_v43  ;;  %v15503_v1 = vpack.c.bf16 %v4593_v30, %v4593_v30  ;;  %v3687_v20 = vmax.f32 %v3685_v33, %v3686_v7 }
 0x2b9   :  { %v4600_v10 = vsel %vm4374_vm9, %v3617_v63, -inf  ;;  %v3693_v5 = vrot.slane %v3692_v55, 1  ;;  %v3700_v51 = vrot.slane %v3699_v52, 1  ;;  %v18119_v34 = vsel %vm4374_vm9, %v3680_v17, -inf }
 0x2ba   :  { %v4602_v45 = vmax.f32 %v4600_v10, %v18085_v9  ;;  %v15504_v8 = vpack.c.bf16 %v4596_v25, %v4596_v25  ;;  %v15505_v57 = vpack.c.bf16 %v4599_v58, %v4599_v58  ;;  %v5343_v46 = vunpack.c.l.b16 %v15503_v1 }
 0x2bb   :  { %v3694_v59 = vmax.f32 %v3692_v55, %v3693_v5  ;;  %v3701_v11 = vmax.f32 %v3699_v52, %v3700_v51  ;;  %v18123_v39 = vsel %vm4374_vm9, %v3687_v20, -inf  ;;  %v1082_v43 = vadd.f32 %v17946_v21, %v18042_v3 }
 0x2bc   :  { %v15506_v49 = vpack.c.bf16 %v4602_v45, %v4602_v45  ;;  %v5344_v32 = vunpack.c.l.b16 %v15504_v8  ;;  %v5345_v6 = vunpack.c.l.b16 %v15505_v57  ;;  %v1016_v24 = vmul.f32 %v18003_v2, %v17867_v36  ;;  %v18168_v8 = vpop.f32.mrb[40].mxu1 }
 0x2bd   :  { %v18130_v22 = vsel %vm4374_vm9, %v3694_v59, -inf  ;;  %v18133_v9 = vsel %vm4374_vm9, %v3701_v11, -inf  ;;  %v1146_v18 = vmax.f32 %v1082_v43, 0.0  ;;  %v1014_v62 = vmul.f32 %v18003_v2, %v17870_v19  ;;  %v18172_v43 = vpop.f32.mrb[41].mxu1 }
 0x2be   :  { %v5346_v48 = vunpack.c.l.b16 %v15506_v49  ;;  %v5459_v3 = vsel %vm5399_vm10, %v5344_v32, %v5343_v46  ;;  %v1087_v4 = vadd.f32 %v17946_v21, %v1016_v24  ;;  %v1017_v26 = vmul.f32 %v18003_v2, %v17907_v31 }
 0x2bf   :  { %v5460_v36 = vsel %vm5401_vm11, %v5345_v6, %v5459_v3  ;;  %v1866_v13 = vcombine.high %v1146_v18, %v1146_v18  ;;  %v1873_v35 = vrot.slane %v1146_v18, %v17092_v61  ;;  %v1085_v27 = vadd.f32 %v17946_v21, %v1014_v62  ;;  %v18174_v18 = vpop.f32.mrb[42].mxu1 }
 0x2c0   :  { %v18145_v16 = vsel %vm5403_vm12, %v5346_v48, %v5460_v36  ;;  %v1151_v19 = vmax.f32 %v1087_v4, 0.0  ;;  %v1088_v47 = vadd.f32 %v17946_v21, %v1017_v26  ;;  %v112_v33 = vsel %vm17067_vm7, 0, %v111_v56 }
 0x2c1   :  { %v1880_v54 = vrot.slane %v1866_v13, %v17092_v61  ;;  %v1881_v29 = vcombine.high %v1873_v35, %v1873_v35  ;;  %v3618_v31 = vsel %vm2581_vm8, %v1873_v35, -inf  ;;  %v18152_v37 = vmax.f32 %v1085_v27, 0.0  ;;  %113 = vst [vmem:[#allocation2 + $0x68] sm:$0x1] %v112_v33  ;;  %v18177_v33 = vpop.f32.mrb[43].mxu1 }
 0x2c2   :  { %v3619_v41 = vrot.slane %v3618_v31, 4  ;;  %v1951_v0 = vcombine.high %v1151_v19, %v1151_v19  ;;  %v1958_v40 = vrot.slane %v1151_v19, %v17092_v61  ;;  %v18155_v30 = vmax.f32 %v1088_v47, 0.0 }
 0x2c3   :  { %v1882_v17 = vcombine.high %v1880_v54, %v1880_v54  ;;  %v3625_v21 = vsel %vm2581_vm8, %v1881_v29, -inf  ;;  %v3632_v7 = vsel %vm2581_vm8, %v1880_v54, -inf  ;;  %v1917_v55 = vcombine.high %v18152_v37, %v18152_v37 }
 0x2c4   :  { %v3620_v63 = vmax.f32 %v3618_v31, %v3619_v41  ;;  %v3626_v23 = vrot.slane %v3625_v21, 4  ;;  %v3633_v44 = vrot.slane %v3632_v7, 4  ;;  %v1965_v52 = vrot.slane %v1951_v0, %v17092_v61 }
 0x2c5   :  { %v3639_v25 = vsel %vm2581_vm8, %v1882_v17, -inf  ;;  %v1966_v58 = vcombine.high %v1958_v40, %v1958_v40  ;;  %v3758_v1 = vsel %vm2581_vm8, %v1958_v40, -inf  ;;  %v18166_v20 = vrot.slane %v18152_v37, %v17092_v61 }
 0x2c6   :  { %v3621_v10 = vrot.slane %v3620_v63, 2  ;;  %v3627_v5 = vmax.f32 %v3625_v21, %v3626_v23  ;;  %v3634_v51 = vmax.f32 %v3632_v7, %v3633_v44  ;;  %v3640_v45 = vrot.slane %v3639_v25, 4 }
 0x2c7   :  { %v1967_v57 = vcombine.high %v1965_v52, %v1965_v52  ;;  %v3759_v46 = vrot.slane %v3758_v1, 4  ;;  %v3765_v59 = vsel %vm2581_vm8, %v1966_v58, -inf  ;;  %v3772_v11 = vsel %vm2581_vm8, %v1965_v52, -inf }
 0x2c8   :  { %v3622_v49 = vmax.f32 %v3620_v63, %v3621_v10  ;;  %v3628_v32 = vrot.slane %v3627_v5, 2  ;;  %v3635_v6 = vrot.slane %v3634_v51, 2  ;;  %v3641_v24 = vmax.f32 %v3639_v25, %v3640_v45 }
 0x2c9   :  { %v3760_v62 = vmax.f32 %v3758_v1, %v3759_v46  ;;  %v3766_v56 = vrot.slane %v3765_v59, 4  ;;  %v3773_v48 = vrot.slane %v3772_v11, 4  ;;  %v3779_v3 = vsel %vm2581_vm8, %v1967_v57, -inf }
 0x2ca   :  { %v3623_v4 = vrot.slane %v3622_v49, 1  ;;  %v3629_v26 = vmax.f32 %v3627_v5, %v3628_v32  ;;  %v3636_v36 = vmax.f32 %v3634_v51, %v3635_v6  ;;  %v3642_v13 = vrot.slane %v3641_v24, 2 }
 0x2cb   :  { %v3761_v35 = vrot.slane %v3760_v62, 2  ;;  %v3767_v27 = vmax.f32 %v3765_v59, %v3766_v56  ;;  %v3774_v19 = vmax.f32 %v3772_v11, %v3773_v48  ;;  %v3780_v47 = vrot.slane %v3779_v3, 4 }
 0x2cc   :  { %v3624_v54 = vmax.f32 %v3622_v49, %v3623_v4  ;;  %v3630_v29 = vrot.slane %v3629_v26, 1  ;;  %v3637_v31 = vrot.slane %v3636_v36, 1  ;;  %v3643_v41 = vmax.f32 %v3641_v24, %v3642_v13 }
 0x2cd   :  { %v3762_v0 = vmax.f32 %v3760_v62, %v3761_v35  ;;  %v3768_v40 = vrot.slane %v3767_v27, 2  ;;  %v3775_v17 = vrot.slane %v3774_v19, 2  ;;  %v3781_v21 = vmax.f32 %v3779_v3, %v3780_v47  ;;  %v5625_v3 = vld [vmem:[#allocation2 + $0x64] sm:$0x1] }
 0x2ce   :  { %v3631_v7 = vmax.f32 %v3629_v26, %v3630_v29  ;;  %v3638_v63 = vmax.f32 %v3636_v36, %v3637_v31  ;;  %v3644_v23 = vrot.slane %v3643_v41, 1  ;;  %v4603_v44 = vsel %vm4374_vm9, %v3624_v54, -inf }
 0x2cf   :  { %v4605_v52 = vmax.f32 %v4603_v44, %v18119_v34  ;;  %v3763_v25 = vrot.slane %v3762_v0, 1  ;;  %v3769_v58 = vmax.f32 %v3767_v27, %v3768_v40  ;;  %v3776_v1 = vmax.f32 %v3774_v19, %v3775_v17  ;;  %v5622_v40 = vld [vmem:[#allocation2 + $0x60] sm:$0xf]  ;;  %v173_v44 = vld [vmem:[#allocation2 + $0x6c] sm:$0x1] }
 0x2d0   :  { %v3645_v10 = vmax.f32 %v3643_v41, %v3644_v23  ;;  %v4606_v5 = vsel %vm4374_vm9, %v3631_v7, -inf  ;;  %v4609_v51 = vsel %vm4374_vm9, %v3638_v63, -inf  ;;  %v3782_v45 = vrot.slane %v3781_v21, 2 }
 0x2d1   :  { %v4608_v57 = vmax.f32 %v4606_v5, %v18123_v39  ;;  %v4611_v46 = vmax.f32 %v4609_v51, %v18130_v22  ;;  %v15507_v59 = vpack.c.bf16 %v4605_v52, %v4605_v52  ;;  %v3764_v11 = vmax.f32 %v3762_v0, %v3763_v25 }
 0x2d2   :  { %v4612_v49 = vsel %vm4374_vm9, %v3645_v10, -inf  ;;  %v3770_v32 = vrot.slane %v3769_v58, 1  ;;  %v3777_v6 = vrot.slane %v3776_v1, 1  ;;  %v3783_v34 = vmax.f32 %v3781_v21, %v3782_v45 }
 0x2d3   :  { %v4614_v24 = vmax.f32 %v4612_v49, %v18133_v9  ;;  %v15508_v62 = vpack.c.bf16 %v4608_v57, %v4608_v57  ;;  %v15509_v56 = vpack.c.bf16 %v4611_v46, %v4611_v46  ;;  %v5347_v48 = vunpack.c.l.b16 %v15507_v59 }
 0x2d4   :  { %v3771_v4 = vmax.f32 %v3769_v58, %v3770_v32  ;;  %v3778_v26 = vmax.f32 %v3776_v1, %v3777_v6  ;;  %v3784_v36 = vrot.slane %v3783_v34, 1  ;;  %v18188_v39 = vsel %vm4374_vm9, %v3764_v11, -inf }
 0x2d5   :  { %v5348_v22 = vunpack.c.l.b16 %v15508_v62  ;;  %v5349_v13 = vunpack.c.l.b16 %v15509_v56  ;;  %v5462_v35 = vsel %vm5405_vm13, %v5347_v48, %v18145_v16  ;;  %v15568_v27 = vpack.c.bf16 %v4614_v24, %v4614_v24 }
 0x2d6   :  { %v3785_v19 = vmax.f32 %v3783_v34, %v3784_v36  ;;  %v18193_v47 = vsel %vm4374_vm9, %v3771_v4, -inf  ;;  %v18196_v9 = vsel %vm4374_vm9, %v3778_v26, -inf  ;;  %v1931_v54 = vrot.slane %v1917_v55, %v17092_v61  ;;  %v18226_v34 = vpop.f32.mrb[44].mxu1 }
 0x2d7   :  { %v5463_v29 = vsel %vm5407_vm14, %v5348_v22, %v5462_v35  ;;  %v5626_v31 = vsel %vm17067_vm7, %v15568_v27, %v5625_v3  ;;  %v1932_v16 = vcombine.high %v18166_v20, %v18166_v20  ;;  %v3702_v41 = vsel %vm2581_vm8, %v18166_v20, -inf  ;;  %v18231_v36 = vpop.f32.mrb[45].mxu1 }
 0x2d8   :  { %v5464_v0 = vsel %vm5409_vm0, %v5349_v13, %v5463_v29  ;;  %5627 = vst [vmem:[#allocation2 + $0x64] sm:$0x1] %v5626_v31  ;;  %v18211_v17 = vsel %vm4374_vm9, %v3785_v19, -inf  ;;  %v1933_v37 = vcombine.high %v1931_v54, %v1931_v54  ;;  %v3703_v55 = vrot.slane %v3702_v41, 4 }
 0x2d9   :  { %v5519_v21 = vpack.c.b16 %v5464_v0, %v5464_v0  ;;  %v3709_v7 = vsel %vm2581_vm8, %v1932_v16, -inf  ;;  %v3716_v63 = vsel %vm2581_vm8, %v1931_v54, -inf  ;;  %v1968_v23 = vcombine.high %v18155_v30, %v18155_v30 }
 0x2da   :  { %v3704_v52 = vmax.f32 %v3702_v41, %v3703_v55  ;;  %v3710_v20 = vrot.slane %v3709_v7, 4  ;;  %v3717_v25 = vrot.slane %v3716_v63, 4  ;;  %v3723_v58 = vsel %vm2581_vm8, %v1933_v37, -inf }
 0x2db   :  { %v5623_v1 = vsel %vm17218_vm1, %v5519_v21, %v5622_v40  ;;  %v3724_v10 = vrot.slane %v3723_v58, 4  ;;  %v1975_v5 = vrot.slane %v18155_v30, %v17092_v61  ;;  %v1982_v51 = vrot.slane %v1968_v23, %v17092_v61 }
 0x2dc   :  { %5624 = vst [vmem:[#allocation2 + $0x60] sm:$0xf] %v5623_v1  ;;  %v3705_v45 = vrot.slane %v3704_v52, 2  ;;  %v3711_v57 = vmax.f32 %v3709_v7, %v3710_v20  ;;  %v3718_v46 = vmax.f32 %v3716_v63, %v3717_v25  ;;  %v174_v59 = vsel %vm17059_vm5, 0, %v173_v44 }
 0x2dd   :  { %v3725_v11 = vmax.f32 %v3723_v58, %v3724_v10  ;;  %v1983_v49 = vcombine.high %v1975_v5, %v1975_v5  ;;  %v1984_v32 = vcombine.high %v1982_v51, %v1982_v51  ;;  %v3786_v6 = vsel %vm2581_vm8, %v1975_v5, -inf  ;;  %175 = vst [vmem:[#allocation2 + $0x6c] sm:$0x1] %v174_v59 }
 0x2de   :  { %v3706_v24 = vmax.f32 %v3704_v52, %v3705_v45  ;;  %v3712_v62 = vrot.slane %v3711_v57, 2  ;;  %v3719_v30 = vrot.slane %v3718_v46, 2  ;;  %v3787_v56 = vrot.slane %v3786_v6, 4 }
 0x2df   :  { %v3726_v48 = vrot.slane %v3725_v11, 2  ;;  %v3793_v3 = vsel %vm2581_vm8, %v1983_v49, -inf  ;;  %v3800_v4 = vsel %vm2581_vm8, %v1982_v51, -inf  ;;  %v3807_v26 = vsel %vm2581_vm8, %v1984_v32, -inf }
 0x2e0   :  { %v3707_v22 = vrot.slane %v3706_v24, 1  ;;  %v3713_v13 = vmax.f32 %v3711_v57, %v3712_v62  ;;  %v3720_v35 = vmax.f32 %v3718_v46, %v3719_v30  ;;  %v3788_v27 = vmax.f32 %v3786_v6, %v3787_v56 }
 0x2e1   :  { %v3727_v19 = vmax.f32 %v3725_v11, %v3726_v48  ;;  %v3794_v54 = vrot.slane %v3793_v3, 4  ;;  %v3801_v29 = vrot.slane %v3800_v4, 4  ;;  %v3808_v31 = vrot.slane %v3807_v26, 4 }
 0x2e2   :  { %v3708_v16 = vmax.f32 %v3706_v24, %v3707_v22  ;;  %v3714_v41 = vrot.slane %v3713_v13, 1  ;;  %v3721_v0 = vrot.slane %v3720_v35, 1  ;;  %v3789_v40 = vrot.slane %v3788_v27, 2 }
 0x2e3   :  { %v3728_v37 = vrot.slane %v3727_v19, 1  ;;  %v3795_v55 = vmax.f32 %v3793_v3, %v3794_v54  ;;  %v3802_v21 = vmax.f32 %v3800_v4, %v3801_v29  ;;  %v3809_v7 = vmax.f32 %v3807_v26, %v3808_v31  ;;  %v18250_v31 = vld [vmem:[%s21029_s3] ss:$0 sm:$0xff] }
 0x2e4   :  { %v3715_v63 = vmax.f32 %v3713_v13, %v3714_v41  ;;  %v3722_v23 = vmax.f32 %v3720_v35, %v3721_v0  ;;  %v4615_v44 = vsel %vm4374_vm9, %v3708_v16, -inf  ;;  %v3790_v52 = vmax.f32 %v3788_v27, %v3789_v40  ;;  %v5666_v0 = vld [vmem:[#allocation2 + $0x10] sm:$0xf] }
 0x2e5   :  { %v3729_v20 = vmax.f32 %v3727_v19, %v3728_v37  ;;  %v4617_v25 = vmax.f32 %v4615_v44, %v18188_v39  ;;  %v3796_v58 = vrot.slane %v3795_v55, 2  ;;  %v3803_v1 = vrot.slane %v3802_v21, 2  ;;  %v5665_v19 = vld [vmem:[#allocation2 + $0x8] sm:$0xf] }
 0x2e6   :  { %v4618_v10 = vsel %vm4374_vm9, %v3715_v63, -inf  ;;  %v4621_v5 = vsel %vm4374_vm9, %v3722_v23, -inf  ;;  %v3791_v51 = vrot.slane %v3790_v52, 1  ;;  %v3810_v45 = vrot.slane %v3809_v7, 2 }
 0x2e7   :  { %v4620_v57 = vmax.f32 %v4618_v10, %v18193_v47  ;;  %v4623_v46 = vmax.f32 %v4621_v5, %v18196_v9  ;;  %v4624_v59 = vsel %vm4374_vm9, %v3729_v20, -inf  ;;  %v15511_v11 = vpack.c.bf16 %v4617_v25, %v4617_v25  ;;  %v5686_v20 = vld [vmem:[#allocation2 + $0x14] sm:$0x1] }
 0x2e8   :  { %v4626_v49 = vmax.f32 %v4624_v59, %v18211_v17  ;;  %v3792_v32 = vmax.f32 %v3790_v52, %v3791_v51  ;;  %v3797_v6 = vmax.f32 %v3795_v55, %v3796_v58  ;;  %v3804_v39 = vmax.f32 %v3802_v21, %v3803_v1  ;;  %v5667_v51 = vld [vmem:[#allocation2 + $0x18] sm:$0xf] }
 0x2e9   :  { %v15512_v24 = vpack.c.bf16 %v4620_v57, %v4620_v57  ;;  %v15513_v62 = vpack.c.bf16 %v4623_v46, %v4623_v46  ;;  %v5351_v30 = vunpack.c.l.b16 %v15511_v11  ;;  %v3811_v56 = vmax.f32 %v3809_v7, %v3810_v45  ;;  %v18287_v57 = vpop.f32.mrb[46].mxu1 }
 0x2ea   :  { %v15514_v48 = vpack.c.bf16 %v4626_v49, %v4626_v49  ;;  %v3798_v3 = vrot.slane %v3797_v6, 1  ;;  %v3805_v4 = vrot.slane %v3804_v39, 1  ;;  %v18242_v26 = vsel %vm4374_vm9, %v3792_v32, -inf }
 0x2eb   :  { %v5352_v47 = vunpack.c.l.b16 %v15512_v24  ;;  %v5353_v9 = vunpack.c.l.b16 %v15513_v62  ;;  %v3812_v22 = vrot.slane %v3811_v56, 1  ;;  %v1015_v13 = vmul.f32 %v18003_v2, %v17918_v60  ;;  %v5685_v60 = vld [vmem:[#allocation2 + $0xc] sm:$0x1] }
 0x2ec   :  { %v5354_v17 = vunpack.c.l.b16 %v15514_v48  ;;  %v3799_v35 = vmax.f32 %v3797_v6, %v3798_v3  ;;  %v3806_v27 = vmax.f32 %v3804_v39, %v3805_v4  ;;  %v16828_v41 = vmov 0  }
 0x2ed   :  { %v5465_v54 = vsel %vm5399_vm10, %v5352_v47, %v5351_v30  ;;  %v3813_v29 = vmax.f32 %v3811_v56, %v3812_v22  ;;  %v1086_v16 = vadd.f32 %v18250_v31, %v1015_v13  ;;  %59 = vst.msk [vmem:[#allocation2] sm:$0xf] %vm58_vm15, %v16828_v41  ;;  %62 = vst.msk [vmem:[#allocation2 + $0x50] sm:$0xf] %vm58_vm15, %v16828_v41  ;;  %v5718_v23 = vshrl.u32 %v5665_v19, 16 }
 0x2ee   :  { %61 = vst.msk [vmem:[#allocation2 + $0x4] sm:$0x1] %vm60_vm3, %v16828_v41  ;;  %63 = vst.msk [vmem:[#allocation2 + $0x54] sm:$0x1] %vm60_vm3, %v16828_v41  ;;  %v5466_v40 = vsel %vm5401_vm11, %v5353_v9, %v5465_v54  ;;  %v18275_v37 = vsel %vm4374_vm9, %v3799_v35, -inf  ;;  %v18278_v55 = vsel %vm4374_vm9, %v3806_v27, -inf }
 0x2ef   :  { %65 = vst.msk [vmem:[#allocation2 + $0x48] sm:$0xf] %vm58_vm15, %v16828_v41  ;;  %67 = vst.msk [vmem:[#allocation2 + $0x98] sm:$0xf] %vm58_vm15, %v16828_v41  ;;  %v18281_v21 = vsel %vm4374_vm9, %v3813_v29, -inf  ;;  %v1150_v7 = vmax.f32 %v1086_v16, 0.0  ;;  %v18284_v63 = vsel %vm5403_vm12, %v5354_v17, %v5466_v40 }
 0x2f0   :  { %66 = vst.msk [vmem:[#allocation2 + $0x4c] sm:$0x1] %vm60_vm3, %v16828_v41  ;;  %68 = vst.msk [vmem:[#allocation2 + $0x9c] sm:$0x1] %vm60_vm3, %v16828_v41  ;;  %v5721_v44 = vshll.u32 %v5665_v19, 16  ;;  %v5727_v52 = vshll.u32 %v5685_v60, 16 }
 0x2f1   :  { %277 = vst [vmem:[#allocation4] sm:$0x3] %v16828_v41  ;;  %278 = vst [vmem:[#allocation4 + $0x8] sm:$0x3] %v16828_v41  ;;  %v5732_v25 = vshrl.u32 %v5666_v0, 16  ;;  %v5735_v58 = vshll.u32 %v5666_v0, 16  ;;  %v1934_v1 = vcombine.high %v1150_v7, %v1150_v7  ;;  %v1941_v10 = vrot.slane %v1150_v7, %v17092_v61 }
 0x2f2   :  { %280 = vst [vmem:[#allocation4 + $0x6] sm:$0x3] %v16828_v41  ;;  %281 = vst [vmem:[#allocation4 + $0xe] sm:$0x3] %v16828_v41  ;;  %v5720_v5 = vrot.slane %v5718_v23, 4  ;;  %v5741_v45 = vshll.u32 %v5686_v20, 16 }
 0x2f3   :  { %v5723_v46 = vrot.slane %v5721_v44, 5  ;;  %v18289_v59 = vrot.slane %v5727_v52, 5  ;;  %v5734_v11 = vrot.slane %v5732_v25, 4  ;;  %v5737_v49 = vrot.slane %v5735_v58, 5  ;;  %v5687_v54 = vld [vmem:[#allocation2 + $0x1c] sm:$0x1]  ;;  %vm18306_vm3 = vmor %vm5700_vm2, %vm5701_vm4 }
 0x2f4   :  { %v1948_v32 = vrot.slane %v1934_v1, %v17092_v61  ;;  %v1949_v6 = vcombine.high %v1941_v10, %v1941_v10  ;;  %v3730_v39 = vsel %vm2581_vm8, %v1941_v10, -inf  ;;  %v18293_v24 = vrot.slane %v5741_v45, 5  ;;  %v72_v30 = vld [vmem:[#allocation2] sm:$0x1] }
 0x2f5   :  { %v3731_v62 = vrot.slane %v3730_v39, 4  ;;  %v134_v56 = vld [vmem:[#allocation2 + $0x4] sm:$0x1]  ;;  %v5724_v48 = vor.u32 %v5723_v46, %v5720_v5  ;;  %v5738_v3 = vor.u32 %v5737_v49, %v5734_v11  ;;  %v5746_v4 = vshrl.u32 %v5667_v51, 16  ;;  %v18317_v11 = vpop.f32.mrb[47].mxu1 }
 0x2f6   :  { %v1950_v47 = vcombine.high %v1948_v32, %v1948_v32  ;;  %v3737_v9 = vsel %vm2581_vm8, %v1949_v6, -inf  ;;  %v3744_v22 = vsel %vm2581_vm8, %v1948_v32, -inf  ;;  %v73_v13 = vsel %vm17067_vm7, 0, %v72_v30 }
 0x2f7   :  { %v3732_v17 = vmax.f32 %v3730_v39, %v3731_v62  ;;  %v3738_v35 = vrot.slane %v3737_v9, 4  ;;  %v3745_v27 = vrot.slane %v3744_v22, 4  ;;  %74 = vst [vmem:[#allocation2] sm:$0x1] %v73_v13  ;;  %v135_v19 = vsel %vm17059_vm5, 0, %v134_v56 }
 0x2f8   :  { %v3751_v29 = vsel %vm2581_vm8, %v1950_v47, -inf  ;;  %136 = vst [vmem:[#allocation2 + $0x4] sm:$0x1] %v135_v19  ;;  %v18302_v16 = vrot.slane %v5724_v48, 4  ;;  %v5739_v60 = vrot.slane %v5738_v3, 4  ;;  %v5748_v0 = vrot.slane %v5746_v4, 4 }
 0x2f9   :  { %v3733_v40 = vrot.slane %v3732_v17, 2  ;;  %v3739_v7 = vmax.f32 %v3737_v9, %v3738_v35  ;;  %v3746_v23 = vmax.f32 %v3744_v22, %v3745_v27  ;;  %v3752_v44 = vrot.slane %v3751_v29, 4  ;;  %v18328_v47 = vld [vmem:[%s21028_s2] ss:$0 sm:$0xff] }
 0x2fa   :  { %v5730_v20 = vsel %vm18306_vm3, %v18302_v16, %v18289_v59  ;;  %v5744_v25 = vsel %vm18306_vm3, %v5739_v60, %v18293_v24  ;;  %v5749_v58 = vshll.u32 %v5667_v51, 16  ;;  %v5755_v1 = vshll.u32 %v5687_v54, 16 }
 0x2fb   :  { %v3734_v10 = vmax.f32 %v3732_v17, %v3733_v40  ;;  %v3740_v5 = vrot.slane %v3739_v7, 2  ;;  %v3747_v45 = vrot.slane %v3746_v23, 2  ;;  %v3753_v46 = vmax.f32 %v3751_v29, %v3752_v44 }
 0x2fc   :  { %v5751_v49 = vrot.slane %v5749_v58, 5  ;;  %v5757_v32 = vrot.slane %v5755_v1, 5  ;;  %v1020_v6 = vmul.f32 %v18003_v2, %v18030_v15  ;;  %v1018_v39 = vmul.f32 %v18003_v2, %v18059_v12 }
 0x2fd   :  { %v3735_v62 = vrot.slane %v3734_v10, 1  ;;  %v3741_v30 = vmax.f32 %v3739_v7, %v3740_v5  ;;  %v3748_v56 = vmax.f32 %v3746_v23, %v3747_v45  ;;  %v3754_v24 = vrot.slane %v3753_v46, 2 }
 0x2fe   :  { %v5664_v51 = vld [vmem:[#allocation2] sm:$0xf]  ;;  %v5752_v48 = vor.u32 %v5751_v49, %v5748_v0  ;;  %v1091_v3 = vadd.f32 %v18250_v31, %v1020_v6  ;;  %v1089_v4 = vadd.f32 %v18250_v31, %v1018_v39  ;;  %v18332_v15 = vmul.f32 %v18328_v47, %v18061_v14 }
 0x2ff   :  { %v3736_v2 = vmax.f32 %v3734_v10, %v3735_v62  ;;  %v3742_v12 = vrot.slane %v3741_v30, 1  ;;  %v3749_v9 = vrot.slane %v3748_v56, 1  ;;  %v3755_v22 = vmax.f32 %v3753_v46, %v3754_v24  ;;  %v5684_v13 = vld [vmem:[#allocation2 + $0x4] sm:$0x1] }
 0x300   :  { %v5704_v17 = vshrl.u32 %v5664_v51, 16  ;;  %v5707_v35 = vshll.u32 %v5664_v51, 16  ;;  %v5713_v27 = vshll.u32 %v5684_v13, 16  ;;  %v5753_v19 = vrot.slane %v5752_v48, 4  ;;  %v5631_v48 = vld [vmem:[#allocation2 + $0x6c] sm:$0x1] }
 0x301   :  { %v3743_v54 = vmax.f32 %v3741_v30, %v3742_v12  ;;  %v3750_v29 = vmax.f32 %v3748_v56, %v3749_v9  ;;  %v3756_v60 = vrot.slane %v3755_v22, 1  ;;  %v4627_v0 = vsel %vm4374_vm9, %v3736_v2, -inf }
 0x302   :  { %v4629_v40 = vmax.f32 %v4627_v0, %v18242_v26  ;;  %v5706_v7 = vrot.slane %v5704_v17, 4  ;;  %v5709_v23 = vrot.slane %v5707_v35, 5  ;;  %v5715_v14 = vrot.slane %v5713_v27, 5 }
 0x303   :  { %v3757_v44 = vmax.f32 %v3755_v22, %v3756_v60  ;;  %v4630_v58 = vsel %vm4374_vm9, %v3743_v54, -inf  ;;  %v4633_v1 = vsel %vm4374_vm9, %v3750_v29, -inf  ;;  %v5758_v10 = vsel %vm18306_vm3, %v5753_v19, %v5757_v32  ;;  %v5628_v54 = vld [vmem:[#allocation2 + $0x68] sm:$0xf] }
 0x304   :  { %v4632_v5 = vmax.f32 %v4630_v58, %v18275_v37  ;;  %v4635_v45 = vmax.f32 %v4633_v1, %v18278_v55  ;;  %v15515_v46 = vpack.c.bf16 %v4629_v40, %v4629_v40  ;;  %v5710_v49 = vor.u32 %v5709_v23, %v5706_v7 }
 0x305   :  { %v4636_v6 = vsel %vm4374_vm9, %v3757_v44, -inf  ;;  %v14626_v26 = vcombine.low %v5744_v25, %v5758_v10  ;;  %v1155_v39 = vmax.f32 %v1091_v3, 0.0  ;;  %v1153_v62 = vmax.f32 %v1089_v4, 0.0 }
 0x306   :  { %v4638_v30 = vmax.f32 %v4636_v6, %v18281_v21  ;;  %v15516_v56 = vpack.c.bf16 %v4632_v5, %v4632_v5  ;;  %v15517_v24 = vpack.c.bf16 %v4635_v45, %v4635_v45  ;;  %v5355_v51 = vunpack.c.l.b16 %v15515_v46 }
 0x307   :  { %v5711_v2 = vrot.slane %v5710_v49, 4  ;;  %v2019_v12 = vcombine.high %v1155_v39, %v1155_v39  ;;  %v2026_v32 = vrot.slane %v1155_v39, %v17092_v61  ;;  %v1985_v37 = vcombine.high %v1153_v62, %v1153_v62 }
 0x308   :  { %v5356_v9 = vunpack.c.l.b16 %v15516_v56  ;;  %v5357_v55 = vunpack.c.l.b16 %v15517_v24  ;;  %v5468_v22 = vsel %vm5405_vm13, %v5355_v51, %v18284_v63  ;;  %v15569_v13 = vpack.c.bf16 %v4638_v30, %v4638_v30 }
 0x309   :  { %v5716_v25 = vsel %vm18306_vm3, %v5711_v2, %v5715_v14  ;;  %v2033_v21 = vrot.slane %v2019_v12, %v17092_v61  ;;  %v2034_v3 = vcombine.high %v2026_v32, %v2026_v32  ;;  %v3870_v4 = vsel %vm2581_vm8, %v2026_v32, -inf }
 0x30a   :  { %v5469_v17 = vsel %vm5407_vm14, %v5356_v9, %v5468_v22  ;;  %v5632_v35 = vsel %vm17067_vm7, %v15569_v13, %v5631_v48  ;;  %v14625_v63 = vcombine.low %v5716_v25, %v5730_v20  ;;  %v3871_v27 = vrot.slane %v3870_v4, 4 }
 0x30b   :  { %v5470_v19 = vsel %vm5409_vm0, %v5357_v55, %v5469_v17  ;;  %5633 = vst [vmem:[#allocation2 + $0x6c] sm:$0x1] %v5632_v35  ;;  %v2035_v29 = vcombine.high %v2033_v21, %v2033_v21  ;;  %v3877_v60 = vsel %vm2581_vm8, %v2034_v3, -inf  ;;  %v3884_v0 = vsel %vm2581_vm8, %v2033_v21, -inf }
 0x30c   :  { %v5521_v40 = vpack.c.b16 %v5470_v19, %v5470_v19  ;;  %15888 = vmatprep.mubr.msk.bf16.mxu1 %vm4374_vm9, %v14625_v63  ;;  %v3872_v7 = vmax.f32 %v3870_v4, %v3871_v27  ;;  %v3878_v23 = vrot.slane %v3877_v60, 4  ;;  %v3885_v14 = vrot.slane %v3884_v0, 4 }
 0x30d   :  { %15889 = vmatmul.mubr.msk.bf16.vlgmr.msra.gmra.mrb[56].mxu1 %vm4374_vm9, %v14626_v26  ;;  %v3891_v59 = vsel %vm2581_vm8, %v2035_v29, -inf  ;;  %v1992_v16 = vrot.slane %v1153_v62, %v17092_v61  ;;  %v1999_v20 = vrot.slane %v1985_v37, %v17092_v61  ;;  %v1092_v44 = vadd.f32 %v18250_v31, %v18332_v15 }
 0x30e   :  { %v5629_v58 = vsel %vm17218_vm1, %v5521_v40, %v5628_v54  ;;  %v3873_v1 = vrot.slane %v3872_v7, 2  ;;  %v3879_v10 = vmax.f32 %v3877_v60, %v3878_v23  ;;  %v3886_v5 = vmax.f32 %v3884_v0, %v3885_v14  ;;  %v114_v23 = vld [vmem:[#allocation2 + $0x70] sm:$0x1] }
 0x30f   :  { %5630 = vst [vmem:[#allocation2 + $0x68] sm:$0xf] %v5629_v58  ;;  %v3892_v45 = vrot.slane %v3891_v59, 4  ;;  %v2000_v46 = vcombine.high %v1992_v16, %v1992_v16  ;;  %v2001_v49 = vcombine.high %v1999_v20, %v1999_v20  ;;  %v3814_v6 = vsel %vm2581_vm8, %v1992_v16, -inf }
 0x310   :  { %v3874_v26 = vmax.f32 %v3872_v7, %v3873_v1  ;;  %v3880_v39 = vrot.slane %v3879_v10, 2  ;;  %v3887_v62 = vrot.slane %v3886_v5, 2  ;;  %v3815_v30 = vrot.slane %v3814_v6, 4 }
 0x311   :  { %v3893_v56 = vmax.f32 %v3891_v59, %v3892_v45  ;;  %v3821_v24 = vsel %vm2581_vm8, %v2000_v46, -inf  ;;  %v3828_v15 = vsel %vm2581_vm8, %v1999_v20, -inf  ;;  %v3835_v51 = vsel %vm2581_vm8, %v2001_v49, -inf }
 0x312   :  { %v3875_v48 = vrot.slane %v3874_v26, 1  ;;  %v3881_v2 = vmax.f32 %v3879_v10, %v3880_v39  ;;  %v3888_v12 = vmax.f32 %v3886_v5, %v3887_v62  ;;  %v3816_v32 = vmax.f32 %v3814_v6, %v3815_v30 }
 0x313   :  { %v3894_v37 = vrot.slane %v3893_v56, 2  ;;  %v3822_v9 = vrot.slane %v3821_v24, 4  ;;  %v3829_v55 = vrot.slane %v3828_v15, 4  ;;  %v3836_v22 = vrot.slane %v3835_v51, 4 }
 0x314   :  { %v3876_v13 = vmax.f32 %v3874_v26, %v3875_v48  ;;  %v3882_v25 = vrot.slane %v3881_v2, 1  ;;  %v3889_v21 = vrot.slane %v3888_v12, 1  ;;  %v3817_v3 = vrot.slane %v3816_v32, 2 }
 0x315   :  { %v3895_v4 = vmax.f32 %v3893_v56, %v3894_v37  ;;  %v3823_v17 = vmax.f32 %v3821_v24, %v3822_v9  ;;  %v3830_v35 = vmax.f32 %v3828_v15, %v3829_v55  ;;  %v3837_v63 = vmax.f32 %v3835_v51, %v3836_v22 }
 0x316   :  { %v3883_v27 = vmax.f32 %v3881_v2, %v3882_v25  ;;  %v3890_v19 = vmax.f32 %v3888_v12, %v3889_v21  ;;  %v4640_v54 = vsel %vm4374_vm9, %v3876_v13, -inf  ;;  %v3818_v29 = vmax.f32 %v3816_v32, %v3817_v3 }
 0x317   :  { %v3896_v60 = vrot.slane %v3895_v4, 1  ;;  %v3824_v0 = vrot.slane %v3823_v17, 2  ;;  %v3831_v40 = vrot.slane %v3830_v35, 2  ;;  %v3838_v7 = vrot.slane %v3837_v63, 2 }
 0x318   :  { %v4643_v14 = vsel %vm4374_vm9, %v3883_v27, -inf  ;;  %v4646_v59 = vsel %vm4374_vm9, %v3890_v19, -inf  ;;  %v3819_v16 = vrot.slane %v3818_v29, 1  ;;  %v1156_v20 = vmax.f32 %v1092_v44, 0.0 }
 0x319   :  { %v3897_v58 = vmax.f32 %v3895_v4, %v3896_v60  ;;  %v3825_v1 = vmax.f32 %v3823_v17, %v3824_v0  ;;  %v3832_v10 = vmax.f32 %v3830_v35, %v3831_v40  ;;  %v3839_v5 = vmax.f32 %v3837_v63, %v3838_v7  ;;  %v176_v63 = vld [vmem:[#allocation2 + $0x74] sm:$0x1] }
 0x31a   :  { %v3820_v45 = vmax.f32 %v3818_v29, %v3819_v16  ;;  %v2036_v46 = vcombine.high %v1156_v20, %v1156_v20  ;;  %v2043_v49 = vrot.slane %v1156_v20, %v17092_v61  ;;  %v115_v6 = vsel %vm17067_vm7, 0, %v114_v23 }
 0x31b   :  { %v4649_v26 = vsel %vm4374_vm9, %v3897_v58, -inf  ;;  %v3826_v39 = vrot.slane %v3825_v1, 1  ;;  %v3833_v62 = vrot.slane %v3832_v10, 1  ;;  %v3840_v30 = vrot.slane %v3839_v5, 1  ;;  %116 = vst [vmem:[#allocation2 + $0x70] sm:$0x1] %v115_v6 }
 0x31c   :  { %v4639_v56 = vsel %vm4374_vm9, %v3820_v45, -inf  ;;  %v2050_v44 = vrot.slane %v2036_v46, %v17092_v61  ;;  %v2051_v24 = vcombine.high %v2043_v49, %v2043_v49  ;;  %v3898_v15 = vsel %vm2581_vm8, %v2043_v49, -inf }
 0x31d   :  { %v3827_v51 = vmax.f32 %v3825_v1, %v3826_v39  ;;  %v3834_v48 = vmax.f32 %v3832_v10, %v3833_v62  ;;  %v3841_v2 = vmax.f32 %v3839_v5, %v3840_v30  ;;  %v4641_v12 = vmax.f32 %v4639_v56, %v4640_v54 }
 0x31e   :  { %v2052_v32 = vcombine.high %v2050_v44, %v2050_v44  ;;  %v3899_v37 = vrot.slane %v3898_v15, 4  ;;  %v3905_v9 = vsel %vm2581_vm8, %v2051_v24, -inf  ;;  %v3912_v55 = vsel %vm2581_vm8, %v2050_v44, -inf }
 0x31f   :  { %v4642_v22 = vsel %vm4374_vm9, %v3827_v51, -inf  ;;  %v4645_v13 = vsel %vm4374_vm9, %v3834_v48, -inf  ;;  %v4648_v25 = vsel %vm4374_vm9, %v3841_v2, -inf  ;;  %v15519_v21 = vpack.c.bf16 %v4641_v12, %v4641_v12  ;;  %v5669_v51 = vld [vmem:[#allocation2 + $0x28] sm:$0xf] }
 0x320   :  { %v4644_v3 = vmax.f32 %v4642_v22, %v4643_v14  ;;  %v4647_v4 = vmax.f32 %v4645_v13, %v4646_v59  ;;  %v4650_v17 = vmax.f32 %v4648_v25, %v4649_v26  ;;  %v3900_v35 = vmax.f32 %v3898_v15, %v3899_v37  ;;  %v5668_v14 = vld [vmem:[#allocation2 + $0x20] sm:$0xf]  ;;  %v5688_v48 = vld [vmem:[#allocation2 + $0x24] sm:$0x1] }
 0x321   :  { %v5359_v27 = vunpack.c.l.b16 %v15519_v21  ;;  %v3906_v19 = vrot.slane %v3905_v9, 4  ;;  %v3913_v54 = vrot.slane %v3912_v55, 4  ;;  %v3919_v29 = vsel %vm2581_vm8, %v2052_v32, -inf }
 0x322   :  { %v15520_v60 = vpack.c.bf16 %v4644_v3, %v4644_v3  ;;  %v15521_v0 = vpack.c.bf16 %v4647_v4, %v4647_v4  ;;  %v15522_v40 = vpack.c.bf16 %v4650_v17, %v4650_v17  ;;  %v3901_v7 = vrot.slane %v3900_v35, 2 }
 0x323   :  { %v3907_v23 = vmax.f32 %v3905_v9, %v3906_v19  ;;  %v3914_v16 = vmax.f32 %v3912_v55, %v3913_v54  ;;  %v3920_v20 = vrot.slane %v3919_v29, 4  ;;  %v177_v58 = vsel %vm17059_vm5, 0, %v176_v63  ;;  %v5689_v54 = vld [vmem:[#allocation2 + $0x2c] sm:$0x1] }
 0x324   :  { %v5360_v59 = vunpack.c.l.b16 %v15520_v60  ;;  %v5361_v1 = vunpack.c.l.b16 %v15521_v0  ;;  %v5362_v10 = vunpack.c.l.b16 %v15522_v40  ;;  %v3902_v5 = vmax.f32 %v3900_v35, %v3901_v7  ;;  %178 = vst [vmem:[#allocation2 + $0x74] sm:$0x1] %v177_v58 }
 0x325   :  { %v3908_v45 = vrot.slane %v3907_v23, 2  ;;  %v3915_v46 = vrot.slane %v3914_v16, 2  ;;  %v3921_v49 = vmax.f32 %v3919_v29, %v3920_v20  ;;  %v1019_v6 = vmul.f32 %v18328_v47, %v18063_v28 }
 0x326   :  { %v5471_v26 = vsel %vm5399_vm10, %v5360_v59, %v5359_v27  ;;  %v3903_v39 = vrot.slane %v3902_v5, 1  ;;  %v5760_v62 = vshrl.u32 %v5668_v14, 16  ;;  %v5763_v30 = vshll.u32 %v5668_v14, 16 }
 0x327   :  { %v5472_v56 = vsel %vm5401_vm11, %v5361_v1, %v5471_v26  ;;  %v3909_v44 = vmax.f32 %v3907_v23, %v3908_v45  ;;  %v3916_v24 = vmax.f32 %v3914_v16, %v3915_v46  ;;  %v3922_v15 = vrot.slane %v3921_v49, 2  ;;  %v18411_v16 = vpop.f32.mrb[48].mxu1 }
 0x328   :  { %v3904_v2 = vmax.f32 %v3902_v5, %v3903_v39  ;;  %v1090_v12 = vadd.f32 %v18250_v31, %v1019_v6  ;;  %v18399_v32 = vsel %vm5403_vm12, %v5362_v10, %v5472_v56  ;;  %v5762_v37 = vrot.slane %v5760_v62, 4  ;;  %v18420_v46 = vpop.f32.mrb[49].mxu1 }
 0x329   :  { %v3910_v28 = vrot.slane %v3909_v44, 1  ;;  %v3917_v9 = vrot.slane %v3916_v24, 1  ;;  %v3923_v55 = vmax.f32 %v3921_v49, %v3922_v15  ;;  %v5765_v22 = vrot.slane %v5763_v30, 5  ;;  %v18424_v62 = vpop.f32.mrb[50].mxu1 }
 0x32a   :  { %v18402_v13 = vsel %vm4374_vm9, %v3904_v2, -inf  ;;  %v1154_v25 = vmax.f32 %v1090_v12, 0.0  ;;  %v5769_v21 = vshll.u32 %v5688_v48, 16  ;;  %v5774_v3 = vshrl.u32 %v5669_v51, 16  ;;  %v18426_v15 = vpop.f32.mrb[51].mxu1 }
 0x32b   :  { %v3911_v4 = vmax.f32 %v3909_v44, %v3910_v28  ;;  %v3918_v17 = vmax.f32 %v3916_v24, %v3917_v9  ;;  %v3924_v35 = vrot.slane %v3923_v55, 1  ;;  %v5766_v63 = vor.u32 %v5765_v22, %v5762_v37 }
 0x32c   :  { %v2002_v27 = vcombine.high %v1154_v25, %v1154_v25  ;;  %v2009_v19 = vrot.slane %v1154_v25, %v17092_v61  ;;  %v5771_v29 = vrot.slane %v5769_v21, 5  ;;  %v5776_v60 = vrot.slane %v5774_v3, 4 }
 0x32d   :  { %v3925_v0 = vmax.f32 %v3923_v55, %v3924_v35  ;;  %v18406_v40 = vsel %vm4374_vm9, %v3911_v4, -inf  ;;  %v18409_v7 = vsel %vm4374_vm9, %v3918_v17, -inf  ;;  %v5767_v23 = vrot.slane %v5766_v63, 4 }
 0x32e   :  { %v2016_v20 = vrot.slane %v2002_v27, %v17092_v61  ;;  %v2017_v58 = vcombine.high %v2009_v19, %v2009_v19  ;;  %v3842_v14 = vsel %vm2581_vm8, %v2009_v19, -inf  ;;  %v5777_v59 = vshll.u32 %v5669_v51, 16 }
 0x32f   :  { %v18416_v1 = vsel %vm4374_vm9, %v3925_v0, -inf  ;;  %v3843_v10 = vrot.slane %v3842_v14, 4  ;;  %v5772_v5 = vsel %vm18306_vm3, %v5767_v23, %v5771_v29  ;;  %v5783_v45 = vshll.u32 %v5689_v54, 16 }
 0x330   :  { %v2018_v49 = vcombine.high %v2016_v20, %v2016_v20  ;;  %v3849_v6 = vsel %vm2581_vm8, %v2017_v58, -inf  ;;  %v3856_v26 = vsel %vm2581_vm8, %v2016_v20, -inf  ;;  %v5779_v39 = vrot.slane %v5777_v59, 5 }
 0x331   :  { %v3844_v30 = vmax.f32 %v3842_v14, %v3843_v10  ;;  %v3850_v56 = vrot.slane %v3849_v6, 4  ;;  %v3857_v44 = vrot.slane %v3856_v26, 4  ;;  %v5785_v24 = vrot.slane %v5783_v45, 5 }
 0x332   :  { %v3863_v51 = vsel %vm2581_vm8, %v2018_v49, -inf  ;;  %v5780_v48 = vor.u32 %v5779_v39, %v5776_v60  ;;  %v1024_v2 = vmul.f32 %v18328_v47, %v18168_v8  ;;  %v1022_v12 = vmul.f32 %v18328_v47, %v18172_v43 }
 0x333   :  { %v3845_v37 = vrot.slane %v3844_v30, 2  ;;  %v3851_v28 = vmax.f32 %v3849_v6, %v3850_v56  ;;  %v3858_v9 = vmax.f32 %v3856_v26, %v3857_v44  ;;  %v3864_v55 = vrot.slane %v3863_v51, 4 }
 0x334   :  { %v5781_v22 = vrot.slane %v5780_v48, 4  ;;  %v1095_v25 = vadd.f32 %v18250_v31, %v1024_v2  ;;  %v1093_v21 = vadd.f32 %v18250_v31, %v1022_v12  ;;  %v1025_v3 = vmul.f32 %v18328_v47, %v18174_v18 }
 0x335   :  { %v3846_v4 = vmax.f32 %v3844_v30, %v3845_v37  ;;  %v3852_v17 = vrot.slane %v3851_v28, 2  ;;  %v3859_v35 = vrot.slane %v3858_v9, 2  ;;  %v3865_v63 = vmax.f32 %v3863_v51, %v3864_v55 }
 0x336   :  { %v5786_v8 = vsel %vm18306_vm3, %v5781_v22, %v5785_v24  ;;  %v1159_v43 = vmax.f32 %v1095_v25, 0.0  ;;  %v1157_v27 = vmax.f32 %v1093_v21, 0.0  ;;  %v18440_v19 = vadd.f32 %v18250_v31, %v1025_v3 }
 0x337   :  { %v3847_v54 = vrot.slane %v3846_v4, 1  ;;  %v3853_v29 = vmax.f32 %v3851_v28, %v3852_v17  ;;  %v3860_v60 = vmax.f32 %v3858_v9, %v3859_v35  ;;  %v3866_v0 = vrot.slane %v3865_v63, 2 }
 0x338   :  { %v14627_v23 = vcombine.low %v5772_v5, %v5786_v8  ;;  %v2087_v20 = vcombine.high %v1159_v43, %v1159_v43  ;;  %v2094_v18 = vrot.slane %v1159_v43, %v17092_v61  ;;  %v2053_v58 = vcombine.high %v1157_v27, %v1157_v27 }
 0x339   :  { %v3848_v14 = vmax.f32 %v3846_v4, %v3847_v54  ;;  %v3854_v59 = vrot.slane %v3853_v29, 1  ;;  %v3861_v10 = vrot.slane %v3860_v60, 1  ;;  %v3867_v45 = vmax.f32 %v3865_v63, %v3866_v0 }
 0x33a   :  { %15892 = vmatprep.mubr.msk.bf16.mxu1 %vm4374_vm9, %v14627_v23  ;;  %v2101_v49 = vrot.slane %v2087_v20, %v17092_v61  ;;  %v2102_v6 = vcombine.high %v2094_v18, %v2094_v18  ;;  %v3982_v26 = vsel %vm2581_vm8, %v2094_v18, -inf  ;;  %v2060_v39 = vrot.slane %v1157_v27, %v17092_v61  ;;  %v5637_v27 = vld [vmem:[#allocation2 + $0x74] sm:$0x1] }
 0x33b   :  { %v3855_v30 = vmax.f32 %v3853_v29, %v3854_v59  ;;  %v3862_v56 = vmax.f32 %v3860_v60, %v3861_v10  ;;  %v3868_v5 = vrot.slane %v3867_v45, 1  ;;  %v4651_v44 = vsel %vm4374_vm9, %v3848_v14, -inf }
 0x33c   :  { %v4653_v24 = vmax.f32 %v4651_v44, %v18402_v13  ;;  %v2103_v51 = vcombine.high %v2101_v49, %v2101_v49  ;;  %v3983_v48 = vrot.slane %v3982_v26, 4  ;;  %v3989_v2 = vsel %vm2581_vm8, %v2102_v6, -inf }
 0x33d   :  { %v3869_v12 = vmax.f32 %v3867_v45, %v3868_v5  ;;  %v4654_v37 = vsel %vm4374_vm9, %v3855_v30, -inf  ;;  %v4657_v28 = vsel %vm4374_vm9, %v3862_v56, -inf  ;;  %v3990_v9 = vrot.slane %v3989_v2, 4  ;;  %v18460_v45 = vpop.f32.mrb[52].mxu1  ;;  %v5634_v56 = vld [vmem:[#allocation2 + $0x70] sm:$0xf] }
 0x33e   :  { %v4656_v55 = vmax.f32 %v4654_v37, %v18406_v40  ;;  %v4659_v22 = vmax.f32 %v4657_v28, %v18409_v7  ;;  %v15523_v25 = vpack.c.bf16 %v4653_v24, %v4653_v24  ;;  %v3984_v21 = vmax.f32 %v3982_v26, %v3983_v48 }
 0x33f   :  { %v4660_v3 = vsel %vm4374_vm9, %v3869_v12, -inf  ;;  %v3991_v4 = vmax.f32 %v3989_v2, %v3990_v9  ;;  %v3996_v13 = vsel %vm2581_vm8, %v2101_v49, -inf  ;;  %v4003_v17 = vsel %vm2581_vm8, %v2103_v51, -inf  ;;  %v18468_v12 = vpop.f32.mrb[53].mxu1 }
 0x340   :  { %v4662_v35 = vmax.f32 %v4660_v3, %v18416_v1  ;;  %v15524_v63 = vpack.c.bf16 %v4656_v55, %v4656_v55  ;;  %v15525_v8 = vpack.c.bf16 %v4659_v22, %v4659_v22  ;;  %v5363_v43 = vunpack.c.l.b16 %v15523_v25 }
 0x341   :  { %v3985_v54 = vrot.slane %v3984_v21, 2  ;;  %v3992_v29 = vrot.slane %v3991_v4, 2  ;;  %v3997_v40 = vrot.slane %v3996_v13, 4  ;;  %v4004_v60 = vrot.slane %v4003_v17, 4 }
 0x342   :  { %v5364_v7 = vunpack.c.l.b16 %v15524_v63  ;;  %v5365_v0 = vunpack.c.l.b16 %v15525_v8  ;;  %v5474_v23 = vsel %vm5405_vm13, %v5363_v43, %v18399_v32  ;;  %v15570_v20 = vpack.c.bf16 %v4662_v35, %v4662_v35 }
 0x343   :  { %v3986_v18 = vmax.f32 %v3984_v21, %v3985_v54  ;;  %v3993_v14 = vmax.f32 %v3991_v4, %v3992_v29  ;;  %v3998_v59 = vmax.f32 %v3996_v13, %v3997_v40  ;;  %v4005_v10 = vmax.f32 %v4003_v17, %v4004_v60  ;;  %v117_v17 = vld [vmem:[#allocation2 + $0x78] sm:$0x1] }
 0x344   :  { %v5475_v1 = vsel %vm5407_vm14, %v5364_v7, %v5474_v23  ;;  %v5638_v49 = vsel %vm17067_vm7, %v15570_v20, %v5637_v27  ;;  %v2067_v6 = vrot.slane %v2053_v58, %v17092_v61  ;;  %v2068_v26 = vcombine.high %v2060_v39, %v2060_v39  ;;  %v179_v20 = vld [vmem:[#allocation2 + $0x7c] sm:$0x1] }
 0x345   :  { %v5476_v30 = vsel %vm5409_vm0, %v5365_v0, %v5475_v1  ;;  %5639 = vst [vmem:[#allocation2 + $0x74] sm:$0x1] %v5638_v49  ;;  %v3987_v32 = vrot.slane %v3986_v18, 1  ;;  %v3994_v5 = vrot.slane %v3993_v14, 1  ;;  %v3999_v44 = vrot.slane %v3998_v59, 2 }
 0x346   :  { %v5523_v24 = vpack.c.b16 %v5476_v30, %v5476_v30  ;;  %v4006_v51 = vrot.slane %v4005_v10, 2  ;;  %v2069_v48 = vcombine.high %v2067_v6, %v2067_v6  ;;  %v3926_v2 = vsel %vm2581_vm8, %v2060_v39, -inf }
 0x347   :  { %v3988_v37 = vmax.f32 %v3986_v18, %v3987_v32  ;;  %v3995_v28 = vmax.f32 %v3993_v14, %v3994_v5  ;;  %v4000_v9 = vmax.f32 %v3998_v59, %v3999_v44  ;;  %v3927_v55 = vrot.slane %v3926_v2, 4 }
 0x348   :  { %v5635_v58 = vsel %vm17218_vm1, %v5523_v24, %v5634_v56  ;;  %v4007_v22 = vmax.f32 %v4005_v10, %v4006_v51  ;;  %v3933_v25 = vsel %vm2581_vm8, %v2068_v26, -inf  ;;  %v3940_v21 = vsel %vm2581_vm8, %v2067_v6, -inf }
 0x349   :  { %5636 = vst [vmem:[#allocation2 + $0x70] sm:$0xf] %v5635_v58  ;;  %v4001_v3 = vrot.slane %v4000_v9, 1  ;;  %v4664_v4 = vsel %vm4374_vm9, %v3988_v37, -inf  ;;  %v4667_v39 = vsel %vm4374_vm9, %v3995_v28, -inf  ;;  %v3928_v13 = vmax.f32 %v3926_v2, %v3927_v55 }
 0x34a   :  { %v4008_v35 = vrot.slane %v4007_v22, 1  ;;  %v3934_v63 = vrot.slane %v3933_v25, 4  ;;  %v3941_v8 = vrot.slane %v3940_v21, 4  ;;  %v3947_v43 = vsel %vm2581_vm8, %v2069_v48, -inf }
 0x34b   :  { %v4002_v27 = vmax.f32 %v4000_v9, %v4001_v3  ;;  %v3929_v54 = vrot.slane %v3928_v13, 2  ;;  %v3948_v29 = vrot.slane %v3947_v43, 4  ;;  %v1160_v40 = vmax.f32 %v18440_v19, 0.0 }
 0x34c   :  { %v4009_v60 = vmax.f32 %v4007_v22, %v4008_v35  ;;  %v3935_v7 = vmax.f32 %v3933_v25, %v3934_v63  ;;  %v3942_v0 = vmax.f32 %v3940_v21, %v3941_v8  ;;  %v118_v23 = vsel %vm17067_vm7, 0, %v117_v17 }
 0x34d   :  { %v4670_v18 = vsel %vm4374_vm9, %v4002_v27, -inf  ;;  %v3930_v14 = vmax.f32 %v3928_v13, %v3929_v54  ;;  %v3949_v59 = vmax.f32 %v3947_v43, %v3948_v29  ;;  %v2104_v10 = vcombine.high %v1160_v40, %v1160_v40  ;;  %119 = vst [vmem:[#allocation2 + $0x78] sm:$0x1] %v118_v23 }
 0x34e   :  { %v4673_v1 = vsel %vm4374_vm9, %v4009_v60, -inf  ;;  %v3936_v49 = vrot.slane %v3935_v7, 2  ;;  %v3943_v6 = vrot.slane %v3942_v0, 2  ;;  %v2111_v26 = vrot.slane %v1160_v40, %v17092_v61 }
 0x34f   :  { %v3931_v19 = vrot.slane %v3930_v14, 1  ;;  %v3950_v30 = vrot.slane %v3949_v59, 2  ;;  %v2118_v56 = vrot.slane %v2104_v10, %v17092_v61  ;;  %v180_v32 = vsel %vm17059_vm5, 0, %v179_v20  ;;  %v18494_v10 = vpop.f32.mrb[54].mxu1 }
 0x350   :  { %v3937_v5 = vmax.f32 %v3935_v7, %v3936_v49  ;;  %v3944_v44 = vmax.f32 %v3942_v0, %v3943_v6  ;;  %v2119_v24 = vcombine.high %v2111_v26, %v2111_v26  ;;  %v4010_v51 = vsel %vm2581_vm8, %v2111_v26, -inf  ;;  %181 = vst [vmem:[#allocation2 + $0x7c] sm:$0x1] %v180_v32  ;;  %v6274_v50 = vld [vmem:[#allocation2 + $0x70] sm:$0xe] }
 0x351   :  { %v3932_v48 = vmax.f32 %v3930_v14, %v3931_v19  ;;  %v3951_v2 = vmax.f32 %v3949_v59, %v3950_v30  ;;  %v2120_v37 = vcombine.high %v2118_v56, %v2118_v56  ;;  %v4011_v28 = vrot.slane %v4010_v51, 4 }
 0x352   :  { %v3938_v9 = vrot.slane %v3937_v5, 1  ;;  %v3945_v55 = vrot.slane %v3944_v44, 1  ;;  %v4017_v58 = vsel %vm2581_vm8, %v2119_v24, -inf  ;;  %v4024_v22 = vsel %vm2581_vm8, %v2118_v56, -inf }
 0x353   :  { %v3952_v25 = vrot.slane %v3951_v2, 1  ;;  %v4663_v21 = vsel %vm4374_vm9, %v3932_v48, -inf  ;;  %v4012_v3 = vmax.f32 %v4010_v51, %v4011_v28  ;;  %v4018_v13 = vrot.slane %v4017_v58, 4 }
 0x354   :  { %v3939_v17 = vmax.f32 %v3937_v5, %v3938_v9  ;;  %v3946_v35 = vmax.f32 %v3944_v44, %v3945_v55  ;;  %v4665_v63 = vmax.f32 %v4663_v21, %v4664_v4  ;;  %v4025_v8 = vrot.slane %v4024_v22, 4 }
 0x355   :  { %v3953_v43 = vmax.f32 %v3951_v2, %v3952_v25  ;;  %v4013_v27 = vrot.slane %v4012_v3, 2  ;;  %v4019_v54 = vmax.f32 %v4017_v58, %v4018_v13  ;;  %v4031_v29 = vsel %vm2581_vm8, %v2120_v37, -inf }
 0x356   :  { %v4666_v40 = vsel %vm4374_vm9, %v3939_v17, -inf  ;;  %v4669_v60 = vsel %vm4374_vm9, %v3946_v35, -inf  ;;  %v15527_v7 = vpack.c.bf16 %v4665_v63, %v4665_v63  ;;  %v4026_v0 = vmax.f32 %v4024_v22, %v4025_v8 }
 0x357   :  { %v4668_v23 = vmax.f32 %v4666_v40, %v4667_v39  ;;  %v4671_v20 = vmax.f32 %v4669_v60, %v4670_v18  ;;  %v4672_v14 = vsel %vm4374_vm9, %v3953_v43, -inf  ;;  %v4014_v59 = vmax.f32 %v4012_v3, %v4013_v27 }
 0x358   :  { %v4674_v4 = vmax.f32 %v4672_v14, %v4673_v1  ;;  %v5367_v49 = vunpack.c.l.b16 %v15527_v7  ;;  %v4020_v6 = vrot.slane %v4019_v54, 2  ;;  %v4027_v26 = vrot.slane %v4026_v0, 2 }
 0x359   :  { %v15528_v19 = vpack.c.bf16 %v4668_v23, %v4668_v23  ;;  %v15529_v30 = vpack.c.bf16 %v4671_v20, %v4671_v20  ;;  %v4015_v56 = vrot.slane %v4014_v59, 1  ;;  %v4032_v32 = vrot.slane %v4031_v29, 4 }
 0x35a   :  { %v15530_v5 = vpack.c.bf16 %v4674_v4, %v4674_v4  ;;  %v4021_v44 = vmax.f32 %v4019_v54, %v4020_v6  ;;  %v4028_v24 = vmax.f32 %v4026_v0, %v4027_v26  ;;  %v1023_v39 = vmul.f32 %v18328_v47, %v18177_v33 }
 0x35b   :  { %v5368_v18 = vunpack.c.l.b16 %v15528_v19  ;;  %v5369_v51 = vunpack.c.l.b16 %v15529_v30  ;;  %v4016_v48 = vmax.f32 %v4014_v59, %v4015_v56  ;;  %v4033_v2 = vmax.f32 %v4031_v29, %v4032_v32 }
 0x35c   :  { %v5370_v37 = vunpack.c.l.b16 %v15530_v5  ;;  %v4022_v28 = vrot.slane %v4021_v44, 1  ;;  %v4029_v1 = vrot.slane %v4028_v24, 1  ;;  %v1094_v9 = vadd.f32 %v18250_v31, %v1023_v39  ;;  %v18512_v31 = vld [vmem:[%s21029_s3] ss:$0 sm:$0xff] }
 0x35d   :  { %v5477_v55 = vsel %vm5399_vm10, %v5368_v18, %v5367_v49  ;;  %v4034_v58 = vrot.slane %v4033_v2, 2  ;;  %v18501_v22 = vsel %vm4374_vm9, %v4016_v48, -inf  ;;  %v1028_v25 = vmul.f32 %v18328_v47, %v18226_v34  ;;  %v120_v34 = vld [vmem:[#allocation2 + $0x80] sm:$0x1] }
 0x35e   :  { %v5478_v33 = vsel %vm5401_vm11, %v5369_v51, %v5477_v55  ;;  %v4023_v21 = vmax.f32 %v4021_v44, %v4022_v28  ;;  %v4030_v3 = vmax.f32 %v4028_v24, %v4029_v1  ;;  %v1158_v13 = vmax.f32 %v1094_v9, 0.0 }
 0x35f   :  { %v4035_v17 = vmax.f32 %v4033_v2, %v4034_v58  ;;  %v18507_v35 = vsel %vm5403_vm12, %v5370_v37, %v5478_v33  ;;  %v1099_v63 = vadd.f32 %v18512_v31, %v1028_v25  ;;  %v1026_v8 = vmul.f32 %v18328_v47, %v18231_v36 }
 0x360   :  { %v18518_v43 = vsel %vm4374_vm9, %v4023_v21, -inf  ;;  %v18521_v27 = vsel %vm4374_vm9, %v4030_v3, -inf  ;;  %v2070_v54 = vcombine.high %v1158_v13, %v1158_v13  ;;  %v2077_v29 = vrot.slane %v1158_v13, %v17092_v61 }
 0x361   :  { %v4036_v40 = vrot.slane %v4035_v17, 1  ;;  %v1163_v60 = vmax.f32 %v1099_v63, 0.0  ;;  %v1097_v7 = vadd.f32 %v18512_v31, %v1026_v8  ;;  %v18527_v0 = vmul.f32 %v18328_v47, %v18287_v57 }
 0x362   :  { %v2084_v36 = vrot.slane %v2070_v54, %v17092_v61  ;;  %v2085_v23 = vcombine.high %v2077_v29, %v2077_v29  ;;  %v3954_v20 = vsel %vm2581_vm8, %v2077_v29, -inf  ;;  %v121_v14 = vsel %vm17067_vm7, 0, %v120_v34 }
 0x363   :  { %v4037_v59 = vmax.f32 %v4035_v17, %v4036_v40  ;;  %v3955_v4 = vrot.slane %v3954_v20, 4  ;;  %v2155_v49 = vcombine.high %v1163_v60, %v1163_v60  ;;  %v2162_v6 = vrot.slane %v1163_v60, %v17092_v61  ;;  %122 = vst [vmem:[#allocation2 + $0x80] sm:$0x1] %v121_v14 }
 0x364   :  { %v2086_v26 = vcombine.high %v2084_v36, %v2084_v36  ;;  %v3961_v19 = vsel %vm2581_vm8, %v2085_v23, -inf  ;;  %v3968_v57 = vsel %vm2581_vm8, %v2084_v36, -inf  ;;  %v18536_v47 = vmax.f32 %v1097_v7, 0.0 }
 0x365   :  { %v4685_v30 = vsel %vm4374_vm9, %v4037_v59, -inf  ;;  %v3956_v56 = vmax.f32 %v3954_v20, %v3955_v4  ;;  %v3962_v32 = vrot.slane %v3961_v19, 4  ;;  %v3969_v5 = vrot.slane %v3968_v57, 4 }
 0x366   :  { %v3975_v44 = vsel %vm2581_vm8, %v2086_v26, -inf  ;;  %v2169_v24 = vrot.slane %v2155_v49, %v17092_v61  ;;  %v2170_v39 = vcombine.high %v2162_v6, %v2162_v6  ;;  %v4094_v18 = vsel %vm2581_vm8, %v2162_v6, -inf }
 0x367   :  { %v3957_v51 = vrot.slane %v3956_v56, 2  ;;  %v3963_v48 = vmax.f32 %v3961_v19, %v3962_v32  ;;  %v3970_v2 = vmax.f32 %v3968_v57, %v3969_v5  ;;  %v3976_v37 = vrot.slane %v3975_v44, 4 }
 0x368   :  { %v2171_v28 = vcombine.high %v2169_v24, %v2169_v24  ;;  %v4095_v1 = vrot.slane %v4094_v18, 4  ;;  %v4101_v9 = vsel %vm2581_vm8, %v2170_v39, -inf  ;;  %v4108_v55 = vsel %vm2581_vm8, %v2169_v24, -inf }
 0x369   :  { %v3958_v58 = vmax.f32 %v3956_v56, %v3957_v51  ;;  %v3964_v25 = vrot.slane %v3963_v48, 2  ;;  %v3971_v33 = vrot.slane %v3970_v2, 2  ;;  %v3977_v21 = vmax.f32 %v3975_v44, %v3976_v37 }
 0x36a   :  { %v4096_v3 = vmax.f32 %v4094_v18, %v4095_v1  ;;  %v4102_v13 = vrot.slane %v4101_v9, 4  ;;  %v4109_v17 = vrot.slane %v4108_v55, 4  ;;  %v4115_v63 = vsel %vm2581_vm8, %v2171_v28, -inf }
 0x36b   :  { %v3959_v8 = vrot.slane %v3958_v58, 1  ;;  %v3965_v34 = vmax.f32 %v3963_v48, %v3964_v25  ;;  %v3972_v54 = vmax.f32 %v3970_v2, %v3971_v33  ;;  %v3978_v29 = vrot.slane %v3977_v21, 2 }
 0x36c   :  { %v4097_v40 = vrot.slane %v4096_v3, 2  ;;  %v4103_v60 = vmax.f32 %v4101_v9, %v4102_v13  ;;  %v4110_v7 = vmax.f32 %v4108_v55, %v4109_v17  ;;  %v4116_v36 = vrot.slane %v4115_v63, 4  ;;  %v5643_v17 = vld [vmem:[#allocation2 + $0x7c] sm:$0x1] }
 0x36d   :  { %v3960_v23 = vmax.f32 %v3958_v58, %v3959_v8  ;;  %v3966_v20 = vrot.slane %v3965_v34, 1  ;;  %v3973_v14 = vrot.slane %v3972_v54, 1  ;;  %v3979_v59 = vmax.f32 %v3977_v21, %v3978_v29 }
 0x36e   :  { %v4098_v4 = vmax.f32 %v4096_v3, %v4097_v40  ;;  %v4104_v49 = vrot.slane %v4103_v60, 2  ;;  %v4111_v6 = vrot.slane %v4110_v7, 2  ;;  %v4117_v26 = vmax.f32 %v4115_v63, %v4116_v36 }
 0x36f   :  { %v3967_v19 = vmax.f32 %v3965_v34, %v3966_v20  ;;  %v3974_v57 = vmax.f32 %v3972_v54, %v3973_v14  ;;  %v3980_v56 = vrot.slane %v3979_v59, 1  ;;  %v4675_v32 = vsel %vm4374_vm9, %v3960_v23, -inf }
 0x370   :  { %v4677_v5 = vmax.f32 %v4675_v32, %v18501_v22  ;;  %v4099_v44 = vrot.slane %v4098_v4, 1  ;;  %v4105_v24 = vmax.f32 %v4103_v60, %v4104_v49  ;;  %v4112_v39 = vmax.f32 %v4110_v7, %v4111_v6  ;;  %v182_v60 = vld [vmem:[#allocation2 + $0x84] sm:$0x1]  ;;  %v5640_v49 = vld [vmem:[#allocation2 + $0x78] sm:$0xf] }
 0x371   :  { %v3981_v18 = vmax.f32 %v3979_v59, %v3980_v56  ;;  %v4678_v51 = vsel %vm4374_vm9, %v3967_v19, -inf  ;;  %v4681_v48 = vsel %vm4374_vm9, %v3974_v57, -inf  ;;  %v4118_v2 = vrot.slane %v4117_v26, 2 }
 0x372   :  { %v4680_v37 = vmax.f32 %v4678_v51, %v18518_v43  ;;  %v4683_v28 = vmax.f32 %v4681_v48, %v18521_v27  ;;  %v15531_v1 = vpack.c.bf16 %v4677_v5, %v4677_v5  ;;  %v4100_v9 = vmax.f32 %v4098_v4, %v4099_v44 }
 0x373   :  { %v4684_v55 = vsel %vm4374_vm9, %v3981_v18, -inf  ;;  %v4106_v58 = vrot.slane %v4105_v24, 1  ;;  %v4113_v25 = vrot.slane %v4112_v39, 1  ;;  %v4119_v22 = vmax.f32 %v4117_v26, %v4118_v2 }
 0x374   :  { %v4686_v33 = vmax.f32 %v4684_v55, %v4685_v30  ;;  %v15532_v21 = vpack.c.bf16 %v4680_v37, %v4680_v37  ;;  %v15533_v3 = vpack.c.bf16 %v4683_v28, %v4683_v28  ;;  %v5371_v13 = vunpack.c.l.b16 %v15531_v1 }
 0x375   :  { %v4107_v63 = vmax.f32 %v4105_v24, %v4106_v58  ;;  %v4114_v8 = vmax.f32 %v4112_v39, %v4113_v25  ;;  %v4120_v34 = vrot.slane %v4119_v22, 1  ;;  %v18553_v54 = vsel %vm4374_vm9, %v4100_v9, -inf  ;;  %v18584_v24 = vld [vmem:[%s21028_s2] ss:$0 sm:$0xff] }
 0x376   :  { %v5372_v43 = vunpack.c.l.b16 %v15532_v21  ;;  %v5373_v27 = vunpack.c.l.b16 %v15533_v3  ;;  %v5480_v29 = vsel %vm5405_vm13, %v5371_v13, %v18507_v35  ;;  %v15571_v40 = vpack.c.bf16 %v4686_v33, %v4686_v33 }
 0x377   :  { %v4121_v7 = vmax.f32 %v4119_v22, %v4120_v34  ;;  %v18558_v30 = vsel %vm4374_vm9, %v4107_v63, -inf  ;;  %v18561_v36 = vsel %vm4374_vm9, %v4114_v8, -inf  ;;  %v2121_v23 = vcombine.high %v18536_v47, %v18536_v47 }
 0x378   :  { %v5481_v20 = vsel %vm5407_vm14, %v5372_v43, %v5480_v29  ;;  %v5644_v14 = vsel %vm17067_vm7, %v15571_v40, %v5643_v17  ;;  %v2128_v35 = vrot.slane %v18536_v47, %v17092_v61  ;;  %v1100_v59 = vadd.f32 %v18512_v31, %v18527_v0  ;;  %v18600_v40 = vpop.f32.mrb[55].mxu1 }
 0x379   :  { %v5482_v4 = vsel %vm5409_vm0, %v5373_v27, %v5481_v20  ;;  %5645 = vst [vmem:[#allocation2 + $0x7c] sm:$0x1] %v5644_v14  ;;  %v18574_v6 = vsel %vm4374_vm9, %v4121_v7, -inf  ;;  %v2135_v26 = vrot.slane %v2121_v23, %v17092_v61  ;;  %v183_v19 = vsel %vm17059_vm5, 0, %v182_v60 }
 0x37a   :  { %v5525_v57 = vpack.c.b16 %v5482_v4, %v5482_v4  ;;  %v2136_v56 = vcombine.high %v2128_v35, %v2128_v35  ;;  %v4038_v32 = vsel %vm2581_vm8, %v2128_v35, -inf  ;;  %v1164_v47 = vmax.f32 %v1100_v59, 0.0  ;;  %184 = vst [vmem:[#allocation2 + $0x84] sm:$0x1] %v183_v19 }
 0x37b   :  { %v2137_v5 = vcombine.high %v2135_v26, %v2135_v26  ;;  %v4039_v0 = vrot.slane %v4038_v32, 4  ;;  %v4052_v44 = vsel %vm2581_vm8, %v2135_v26, -inf  ;;  %v1027_v39 = vmul.f32 %v18584_v24, %v18317_v11 }
 0x37c   :  { %v5641_v18 = vsel %vm17218_vm1, %v5525_v57, %v5640_v49  ;;  %v4045_v51 = vsel %vm2581_vm8, %v2136_v56, -inf  ;;  %v4053_v48 = vrot.slane %v4052_v44, 4  ;;  %v2172_v2 = vcombine.high %v1164_v47, %v1164_v47 }
 0x37d   :  { %5642 = vst [vmem:[#allocation2 + $0x78] sm:$0xf] %v5641_v18  ;;  %v4040_v37 = vmax.f32 %v4038_v32, %v4039_v0  ;;  %v4046_v28 = vrot.slane %v4045_v51, 4  ;;  %v4059_v1 = vsel %vm2581_vm8, %v2137_v5, -inf  ;;  %v2179_v9 = vrot.slane %v1164_v47, %v17092_v61 }
 0x37e   :  { %v4054_v55 = vmax.f32 %v4052_v44, %v4053_v48  ;;  %v4060_v58 = vrot.slane %v4059_v1, 4  ;;  %v2186_v25 = vrot.slane %v2172_v2, %v17092_v61  ;;  %v18595_v11 = vadd.f32 %v18512_v31, %v1027_v39 }
 0x37f   :  { %v4041_v22 = vrot.slane %v4040_v37, 2  ;;  %v4047_v33 = vmax.f32 %v4045_v51, %v4046_v28  ;;  %v2187_v21 = vcombine.high %v2179_v9, %v2179_v9  ;;  %v4122_v3 = vsel %vm2581_vm8, %v2179_v9, -inf }
 0x380   :  { %v4055_v13 = vrot.slane %v4054_v55, 2  ;;  %v4061_v17 = vmax.f32 %v4059_v1, %v4060_v58  ;;  %v2188_v63 = vcombine.high %v2186_v25, %v2186_v25  ;;  %v4123_v8 = vrot.slane %v4122_v3, 4 }
 0x381   :  { %v4042_v34 = vmax.f32 %v4040_v37, %v4041_v22  ;;  %v4048_v43 = vrot.slane %v4047_v33, 2  ;;  %v4129_v27 = vsel %vm2581_vm8, %v2187_v21, -inf  ;;  %v4136_v29 = vsel %vm2581_vm8, %v2186_v25, -inf }
 0x382   :  { %v4056_v60 = vmax.f32 %v4054_v55, %v4055_v13  ;;  %v4062_v7 = vrot.slane %v4061_v17, 2  ;;  %v4124_v23 = vmax.f32 %v4122_v3, %v4123_v8  ;;  %v4130_v20 = vrot.slane %v4129_v27, 4 }
 0x383   :  { %v4043_v14 = vrot.slane %v4042_v34, 1  ;;  %v4049_v35 = vmax.f32 %v4047_v33, %v4048_v43  ;;  %v4137_v59 = vrot.slane %v4136_v29, 4  ;;  %v4143_v4 = vsel %vm2581_vm8, %v2188_v63, -inf  ;;  %v5670_v43 = vld [vmem:[#allocation2 + $0x30] sm:$0xf] }
 0x384   :  { %v4057_v49 = vrot.slane %v4056_v60, 1  ;;  %v4063_v26 = vmax.f32 %v4061_v17, %v4062_v7  ;;  %v4125_v19 = vrot.slane %v4124_v23, 2  ;;  %v4131_v57 = vmax.f32 %v4129_v27, %v4130_v20 }
 0x385   :  { %v4044_v56 = vmax.f32 %v4042_v34, %v4043_v14  ;;  %v4050_v32 = vrot.slane %v4049_v35, 1  ;;  %v4138_v47 = vmax.f32 %v4136_v29, %v4137_v59  ;;  %v4144_v5 = vrot.slane %v4143_v4, 4 }
 0x386   :  { %v4058_v0 = vmax.f32 %v4056_v60, %v4057_v49  ;;  %v4064_v44 = vrot.slane %v4063_v26, 1  ;;  %v4126_v39 = vmax.f32 %v4124_v23, %v4125_v19  ;;  %v4132_v18 = vrot.slane %v4131_v57, 2 }
 0x387   :  { %v4051_v51 = vmax.f32 %v4049_v35, %v4050_v32  ;;  %v4687_v48 = vsel %vm4374_vm9, %v4044_v56, -inf  ;;  %v4139_v2 = vrot.slane %v4138_v47, 2  ;;  %v4145_v37 = vmax.f32 %v4143_v4, %v4144_v5  ;;  %v5690_v4 = vld [vmem:[#allocation2 + $0x34] sm:$0x1] }
 0x388   :  { %v4065_v28 = vmax.f32 %v4063_v26, %v4064_v44  ;;  %v4689_v1 = vmax.f32 %v4687_v48, %v18553_v54  ;;  %v4693_v9 = vsel %vm4374_vm9, %v4058_v0, -inf  ;;  %v4127_v55 = vrot.slane %v4126_v39, 1 }
 0x389   :  { %v4690_v58 = vsel %vm4374_vm9, %v4051_v51, -inf  ;;  %v4695_v25 = vmax.f32 %v4693_v9, %v18561_v36  ;;  %v4133_v22 = vmax.f32 %v4131_v57, %v4132_v18  ;;  %v4140_v33 = vmax.f32 %v4138_v47, %v4139_v2  ;;  %v5691_v9 = vld [vmem:[#allocation2 + $0x3c] sm:$0x1] }
 0x38a   :  { %v4692_v21 = vmax.f32 %v4690_v58, %v18558_v30  ;;  %v4696_v3 = vsel %vm4374_vm9, %v4065_v28, -inf  ;;  %v15535_v13 = vpack.c.bf16 %v4689_v1, %v4689_v1  ;;  %v4128_v17 = vmax.f32 %v4126_v39, %v4127_v55  ;;  %v5671_v1 = vld [vmem:[#allocation2 + $0x38] sm:$0xf] }
 0x38b   :  { %v4698_v63 = vmax.f32 %v4696_v3, %v18574_v6  ;;  %v15537_v8 = vpack.c.bf16 %v4695_v25, %v4695_v25  ;;  %v4134_v34 = vrot.slane %v4133_v22, 1  ;;  %v4141_v54 = vrot.slane %v4140_v33, 1 }
 0x38c   :  { %v15536_v27 = vpack.c.bf16 %v4692_v21, %v4692_v21  ;;  %v5375_v29 = vunpack.c.l.b16 %v15535_v13  ;;  %v4146_v60 = vrot.slane %v4145_v37, 2  ;;  %v18612_v7 = vsel %vm4374_vm9, %v4128_v17, -inf }
 0x38d   :  { %v15538_v36 = vpack.c.bf16 %v4698_v63, %v4698_v63  ;;  %v5377_v23 = vunpack.c.l.b16 %v15537_v8  ;;  %v4135_v20 = vmax.f32 %v4133_v22, %v4134_v34  ;;  %v4142_v30 = vmax.f32 %v4140_v33, %v4141_v54 }
 0x38e   :  { %v5376_v14 = vunpack.c.l.b16 %v15536_v27  ;;  %v4147_v35 = vmax.f32 %v4145_v37, %v4146_v60  ;;  %v1162_v59 = vmax.f32 %v18595_v11, 0.0  ;;  %v5788_v6 = vshrl.u32 %v5670_v43, 16 }
 0x38f   :  { %v5378_v49 = vunpack.c.l.b16 %v15538_v36  ;;  %v18616_v26 = vsel %vm4374_vm9, %v4135_v20, -inf  ;;  %v18619_v19 = vsel %vm4374_vm9, %v4142_v30, -inf  ;;  %v5791_v57 = vshll.u32 %v5670_v43, 16 }
 0x390   :  { %v5483_v56 = vsel %vm5399_vm10, %v5376_v14, %v5375_v29  ;;  %v4148_v32 = vrot.slane %v4147_v35, 1  ;;  %v2138_v47 = vcombine.high %v1162_v59, %v1162_v59  ;;  %v2145_v5 = vrot.slane %v1162_v59, %v17092_v61 }
 0x391   :  { %v5484_v0 = vsel %vm5401_vm11, %v5377_v23, %v5483_v56  ;;  %v5790_v44 = vrot.slane %v5788_v6, 4  ;;  %v5793_v11 = vrot.slane %v5791_v57, 5  ;;  %v5797_v39 = vshll.u32 %v5690_v4, 16 }
 0x392   :  { %v4149_v18 = vmax.f32 %v4147_v35, %v4148_v32  ;;  %v2152_v51 = vrot.slane %v2138_v47, %v17092_v61  ;;  %v2153_v48 = vcombine.high %v2145_v5, %v2145_v5  ;;  %v4066_v2 = vsel %vm2581_vm8, %v2145_v5, -inf }
 0x393   :  { %v4067_v37 = vrot.slane %v4066_v2, 4  ;;  %v18627_v28 = vsel %vm5403_vm12, %v5378_v49, %v5484_v0  ;;  %v5794_v55 = vor.u32 %v5793_v11, %v5790_v44  ;;  %v5799_v58 = vrot.slane %v5797_v39, 5 }
 0x394   :  { %v18630_v25 = vsel %vm4374_vm9, %v4149_v18, -inf  ;;  %v2154_v22 = vcombine.high %v2152_v51, %v2152_v51  ;;  %v4073_v33 = vsel %vm2581_vm8, %v2153_v48, -inf  ;;  %v4080_v21 = vsel %vm2581_vm8, %v2152_v51, -inf }
 0x395   :  { %v4068_v3 = vmax.f32 %v4066_v2, %v4067_v37  ;;  %v4074_v13 = vrot.slane %v4073_v33, 4  ;;  %v4081_v17 = vrot.slane %v4080_v21, 4  ;;  %v5795_v63 = vrot.slane %v5794_v55, 4 }
 0x396   :  { %v4087_v8 = vsel %vm2581_vm8, %v2154_v22, -inf  ;;  %v5802_v34 = vshrl.u32 %v5671_v1, 16  ;;  %v5805_v54 = vshll.u32 %v5671_v1, 16  ;;  %v5811_v43 = vshll.u32 %v5691_v9, 16 }
 0x397   :  { %v4069_v27 = vrot.slane %v4068_v3, 2  ;;  %v4075_v29 = vmax.f32 %v4073_v33, %v4074_v13  ;;  %v4082_v60 = vmax.f32 %v4080_v21, %v4081_v17  ;;  %v4088_v36 = vrot.slane %v4087_v8, 4 }
 0x398   :  { %v5800_v23 = vsel %vm18306_vm3, %v5795_v63, %v5799_v58  ;;  %v5804_v20 = vrot.slane %v5802_v34, 4  ;;  %v5807_v30 = vrot.slane %v5805_v54, 5  ;;  %v5813_v14 = vrot.slane %v5811_v43, 5  ;;  %v16433_v34 = vld [vmem:[%s21030_s4 + $0x20] sm:$0xff]  }
 0x399   :  { %v4070_v35 = vmax.f32 %v4068_v3, %v4069_v27  ;;  %v4076_v59 = vrot.slane %v4075_v29, 2  ;;  %v4083_v4 = vrot.slane %v4082_v60, 2  ;;  %v4089_v6 = vmax.f32 %v4087_v8, %v4088_v36 }
 0x39a   :  { %v5808_v49 = vor.u32 %v5807_v30, %v5804_v20  ;;  %v1032_v57 = vmul.f32 %v18584_v24, %v18411_v16  ;;  %v1030_v56 = vmul.f32 %v18584_v24, %v18420_v46  ;;  %v1033_v32 = vmul.f32 %v18584_v24, %v18424_v62  ;;  %v16431_v16 = vld [vmem:[%s21030_s4] sm:$0xff]   ;;  %v16432_v46 = vld [vmem:[%s21030_s4 + $0x8] sm:$0xff]  }
 0x39b   :  { %v4071_v47 = vrot.slane %v4070_v35, 1  ;;  %v4077_v5 = vmax.f32 %v4075_v29, %v4076_v59  ;;  %v4084_v0 = vmax.f32 %v4082_v60, %v4083_v4  ;;  %v4090_v44 = vrot.slane %v4089_v6, 2  ;;  %15904 = vmatprep.subr.bf16.mxu1 %v16431_v16 }
 0x39c   :  { %v5809_v11 = vrot.slane %v5808_v49, 4  ;;  %v1103_v39 = vadd.f32 %v18512_v31, %v1032_v57  ;;  %v1101_v18 = vadd.f32 %v18512_v31, %v1030_v56  ;;  %v1104_v51 = vadd.f32 %v18512_v31, %v1033_v32  ;;  %15905 = vmatpush3.bf16.msra.mxu1 %v16431_v16 }
 0x39d   :  { %v4072_v62 = vmax.f32 %v4070_v35, %v4071_v47  ;;  %v4078_v48 = vrot.slane %v4077_v5, 1  ;;  %v4085_v2 = vrot.slane %v4084_v0, 1  ;;  %v4091_v37 = vmax.f32 %v4089_v6, %v4090_v44  ;;  %15906 = vmatprep.subr.bf16.mxu1 %v16432_v46 }
 0x39e   :  { %v5814_v1 = vsel %vm18306_vm3, %v5809_v11, %v5813_v14  ;;  %v1167_v9 = vmax.f32 %v1103_v39, 0.0  ;;  %v1165_v55 = vmax.f32 %v1101_v18, 0.0  ;;  %v18654_v58 = vmax.f32 %v1104_v51, 0.0 }
 0x39f   :  { %v4079_v22 = vmax.f32 %v4077_v5, %v4078_v48  ;;  %v4086_v33 = vmax.f32 %v4084_v0, %v4085_v2  ;;  %v4092_v21 = vrot.slane %v4091_v37, 1  ;;  %v4699_v3 = vsel %vm4374_vm9, %v4072_v62, -inf  ;;  %v5646_v2 = vld [vmem:[#allocation2 + $0x80] sm:$0xf] }
 0x3a0   :  { %v4701_v13 = vmax.f32 %v4699_v3, %v18612_v7  ;;  %v14628_v17 = vcombine.low %v5800_v23, %v5814_v1  ;;  %v2223_v63 = vcombine.high %v1167_v9, %v1167_v9  ;;  %v2230_v8 = vrot.slane %v1167_v9, %v17092_v61  ;;  %15907 = vmatpush3.bf16.msra.mxu1 %v16432_v46 }
 0x3a1   :  { %v4093_v54 = vmax.f32 %v4091_v37, %v4092_v21  ;;  %v4702_v43 = vsel %vm4374_vm9, %v4079_v22, -inf  ;;  %v4705_v27 = vsel %vm4374_vm9, %v4086_v33, -inf  ;;  %v2189_v29 = vcombine.high %v1165_v55, %v1165_v55  ;;  %15924 = vmatprep.subr.bf16.mxu1 %v16433_v34 }
 0x3a2   :  { %v4704_v60 = vmax.f32 %v4702_v43, %v18616_v26  ;;  %v4707_v36 = vmax.f32 %v4705_v27, %v18619_v19  ;;  %v15539_v7 = vpack.c.bf16 %v4701_v13, %v4701_v13  ;;  %15893 = vmatmul.mubr.msk.bf16.gmra.mrb[60].mxu1 %vm4374_vm9, %v14628_v17  ;;  %v2237_v23 = vrot.slane %v2223_v63, %v17092_v61  ;;  %v5649_v19 = vld [vmem:[#allocation2 + $0x84] sm:$0x1] }
 0x3a3   :  { %v4708_v20 = vsel %vm4374_vm9, %v4093_v54, -inf  ;;  %v2238_v30 = vcombine.high %v2230_v8, %v2230_v8  ;;  %v4206_v14 = vsel %vm2581_vm8, %v2230_v8, -inf  ;;  %v2196_v35 = vrot.slane %v1165_v55, %v17092_v61 }
 0x3a4   :  { %v4710_v59 = vmax.f32 %v4708_v20, %v18630_v25  ;;  %v15540_v4 = vpack.c.bf16 %v4704_v60, %v4704_v60  ;;  %v15541_v6 = vpack.c.bf16 %v4707_v36, %v4707_v36  ;;  %v5379_v26 = vunpack.c.l.b16 %v15539_v7 }
 0x3a5   :  { %v2239_v49 = vcombine.high %v2237_v23, %v2237_v23  ;;  %v4207_v57 = vrot.slane %v4206_v14, 4  ;;  %v4213_v56 = vsel %vm2581_vm8, %v2238_v30, -inf  ;;  %v4220_v32 = vsel %vm2581_vm8, %v2237_v23, -inf }
 0x3a6   :  { %v5380_v47 = vunpack.c.l.b16 %v15540_v4  ;;  %v5381_v5 = vunpack.c.l.b16 %v15541_v6  ;;  %v5486_v0 = vsel %vm5405_vm13, %v5379_v26, %v18627_v28  ;;  %v15572_v44 = vpack.c.bf16 %v4710_v59, %v4710_v59 }
 0x3a7   :  { %v4208_v11 = vmax.f32 %v4206_v14, %v4207_v57  ;;  %v4214_v39 = vrot.slane %v4213_v56, 4  ;;  %v4221_v25 = vrot.slane %v4220_v32, 4  ;;  %v4227_v18 = vsel %vm2581_vm8, %v2239_v49, -inf }
 0x3a8   :  { %v5487_v51 = vsel %vm5407_vm14, %v5380_v47, %v5486_v0  ;;  %v5650_v16 = vsel %vm17067_vm7, %v15572_v44, %v5649_v19  ;;  %v4228_v46 = vrot.slane %v4227_v18, 4  ;;  %v2203_v62 = vrot.slane %v2189_v29, %v17092_v61 }
 0x3a9   :  { %v5488_v48 = vsel %vm5409_vm0, %v5381_v5, %v5487_v51  ;;  %5651 = vst [vmem:[#allocation2 + $0x84] sm:$0x1] %v5650_v16  ;;  %v4209_v37 = vrot.slane %v4208_v11, 2  ;;  %v4215_v28 = vmax.f32 %v4213_v56, %v4214_v39  ;;  %v4222_v1 = vmax.f32 %v4220_v32, %v4221_v25  ;;  %v185_v16 = vld [vmem:[#allocation2 + $0x8c] sm:$0x1] }
 0x3aa   :  { %v5527_v9 = vpack.c.b16 %v5488_v48, %v5488_v48  ;;  %v4229_v55 = vmax.f32 %v4227_v18, %v4228_v46  ;;  %v2204_v22 = vcombine.high %v2196_v35, %v2196_v35  ;;  %v2205_v33 = vcombine.high %v2203_v62, %v2203_v62 }
 0x3ab   :  { %v4210_v21 = vmax.f32 %v4208_v11, %v4209_v37  ;;  %v4216_v3 = vrot.slane %v4215_v28, 2  ;;  %v4223_v13 = vrot.slane %v4222_v1, 2  ;;  %v4150_v17 = vsel %vm2581_vm8, %v2196_v35, -inf  ;;  %v123_v11 = vld [vmem:[#allocation2 + $0x88] sm:$0x1] }
 0x3ac   :  { %v5647_v63 = vsel %vm17218_vm1, %v5527_v9, %v5646_v2  ;;  %v4230_v8 = vrot.slane %v4229_v55, 2  ;;  %v4151_v34 = vrot.slane %v4150_v17, 4  ;;  %v4157_v54 = vsel %vm2581_vm8, %v2204_v22, -inf }
 0x3ad   :  { %5648 = vst [vmem:[#allocation2 + $0x80] sm:$0xf] %v5647_v63  ;;  %v4211_v43 = vrot.slane %v4210_v21, 1  ;;  %v4217_v27 = vmax.f32 %v4215_v28, %v4216_v3  ;;  %v4224_v29 = vmax.f32 %v4222_v1, %v4223_v13  ;;  %v4158_v60 = vrot.slane %v4157_v54, 4 }
 0x3ae   :  { %v4231_v36 = vmax.f32 %v4229_v55, %v4230_v8  ;;  %v4152_v7 = vmax.f32 %v4150_v17, %v4151_v34  ;;  %v4164_v23 = vsel %vm2581_vm8, %v2203_v62, -inf  ;;  %v4171_v20 = vsel %vm2581_vm8, %v2205_v33, -inf }
 0x3af   :  { %v4212_v30 = vmax.f32 %v4210_v21, %v4211_v43  ;;  %v4218_v14 = vrot.slane %v4217_v27, 1  ;;  %v4225_v35 = vrot.slane %v4224_v29, 1  ;;  %v4159_v59 = vmax.f32 %v4157_v54, %v4158_v60 }
 0x3b0   :  { %v4232_v4 = vrot.slane %v4231_v36, 1  ;;  %v4153_v6 = vrot.slane %v4152_v7, 2  ;;  %v4165_v26 = vrot.slane %v4164_v23, 4  ;;  %v4172_v19 = vrot.slane %v4171_v20, 4 }
 0x3b1   :  { %v4219_v49 = vmax.f32 %v4217_v27, %v4218_v14  ;;  %v4226_v57 = vmax.f32 %v4224_v29, %v4225_v35  ;;  %v4712_v56 = vsel %vm4374_vm9, %v4212_v30, -inf  ;;  %v4160_v32 = vrot.slane %v4159_v59, 2 }
 0x3b2   :  { %v4233_v47 = vmax.f32 %v4231_v36, %v4232_v4  ;;  %v4154_v5 = vmax.f32 %v4152_v7, %v4153_v6  ;;  %v4166_v0 = vmax.f32 %v4164_v23, %v4165_v26  ;;  %v4173_v44 = vmax.f32 %v4171_v20, %v4172_v19 }
 0x3b3   :  { %v4715_v39 = vsel %vm4374_vm9, %v4219_v49, -inf  ;;  %v4718_v25 = vsel %vm4374_vm9, %v4226_v57, -inf  ;;  %v4161_v18 = vmax.f32 %v4159_v59, %v4160_v32  ;;  %v2240_v51 = vcombine.high %v18654_v58, %v18654_v58 }
 0x3b4   :  { %v4721_v46 = vsel %vm4374_vm9, %v4233_v47, -inf  ;;  %v4155_v62 = vrot.slane %v4154_v5, 1  ;;  %v4167_v48 = vrot.slane %v4166_v0, 2  ;;  %v4174_v2 = vrot.slane %v4173_v44, 2  ;;  %v6791_v38 = vld [vmem:[#allocation2 + $0x80] sm:$0xf] }
 0x3b5   :  { %v4162_v37 = vrot.slane %v4161_v18, 1  ;;  %v2247_v28 = vrot.slane %v18654_v58, %v17092_v61  ;;  %v2254_v1 = vrot.slane %v2240_v51, %v17092_v61  ;;  %v124_v9 = vsel %vm17067_vm7, 0, %v123_v11 }
 0x3b6   :  { %v4156_v55 = vmax.f32 %v4154_v5, %v4155_v62  ;;  %v4168_v22 = vmax.f32 %v4166_v0, %v4167_v48  ;;  %v4175_v33 = vmax.f32 %v4173_v44, %v4174_v2  ;;  %125 = vst [vmem:[#allocation2 + $0x88] sm:$0x1] %v124_v9  ;;  %v186_v21 = vsel %vm17059_vm5, 0, %v185_v16 }
 0x3b7   :  { %v4163_v3 = vmax.f32 %v4161_v18, %v4162_v37  ;;  %v2255_v13 = vcombine.high %v2247_v28, %v2247_v28  ;;  %v2256_v17 = vcombine.high %v2254_v1, %v2254_v1  ;;  %v4234_v63 = vsel %vm2581_vm8, %v2247_v28, -inf  ;;  %187 = vst [vmem:[#allocation2 + $0x8c] sm:$0x1] %v186_v21 }
 0x3b8   :  { %v4169_v8 = vrot.slane %v4168_v22, 1  ;;  %v4176_v58 = vrot.slane %v4175_v33, 1  ;;  %v4711_v34 = vsel %vm4374_vm9, %v4156_v55, -inf  ;;  %v4235_v54 = vrot.slane %v4234_v63, 4 }
 0x3b9   :  { %v4713_v43 = vmax.f32 %v4711_v34, %v4712_v56  ;;  %v4714_v27 = vsel %vm4374_vm9, %v4163_v3, -inf  ;;  %v4241_v29 = vsel %vm2581_vm8, %v2255_v13, -inf  ;;  %v4248_v60 = vsel %vm2581_vm8, %v2254_v1, -inf }
 0x3ba   :  { %v4170_v36 = vmax.f32 %v4168_v22, %v4169_v8  ;;  %v4177_v7 = vmax.f32 %v4175_v33, %v4176_v58  ;;  %v4716_v23 = vmax.f32 %v4714_v27, %v4715_v39  ;;  %v4236_v20 = vmax.f32 %v4234_v63, %v4235_v54 }
 0x3bb   :  { %v15543_v30 = vpack.c.bf16 %v4713_v43, %v4713_v43  ;;  %v4242_v14 = vrot.slane %v4241_v29, 4  ;;  %v4249_v35 = vrot.slane %v4248_v60, 4  ;;  %v4255_v59 = vsel %vm2581_vm8, %v2256_v17, -inf }
 0x3bc   :  { %v4717_v4 = vsel %vm4374_vm9, %v4170_v36, -inf  ;;  %v4720_v6 = vsel %vm4374_vm9, %v4177_v7, -inf  ;;  %v15544_v26 = vpack.c.bf16 %v4716_v23, %v4716_v23  ;;  %v4237_v19 = vrot.slane %v4236_v20, 2 }
 0x3bd   :  { %v4719_v49 = vmax.f32 %v4717_v4, %v4718_v25  ;;  %v4722_v57 = vmax.f32 %v4720_v6, %v4721_v46  ;;  %v5383_v56 = vunpack.c.l.b16 %v15543_v30  ;;  %v4243_v32 = vmax.f32 %v4241_v29, %v4242_v14 }
 0x3be   :  { %v5384_v47 = vunpack.c.l.b16 %v15544_v26  ;;  %v4238_v5 = vmax.f32 %v4236_v20, %v4237_v19  ;;  %v4250_v0 = vmax.f32 %v4248_v60, %v4249_v35  ;;  %v4256_v44 = vrot.slane %v4255_v59, 4 }
 0x3bf   :  { %v15545_v11 = vpack.c.bf16 %v4719_v49, %v4719_v49  ;;  %v15546_v39 = vpack.c.bf16 %v4722_v57, %v4722_v57  ;;  %v4244_v18 = vrot.slane %v4243_v32, 2  ;;  %v1031_v51 = vmul.f32 %v18584_v24, %v18426_v15 }
 0x3c0   :  { %v5489_v16 = vsel %vm5399_vm10, %v5384_v47, %v5383_v56  ;;  %v4239_v62 = vrot.slane %v4238_v5, 1  ;;  %v4251_v48 = vrot.slane %v4250_v0, 2  ;;  %v4257_v2 = vmax.f32 %v4255_v59, %v4256_v44 }
 0x3c1   :  { %v5385_v37 = vunpack.c.l.b16 %v15545_v11  ;;  %v5386_v25 = vunpack.c.l.b16 %v15546_v39  ;;  %v4245_v46 = vmax.f32 %v4243_v32, %v4244_v18  ;;  %v1102_v28 = vadd.f32 %v18512_v31, %v1031_v51 }
 0x3c2   :  { %v4240_v1 = vmax.f32 %v4238_v5, %v4239_v62  ;;  %v4252_v9 = vmax.f32 %v4250_v0, %v4251_v48  ;;  %v4258_v55 = vrot.slane %v4257_v2, 2  ;;  %v1036_v22 = vmul.f32 %v18584_v24, %v18460_v45 }
 0x3c3   :  { %v5490_v33 = vsel %vm5401_vm11, %v5385_v37, %v5489_v16  ;;  %v4246_v21 = vrot.slane %v4245_v46, 1  ;;  %v1166_v15 = vmax.f32 %v1102_v28, 0.0  ;;  %v1034_v3 = vmul.f32 %v18584_v24, %v18468_v12 }
 0x3c4   :  { %v4253_v13 = vrot.slane %v4252_v9, 1  ;;  %v4259_v17 = vmax.f32 %v4257_v2, %v4258_v55  ;;  %v18719_v63 = vsel %vm5403_vm12, %v5386_v25, %v5490_v33  ;;  %v1107_v54 = vadd.f32 %v18512_v31, %v1036_v22 }
 0x3c5   :  { %v4247_v8 = vmax.f32 %v4245_v46, %v4246_v21  ;;  %v2206_v58 = vcombine.high %v1166_v15, %v1166_v15  ;;  %v2213_v34 = vrot.slane %v1166_v15, %v17092_v61  ;;  %v4724_v27 = vsel %vm4374_vm9, %v4240_v1, -inf }
 0x3c6   :  { %v4254_v43 = vmax.f32 %v4252_v9, %v4253_v13  ;;  %v4260_v45 = vrot.slane %v4259_v17, 1  ;;  %v1105_v29 = vadd.f32 %v18512_v31, %v1034_v3  ;;  %v1171_v14 = vmax.f32 %v1107_v54, 0.0 }
 0x3c7   :  { %v18726_v60 = vsel %vm4374_vm9, %v4247_v8, -inf  ;;  %v2220_v12 = vrot.slane %v2206_v58, %v17092_v61  ;;  %v2221_v36 = vcombine.high %v2213_v34, %v2213_v34  ;;  %v4178_v7 = vsel %vm2581_vm8, %v2213_v34, -inf }
 0x3c8   :  { %v4261_v23 = vmax.f32 %v4259_v17, %v4260_v45  ;;  %v4730_v20 = vsel %vm4374_vm9, %v4254_v43, -inf  ;;  %v4179_v30 = vrot.slane %v4178_v7, 4  ;;  %v18733_v6 = vmax.f32 %v1105_v29, 0.0 }
 0x3c9   :  { %v2222_v35 = vcombine.high %v2220_v12, %v2220_v12  ;;  %v4185_v59 = vsel %vm2581_vm8, %v2221_v36, -inf  ;;  %v4192_v4 = vsel %vm2581_vm8, %v2220_v12, -inf  ;;  %v2291_v56 = vcombine.high %v1171_v14, %v1171_v14 }
 0x3ca   :  { %v4733_v31 = vsel %vm4374_vm9, %v4261_v23, -inf  ;;  %v4180_v26 = vmax.f32 %v4178_v7, %v4179_v30  ;;  %v4186_v19 = vrot.slane %v4185_v59, 4  ;;  %v4193_v49 = vrot.slane %v4192_v4, 4 }
 0x3cb   :  { %v4199_v57 = vsel %vm2581_vm8, %v2222_v35, -inf  ;;  %v2298_v32 = vrot.slane %v1171_v14, %v17092_v61  ;;  %v2257_v47 = vcombine.high %v18733_v6, %v18733_v6  ;;  %v2305_v39 = vrot.slane %v2291_v56, %v17092_v61 }
 0x3cc   :  { %v4181_v5 = vrot.slane %v4180_v26, 2  ;;  %v4187_v0 = vmax.f32 %v4185_v59, %v4186_v19  ;;  %v4194_v44 = vmax.f32 %v4192_v4, %v4193_v49  ;;  %v4200_v11 = vrot.slane %v4199_v57, 4 }
 0x3cd   :  { %v2306_v18 = vcombine.high %v2298_v32, %v2298_v32  ;;  %v4318_v51 = vsel %vm2581_vm8, %v2298_v32, -inf  ;;  %v18744_v16 = vrot.slane %v18733_v6, %v17092_v61  ;;  %v2307_v25 = vcombine.high %v2305_v39, %v2305_v39 }
 0x3ce   :  { %v4182_v62 = vmax.f32 %v4180_v26, %v4181_v5  ;;  %v4188_v48 = vrot.slane %v4187_v0, 2  ;;  %v4195_v2 = vrot.slane %v4194_v44, 2  ;;  %v4201_v37 = vmax.f32 %v4199_v57, %v4200_v11 }
 0x3cf   :  { %v4319_v46 = vrot.slane %v4318_v51, 4  ;;  %v4325_v28 = vsel %vm2581_vm8, %v2306_v18, -inf  ;;  %v4332_v1 = vsel %vm2581_vm8, %v2305_v39, -inf  ;;  %v4339_v13 = vsel %vm2581_vm8, %v2307_v25, -inf }
 0x3d0   :  { %v4183_v9 = vrot.slane %v4182_v62, 1  ;;  %v4189_v55 = vmax.f32 %v4187_v0, %v4188_v48  ;;  %v4196_v22 = vmax.f32 %v4194_v44, %v4195_v2  ;;  %v4202_v33 = vrot.slane %v4201_v37, 2  ;;  %v5655_v48 = vld [vmem:[#allocation2 + $0x8c] sm:$0x1] }
 0x3d1   :  { %v4320_v21 = vmax.f32 %v4318_v51, %v4319_v46  ;;  %v4326_v15 = vrot.slane %v4325_v28, 4  ;;  %v4333_v3 = vrot.slane %v4332_v1, 4  ;;  %v4340_v29 = vrot.slane %v4339_v13, 4 }
 0x3d2   :  { %v4184_v17 = vmax.f32 %v4182_v62, %v4183_v9  ;;  %v4190_v8 = vrot.slane %v4189_v55, 1  ;;  %v4197_v58 = vrot.slane %v4196_v22, 1  ;;  %v4203_v34 = vmax.f32 %v4201_v37, %v4202_v33 }
 0x3d3   :  { %v4321_v54 = vrot.slane %v4320_v21, 2  ;;  %v4327_v43 = vmax.f32 %v4325_v28, %v4326_v15  ;;  %v4334_v45 = vmax.f32 %v4332_v1, %v4333_v3  ;;  %v4341_v49 = vmax.f32 %v4339_v13, %v4340_v29 }
 0x3d4   :  { %v4191_v12 = vmax.f32 %v4189_v55, %v4190_v8  ;;  %v4198_v36 = vmax.f32 %v4196_v22, %v4197_v58  ;;  %v4204_v7 = vrot.slane %v4203_v34, 1  ;;  %v4723_v23 = vsel %vm4374_vm9, %v4184_v17, -inf }
 0x3d5   :  { %v4725_v30 = vmax.f32 %v4723_v23, %v4724_v27  ;;  %v4322_v14 = vmax.f32 %v4320_v21, %v4321_v54  ;;  %v4328_v35 = vrot.slane %v4327_v43, 2  ;;  %v4335_v59 = vrot.slane %v4334_v45, 2  ;;  %v164_v54 = vld [vmem:[#allocation2 + $0x54] sm:$0x1] }
 0x3d6   :  { %v4205_v4 = vmax.f32 %v4203_v34, %v4204_v7  ;;  %v4726_v26 = vsel %vm4374_vm9, %v4191_v12, -inf  ;;  %v4729_v19 = vsel %vm4374_vm9, %v4198_v36, -inf  ;;  %v4342_v39 = vrot.slane %v4341_v49, 2  ;;  %v102_v34 = vld [vmem:[#allocation2 + $0x50] sm:$0x1] }
 0x3d7   :  { %v4728_v57 = vmax.f32 %v4726_v26, %v18726_v60  ;;  %v4731_v56 = vmax.f32 %v4729_v19, %v4730_v20  ;;  %v15547_v32 = vpack.c.bf16 %v4725_v30, %v4725_v30  ;;  %v4323_v5 = vrot.slane %v4322_v14, 1  ;;  %v18779_v36 = vld [vmem:[#allocation2 + $0x58] sm:$0xf] }
 0x3d8   :  { %v4732_v0 = vsel %vm4374_vm9, %v4205_v4, -inf  ;;  %v4329_v44 = vmax.f32 %v4327_v43, %v4328_v35  ;;  %v4336_v11 = vmax.f32 %v4334_v45, %v4335_v59  ;;  %v4343_v46 = vmax.f32 %v4341_v49, %v4342_v39 }
 0x3d9   :  { %v4734_v27 = vmax.f32 %v4732_v0, %v4733_v31  ;;  %v15548_v18 = vpack.c.bf16 %v4728_v57, %v4728_v57  ;;  %v15549_v51 = vpack.c.bf16 %v4731_v56, %v4731_v56  ;;  %v5387_v62 = vunpack.c.l.b16 %v15547_v32 }
 0x3da   :  { %v4324_v2 = vmax.f32 %v4322_v14, %v4323_v5  ;;  %v4330_v37 = vrot.slane %v4329_v44, 1  ;;  %v4337_v25 = vrot.slane %v4336_v11, 1  ;;  %v1037_v1 = vmul.f32 %v18584_v24, %v18494_v10  ;;  %v5652_v10 = vld [vmem:[#allocation2 + $0x88] sm:$0xf] }
 0x3db   :  { %v5388_v28 = vunpack.c.l.b16 %v15548_v18  ;;  %v5492_v60 = vsel %vm5405_vm13, %v5387_v62, %v18719_v63  ;;  %v15573_v20 = vpack.c.bf16 %v4734_v27, %v4734_v27  ;;  %v5389_v9 = vunpack.c.l.b16 %v15549_v51 }
 0x3dc   :  { %v4331_v55 = vmax.f32 %v4329_v44, %v4330_v37  ;;  %v4338_v22 = vmax.f32 %v4336_v11, %v4337_v25  ;;  %v4344_v31 = vrot.slane %v4343_v46, 1  ;;  %v2271_v15 = vrot.slane %v2257_v47, %v17092_v61 }
 0x3dd   :  { %v5493_v33 = vsel %vm5407_vm14, %v5388_v28, %v5492_v60  ;;  %v5656_v21 = vsel %vm17067_vm7, %v15573_v20, %v5655_v48  ;;  %v2272_v63 = vcombine.high %v18744_v16, %v18744_v16  ;;  %v18769_v13 = vsel %vm4374_vm9, %v4324_v2, -inf }
 0x3de   :  { %v5494_v3 = vsel %vm5409_vm0, %v5389_v9, %v5493_v33  ;;  %5657 = vst [vmem:[#allocation2 + $0x8c] sm:$0x1] %v5656_v21  ;;  %v4345_v24 = vmax.f32 %v4343_v46, %v4344_v31  ;;  %v18772_v17 = vsel %vm4374_vm9, %v4331_v55, -inf  ;;  %v2273_v58 = vcombine.high %v2271_v15, %v2271_v15 }
 0x3df   :  { %v5529_v8 = vpack.c.b16 %v5494_v3, %v5494_v3  ;;  %v4262_v6 = vsel %vm2581_vm8, %v18744_v16, -inf  ;;  %v4269_v47 = vsel %vm2581_vm8, %v2272_v63, -inf  ;;  %v4742_v43 = vsel %vm4374_vm9, %v4338_v22, -inf  ;;  %v18787_v16 = vld [vmem:[%s21029_s3] ss:$0 sm:$0xff] }
 0x3e0   :  { %v4263_v45 = vrot.slane %v4262_v6, 4  ;;  %v4270_v29 = vrot.slane %v4269_v47, 4  ;;  %v4276_v12 = vsel %vm2581_vm8, %v2271_v15, -inf  ;;  %v4283_v30 = vsel %vm2581_vm8, %v2273_v58, -inf }
 0x3e1   :  { %v5653_v7 = vsel %vm17218_vm1, %v5529_v8, %v5652_v10  ;;  %v4277_v23 = vrot.slane %v4276_v12, 4  ;;  %v1108_v14 = vadd.f32 %v18787_v16, %v1037_v1  ;;  %v4284_v4 = vrot.slane %v4283_v30, 4 }
 0x3e2   :  { %5654 = vst [vmem:[#allocation2 + $0x88] sm:$0xf] %v5653_v7  ;;  %v4264_v35 = vmax.f32 %v4262_v6, %v4263_v45  ;;  %v4271_v59 = vmax.f32 %v4269_v47, %v4270_v29  ;;  %v103_v26 = vsel %vm17067_vm7, 0, %v102_v34  ;;  %v165_v57 = vsel %vm17059_vm5, 0, %v164_v54 }
 0x3e3   :  { %v4278_v19 = vmax.f32 %v4276_v12, %v4277_v23  ;;  %v1172_v49 = vmax.f32 %v1108_v14, 0.0  ;;  %104 = vst [vmem:[#allocation2 + $0x50] sm:$0x1] %v103_v26  ;;  %v5830_v56 = vshrl.u32 %v18779_v36, 16  ;;  %v4745_v32 = vsel %vm4374_vm9, %v4345_v24, -inf }
 0x3e4   :  { %v4265_v5 = vrot.slane %v4264_v35, 2  ;;  %v4272_v0 = vrot.slane %v4271_v59, 2  ;;  %v4285_v44 = vmax.f32 %v4283_v30, %v4284_v4  ;;  %166 = vst [vmem:[#allocation2 + $0x54] sm:$0x1] %v165_v57  ;;  %v5833_v18 = vshll.u32 %v18779_v36, 16 }
 0x3e5   :  { %v4279_v11 = vrot.slane %v4278_v19, 2  ;;  %v2308_v39 = vcombine.high %v1172_v49, %v1172_v49  ;;  %v2315_v27 = vrot.slane %v1172_v49, %v17092_v61  ;;  %v18798_v2 = vrot.slane %v5830_v56, 4 }
 0x3e6   :  { %v4266_v51 = vmax.f32 %v4264_v35, %v4265_v5  ;;  %v4273_v62 = vmax.f32 %v4271_v59, %v4272_v0  ;;  %v4286_v48 = vrot.slane %v4285_v44, 2  ;;  %vm239_vm2 = vsmask.f32 7946 }
 0x3e7   :  { %v4280_v37 = vmax.f32 %v4278_v19, %v4279_v11  ;;  %v2322_v25 = vrot.slane %v2308_v39, %v17092_v61  ;;  %v2323_v46 = vcombine.high %v2315_v27, %v2315_v27  ;;  %v4346_v28 = vsel %vm2581_vm8, %v2315_v27, -inf }
 0x3e8   :  { %v4267_v60 = vrot.slane %v4266_v51, 1  ;;  %v4274_v20 = vrot.slane %v4273_v62, 1  ;;  %v4287_v1 = vmax.f32 %v4285_v44, %v4286_v48  ;;  %v4347_v9 = vrot.slane %v4346_v28, 4 }
 0x3e9   :  { %v4281_v55 = vrot.slane %v4280_v37, 1  ;;  %v2324_v22 = vcombine.high %v2322_v25, %v2322_v25  ;;  %v4353_v31 = vsel %vm2581_vm8, %v2323_v46, -inf  ;;  %v4360_v33 = vsel %vm2581_vm8, %v2322_v25, -inf }
 0x3ea   :  { %v4268_v21 = vmax.f32 %v4266_v51, %v4267_v60  ;;  %v4275_v15 = vmax.f32 %v4273_v62, %v4274_v20  ;;  %v4288_v63 = vrot.slane %v4287_v1, 1  ;;  %v4348_v3 = vmax.f32 %v4346_v28, %v4347_v9  ;;  %v18811_v0 = vld [vmem:[#allocation2 + $0x50] sm:$0xf] }
 0x3eb   :  { %v4282_v10 = vmax.f32 %v4280_v37, %v4281_v55  ;;  %v4354_v24 = vrot.slane %v4353_v31, 4  ;;  %v4361_v8 = vrot.slane %v4360_v33, 4  ;;  %v4367_v58 = vsel %vm2581_vm8, %v2324_v22, -inf  ;;  %v18814_v37 = vld [vmem:[#allocation2 + $0x5c] sm:$0x1] }
 0x3ec   :  { %v4289_v6 = vmax.f32 %v4287_v1, %v4288_v63  ;;  %v4735_v47 = vsel %vm4374_vm9, %v4268_v21, -inf  ;;  %v4738_v34 = vsel %vm4374_vm9, %v4275_v15, -inf  ;;  %v4349_v54 = vrot.slane %v4348_v3, 2  ;;  %v18818_v60 = vld [vmem:[#allocation2 + $0x54] sm:$0x1] }
 0x3ed   :  { %v4737_v45 = vmax.f32 %v4735_v47, %v18769_v13  ;;  %v4740_v29 = vmax.f32 %v4738_v34, %v18772_v17  ;;  %v4741_v12 = vsel %vm4374_vm9, %v4282_v10, -inf  ;;  %v4355_v7 = vmax.f32 %v4353_v31, %v4354_v24  ;;  %v126_v20 = vld [vmem:[#allocation2 + $0x90] sm:$0x1]  ;;  %v188_v15 = vld [vmem:[#allocation2 + $0x94] sm:$0x1] }
 0x3ee   :  { %v4743_v23 = vmax.f32 %v4741_v12, %v4742_v43  ;;  %v4744_v30 = vsel %vm4374_vm9, %v4289_v6, -inf  ;;  %v4350_v14 = vmax.f32 %v4348_v3, %v4349_v54  ;;  %v4362_v35 = vmax.f32 %v4360_v33, %v4361_v8  ;;  %v18829_v24 = vld [vmem:[#allocation2 + $0x60] sm:$0xf]  ;;  %v18833_v34 = vld [vmem:[#allocation2 + $0x68] sm:$0xf] }
 0x3ef   :  { %v4746_v59 = vmax.f32 %v4744_v30, %v4745_v32  ;;  %v15551_v4 = vpack.c.bf16 %v4737_v45, %v4737_v45  ;;  %v15552_v26 = vpack.c.bf16 %v4740_v29, %v4740_v29  ;;  %v4356_v19 = vrot.slane %v4355_v7, 2  ;;  %v16769_v45 = vld [vmem:[%s21028_s2] ss:$0 sm:$0xff] }
 0x3f0   :  { %v15553_v49 = vpack.c.bf16 %v4743_v23, %v4743_v23  ;;  %v4351_v57 = vrot.slane %v4350_v14, 1  ;;  %v4363_v56 = vrot.slane %v4362_v35, 2  ;;  %v4368_v5 = vrot.slane %v4367_v58, 4 }
 0x3f1   :  { %v15554_v13 = vpack.c.bf16 %v4746_v59, %v4746_v59  ;;  %v5391_v17 = vunpack.c.l.b16 %v15551_v4  ;;  %v5392_v44 = vunpack.c.l.b16 %v15552_v26  ;;  %v4357_v11 = vmax.f32 %v4355_v7, %v4356_v19  ;;  %v18844_v7 = vld [vmem:[#allocation2 + $0x64] sm:$0x1]  ;;  %v18854_v26 = vld [vmem:[#allocation2 + $0x6c] sm:$0x1] }
 0x3f2   :  { %v5393_v39 = vunpack.c.l.b16 %v15553_v49  ;;  %v4364_v43 = vmax.f32 %v4362_v35, %v4363_v56  ;;  %v4369_v27 = vmax.f32 %v4367_v58, %v4368_v5  ;;  %v5835_v51 = vrot.slane %v5833_v18, 5 }
 0x3f3   :  { %v5495_v62 = vsel %vm5399_vm10, %v5392_v44, %v5391_v17  ;;  %v4352_v32 = vmax.f32 %v4350_v14, %v4351_v57  ;;  %v4358_v48 = vrot.slane %v4357_v11, 1  ;;  %v5816_v25 = vshrl.u32 %v18811_v0, 16 }
 0x3f4   :  { %v5496_v46 = vsel %vm5401_vm11, %v5393_v39, %v5495_v62  ;;  %v4370_v28 = vrot.slane %v4369_v27, 2  ;;  %v5394_v1 = vunpack.c.l.b16 %v15554_v13  ;;  %v5819_v55 = vshll.u32 %v18811_v0, 16  ;;  %v18859_v13 = vld [vmem:[#allocation2 + $0x70] sm:$0xf] }
 0x3f5   :  { %v5818_v9 = vrot.slane %v5816_v25, 4  ;;  %v5825_v18 = vshll.u32 %v18818_v60, 16  ;;  %v4359_v22 = vmax.f32 %v4357_v11, %v4358_v48  ;;  %v4365_v31 = vrot.slane %v4364_v43, 1 }
 0x3f6   :  { %v5836_v33 = vor.u32 %v5835_v51, %v18798_v2  ;;  %v5839_v21 = vshll.u32 %v18814_v37, 16  ;;  %v18825_v63 = vsel %vm4374_vm9, %v4352_v32, -inf  ;;  %v5821_v3 = vrot.slane %v5819_v55, 5 }
 0x3f7   :  { %v127_v10 = vsel %vm17067_vm7, 0, %v126_v20  ;;  %v18831_v8 = vmax.f32 %v4369_v27, %v4370_v28  ;;  %v5827_v58 = vrot.slane %v5825_v18, 5  ;;  %v189_v54 = vsel %vm17059_vm5, 0, %v188_v15 }
 0x3f8   :  { %v5837_v6 = vrot.slane %v5836_v33, 4  ;;  %v5841_v47 = vrot.slane %v5839_v21, 5  ;;  %128 = vst [vmem:[#allocation2 + $0x90] sm:$0x1] %v127_v10  ;;  %v5822_v2 = vor.u32 %v5821_v3, %v5818_v9  ;;  %v1035_v29 = vmul.f32 %v16769_v45, %v18600_v40  ;;  %190 = vst [vmem:[#allocation2 + $0x94] sm:$0x1] %v189_v54 }
 0x3f9   :  { %v18842_v12 = vsel %vm5403_vm12, %v5394_v1, %v5496_v46  ;;  %v4366_v23 = vmax.f32 %v4364_v43, %v4365_v31  ;;  %v18847_v30 = vsel %vm4374_vm9, %v4359_v22, -inf  ;;  %v5844_v14 = vshrl.u32 %v18829_v24, 16  ;;  %v18874_v31 = vld [vmem:[#allocation2 + $0x74] sm:$0x1]  ;;  %v18878_v3 = vld [vmem:[#allocation2 + $0x78] sm:$0xf] }
 0x3fa   :  { %v5847_v35 = vshll.u32 %v18829_v24, 16  ;;  %v5823_v59 = vrot.slane %v5822_v2, 4  ;;  %v5842_v4 = vsel %vm18306_vm3, %v5837_v6, %v5841_v47  ;;  %v1106_v40 = vadd.f32 %v18787_v16, %v1035_v29 }
 0x3fb   :  { %v5858_v19 = vshrl.u32 %v18833_v34, 16  ;;  %v5846_v49 = vrot.slane %v5844_v14, 4  ;;  %v5853_v56 = vshll.u32 %v18844_v7, 16  ;;  %v5861_v5 = vshll.u32 %v18833_v34, 16  ;;  %v18884_v14 = vld [vmem:[#allocation2 + $0x7c] sm:$0x1] }
 0x3fc   :  { %v5849_v57 = vrot.slane %v5847_v35, 5  ;;  %v4372_v17 = vrot.slane %v18831_v8, 1  ;;  %v5828_v44 = vsel %vm18306_vm3, %v5823_v59, %v5827_v58  ;;  %v1170_v11 = vmax.f32 %v1106_v40, 0.0 }
 0x3fd   :  { %v5860_v39 = vrot.slane %v5858_v19, 4  ;;  %v14629_v16 = vcombine.low %v5828_v44, %v5842_v4  ;;  %v5863_v27 = vrot.slane %v5861_v5, 5  ;;  %v5867_v51 = vshll.u32 %v18854_v26, 16  ;;  %v18889_v5 = vld [vmem:[#allocation2 + $0x80] sm:$0xf] }
 0x3fe   :  { %v5850_v43 = vor.u32 %v5849_v57, %v5846_v49  ;;  %v2274_v62 = vcombine.high %v1170_v11, %v1170_v11  ;;  %v2281_v32 = vrot.slane %v1170_v11, %v17092_v61  ;;  %v5872_v48 = vshrl.u32 %v18859_v13, 16 }
 0x3ff   :  { %v5875_v25 = vshll.u32 %v18859_v13, 16  ;;  %v18869_v46 = vsel %vm4374_vm9, %v4366_v23, -inf  ;;  %15896 = vmatprep.mubr.msk.bf16.mxu1 %vm4374_vm9, %v14629_v16  ;;  %v5855_v20 = vrot.slane %v5853_v56, 5  ;;  %v5864_v1 = vor.u32 %v5863_v27, %v5860_v39 }
 0x400   :  { %v5851_v28 = vrot.slane %v5850_v43, 4  ;;  %v2288_v9 = vrot.slane %v2274_v62, %v17092_v61  ;;  %v2289_v55 = vcombine.high %v2281_v32, %v2281_v32  ;;  %v4290_v18 = vsel %vm2581_vm8, %v2281_v32, -inf }
 0x401   :  { %v5869_v22 = vrot.slane %v5867_v51, 5  ;;  %v4291_v33 = vrot.slane %v4290_v18, 4  ;;  %v5865_v15 = vrot.slane %v5864_v1, 4  ;;  %v5874_v10 = vrot.slane %v5872_v48, 4 }
 0x402   :  { %v5856_v21 = vsel %vm18306_vm3, %v5851_v28, %v5855_v20  ;;  %v2290_v58 = vcombine.high %v2288_v9, %v2288_v9  ;;  %v4297_v6 = vsel %vm2581_vm8, %v2289_v55, -inf  ;;  %v4304_v47 = vsel %vm2581_vm8, %v2288_v9, -inf }
 0x403   :  { %v5877_v2 = vrot.slane %v5875_v25, 5  ;;  %v4292_v54 = vmax.f32 %v4290_v18, %v4291_v33  ;;  %v4298_v45 = vrot.slane %v4297_v6, 4  ;;  %v4305_v29 = vrot.slane %v4304_v47, 4  ;;  %v18896_v18 = vld [vmem:[#allocation2 + $0x88] sm:$0xf] }
 0x404   :  { %v5870_v23 = vsel %vm18306_vm3, %v5865_v15, %v5869_v22  ;;  %v4311_v35 = vsel %vm2581_vm8, %v2290_v58, -inf  ;;  %v5881_v4 = vshll.u32 %v18874_v31, 16  ;;  %v5886_v40 = vshrl.u32 %v18878_v3, 16 }
 0x405   :  { %v14630_v59 = vcombine.low %v5856_v21, %v5870_v23  ;;  %v4293_v19 = vrot.slane %v4292_v54, 2  ;;  %v4299_v49 = vmax.f32 %v4297_v6, %v4298_v45  ;;  %v4306_v57 = vmax.f32 %v4304_v47, %v4305_v29 }
 0x406   :  { %v4312_v56 = vrot.slane %v4311_v35, 4  ;;  %v5878_v44 = vor.u32 %v5877_v2, %v5874_v10  ;;  %v5888_v11 = vrot.slane %v5886_v40, 4  ;;  %v5889_v39 = vshll.u32 %v18878_v3, 16 }
 0x407   :  { %15897 = vmatmul.mubr.msk.bf16.gmra.mrb[64].mxu1 %vm4374_vm9, %v14630_v59  ;;  %v5895_v16 = vshll.u32 %v18884_v14, 16  ;;  %v4294_v43 = vmax.f32 %v4292_v54, %v4293_v19  ;;  %v4300_v27 = vrot.slane %v4299_v49, 2  ;;  %v4307_v51 = vrot.slane %v4306_v57, 2 }
 0x408   :  { %v4313_v62 = vmax.f32 %v4311_v35, %v4312_v56  ;;  %v4373_v32 = vmax.f32 %v18831_v8, %v4372_v17  ;;  %v5883_v48 = vrot.slane %v5881_v4, 5  ;;  %v5891_v25 = vrot.slane %v5889_v39, 5 }
 0x409   :  { %v5900_v28 = vshrl.u32 %v18889_v5, 16  ;;  %v4295_v20 = vrot.slane %v4294_v43, 1  ;;  %v4301_v1 = vmax.f32 %v4299_v49, %v4300_v27  ;;  %v4308_v9 = vmax.f32 %v4306_v57, %v4307_v51 }
 0x40a   :  { %v4314_v55 = vrot.slane %v4313_v62, 2  ;;  %v5879_v22 = vrot.slane %v5878_v44, 4  ;;  %v5892_v33 = vor.u32 %v5891_v25, %v5888_v11  ;;  %v5897_v21 = vrot.slane %v5895_v16, 5 }
 0x40b   :  { %v5903_v15 = vshll.u32 %v18889_v5, 16  ;;  %v4296_v10 = vmax.f32 %v4294_v43, %v4295_v20  ;;  %v4302_v58 = vrot.slane %v4301_v1, 1  ;;  %v4309_v6 = vrot.slane %v4308_v9, 1  ;;  %v18911_v43 = vld [vmem:[#allocation2 + $0x84] sm:$0x1] }
 0x40c   :  { %v4315_v47 = vmax.f32 %v4313_v62, %v4314_v55  ;;  %v5893_v8 = vrot.slane %v5892_v33, 4  ;;  %v5902_v17 = vrot.slane %v5900_v28, 4  ;;  %v5914_v54 = vshrl.u32 %v18896_v18, 16 }
 0x40d   :  { %v5905_v2 = vrot.slane %v5903_v15, 5  ;;  %v4303_v45 = vmax.f32 %v4301_v1, %v4302_v58  ;;  %v4310_v29 = vmax.f32 %v4308_v9, %v4309_v6  ;;  %v4747_v35 = vsel %vm4374_vm9, %v4296_v10, -inf }
 0x40e   :  { %v4316_v23 = vrot.slane %v4315_v47, 1  ;;  %v4757_v59 = vsel %vm4374_vm9, %v4373_v32, -inf  ;;  %v4749_v4 = vmax.f32 %v4747_v35, %v18825_v63  ;;  %v5884_v40 = vsel %vm18306_vm3, %v5879_v22, %v5883_v48  ;;  %v18913_v63 = vld [vmem:[#allocation2 + $0x8c] sm:$0x1] }
 0x40f   :  { %v5898_v19 = vsel %vm18306_vm3, %v5893_v8, %v5897_v21  ;;  %v4750_v57 = vsel %vm4374_vm9, %v4303_v45, -inf  ;;  %v4753_v56 = vsel %vm4374_vm9, %v4310_v29, -inf  ;;  %v5906_v51 = vor.u32 %v5905_v2, %v5902_v17  ;;  %v5658_v8 = vld [vmem:[#allocation2 + $0x90] sm:$0xf] }
 0x410   :  { %v4317_v49 = vmax.f32 %v4315_v47, %v4316_v23  ;;  %v14631_v44 = vcombine.low %v5884_v40, %v5898_v19  ;;  %v4752_v11 = vmax.f32 %v4750_v57, %v18847_v30  ;;  %v4755_v39 = vmax.f32 %v4753_v56, %v18869_v46  ;;  %v5661_v30 = vld [vmem:[#allocation2 + $0x94] sm:$0x1]  ;;  %v6270_v19 = vld [vmem:[#allocation2 + $0x50] sm:$0xe]  ;;  %v6272_v57 = vld [vmem:[#allocation2 + $0x60] sm:$0xe] }
 0x411   :  { %v15555_v16 = vpack.c.bf16 %v4749_v4, %v4749_v4  ;;  %v5916_v62 = vrot.slane %v5914_v54, 4  ;;  %v5917_v32 = vshll.u32 %v18896_v18, 16  ;;  %v5909_v46 = vshll.u32 %v18911_v43, 16  ;;  %v16771_v4 = vld [vmem:[#allocation2] sm:$0xf] }
 0x412   :  { %v4756_v27 = vsel %vm4374_vm9, %v4317_v49, -inf  ;;  %15900 = vmatprep.mubr.msk.bf16.mxu1 %vm4374_vm9, %v14631_v44  ;;  %v15556_v25 = vpack.c.bf16 %v4752_v11, %v4752_v11  ;;  %v15557_v28 = vpack.c.bf16 %v4755_v39, %v4755_v39  ;;  %v5923_v9 = vshll.u32 %v18913_v63, 16  ;;  %v6271_v49 = vld [vmem:[#allocation2 + $0x58] sm:$0xe]  ;;  %v6273_v11 = vld [vmem:[#allocation2 + $0x68] sm:$0xe] }
 0x413   :  { %v4758_v48 = vmax.f32 %v4756_v27, %v4757_v59  ;;  %v5395_v20 = vunpack.c.l.b16 %v15555_v16  ;;  %v5919_v1 = vrot.slane %v5917_v32, 5  ;;  %v5907_v15 = vrot.slane %v5906_v51, 4  ;;  %v16770_v59 = vld [vmem:[#allocation2 + $0x8] sm:$0xf]  ;;  %v6275_v51 = vld [vmem:[#allocation2 + $0x78] sm:$0xe] }
 0x414   :  { %v5396_v55 = vunpack.c.l.b16 %v15556_v25  ;;  %v5397_v22 = vunpack.c.l.b16 %v15557_v28  ;;  %v5911_v17 = vrot.slane %v5909_v46, 5  ;;  %v5925_v54 = vrot.slane %v5923_v9, 5  ;;  %v16773_v32 = vld [vmem:[#allocation2 + $0x18] sm:$0xf]  ;;  %v16438_v46 = vld [vmem:[%s21030_s4 + $0x28] sm:$0xff]  }
 0x415   :  { %v5498_v33 = vsel %vm5405_vm13, %v5395_v20, %v18842_v12  ;;  %v15574_v21 = vpack.c.bf16 %v4758_v48, %v4758_v48  ;;  %v5920_v10 = vor.u32 %v5919_v1, %v5916_v62  ;;  %v14643_v40 = vcombine.low %v16771_v4, %v16770_v59  ;;  %v16772_v62 = vld [vmem:[#allocation2 + $0x10] sm:$0xf]  ;;  %v6276_v20 = vld [vmem:[#allocation2 + $0x80] sm:$0xe]  ;;  %v16778_v59 = vld [vmem:[#allocation2 + $0x38] sm:$0xf] }
 0x416   :  { %v5499_v58 = vsel %vm5407_vm14, %v5396_v55, %v5498_v33  ;;  %v5912_v29 = vsel %vm18306_vm3, %v5907_v15, %v5911_v17  ;;  %vm6310_vm8 = vcmask 1042432   ;;  %vm6311_vm13 = vcmask 1046532   ;;  %v16775_v33 = vld [vmem:[#allocation2 + $0x28] sm:$0xf] }
 0x417   :  { %v5662_v6 = vsel %vm17067_vm7, %v15574_v21, %v5661_v30  ;;  %v5500_v47 = vsel %vm5409_vm0, %v5397_v22, %v5499_v58  ;;  %v5921_v2 = vrot.slane %v5920_v10, 4  ;;  %v14669_v56 = vrot.slane %v6270_v19, 9  ;;  %vm18935_vm15 = vmor %vm6310_vm8, %vm6311_vm13  ;;  %v6277_v30 = vld [vmem:[#allocation2 + $0x88] sm:$0xe]  ;;  %v16774_v22 = vld [vmem:[#allocation2 + $0x20] sm:$0xf] }
 0x418   :  { %5663 = vst [vmem:[#allocation2 + $0x94] sm:$0x1] %v5662_v6  ;;  %v5531_v45 = vpack.c.b16 %v5500_v47, %v5500_v47  ;;  %v6347_v44 = vrot.slane %v18818_v60, 5  ;;  %v14670_v16 = vrot.slane %v6271_v49, 9  ;;  %v6351_v27 = vrot.slane %v18814_v37, 5 }
 0x419   :  { %v5926_v12 = vsel %vm18306_vm3, %v5921_v2, %v5925_v54  ;;  %v14644_v48 = vcombine.low %v16772_v62, %v16773_v32  ;;  %v14671_v28 = vrot.slane %v6272_v57, 9  ;;  %v6355_v60 = vrot.slane %v18844_v7, 5  ;;  %v6262_v19 = vld [vmem:[#allocation2] sm:$0xe]  ;;  %v6263_v49 = vld [vmem:[#allocation2 + $0x8] sm:$0xe] }
 0x41a   :  { %v5659_v23 = vsel %vm17218_vm1, %v5531_v45, %v5658_v8  ;;  %v14632_v35 = vcombine.low %v5912_v29, %v5926_v12  ;;  %v18942_v25 = vsel %vm18935_vm15, %v14669_v56, %v6347_v44  ;;  %v18950_v37 = vsel %vm18935_vm15, %v14670_v16, %v6351_v27  ;;  %v16776_v8 = vld [vmem:[%s21030_s4 + $0x20] sm:$0xff]   ;;  %v16780_v27 = vld [vmem:[#allocation2 + $0xc] sm:$0x1] }
 0x41b   :  { %5660 = vst [vmem:[#allocation2 + $0x90] sm:$0xf] %v5659_v23  ;;  %v14672_v1 = vrot.slane %v6273_v11, 9  ;;  %v6359_v9 = vrot.slane %v18854_v26, 5  ;;  %v14673_v55 = vrot.slane %v6274_v50, 9  ;;  %v14645_v21 = vcombine.low %v16774_v22, %v16775_v33 }
 0x41c   :  { %15901 = vmatmul.mubr.msk.bf16.gmra.mrb[68].mxu1 %vm4374_vm9, %v14632_v35  ;;  %v14685_v7 = vcombine.low %v18942_v25, %v18950_v37  ;;  %v18957_v15 = vsel %vm18935_vm15, %v14671_v28, %v6355_v60  ;;  %v14674_v10 = vrot.slane %v6275_v51, 9  ;;  %v6363_v26 = vrot.slane %v18874_v31, 5  ;;  %v16442_v31 = vld [vmem:[%s21030_s4 + $0x30] sm:$0xff]   ;;  %v16779_v11 = vld [vmem:[#allocation2 + $0x4] sm:$0x1] }
 0x41d   :  { %15908 = vmatprep.mubr.msk.bf16.mxu1 %vm4374_vm9, %v14643_v40  ;;  %v18962_v58 = vsel %vm18935_vm15, %v14672_v1, %v6359_v9  ;;  %v6367_v6 = vrot.slane %v18884_v14, 5  ;;  %v14675_v47 = vrot.slane %v6276_v20, 9  ;;  %v6371_v2 = vrot.slane %v18911_v43, 5  ;;  %v16777_v35 = vld [vmem:[#allocation2 + $0x30] sm:$0xf] }
 0x41e   :  { %v14686_v17 = vcombine.low %v18957_v15, %v18962_v58  ;;  %v14676_v54 = vrot.slane %v6277_v30, 9  ;;  %v6375_v45 = vrot.slane %v18913_v63, 5  ;;  %v18979_v14 = vsel %vm18935_vm15, %v14673_v55, %v6363_v26  ;;  %v6266_v60 = vld [vmem:[#allocation2 + $0x20] sm:$0xe]  ;;  %v16782_v1 = vld [vmem:[#allocation2 + $0x2c] sm:$0x1] }
 0x41f   :  { %v18983_v29 = vsel %vm18935_vm15, %v14674_v10, %v6367_v6  ;;  %v18989_v43 = vsel %vm18935_vm15, %v14675_v47, %v6371_v2  ;;  %v14646_v4 = vcombine.low %v16777_v35, %v16778_v59  ;;  %v14647_v40 = vcombine.low %v18811_v0, %v18779_v36  ;;  %v16783_v22 = vld [vmem:[#allocation2 + $0x1c] sm:$0x1]  ;;  %v6269_v10 = vld [vmem:[#allocation2 + $0x38] sm:$0xe]  ;;  %v16444_v37 = vld [vmem:[#allocation2 + $0x8] ss:$8 sps:$4 sm:$0xff]  }
 0x420   :  { %v14687_v12 = vcombine.low %v18979_v14, %v18983_v29  ;;  %v18993_v63 = vsel %vm18935_vm15, %v14676_v54, %v6375_v45  ;;  %v14648_v57 = vcombine.low %v18829_v24, %v18833_v34  ;;  %v14649_v56 = vcombine.low %v18859_v13, %v18878_v3  ;;  %v6264_v24 = vld [vmem:[#allocation2 + $0x10] sm:$0xe]  ;;  %v6267_v34 = vld [vmem:[#allocation2 + $0x28] sm:$0xe]  ;;  %v6265_v3 = vld [vmem:[#allocation2 + $0x18] sm:$0xe] }
 0x421   :  { %v14688_v23 = vcombine.low %v18989_v43, %v18993_v63  ;;  %v14661_v44 = vrot.slane %v6262_v19, 9  ;;  %v6315_v50 = vrot.slane %v16779_v11, 5  ;;  %v14662_v16 = vrot.slane %v6263_v49, 9  ;;  %v16443_v2 = vld [vmem:[%s21030_s4 + $0x38] sm:$0xff]   ;;  %v16786_v19 = vld [vmem:[#allocation2 + $0x34] sm:$0x1] }
 0x422   :  { %v6319_v36 = vrot.slane %v16780_v27, 5  ;;  %v14650_v13 = vcombine.low %v18889_v5, %v18896_v18  ;;  %v14663_v32 = vrot.slane %v6264_v24, 9  ;;  %v14666_v20 = vrot.slane %v6267_v34, 9  ;;  %v16784_v18 = vld [vmem:[#allocation2 + $0x24] sm:$0x1]  ;;  %v19065_v63 = vld [vmem:[%s21030_s4 + $0x50] sm:$0xff]  }
 0x423   :  { %v6316_v0 = vsel %vm18935_vm15, %v14661_v44, %v6315_v50  ;;  %v14664_v30 = vrot.slane %v6265_v3, 9  ;;  %v6335_v9 = vrot.slane %v16782_v1, 5  ;;  %v6327_v5 = vrot.slane %v16783_v22, 5  ;;  %v16785_v59 = vld [vmem:[#allocation2 + $0x3c] sm:$0x1] }
 0x424   :  { %15909 = vmatmul.mubr.msk.bf16.vlgmr.msra.gmra.mrb[56].mxu1 %vm4374_vm9, %v14644_v48  ;;  %v6320_v51 = vsel %vm18935_vm15, %v14662_v16, %v6319_v36  ;;  %v16781_v48 = vld [vmem:[#allocation2 + $0x14] sm:$0x1]  ;;  %v6331_v33 = vrot.slane %v16784_v18, 5  ;;  %v14668_v45 = vrot.slane %v6269_v10, 9  ;;  %v6339_v49 = vrot.slane %v16786_v19, 5 }
 0x425   :  { %15925 = vmatpush3.bf16.msra.mxu1 %v16776_v8  ;;  %15912 = vmatprep.mubr.msk.bf16.mxu1 %vm4374_vm9, %v14645_v21  ;;  %v14681_v62 = vcombine.low %v6316_v0, %v6320_v51  ;;  %v6323_v28 = vrot.slane %v16781_v48, 5  ;;  %v6336_v21 = vsel %vm18935_vm15, %v14666_v20, %v6335_v9  ;;  %v6328_v26 = vsel %vm18935_vm15, %v14664_v30, %v6327_v5  ;;  %v6268_v8 = vld [vmem:[#allocation2 + $0x30] sm:$0xe]  ;;  %v99_v44 = vld [vmem:[#allocation2 + $0x48] sm:$0x1] }
 0x426   :  { %15926 = vmatprep.subr.bf16.mxu1 %v16438_v46  ;;  %v14667_v35 = vrot.slane %v6268_v8, 9  ;;  %v129_v11 = vld [vmem:[#allocation2 + $0x98] sm:$0x1]  ;;  %v100_v50 = vsel %vm17067_vm7, 0, %v99_v44  ;;  %v6767_v58 = vld [vmem:[#allocation2 + $0x10] sm:$0xf] }
 0x427   :  { %v6324_v55 = vsel %vm18935_vm15, %v14663_v32, %v6323_v28  ;;  %v130_v25 = vsel %vm17067_vm7, 0, %v129_v11  ;;  %101 = vst [vmem:[#allocation2 + $0x48] sm:$0x1] %v100_v50  ;;  %v16446_v15 = vld [vmem:[#allocation2 + $0x18] ss:$8 sps:$4 sm:$0xff]   ;;  %v6815_v16 = vshll.u32 %v6767_v58, 16 }
 0x428   :  { %v14682_v6 = vcombine.low %v6324_v55, %v6328_v26  ;;  %131 = vst [vmem:[#allocation2 + $0x98] sm:$0x1] %v130_v25  ;;  %v16447_v14 = vld [vmem:[#allocation2 + $0x28] ss:$8 sps:$4 sm:$0xff]   ;;  %v161_v43 = vld [vmem:[#allocation2 + $0x4c] sm:$0x1] }
 0x429   :  { %15927 = vmatpush3.bf16.msra.mxu1 %v16438_v46  ;;  %v14665_v46 = vrot.slane %v6266_v60, 9  ;;  %v6769_v36 = vld [vmem:[#allocation2 + $0x18] sm:$0xf]  ;;  %v19067_v0 = vld [vmem:[#allocation2 + $0xc] sm:$0x1]  ;;  %v6817_v34 = vrot.slane %v6815_v16, 5 }
 0x42a   :  { %15944 = vmatprep.subr.bf16.mxu1 %v16442_v31  ;;  %v19071_v3 = vld [vmem:[#allocation2 + $0x14] sm:$0x1]  ;;  %v16448_v48 = vld [vmem:[#allocation2 + $0x38] ss:$8 sps:$4 sm:$0xff]   ;;  %v6773_v28 = vld [vmem:[#allocation2 + $0x28] sm:$0xf] }
 0x42b   :  { %v6332_v47 = vsel %vm18935_vm15, %v14665_v46, %v6331_v33  ;;  %v16449_v60 = vld [vmem:[#allocation2 + $0x58] ss:$8 sps:$4 sm:$0xff]   ;;  %v6807_v20 = vshll.u32 %v19067_v0, 16  ;;  %v6826_v30 = vshrl.u32 %v6769_v36, 16  ;;  %v6829_v46 = vshll.u32 %v6769_v36, 16 }
 0x42c   :  { %15913 = vmatmul.mubr.msk.bf16.gmra.mrb[60].mxu1 %vm4374_vm9, %v14646_v4  ;;  %v14683_v54 = vcombine.low %v6332_v47, %v6336_v21  ;;  %v6343_v4 = vrot.slane %v16785_v59, 5  ;;  %v6821_v55 = vshll.u32 %v19071_v3, 16  ;;  %v6775_v18 = vld [vmem:[#allocation2 + $0x30] sm:$0xf]  ;;  %v6854_v33 = vshrl.u32 %v6773_v28, 16 }
 0x42d   :  { %15916 = vmatprep.mubr.msk.bf16.mxu1 %vm4374_vm9, %v14647_v40  ;;  %v16445_v40 = vld [vmem:[%s21030_s4 + $0x40] sm:$0xff]   ;;  %v6857_v21 = vshll.u32 %v6773_v28, 16  ;;  %v19078_v10 = vld [vmem:[#allocation2 + $0x1c] sm:$0x1]  ;;  %v6809_v26 = vrot.slane %v6807_v20, 5  ;;  %v6828_v47 = vrot.slane %v6826_v30, 4 }
 0x42e   :  { %v6831_v8 = vrot.slane %v6829_v46, 5  ;;  %v16452_v44 = vld [vmem:[#allocation2 + $0x78] ss:$8 sps:$4 sm:$0xff]   ;;  %vm200_vm7 = vcmask 516096   ;;  %vm238_vm0 = vcmask 518146   ;;  %vm8838_vm4 = vcmask 517120  }
 0x42f   :  { %v6859_v19 = vrot.slane %v6857_v21, 5  ;;  %v6777_v50 = vld [vmem:[#allocation2 + $0x38] sm:$0xf]  ;;  %vm19409_vm1 = vmand %vm200_vm7, %vm70_vm6  ;;  %vm9586_vm8 = vsmask.f32 2306 }
 0x430   :  { %v6832_v11 = vor.u32 %v6831_v8, %v6828_v47  ;;  %vm9711_vm7 = vsmask.f32 5392 }
 0x432   :  { %v6833_v36 = vrot.slane %v6832_v11, 4  ;;  %v6785_v11 = vld [vmem:[#allocation2 + $0x68] sm:$0xf] }
 0x434   :  { %15917 = vmatmul.mubr.msk.bf16.gmra.mrb[64].mxu1 %vm4374_vm9, %v14648_v57  ;;  %v6344_v57 = vsel %vm18935_vm15, %v14668_v45, %v6343_v4  ;;  %v6868_v45 = vshrl.u32 %v6775_v18, 16 }
 0x435   :  { %15920 = vmatprep.mubr.msk.bf16.mxu1 %vm4374_vm9, %v14649_v56  ;;  %v6340_v56 = vsel %vm18935_vm15, %v14667_v35, %v6339_v49  ;;  %v6871_v35 = vshll.u32 %v6775_v18, 16  ;;  %v16451_v49 = vld [vmem:[#allocation2 + $0x68] ss:$8 sps:$4 sm:$0xff]  }
 0x43c   :  { %15921 = vmatmul.mubr.msk.bf16.gmra.mrb[68].mxu1 %vm4374_vm9, %v14650_v13  ;;  %v162_v13 = vsel %vm17059_vm5, 0, %v161_v43 }
 0x43d   :  { %15928 = vmatprep.mubr.msk.bf16.mxu1 %vm4374_vm9, %v14681_v62  ;;  %163 = vst [vmem:[#allocation2 + $0x4c] sm:$0x1] %v162_v13  ;;  %v6781_v13 = vld [vmem:[#allocation2 + $0x58] sm:$0xf] }
 0x43e   :  { %v6913_v18 = vshll.u32 %v6781_v13, 16 }
 0x444   :  { %15929 = vmatmul.mubr.msk.bf16.vlgmr.msra.gmra.mrb[56].mxu1 %vm4374_vm9, %v14682_v6  ;;  %v19080_v6 = vld [vmem:[#allocation2 + $0x24] sm:$0x1] }
 0x445   :  { %15945 = vmatpush3.bf16.msra.mxu1 %v16442_v31  ;;  %15932 = vmatprep.mubr.msk.bf16.mxu1 %vm4374_vm9, %v14683_v54  ;;  %v14684_v31 = vcombine.low %v6340_v56, %v6344_v57  ;;  %v6823_v54 = vrot.slane %v6821_v55, 5  ;;  %v6835_v57 = vshll.u32 %v19078_v10, 16  ;;  %v6849_v56 = vshll.u32 %v19080_v6, 16 }
 0x446   :  { %15946 = vmatprep.subr.bf16.mxu1 %v16443_v2 }
 0x447   :  { %v6837_v16 = vrot.slane %v6835_v57, 5  ;;  %v6851_v43 = vrot.slane %v6849_v56, 5 }
 0x449   :  { %15947 = vmatpush3.bf16.msra.mxu1 %v16443_v2  ;;  %v6838_v8 = vsel %vm18306_vm3, %v6833_v36, %v6837_v16  ;;  %v6941_v36 = vshll.u32 %v6785_v11, 16 }
 0x44a   :  { %15964 = vmatprep.subr.bf16.mxu1 %v16445_v40 }
 0x44c   :  { %15933 = vmatmul.mubr.msk.bf16.gmra.mrb[60].mxu1 %vm4374_vm9, %v14684_v31  ;;  %v19084_v31 = vld [vmem:[#allocation2 + $0x2c] sm:$0x1] }
 0x44d   :  { %15936 = vmatprep.mubr.msk.bf16.mxu1 %vm4374_vm9, %v14685_v7  ;;  %v6765_v7 = vld [vmem:[#allocation2 + $0x8] sm:$0xf] }
 0x44e   :  { %v6798_v42 = vshrl.u32 %v6765_v7, 16  ;;  %v6801_v29 = vshll.u32 %v6765_v7, 16  ;;  %v6873_v7 = vrot.slane %v6871_v35, 5 }
 0x450   :  { %v6800_v27 = vrot.slane %v6798_v42, 4  ;;  %v6803_v51 = vrot.slane %v6801_v29, 5  ;;  %v6863_v29 = vshll.u32 %v19084_v31, 16 }
 0x452   :  { %v6804_v1 = vor.u32 %v6803_v51, %v6800_v27  ;;  %v6882_v27 = vshrl.u32 %v6777_v50, 16  ;;  %v6885_v51 = vshll.u32 %v6777_v50, 16  ;;  %v6865_v46 = vrot.slane %v6863_v29, 5 }
 0x453   :  { %v6980_v29 = vshrl.u32 %v6791_v38, 16 }
 0x454   :  { %15937 = vmatmul.mubr.msk.bf16.gmra.mrb[64].mxu1 %vm4374_vm9, %v14686_v17  ;;  %v16450_v17 = vld [vmem:[%s21030_s4 + $0x48] sm:$0xff]   ;;  %v6805_v2 = vrot.slane %v6804_v1, 4  ;;  %v6884_v55 = vrot.slane %v6882_v27, 4  ;;  %v6938_v27 = vshrl.u32 %v6785_v11, 16 }
 0x455   :  { %15940 = vmatprep.mubr.msk.bf16.mxu1 %vm4374_vm9, %v14687_v12  ;;  %v6812_v12 = vshrl.u32 %v6767_v58, 16 }
 0x456   :  { %v6810_v25 = vsel %vm18306_vm3, %v6805_v2, %v6809_v26 }
 0x457   :  { %v6814_v24 = vrot.slane %v6812_v12, 4  ;;  %v6783_v12 = vld [vmem:[#allocation2 + $0x60] sm:$0xf] }
 0x458   :  { %v6927_v28 = vshll.u32 %v6783_v12, 16 }
 0x459   :  { %v6818_v9 = vor.u32 %v6817_v34, %v6814_v24 }
 0x45a   :  { %v6929_v35 = vrot.slane %v6927_v28, 5  ;;  %v19125_v28 = vld [vmem:[#allocation2 + $0x6c] sm:$0x1] }
 0x45b   :  { %v6819_v59 = vrot.slane %v6818_v9, 4  ;;  %v16453_v9 = vld [vmem:[#allocation2 + $0x88] ss:$8 sps:$4 sm:$0xff]  }
 0x45c   :  { %15941 = vmatmul.mubr.msk.bf16.gmra.mrb[68].mxu1 %vm4374_vm9, %v14688_v23  ;;  %v6771_v23 = vld [vmem:[#allocation2 + $0x20] sm:$0xf] }
 0x45d   :  { %15948 = vmatprep.mubr.msk.bf16.mxu1 %vm4374_vm9, %v16444_v37  ;;  %v6840_v62 = vshrl.u32 %v6771_v23, 16  ;;  %v6843_v32 = vshll.u32 %v6771_v23, 16  ;;  %v6870_v37 = vrot.slane %v6868_v45, 4  ;;  %v6824_v58 = vsel %vm18306_vm3, %v6819_v59, %v6823_v54  ;;  %v19095_v23 = vld [vmem:[#allocation2 + $0x3c] sm:$0x1] }
 0x45e   :  { %v19106_v54 = vld [vmem:[#allocation2 + $0x44] sm:$0x1]  ;;  %v6787_v59 = vld [vmem:[#allocation2 + $0x70] sm:$0xf] }
 0x45f   :  { %v6842_v22 = vrot.slane %v6840_v62, 4  ;;  %v6845_v5 = vrot.slane %v6843_v32, 5  ;;  %v14725_v62 = vcombine.low %v6810_v25, %v6824_v58  ;;  %v6874_v32 = vor.u32 %v6873_v7, %v6870_v37  ;;  %v19115_v37 = vld [vmem:[#allocation2 + $0x64] sm:$0x1]  ;;  %v6789_v58 = vld [vmem:[#allocation2 + $0x78] sm:$0xf] }
 0x460   :  { %v6952_v7 = vshrl.u32 %v6787_v59, 16  ;;  %v6905_v16 = vshll.u32 %v19106_v54, 16 }
 0x461   :  { %v6846_v4 = vor.u32 %v6845_v5, %v6842_v22  ;;  %v6891_v22 = vshll.u32 %v19095_v23, 16  ;;  %v6910_v5 = vshrl.u32 %v6781_v13, 16  ;;  %v6875_v2 = vrot.slane %v6874_v32, 4 }
 0x462   :  { %v6966_v13 = vshrl.u32 %v6789_v58, 16 }
 0x463   :  { %v19113_v57 = vrot.slane %v6891_v22, 5  ;;  %v6912_v56 = vrot.slane %v6910_v5, 4  ;;  %v6795_v22 = vld [vmem:[#allocation2 + $0x90] sm:$0xf]  ;;  %v6907_v5 = vrot.slane %v6905_v16, 5 }
 0x464   :  { %15949 = vmatmul.mubr.msk.bf16.vlgmr.msra.gmra.mrb[56].mxu1 %vm4374_vm9, %v16446_v15  ;;  %v6779_v15 = vld [vmem:[#allocation2 + $0x40] sm:$0xf] }
 0x465   :  { %15965 = vmatpush3.bf16.msra.mxu1 %v16445_v40  ;;  %15952 = vmatprep.mubr.msk.bf16.mxu1 %vm4374_vm9, %v16447_v14  ;;  %v6856_v40 = vrot.slane %v6854_v33, 4  ;;  %v19092_v14 = vld [vmem:[#allocation2 + $0x34] sm:$0x1]  ;;  %v6896_v24 = vshrl.u32 %v6779_v15, 16  ;;  %v6899_v34 = vshll.u32 %v6779_v15, 16  ;;  %v6887_v33 = vrot.slane %v6885_v51, 5 }
 0x466   :  { %15966 = vmatprep.subr.bf16.mxu1 %v16450_v17  ;;  %v6877_v1 = vshll.u32 %v19092_v14, 16  ;;  %v6955_v15 = vshll.u32 %v6787_v59, 16 }
 0x467   :  { %v6860_v42 = vor.u32 %v6859_v19, %v6856_v40  ;;  %v6898_v21 = vrot.slane %v6896_v24, 4  ;;  %v6901_v26 = vrot.slane %v6899_v34, 5  ;;  %v19109_v19 = vld [vmem:[#allocation2 + $0x5c] sm:$0x1]  ;;  %v6888_v50 = vor.u32 %v6887_v33, %v6884_v55 }
 0x468   :  { %v6879_v40 = vrot.slane %v6877_v1, 5  ;;  %v6933_v24 = vshll.u32 %v19115_v37, 16  ;;  %v16455_v34 = vld [vmem:[%s21030_s4 + $0x58] sm:$0xff]   ;;  %v19128_v1 = vld [vmem:[#allocation2 + $0x74] sm:$0x1]  ;;  %v6940_v33 = vrot.slane %v6938_v27, 4 }
 0x469   :  { %15967 = vmatpush3.bf16.msra.mxu1 %v16450_v17  ;;  %v6847_v17 = vrot.slane %v6846_v4, 4  ;;  %v6861_v30 = vrot.slane %v6860_v42, 4  ;;  %v6902_v25 = vor.u32 %v6901_v26, %v6898_v21  ;;  %v6943_v21 = vrot.slane %v6941_v36, 5  ;;  %v6793_v26 = vld [vmem:[#allocation2 + $0x88] sm:$0xf] }
 0x46a   :  { %15984 = vmatprep.subr.bf16.mxu1 %v19065_v63 }
 0x46b   :  { %v6852_v20 = vsel %vm18306_vm3, %v6847_v17, %v6851_v43  ;;  %v6880_v17 = vsel %vm18306_vm3, %v6875_v2, %v6879_v40  ;;  %v6919_v43 = vshll.u32 %v19109_v19, 16  ;;  %v6968_v2 = vrot.slane %v6966_v13, 4 }
 0x46c   :  { %15953 = vmatmul.mubr.msk.bf16.gmra.mrb[60].mxu1 %vm4374_vm9, %v16448_v48  ;;  %v6924_v48 = vshrl.u32 %v6783_v12, 16  ;;  %v14726_v4 = vcombine.low %v6838_v8, %v6852_v20  ;;  %v6983_v12 = vshll.u32 %v6791_v38, 16  ;;  %v6957_v20 = vrot.slane %v6955_v15, 5 }
 0x46d   :  { %15956 = vmatprep.mubr.msk.bf16.mxu1 %vm4374_vm9, %v16449_v60  ;;  %v191_v60 = vld [vmem:[#allocation2 + $0x9c] sm:$0x1]  ;;  %v6935_v8 = vrot.slane %v6933_v24, 5  ;;  %v7008_v40 = vshrl.u32 %v6795_v22, 16  ;;  %v7011_v38 = vshll.u32 %v6795_v22, 16  ;;  %v6994_v15 = vshrl.u32 %v6793_v26, 16 }
 0x46e   :  { %v192_v47 = vsel %vm17059_vm5, 0, %v191_v60  ;;  %v6926_v45 = vrot.slane %v6924_v48, 4  ;;  %v6903_v48 = vrot.slane %v6902_v25, 4  ;;  %v6954_v60 = vrot.slane %v6952_v7, 4  ;;  %v19148_v7 = vld [vmem:[#allocation2 + $0x7c] sm:$0x1] }
 0x46f   :  { %193 = vst [vmem:[#allocation2 + $0x9c] sm:$0x1] %v192_v47  ;;  %v6985_v55 = vrot.slane %v6983_v12, 5  ;;  %v6961_v25 = vshll.u32 %v19128_v1, 16  ;;  %v7013_v27 = vrot.slane %v7011_v38, 5  ;;  %v6975_v36 = vshll.u32 %v19148_v7, 16 }
 0x470   :  { %v6930_v42 = vor.u32 %v6929_v35, %v6926_v45  ;;  %v19135_v35 = vld [vmem:[%s21030_s4 + $0x60] sm:$0xff]   ;;  %v6958_v59 = vor.u32 %v6957_v20, %v6954_v60  ;;  %v6996_v13 = vrot.slane %v6994_v15, 4  ;;  %v19157_v60 = vld [vmem:[#allocation2 + $0x94] sm:$0x1]  ;;  %v7249_v38 = vrot.slane %v19067_v0, 5 }
 0x471   :  { %vm194_vm5 = vcmask 518144  }
 0x472   :  { %v6959_v16 = vrot.slane %v6958_v59, 4  ;;  %196 = vst.msk [vmem:[#allocation3 + $0x18] sm:$0x7] %vm194_vm5, %v16828_v41  ;;  %195 = vst.msk [vmem:[#allocation3] sm:$0x7] %vm194_vm5, %v16828_v41 }
 0x473   :  { %198 = vst.msk [vmem:[#allocation3 + $0x14] sm:$0x7] %vm194_vm5, %v16828_v41  ;;  %199 = vst.msk [vmem:[#allocation3 + $0x2c] sm:$0x7] %vm194_vm5, %v16828_v41 }
 0x474   :  { %15957 = vmatmul.mubr.msk.bf16.gmra.mrb[64].mxu1 %vm4374_vm9, %v16451_v49  ;;  %v6866_v49 = vsel %vm18306_vm3, %v6861_v30, %v6865_v46  ;;  %v6889_v30 = vrot.slane %v6888_v50, 4  ;;  %v6931_v46 = vrot.slane %v6930_v42, 4  ;;  %v6944_v50 = vor.u32 %v6943_v21, %v6940_v33  ;;  %v7199_v21 = vld [vmem:[#allocation2 + $0x8] sm:$0xe]  ;;  %vm19569_vm13 = vmand %vm194_vm5, %vm9586_vm8 }
 0x475   :  { %15960 = vmatprep.mubr.msk.bf16.mxu1 %vm4374_vm9, %v16452_v44  ;;  %v6915_v44 = vrot.slane %v6913_v18, 5  ;;  %v14727_v32 = vcombine.low %v6866_v49, %v6880_v17  ;;  %v6921_v18 = vrot.slane %v6919_v43, 5  ;;  %v7010_v43 = vrot.slane %v7008_v40, 4 }
 0x476   :  { %v6894_v49 = vsel %vm18306_vm3, %v6889_v30, %v19113_v57  ;;  %v6945_v24 = vrot.slane %v6944_v50, 4  ;;  %v14743_v40 = vrot.slane %v7199_v21, 9  ;;  %v7285_v21 = vrot.slane %v19115_v37, 5  ;;  %v7212_v37 = vld [vmem:[#allocation2 + $0x80] sm:$0xe] }
 0x477   :  { %v6916_v51 = vor.u32 %v6915_v44, %v6912_v56  ;;  %v6936_v56 = vsel %vm18306_vm3, %v6931_v46, %v6935_v8  ;;  %v6947_v44 = vshll.u32 %v19125_v28, 16  ;;  %v7014_v46 = vor.u32 %v7013_v27, %v7010_v43 }
 0x478   :  { %v7261_v27 = vrot.slane %v19080_v6, 5  ;;  %vm9709_vm5 = vsmask.f32 3336 }
 0x479   :  { %v6917_v47 = vrot.slane %v6916_v51, 4  ;;  %v6949_v20 = vrot.slane %v6947_v44, 5 }
 0x47b   :  { %v6922_v42 = vsel %vm18306_vm3, %v6917_v47, %v6921_v18  ;;  %v6950_v18 = vsel %vm18306_vm3, %v6945_v24, %v6949_v20  ;;  %v7257_v24 = vrot.slane %v19078_v10, 5  ;;  %v7208_v20 = vld [vmem:[#allocation2 + $0x60] sm:$0xe]  ;;  %v16457_v10 = vld [vmem:[%s21030_s4 + $0x68] sm:$0xff]  }
 0x47c   :  { %15961 = vmatmul.mubr.msk.bf16.gmra.mrb[68].mxu1 %vm4374_vm9, %v16453_v9  ;;  %v6982_v9 = vrot.slane %v6980_v29, 4  ;;  %v14729_v12 = vcombine.low %v6922_v42, %v6936_v56  ;;  %v7253_v56 = vrot.slane %v19071_v3, 5  ;;  %v7201_v3 = vld [vmem:[#allocation2 + $0x18] sm:$0xe] }
 0x47d   :  { %15968 = vmatprep.mubr.msk.bf16.mxu1 %vm4374_vm9, %v14725_v62  ;;  %v6969_v62 = vshll.u32 %v6789_v58, 16  ;;  %v6997_v58 = vshll.u32 %v6793_v26, 16  ;;  %v7200_v26 = vld [vmem:[#allocation2 + $0x10] sm:$0xe]  ;;  %v14745_v43 = vrot.slane %v7201_v3, 9 }
 0x47e   :  { %v6986_v11 = vor.u32 %v6985_v55, %v6982_v9  ;;  %v7017_v9 = vshll.u32 %v19157_v60, 16  ;;  %v6977_v55 = vrot.slane %v6975_v36, 5 }
 0x47f   :  { %v6971_v45 = vrot.slane %v6969_v62, 5  ;;  %v6999_v62 = vrot.slane %v6997_v58, 5  ;;  %v7202_v58 = vld [vmem:[#allocation2 + $0x20] sm:$0xe] }
 0x480   :  { %v6987_v51 = vrot.slane %v6986_v11, 4  ;;  %v7019_v59 = vrot.slane %v7017_v9, 5 }
 0x481   :  { %v6972_v29 = vor.u32 %v6971_v45, %v6968_v2  ;;  %v7000_v33 = vor.u32 %v6999_v62, %v6996_v13  ;;  %v7265_v13 = vrot.slane %v19084_v31, 5  ;;  %v7207_v31 = vld [vmem:[#allocation2 + $0x58] sm:$0xe] }
 0x483   :  { %v7001_v44 = vrot.slane %v7000_v33, 4  ;;  %v14751_v33 = vrot.slane %v7207_v31, 9 }
 0x484   :  { %15969 = vmatmul.mubr.msk.bf16.vlgmr.msra.gmra.mrb[56].mxu1 %vm4374_vm9, %v14726_v4  ;;  %v19139_v4 = vld [vmem:[#allocation2 + $0x84] sm:$0x1] }
 0x485   :  { %15985 = vmatpush3.bf16.msra.mxu1 %v19065_v63  ;;  %15972 = vmatprep.mubr.msk.bf16.mxu1 %vm4374_vm9, %v14727_v32  ;;  %v6908_v63 = vsel %vm18306_vm3, %v6903_v48, %v6907_v5  ;;  %v6989_v57 = vshll.u32 %v19139_v4, 16  ;;  %v6973_v32 = vrot.slane %v6972_v29, 4  ;;  %v19164_v5 = vld [vmem:[#allocation2 + $0x8c] sm:$0x1] }
 0x486   :  { %15986 = vmatprep.subr.bf16.mxu1 %v16455_v34  ;;  %v14728_v17 = vcombine.low %v6894_v49, %v6908_v63  ;;  %v7003_v45 = vshll.u32 %v19164_v5, 16  ;;  %v7015_v63 = vrot.slane %v7014_v46, 4  ;;  %v14744_v49 = vrot.slane %v7200_v26, 9  ;;  %v16459_v26 = vld [vmem:[%s21030_s4 + $0x70] sm:$0xff]  }
 0x487   :  { %v6991_v48 = vrot.slane %v6989_v57, 5  ;;  %v6978_v8 = vsel %vm18306_vm3, %v6973_v32, %v6977_v55  ;;  %v14746_v57 = vrot.slane %v7202_v58, 9  ;;  %v7206_v32 = vld [vmem:[#allocation2 + $0x40] sm:$0xe]  ;;  %v14752_v55 = vrot.slane %v7208_v20, 9 }
 0x488   :  { %v7005_v11 = vrot.slane %v7003_v45, 5  ;;  %v7020_v50 = vsel %vm18306_vm3, %v7015_v63, %v7019_v59  ;;  %v7254_v15 = vsel %vm18935_vm15, %v14744_v49, %v7253_v56  ;;  %v14750_v9 = vrot.slane %v7206_v32, 9  ;;  %v7210_v45 = vld [vmem:[#allocation2 + $0x70] sm:$0xe]  ;;  %v7211_v49 = vld [vmem:[#allocation2 + $0x78] sm:$0xe] }
 0x489   :  { %15987 = vmatpush3.bf16.msra.mxu1 %v16455_v34  ;;  %v6963_v34 = vrot.slane %v6961_v25, 5  ;;  %v6992_v22 = vsel %vm18306_vm3, %v6987_v51, %v6991_v48  ;;  %v7250_v25 = vsel %vm18935_vm15, %v14743_v40, %v7249_v38  ;;  %v7269_v51 = vrot.slane %v19092_v14, 5  ;;  %v7205_v14 = vld [vmem:[#allocation2 + $0x38] sm:$0xe]  ;;  %v7209_v40 = vld [vmem:[#allocation2 + $0x68] sm:$0xe] }
 0x48a   :  { %16004 = vmatprep.subr.bf16.mxu1 %v19135_v35  ;;  %v14731_v2 = vcombine.low %v6978_v8, %v6992_v22  ;;  %v7006_v0 = vsel %vm18306_vm3, %v7001_v44, %v7005_v11  ;;  %v14763_v29 = vcombine.low %v7250_v25, %v7254_v15  ;;  %v7258_v48 = vsel %vm18935_vm15, %v14745_v43, %v7257_v24  ;;  %v16464_v24 = vld [vmem:[%s21030_s4 + $0x78] sm:$0xff]   ;;  %v19250_v32 = vld [vmem:[%s21030_s4 + $0x80] sm:$0xff]   ;;  %v7706_v20 = vld [vmem:[#allocation2 + $0x28] sm:$0xf] }
 0x48b   :  { %v6964_v30 = vsel %vm18306_vm3, %v6959_v16, %v6963_v34  ;;  %v14732_v42 = vcombine.low %v7006_v0, %v7020_v50  ;;  %v7262_v34 = vsel %vm18935_vm15, %v14746_v57, %v7261_v27  ;;  %v14749_v22 = vrot.slane %v7205_v14, 9 }
 0x48c   :  { %15973 = vmatmul.mubr.msk.bf16.gmra.mrb[60].mxu1 %vm4374_vm9, %v14728_v17  ;;  %v14730_v47 = vcombine.low %v6950_v18, %v6964_v30  ;;  %v7204_v17 = vld [vmem:[#allocation2 + $0x30] sm:$0xe]  ;;  %v14764_v30 = vcombine.low %v7258_v48, %v7262_v34  ;;  %v7277_v18 = vrot.slane %v19106_v54, 5  ;;  %v14754_v38 = vrot.slane %v7210_v45, 9  ;;  %v7704_v48 = vld [vmem:[#allocation2 + $0x20] sm:$0xf] }
 0x48d   :  { %15976 = vmatprep.mubr.msk.bf16.mxu1 %vm4374_vm9, %v14729_v12  ;;  %v7203_v12 = vld [vmem:[#allocation2 + $0x28] sm:$0xe]  ;;  %v14748_v16 = vrot.slane %v7204_v17, 9  ;;  %v14753_v56 = vrot.slane %v7209_v40, 9  ;;  %v7293_v44 = vrot.slane %v19128_v1, 5  ;;  %v14755_v11 = vrot.slane %v7211_v49, 9 }
 0x48e   :  { %v14747_v36 = vrot.slane %v7203_v12, 9  ;;  %v7278_v8 = vsel %vm18935_vm15, %v14750_v9, %v7277_v18  ;;  %v7301_v50 = vrot.slane %v19139_v4, 5  ;;  %v7289_v25 = vrot.slane %v19125_v28, 5  ;;  %v7214_v17 = vld [vmem:[#allocation2 + $0x90] sm:$0xe] }
 0x48f   :  { %v7270_v62 = vsel %vm18935_vm15, %v14748_v16, %v7269_v51  ;;  %v7294_v15 = vsel %vm18935_vm15, %v14754_v38, %v7293_v44  ;;  %v7297_v58 = vrot.slane %v19148_v7, 5  ;;  %v14758_v57 = vrot.slane %v7214_v17, 9  ;;  %v16460_v51 = vld [vmem:[#allocation2 + $0x20] ss:$8 sps:$4 sm:$0xff]   ;;  %v16461_v34 = vld [vmem:[#allocation2 + $0x30] ss:$8 sps:$4 sm:$0xff]  }
 0x490   :  { %v7266_v6 = vsel %vm18935_vm15, %v14747_v36, %v7265_v13  ;;  %v7309_v28 = vrot.slane %v19157_v60, 5  ;;  %v7305_v12 = vrot.slane %v19164_v5, 5  ;;  %v16458_v36 = vld [vmem:[#allocation2 + $0x10] ss:$8 sps:$4 sm:$0xff]   ;;  %v7764_v9 = vshll.u32 %v7704_v48, 16 }
 0x491   :  { %v14765_v46 = vcombine.low %v7266_v6, %v7270_v62  ;;  %v7298_v1 = vsel %vm18935_vm15, %v14755_v11, %v7297_v58  ;;  %v7700_v60 = vld [vmem:[#allocation2 + $0x10] sm:$0xf]  ;;  %v7702_v62 = vld [vmem:[#allocation2 + $0x18] sm:$0xf]  ;;  %v7775_v31 = vshrl.u32 %v7706_v20, 16 }
 0x492   :  { %v7310_v16 = vsel %vm18935_vm15, %v14758_v57, %v7309_v28  ;;  %v7733_v5 = vshrl.u32 %v7700_v60, 16  ;;  %v7736_v13 = vshll.u32 %v7700_v60, 16  ;;  %v7747_v14 = vshrl.u32 %v7702_v62, 16  ;;  %v16463_v18 = vld [vmem:[#allocation2 + $0x60] ss:$8 sps:$4 sm:$0xff]  }
 0x493   :  { %v19258_v45 = vld [vmem:[#allocation2 + $0x1c] sm:$0x1]  ;;  %v19260_v38 = vld [vmem:[#allocation2 + $0x2c] sm:$0x1]  ;;  %v19263_v11 = vld [vmem:[#allocation2 + $0x24] sm:$0x1] }
 0x494   :  { %15977 = vmatmul.mubr.msk.bf16.gmra.mrb[64].mxu1 %vm4374_vm9, %v14730_v47  ;;  %v7273_v47 = vrot.slane %v19095_v23, 5  ;;  %v7738_v6 = vrot.slane %v7736_v13, 5  ;;  %v7756_v44 = vshll.u32 %v19258_v45, 16  ;;  %v16466_v57 = vld [vmem:[#allocation2 + $0x80] ss:$8 sps:$4 sm:$0xff]  }
 0x495   :  { %15980 = vmatprep.mubr.msk.bf16.mxu1 %vm4374_vm9, %v14731_v2  ;;  %v7286_v2 = vsel %vm18935_vm15, %v14752_v55, %v7285_v21  ;;  %v7778_v55 = vshll.u32 %v7706_v20, 16  ;;  %v7708_v21 = vld [vmem:[#allocation2 + $0x30] sm:$0xf]  ;;  %v19273_v20 = vld [vmem:[#allocation2 + $0x3c] sm:$0x1] }
 0x496   :  { %v7274_v54 = vsel %vm18935_vm15, %v14749_v22, %v7273_v47  ;;  %v16462_v22 = vld [vmem:[#allocation2 + $0x40] ss:$8 sps:$4 sm:$0xff]   ;;  %v7789_v40 = vshrl.u32 %v7708_v21, 16 }
 0x497   :  { %v14766_v63 = vcombine.low %v7274_v54, %v7278_v8  ;;  %v7749_v8 = vrot.slane %v7747_v14, 4 }
 0x49c   :  { %15981 = vmatmul.mubr.msk.bf16.gmra.mrb[68].mxu1 %vm4374_vm9, %v14732_v42  ;;  %v7290_v42 = vsel %vm18935_vm15, %v14753_v56, %v7289_v25  ;;  %v16465_v25 = vld [vmem:[#allocation2 + $0x70] ss:$8 sps:$4 sm:$0xff]  }
 0x49d   :  { %15988 = vmatprep.mubr.msk.bf16.mxu1 %vm4374_vm9, %v14763_v29  ;;  %v14768_v3 = vcombine.low %v7290_v42, %v7294_v15  ;;  %v7213_v29 = vld [vmem:[#allocation2 + $0x88] sm:$0xe] }
 0x49e   :  { %v14757_v7 = vrot.slane %v7213_v29, 9  ;;  %v7714_v42 = vld [vmem:[#allocation2 + $0x48] sm:$0xf] }
 0x49f   :  { %v7831_v60 = vshrl.u32 %v7714_v42, 16 }
 0x4a0   :  { %v7306_v43 = vsel %vm18935_vm15, %v14757_v7, %v7305_v12 }
 0x4a1   :  { %v14770_v27 = vcombine.low %v7306_v43, %v7310_v16  ;;  %v7758_v43 = vrot.slane %v7756_v44, 5 }
 0x4a4   :  { %15989 = vmatmul.mubr.msk.bf16.vlgmr.msra.gmra.mrb[56].mxu1 %vm4374_vm9, %v14764_v30  ;;  %v7735_v30 = vrot.slane %v7733_v5, 4 }
 0x4a5   :  { %16005 = vmatpush3.bf16.msra.mxu1 %v19135_v35  ;;  %15992 = vmatprep.mubr.msk.bf16.mxu1 %vm4374_vm9, %v14765_v46  ;;  %v7281_v35 = vrot.slane %v19109_v19, 5  ;;  %v14756_v19 = vrot.slane %v7212_v37, 9  ;;  %v7761_v46 = vshrl.u32 %v7704_v48, 16  ;;  %v7766_v37 = vrot.slane %v7764_v9, 5  ;;  %v19276_v9 = vld [vmem:[#allocation2 + $0x44] sm:$0x1] }
 0x4a6   :  { %16006 = vmatprep.subr.bf16.mxu1 %v16457_v10 }
 0x4a7   :  { %v7282_v59 = vsel %vm18935_vm15, %v14751_v33, %v7281_v35  ;;  %v7302_v0 = vsel %vm18935_vm15, %v14756_v19, %v7301_v50  ;;  %v19253_v33 = vld [vmem:[#allocation2 + $0x14] sm:$0x1]  ;;  %v7763_v54 = vrot.slane %v7761_v46, 4  ;;  %v7712_v50 = vld [vmem:[#allocation2 + $0x40] sm:$0xf] }
 0x4a8   :  { %v14767_v23 = vcombine.low %v7282_v59, %v7286_v2  ;;  %v14769_v4 = vcombine.low %v7298_v1, %v7302_v0  ;;  %v7742_v47 = vshll.u32 %v19253_v33, 16  ;;  %v7710_v2 = vld [vmem:[#allocation2 + $0x38] sm:$0xf]  ;;  %v7780_v59 = vrot.slane %v7778_v55, 5 }
 0x4a9   :  { %16007 = vmatpush3.bf16.msra.mxu1 %v16457_v10  ;;  %v7750_v10 = vshll.u32 %v7702_v62, 16  ;;  %v7803_v49 = vshrl.u32 %v7710_v2, 16  ;;  %v7806_v19 = vshll.u32 %v7710_v2, 16  ;;  %v7767_v0 = vor.u32 %v7766_v37, %v7763_v54  ;;  %v7716_v62 = vld [vmem:[#allocation2 + $0x60] sm:$0xf] }
 0x4aa   :  { %16024 = vmatprep.subr.bf16.mxu1 %v16459_v26  ;;  %v7744_v56 = vrot.slane %v7742_v47, 5  ;;  %v7791_v1 = vrot.slane %v7789_v40, 4  ;;  %v7817_v12 = vshrl.u32 %v7712_v50, 16  ;;  %v7820_v16 = vshll.u32 %v7712_v50, 16  ;;  %v7722_v54 = vld [vmem:[#allocation2 + $0x78] sm:$0xf] }
 0x4ab   :  { %v7752_v35 = vrot.slane %v7750_v10, 5  ;;  %v7805_v28 = vrot.slane %v7803_v49, 4  ;;  %v7808_v7 = vrot.slane %v7806_v19, 5  ;;  %v7768_v5 = vrot.slane %v7767_v0, 4  ;;  %v16467_v37 = vld [vmem:[#allocation2 + $0x90] ss:$8 sps:$4 sm:$0xff]  }
 0x4ac   :  { %15993 = vmatmul.mubr.msk.bf16.gmra.mrb[60].mxu1 %vm4374_vm9, %v14766_v63  ;;  %v7777_v63 = vrot.slane %v7775_v31, 4  ;;  %v7819_v31 = vrot.slane %v7817_v12, 4  ;;  %v7822_v55 = vrot.slane %v7820_v16, 5  ;;  %v7812_v2 = vshll.u32 %v19273_v20, 16  ;;  %v19286_v50 = vld [vmem:[#allocation2 + $0x64] sm:$0x1] }
 0x4ad   :  { %15996 = vmatprep.mubr.msk.bf16.mxu1 %vm4374_vm9, %v14767_v23  ;;  %v7792_v23 = vshll.u32 %v7708_v21, 16  ;;  %v7753_v58 = vor.u32 %v7752_v35, %v7749_v8  ;;  %v7809_v46 = vor.u32 %v7808_v7, %v7805_v28  ;;  %v7845_v21 = vshrl.u32 %v7716_v62, 16  ;;  %v7720_v16 = vld [vmem:[#allocation2 + $0x70] sm:$0xf] }
 0x4ae   :  { %v7781_v17 = vor.u32 %v7780_v59, %v7777_v63  ;;  %v7826_v59 = vshll.u32 %v19276_v9, 16  ;;  %v7823_v44 = vor.u32 %v7822_v55, %v7819_v31  ;;  %v16469_v31 = vld [vmem:[%s21030_s4 + $0x88] sm:$0xff]  }
 0x4af   :  { %v7794_v29 = vrot.slane %v7792_v23, 5 }
 0x4b0   :  { %v7782_v13 = vrot.slane %v7781_v17, 4  ;;  %v7847_v17 = vrot.slane %v7845_v21, 4  ;;  %v7828_v7 = vrot.slane %v7826_v59, 5 }
 0x4b4   :  { %15997 = vmatmul.mubr.msk.bf16.gmra.mrb[64].mxu1 %vm4374_vm9, %v14768_v3  ;;  %v7784_v3 = vshll.u32 %v19260_v38, 16 }
 0x4b5   :  { %16000 = vmatprep.mubr.msk.bf16.mxu1 %vm4374_vm9, %v14769_v4  ;;  %v7718_v4 = vld [vmem:[#allocation2 + $0x68] sm:$0xf] }
 0x4b6   :  { %v7786_v48 = vrot.slane %v7784_v3, 5  ;;  %v7862_v14 = vshll.u32 %v7718_v4, 16 }
 0x4b8   :  { %v7787_v35 = vsel %vm18306_vm3, %v7782_v13, %v7786_v48  ;;  %v7864_v23 = vrot.slane %v7862_v14, 5  ;;  %v7876_v14 = vshll.u32 %v7720_v16, 16 }
 0x4bc   :  { %16001 = vmatmul.mubr.msk.bf16.gmra.mrb[68].mxu1 %vm4374_vm9, %v14770_v27  ;;  %v7770_v27 = vshll.u32 %v19263_v11, 16 }
 0x4bd   :  { %16008 = vmatprep.mubr.msk.bf16.mxu1 %vm4374_vm9, %v16458_v36  ;;  %v19268_v36 = vld [vmem:[#allocation2 + $0x34] sm:$0x1] }
 0x4be   :  { %v7798_v10 = vshll.u32 %v19268_v36, 16  ;;  %v7772_v8 = vrot.slane %v7770_v27, 5 }
 0x4c0   :  { %v7773_v19 = vsel %vm18306_vm3, %v7768_v5, %v7772_v8 }
 0x4c1   :  { %v14808_v3 = vcombine.low %v7773_v19, %v7787_v35 }
 0x4c4   :  { %16009 = vmatmul.mubr.msk.bf16.vlgmr.msra.gmra.mrb[56].mxu1 %vm4374_vm9, %v16460_v51  ;;  %v7834_v51 = vshll.u32 %v7714_v42, 16 }
 0x4c5   :  { %16025 = vmatpush3.bf16.msra.mxu1 %v16459_v26  ;;  %16012 = vmatprep.mubr.msk.bf16.mxu1 %vm4374_vm9, %v16461_v34  ;;  %v7739_v26 = vor.u32 %v7738_v6, %v7735_v30  ;;  %v7754_v34 = vrot.slane %v7753_v58, 4  ;;  %v7795_v30 = vor.u32 %v7794_v29, %v7791_v1  ;;  %v7859_v6 = vshrl.u32 %v7718_v4, 16  ;;  %v19291_v58 = vld [vmem:[#allocation2 + $0x4c] sm:$0x1] }
 0x4c6   :  { %16026 = vmatprep.subr.bf16.mxu1 %v16464_v24  ;;  %v7814_v1 = vrot.slane %v7812_v2, 5  ;;  %v7840_v29 = vshll.u32 %v19291_v58, 16  ;;  %v7887_v4 = vshrl.u32 %v7722_v54, 16 }
 0x4c7   :  { %v7740_v15 = vrot.slane %v7739_v26, 4  ;;  %v7848_v26 = vshll.u32 %v7716_v62, 16  ;;  %v7759_v47 = vsel %vm18306_vm3, %v7754_v34, %v7758_v43  ;;  %v7796_v63 = vrot.slane %v7795_v30, 4  ;;  %v7724_v34 = vld [vmem:[#allocation2 + $0x80] sm:$0xf] }
 0x4c8   :  { %v7861_v40 = vrot.slane %v7859_v6, 4  ;;  %v7890_v43 = vshll.u32 %v7722_v54, 16  ;;  %v7842_v30 = vrot.slane %v7840_v29, 5  ;;  %v7873_v6 = vshrl.u32 %v7720_v16, 16  ;;  %v7728_v54 = vld [vmem:[#allocation2 + $0x90] sm:$0xf] }
 0x4c9   :  { %16027 = vmatpush3.bf16.msra.mxu1 %v16464_v24  ;;  %v7745_v24 = vsel %vm18306_vm3, %v7740_v15, %v7744_v56  ;;  %v7810_v56 = vrot.slane %v7809_v46, 4  ;;  %v7800_v15 = vrot.slane %v7798_v10, 5  ;;  %v7850_v42 = vrot.slane %v7848_v26, 5  ;;  %v19323_v16 = vld [vmem:[#allocation2 + $0x84] sm:$0x1] }
 0x4ca   :  { %16044 = vmatprep.subr.bf16.mxu1 %v19250_v32  ;;  %v14807_v49 = vcombine.low %v7745_v24, %v7759_v47  ;;  %v7865_v12 = vor.u32 %v7864_v23, %v7861_v40  ;;  %v7889_v10 = vrot.slane %v7887_v4, 4  ;;  %v7892_v55 = vrot.slane %v7890_v43, 5  ;;  %v19311_v40 = vld [vmem:[#allocation2 + $0x74] sm:$0x1] }
 0x4cb   :  { %v7801_v28 = vsel %vm18306_vm3, %v7796_v63, %v7800_v15  ;;  %v7815_v27 = vsel %vm18306_vm3, %v7810_v56, %v7814_v1  ;;  %v7851_v13 = vor.u32 %v7850_v42, %v7847_v17  ;;  %v7875_v23 = vrot.slane %v7873_v6, 4  ;;  %v19315_v56 = vld [vmem:[#allocation2 + $0x7c] sm:$0x1] }
 0x4cc   :  { %16013 = vmatmul.mubr.msk.bf16.gmra.mrb[60].mxu1 %vm4374_vm9, %v16462_v22  ;;  %v7833_v22 = vrot.slane %v7831_v60, 4  ;;  %v7824_v60 = vrot.slane %v7823_v44, 4  ;;  %v7866_v46 = vrot.slane %v7865_v12, 4  ;;  %v14809_v21 = vcombine.low %v7801_v28, %v7815_v27  ;;  %v19330_v6 = vld [vmem:[#allocation2 + $0x9c] sm:$0x1] }
 0x4cd   :  { %16016 = vmatprep.mubr.msk.bf16.mxu1 %vm4374_vm9, %v16463_v18  ;;  %v7836_v18 = vrot.slane %v7834_v51, 5  ;;  %v7854_v51 = vshll.u32 %v19286_v50, 16  ;;  %v7852_v59 = vrot.slane %v7851_v13, 4  ;;  %v7893_v44 = vor.u32 %v7892_v55, %v7889_v10 }
 0x4ce   :  { %v7829_v8 = vsel %vm18306_vm3, %v7824_v60, %v7828_v7  ;;  %v7929_v17 = vshrl.u32 %v7728_v54, 16  ;;  %v7932_v42 = vshll.u32 %v7728_v54, 16  ;;  %v7882_v29 = vshll.u32 %v19311_v40, 16  ;;  %v8134_v54 = vld [vmem:[#allocation2 + $0x10] sm:$0xe] }
 0x4cf   :  { %v7837_v0 = vor.u32 %v7836_v18, %v7833_v22  ;;  %v7901_v22 = vshrl.u32 %v7724_v34, 16  ;;  %v7904_v18 = vshll.u32 %v7724_v34, 16  ;;  %v7856_v26 = vrot.slane %v7854_v51, 5 }
 0x4d0   :  { %v7896_v12 = vshll.u32 %v19315_v56, 16  ;;  %v7894_v27 = vrot.slane %v7893_v44, 4  ;;  %v7931_v34 = vrot.slane %v7929_v17, 4  ;;  %v8184_v17 = vrot.slane %v19253_v33, 5 }
 0x4d1   :  { %v7838_v5 = vrot.slane %v7837_v0, 4  ;;  %v7903_v15 = vrot.slane %v7901_v22, 4  ;;  %v7906_v0 = vrot.slane %v7904_v18, 5  ;;  %v7857_v28 = vsel %vm18306_vm3, %v7852_v59, %v7856_v26 }
 0x4d2   :  { %v7898_v10 = vrot.slane %v7896_v12, 5  ;;  %v8136_v12 = vld [vmem:[#allocation2 + $0x20] sm:$0xe] }
 0x4d3   :  { %v7843_v63 = vsel %vm18306_vm3, %v7838_v5, %v7842_v30  ;;  %v7907_v60 = vor.u32 %v7906_v0, %v7903_v15  ;;  %v7934_v5 = vrot.slane %v7932_v42, 5  ;;  %v8135_v15 = vld [vmem:[#allocation2 + $0x18] sm:$0xe]  ;;  %v14825_v0 = vrot.slane %v8134_v54, 9 }
 0x4d4   :  { %16017 = vmatmul.mubr.msk.bf16.gmra.mrb[64].mxu1 %vm4374_vm9, %v16465_v25  ;;  %v19288_v25 = vld [vmem:[#allocation2 + $0x6c] sm:$0x1]  ;;  %v7899_v18 = vsel %vm18306_vm3, %v7894_v27, %v7898_v10  ;;  %v14826_v42 = vrot.slane %v8135_v15, 9  ;;  %v14827_v52 = vrot.slane %v8136_v12, 9  ;;  %v8141_v10 = vld [vmem:[#allocation2 + $0x48] sm:$0xe] }
 0x4d5   :  { %16020 = vmatprep.mubr.msk.bf16.mxu1 %vm4374_vm9, %v16466_v57  ;;  %v7726_v57 = vld [vmem:[#allocation2 + $0x88] sm:$0xf]  ;;  %v7868_v24 = vshll.u32 %v19288_v25, 16  ;;  %v8216_v54 = vrot.slane %v19286_v50, 5  ;;  %v8228_v50 = vrot.slane %v19315_v56, 5 }
 0x4d6   :  { %v7915_v62 = vshrl.u32 %v7726_v57, 16  ;;  %v7918_v48 = vshll.u32 %v7726_v57, 16  ;;  %v14810_v57 = vcombine.low %v7829_v8, %v7843_v63 }
 0x4d7   :  { %v7870_v47 = vrot.slane %v7868_v24, 5  ;;  %v19326_v24 = vld [vmem:[#allocation2 + $0x94] sm:$0x1] }
 0x4d8   :  { %v7917_v35 = vrot.slane %v7915_v62, 4  ;;  %v7920_v2 = vrot.slane %v7918_v48, 5  ;;  %v7910_v48 = vshll.u32 %v19323_v16, 16  ;;  %v7938_v22 = vshll.u32 %v19326_v24, 16 }
 0x4d9   :  { %v7871_v19 = vsel %vm18306_vm3, %v7866_v46, %v7870_v47  ;;  %v7884_v46 = vrot.slane %v7882_v29, 5  ;;  %v7952_v47 = vshll.u32 %v19330_v6, 16  ;;  %v8185_v29 = vsel %vm18935_vm15, %v14825_v0, %v8184_v17 }
 0x4da   :  { %v7921_v4 = vor.u32 %v7920_v2, %v7917_v35  ;;  %v14811_v43 = vcombine.low %v7857_v28, %v7871_v19  ;;  %v7912_v8 = vrot.slane %v7910_v48, 5  ;;  %v7940_v59 = vrot.slane %v7938_v22, 5  ;;  %v8139_v28 = vld [vmem:[#allocation2 + $0x38] sm:$0xe] }
 0x4db   :  { %v7954_v44 = vrot.slane %v7952_v47, 5  ;;  %v8200_v48 = vrot.slane %v19268_v36, 5  ;;  %v14832_v22 = vrot.slane %v8141_v10, 9 }
 0x4dc   :  { %16021 = vmatmul.mubr.msk.bf16.gmra.mrb[68].mxu1 %vm4374_vm9, %v16467_v37  ;;  %v7730_v37 = vld [vmem:[#allocation2 + $0x98] sm:$0xf]  ;;  %v7922_v30 = vrot.slane %v7921_v4, 4  ;;  %v8188_v4 = vrot.slane %v19258_v45, 5  ;;  %v8204_v45 = vrot.slane %v19273_v20, 5 }
 0x4dd   :  { %16028 = vmatprep.mubr.msk.bf16.mxu1 %vm4374_vm9, %v14807_v49  ;;  %v7878_v49 = vrot.slane %v7876_v14, 5  ;;  %v7946_v1 = vshll.u32 %v7730_v37, 16 }
 0x4de   :  { %v8189_v33 = vsel %vm18935_vm15, %v14826_v42, %v8188_v4  ;;  %v8224_v42 = vrot.slane %v19311_v40, 5  ;;  %v8148_v4 = vld [vmem:[#allocation2 + $0x90] sm:$0xe]  ;;  %v8240_v40 = vrot.slane %v19326_v24, 5 }
 0x4df   :  { %v7879_v7 = vor.u32 %v7878_v49, %v7875_v23  ;;  %v7948_v62 = vrot.slane %v7946_v1, 5 }
 0x4e1   :  { %v7880_v14 = vrot.slane %v7879_v7, 4 }
 0x4e3   :  { %v7885_v2 = vsel %vm18306_vm3, %v7880_v14, %v7884_v46  ;;  %v8140_v14 = vld [vmem:[#allocation2 + $0x40] sm:$0xe] }
 0x4e4   :  { %16029 = vmatmul.mubr.msk.bf16.vlgmr.msra.gmra.mrb[56].mxu1 %vm4374_vm9, %v14808_v3  ;;  %v7943_v3 = vshrl.u32 %v7730_v37, 16  ;;  %v14812_v37 = vcombine.low %v7885_v2, %v7899_v18  ;;  %v8212_v18 = vrot.slane %v19291_v58, 5 }
 0x4e5   :  { %16045 = vmatpush3.bf16.msra.mxu1 %v19250_v32  ;;  %16032 = vmatprep.mubr.msk.bf16.mxu1 %vm4374_vm9, %v14809_v21  ;;  %v19317_v32 = vld [vmem:[#allocation2 + $0x8c] sm:$0x1]  ;;  %v7935_v21 = vor.u32 %v7934_v5, %v7931_v34  ;;  %v8196_v34 = vrot.slane %v19260_v38, 5 }
 0x4e6   :  { %16046 = vmatprep.subr.bf16.mxu1 %v16469_v31  ;;  %v7924_v51 = vshll.u32 %v19317_v32, 16  ;;  %v7945_v13 = vrot.slane %v7943_v3, 4  ;;  %v8213_v2 = vsel %vm18935_vm15, %v14832_v22, %v8212_v18  ;;  %v8236_v17 = vrot.slane %v19317_v32, 5  ;;  %v226_v18 = vld [vmem:[#allocation3 + $0x20] sm:$0x1] }
 0x4e7   :  { %v7936_v49 = vrot.slane %v7935_v21, 4  ;;  %v8142_v21 = vld [vmem:[#allocation2 + $0x60] sm:$0xe] }
 0x4e8   :  { %v7926_v55 = vrot.slane %v7924_v51, 5  ;;  %v7949_v26 = vor.u32 %v7948_v62, %v7945_v13  ;;  %v14830_v51 = vrot.slane %v8139_v28, 9  ;;  %v8192_v13 = vrot.slane %v19263_v11, 5 }
 0x4e9   :  { %16047 = vmatpush3.bf16.msra.mxu1 %v16469_v31  ;;  %v7908_v31 = vrot.slane %v7907_v60, 4  ;;  %v7941_v3 = vsel %vm18306_vm3, %v7936_v49, %v7940_v59  ;;  %v8138_v60 = vld [vmem:[#allocation2 + $0x30] sm:$0xe]  ;;  %v14831_v11 = vrot.slane %v8140_v14, 9  ;;  %v14833_v47 = vrot.slane %v8142_v21, 9 }
 0x4ea   :  { %v7927_v35 = vsel %vm18306_vm3, %v7922_v30, %v7926_v55  ;;  %v7950_v19 = vrot.slane %v7949_v26, 4  ;;  %v14829_v5 = vrot.slane %v8138_v60, 9  ;;  %v8205_v30 = vsel %vm18935_vm15, %v14830_v51, %v8204_v45  ;;  %v8146_v49 = vld [vmem:[#allocation2 + $0x80] sm:$0xe]  ;;  %v208_v51 = vld [vmem:[#allocation3 + $0x8] sm:$0x1] }
 0x4eb   :  { %v7913_v63 = vsel %vm18306_vm3, %v7908_v31, %v7912_v8  ;;  %v8193_v46 = vsel %vm18935_vm15, %v14827_v52, %v8192_v13  ;;  %v8143_v31 = vld [vmem:[#allocation2 + $0x68] sm:$0xe]  ;;  %v8208_v26 = vrot.slane %v19276_v9, 5  ;;  %v8220_v8 = vrot.slane %v19288_v25, 5  ;;  %v244_v45 = vld [vmem:[#allocation3 + $0x4] sm:$0x4] }
 0x4ec   :  { %16033 = vmatmul.mubr.msk.bf16.gmra.mrb[60].mxu1 %vm4374_vm9, %v14810_v57  ;;  %v14813_v23 = vcombine.low %v7913_v63, %v7927_v35  ;;  %v7955_v1 = vsel %vm18306_vm3, %v7950_v19, %v7954_v44  ;;  %v8137_v57 = vld [vmem:[#allocation2 + $0x28] sm:$0xe]  ;;  %v8201_v20 = vsel %vm18935_vm15, %v14829_v5, %v8200_v48  ;;  %v14834_v36 = vrot.slane %v8143_v31, 9  ;;  %v205_v5 = vld [vmem:[#allocation3 + $0x4] sm:$0x1] }
 0x4ed   :  { %16036 = vmatprep.mubr.msk.bf16.mxu1 %vm4374_vm9, %v14811_v43  ;;  %v14814_v7 = vcombine.low %v7941_v3, %v7955_v1  ;;  %v14845_v43 = vcombine.low %v8185_v29, %v8189_v33  ;;  %v14828_v27 = vrot.slane %v8137_v57, 9  ;;  %v14847_v55 = vcombine.low %v8201_v20, %v8205_v30  ;;  %v8147_v63 = vld [vmem:[#allocation2 + $0x88] sm:$0xe]  ;;  %v8149_v57 = vld [vmem:[#allocation2 + $0x98] sm:$0xe] }
 0x4ee   :  { %v8209_v35 = vsel %vm18935_vm15, %v14831_v11, %v8208_v26  ;;  %v8221_v58 = vsel %vm18935_vm15, %v14834_v36, %v8220_v8  ;;  %v8217_v9 = vsel %vm18935_vm15, %v14833_v47, %v8216_v54  ;;  %v14838_v44 = vrot.slane %v8147_v63, 9  ;;  %v214_v48 = vld [vmem:[#allocation3 + $0x10] sm:$0x1]  ;;  %v253_v30 = vld [vmem:[#allocation3 + $0x10] sm:$0x4] }
 0x4ef   :  { %v8197_v62 = vsel %vm18935_vm15, %v14828_v27, %v8196_v34  ;;  %v14848_v59 = vcombine.low %v8209_v35, %v8213_v2  ;;  %v14849_v25 = vcombine.low %v8217_v9, %v8221_v58  ;;  %v14837_v0 = vrot.slane %v8146_v49, 9  ;;  %v250_v31 = vld [vmem:[#allocation3 + $0xc] sm:$0x4]  ;;  %v19447_v11 = vld [vmem:[%s21032_s6] ss:$0 sm:$0xff] }
 0x4f0   :  { %v14846_v38 = vcombine.low %v8193_v46, %v8197_v62  ;;  %v8232_v1 = vrot.slane %v19323_v16, 5  ;;  %v8237_v29 = vsel %vm18935_vm15, %v14838_v44, %v8236_v17  ;;  %v14839_v33 = vrot.slane %v8148_v4, 9  ;;  %v211_v46 = vld [vmem:[#allocation3 + $0xc] sm:$0x1]  ;;  %v265_v21 = vld [vmem:[#allocation3 + $0x20] sm:$0x4] }
 0x4f1   :  { %v14840_v12 = vrot.slane %v8149_v57, 9  ;;  %v209_v39 = vsel %vm19409_vm1, 0, %v208_v51  ;;  %v206_v13 = vsel %vm19409_vm1, 0, %v205_v5  ;;  %v215_v14 = vsel %vm19409_vm1, 0, %v214_v48 }
 0x4f2   :  { %v8233_v56 = vsel %vm18935_vm15, %v14837_v0, %v8232_v1  ;;  %v8241_v16 = vsel %vm18935_vm15, %v14839_v33, %v8240_v40  ;;  %210 = vst [vmem:[#allocation3 + $0x8] sm:$0x1] %v209_v39  ;;  %207 = vst [vmem:[#allocation3 + $0x4] sm:$0x1] %v206_v13  ;;  %v227_v47 = vsel %vm19409_vm1, 0, %v226_v18  ;;  %vm9287_vm3 = vcmask 523264  }
 0x4f3   :  { %v14851_v32 = vcombine.low %v8233_v56, %v8237_v29  ;;  %216 = vst [vmem:[#allocation3 + $0x10] sm:$0x1] %v215_v14  ;;  %228 = vst [vmem:[#allocation3 + $0x20] sm:$0x1] %v227_v47 }
 0x4f4   :  { %16037 = vmatmul.mubr.msk.bf16.gmra.mrb[64].mxu1 %vm4374_vm9, %v14812_v37  ;;  %v8145_v37 = vld [vmem:[#allocation2 + $0x78] sm:$0xe] }
 0x4f5   :  { %16040 = vmatprep.mubr.msk.bf16.mxu1 %vm4374_vm9, %v14813_v23  ;;  %v8144_v23 = vld [vmem:[#allocation2 + $0x70] sm:$0xe]  ;;  %v14836_v19 = vrot.slane %v8145_v37, 9 }
 0x4f6   :  { %v14835_v15 = vrot.slane %v8144_v23, 9 }
 0x4f7   :  { %v8229_v3 = vsel %vm18935_vm15, %v14836_v19, %v8228_v50 }
 0x4f8   :  { %v8225_v28 = vsel %vm18935_vm15, %v14835_v15, %v8224_v42 }
 0x4fc   :  { %16041 = vmatmul.mubr.msk.bf16.gmra.mrb[68].mxu1 %vm4374_vm9, %v14814_v7  ;;  %v14850_v7 = vcombine.low %v8225_v28, %v8229_v3 }
 0x4fd   :  { %16048 = vmatprep.mubr.msk.bf16.mxu1 %vm4374_vm9, %v14845_v43  ;;  %v8244_v43 = vrot.slane %v19330_v6, 5  ;;  %v247_v6 = vld [vmem:[#allocation3 + $0x8] sm:$0x4] }
 0x4ff   :  { %v8245_v27 = vsel %vm18935_vm15, %v14840_v12, %v8244_v43  ;;  %vm9708_vm15 = vsmask.f32 1280 }
 0x500   :  { %v14852_v60 = vcombine.low %v8241_v16, %v8245_v27 }
 0x504   :  { %16049 = vmatmul.mubr.msk.bf16.vlgmr.msra.gmra.mrb[56].mxu1 %vm4374_vm9, %v14846_v38  ;;  %v212_v38 = vsel %vm19409_vm1, 0, %v211_v46 }
 0x505   :  { %16052 = vmatprep.mubr.msk.bf16.mxu1 %vm4374_vm9, %v14847_v55  ;;  %213 = vst [vmem:[#allocation3 + $0xc] sm:$0x1] %v212_v38  ;;  %v19442_v55 = vld [vmem:[%s21031_s5] ss:$0 sm:$0xff] }
 0x50c   :  { %16053 = vmatmul.mubr.msk.bf16.gmra.mrb[60].mxu1 %vm4374_vm9, %v14848_v59 }
 0x50d   :  { %16056 = vmatprep.mubr.msk.bf16.mxu1 %vm4374_vm9, %v14849_v25 }
 0x514   :  { %16057 = vmatmul.mubr.msk.bf16.gmra.mrb[64].mxu1 %vm4374_vm9, %v14850_v7 }
 0x515   :  { %16060 = vmatprep.mubr.msk.bf16.mxu1 %vm4374_vm9, %v14851_v32 }
 0x51c   :  { %16061 = vmatmul.mubr.msk.bf16.gmra.mrb[68].mxu1 %vm4374_vm9, %v14852_v60  ;;  %vm19421_vm9 = vmand %vm238_vm0, %vm239_vm2  ;;  %vm9713_vm2 = vsmask.f32 7448 }
 0x51d   :  { %v248_v34 = vsel %vm19421_vm9, 0, %v247_v6  ;;  %v245_v62 = vsel %vm19421_vm9, 0, %v244_v45  ;;  %v254_v10 = vsel %vm19421_vm9, 0, %v253_v30  ;;  %v251_v20 = vsel %vm19421_vm9, 0, %v250_v31  ;;  %vm9710_vm0 = vmor %vm9708_vm15, %vm9709_vm5 }
 0x51e   :  { %249 = vst [vmem:[#allocation3 + $0x8] sm:$0x4] %v248_v34  ;;  %246 = vst [vmem:[#allocation3 + $0x4] sm:$0x4] %v245_v62  ;;  %v266_v8 = vsel %vm19421_vm9, 0, %v265_v21 }
 0x51f   :  { %255 = vst [vmem:[#allocation3 + $0x10] sm:$0x4] %v254_v10  ;;  %252 = vst [vmem:[#allocation3 + $0xc] sm:$0x4] %v251_v20 }
 0x520   :  { %267 = vst [vmem:[#allocation3 + $0x20] sm:$0x4] %v266_v8 }
 0x5d7   :  { %v16050_v22 = vpop.f32.mrb[56].mxu1 }
 0x5d8   :  { %v8433_v36 = vmul.f32 %v16050_v22, %v19442_v55  ;;  %v8345_v26 = vpop.f32.mrb[57].mxu1 }
 0x5d9   :  { %v8431_v35 = vmul.f32 %v19442_v55, %v8345_v26  ;;  %v16051_v2 = vpop.f32.mrb[58].mxu1 }
 0x5da   :  { %v8456_v54 = vadd.f32 %v19447_v11, %v8433_v36  ;;  %v8434_v58 = vmul.f32 %v16051_v2, %v19442_v55  ;;  %v8348_v37 = vpop.f32.mrb[59].mxu1 }
 0x5db   :  { %v8454_v63 = vadd.f32 %v19447_v11, %v8431_v35  ;;  %v8432_v59 = vmul.f32 %v19442_v55, %v8348_v37 }
 0x5dc   :  { %v8472_v9 = vmax.f32 %v8456_v54, 0.0  ;;  %v8457_v23 = vadd.f32 %v19447_v11, %v8434_v58 }
 0x5dd   :  { %v8470_v49 = vmax.f32 %v8454_v63, 0.0  ;;  %v8455_v25 = vadd.f32 %v19447_v11, %v8432_v59 }
 0x5de   :  { %v8536_v19 = vcombine.high %v8472_v9, %v8472_v9  ;;  %v8543_v44 = vrot.slane %v8472_v9, %v17092_v61  ;;  %v19462_v15 = vmax.f32 %v8457_v23, 0.0 }
 0x5df   :  { %v8502_v50 = vcombine.high %v8470_v49, %v8470_v49  ;;  %v8509_v0 = vrot.slane %v8470_v49, %v17092_v61  ;;  %v19465_v17 = vmax.f32 %v8455_v25, 0.0  ;;  %v19467_v42 = vpop.f32.mrb[60].mxu1 }
 0x5e0   :  { %v8550_v3 = vrot.slane %v8536_v19, %v17092_v61  ;;  %v8551_v1 = vcombine.high %v8543_v44, %v8543_v44  ;;  %v8895_v29 = vsel %vm8838_vm4, %v8543_v44, -inf  ;;  %v8553_v4 = vcombine.high %v19462_v15, %v19462_v15  ;;  %v19473_v57 = vpop.f32.mrb[61].mxu1 }
 0x5e1   :  { %v8896_v28 = vrot.slane %v8895_v29, 4  ;;  %v8516_v56 = vrot.slane %v8502_v50, %v17092_v61  ;;  %v8517_v7 = vcombine.high %v8509_v0, %v8509_v0  ;;  %v8839_v32 = vsel %vm8838_vm4, %v8509_v0, -inf  ;;  %v19477_v33 = vpop.f32.mrb[62].mxu1 }
 0x5e2   :  { %v8552_v40 = vcombine.high %v8550_v3, %v8550_v3  ;;  %v8902_v12 = vsel %vm8838_vm4, %v8551_v1, -inf  ;;  %v8909_v43 = vsel %vm8838_vm4, %v8550_v3, -inf  ;;  %v8840_v16 = vrot.slane %v8839_v32, 4  ;;  %v19481_v27 = vpop.f32.mrb[63].mxu1 }
 0x5e3   :  { %v8897_v60 = vmax.f32 %v8895_v29, %v8896_v28  ;;  %v8903_v51 = vrot.slane %v8902_v12, 4  ;;  %v8910_v6 = vrot.slane %v8909_v43, 4  ;;  %v8518_v39 = vcombine.high %v8516_v56, %v8516_v56 }
 0x5e4   :  { %v8916_v34 = vsel %vm8838_vm4, %v8552_v40, -inf  ;;  %v8841_v5 = vmax.f32 %v8839_v32, %v8840_v16  ;;  %v8846_v45 = vsel %vm8838_vm4, %v8517_v7, -inf  ;;  %v8853_v13 = vsel %vm8838_vm4, %v8516_v56, -inf }
 0x5e5   :  { %v8898_v62 = vrot.slane %v8897_v60, 2  ;;  %v8904_v48 = vmax.f32 %v8902_v12, %v8903_v51  ;;  %v8911_v30 = vmax.f32 %v8909_v43, %v8910_v6  ;;  %v8917_v14 = vrot.slane %v8916_v34, 4 }
 0x5e6   :  { %v8842_v10 = vrot.slane %v8841_v5, 2  ;;  %v8847_v46 = vrot.slane %v8846_v45, 4  ;;  %v8854_v31 = vrot.slane %v8853_v13, 4  ;;  %v8860_v38 = vsel %vm8838_vm4, %v8518_v39, -inf }
 0x5e7   :  { %v8899_v20 = vmax.f32 %v8897_v60, %v8898_v62  ;;  %v8905_v22 = vrot.slane %v8904_v48, 2  ;;  %v8912_v18 = vrot.slane %v8911_v30, 2  ;;  %v8918_v21 = vmax.f32 %v8916_v34, %v8917_v14  ;;  %v19487_v36 = vpop.f32.mrb[64].mxu1 }
 0x5e8   :  { %v8843_v26 = vmax.f32 %v8841_v5, %v8842_v10  ;;  %v8848_v47 = vmax.f32 %v8846_v45, %v8847_v46  ;;  %v8855_v8 = vmax.f32 %v8853_v13, %v8854_v31  ;;  %v8861_v35 = vrot.slane %v8860_v38, 4  ;;  %v19489_v2 = vpop.f32.mrb[65].mxu1 }
 0x5e9   :  { %v8900_v54 = vrot.slane %v8899_v20, 1  ;;  %v8906_v58 = vmax.f32 %v8904_v48, %v8905_v22  ;;  %v8913_v37 = vmax.f32 %v8911_v30, %v8912_v18  ;;  %v8919_v63 = vrot.slane %v8918_v21, 2  ;;  %v19491_v59 = vpop.f32.mrb[66].mxu1 }
 0x5ea   :  { %v8844_v9 = vrot.slane %v8843_v26, 1  ;;  %v8849_v23 = vrot.slane %v8848_v47, 2  ;;  %v8856_v49 = vrot.slane %v8855_v8, 2  ;;  %v8862_v25 = vmax.f32 %v8860_v38, %v8861_v35  ;;  %v19499_v51 = vpop.f32.mrb[67].mxu1 }
 0x5eb   :  { %v8901_v19 = vmax.f32 %v8899_v20, %v8900_v54  ;;  %v8907_v44 = vrot.slane %v8906_v58, 1  ;;  %v8914_v50 = vrot.slane %v8913_v37, 1  ;;  %v8920_v0 = vmax.f32 %v8918_v21, %v8919_v63 }
 0x5ec   :  { %v8845_v3 = vmax.f32 %v8843_v26, %v8844_v9  ;;  %v8850_v1 = vmax.f32 %v8848_v47, %v8849_v23  ;;  %v8857_v29 = vmax.f32 %v8855_v8, %v8856_v49  ;;  %v8863_v28 = vrot.slane %v8862_v25, 2 }
 0x5ed   :  { %v8908_v56 = vmax.f32 %v8906_v58, %v8907_v44  ;;  %v8915_v7 = vmax.f32 %v8913_v37, %v8914_v50  ;;  %v8921_v32 = vrot.slane %v8920_v0, 1  ;;  %v19494_v40 = vsel %vm9287_vm3, %v8901_v19, -inf }
 0x5ee   :  { %v8851_v12 = vrot.slane %v8850_v1, 1  ;;  %v8858_v43 = vrot.slane %v8857_v29, 1  ;;  %v8864_v16 = vmax.f32 %v8862_v25, %v8863_v28  ;;  %v19497_v60 = vsel %vm9287_vm3, %v8845_v3, -inf }
 0x5ef   :  { %v8922_v6 = vmax.f32 %v8920_v0, %v8921_v32  ;;  %v19502_v39 = vsel %vm9287_vm3, %v8908_v56, -inf  ;;  %v19505_v34 = vsel %vm9287_vm3, %v8915_v7, -inf  ;;  %v8560_v5 = vrot.slane %v19462_v15, %v17092_v61 }
 0x5f0   :  { %v8852_v45 = vmax.f32 %v8850_v1, %v8851_v12  ;;  %v8859_v13 = vmax.f32 %v8857_v29, %v8858_v43  ;;  %v8865_v62 = vrot.slane %v8864_v16, 1  ;;  %v8567_v48 = vrot.slane %v8553_v4, %v17092_v61 }
 0x5f1   :  { %v19514_v30 = vsel %vm9287_vm3, %v8922_v6, -inf  ;;  %v8568_v14 = vcombine.high %v8560_v5, %v8560_v5  ;;  %v8923_v10 = vsel %vm8838_vm4, %v8560_v5, -inf  ;;  %v8519_v46 = vcombine.high %v19465_v17, %v19465_v17 }
 0x5f2   :  { %v8866_v31 = vmax.f32 %v8864_v16, %v8865_v62  ;;  %v19520_v38 = vsel %vm9287_vm3, %v8852_v45, -inf  ;;  %v19523_v20 = vsel %vm9287_vm3, %v8859_v13, -inf  ;;  %v8569_v22 = vcombine.high %v8567_v48, %v8567_v48  ;;  %v19542_v62 = vpop.f32.mrb[68].mxu1 }
 0x5f3   :  { %v8924_v18 = vrot.slane %v8923_v10, 4  ;;  %v8930_v15 = vsel %vm8838_vm4, %v8568_v14, -inf  ;;  %v8937_v4 = vsel %vm8838_vm4, %v8567_v48, -inf  ;;  %v8526_v21 = vrot.slane %v19465_v17, %v17092_v61 }
 0x5f4   :  { %v19530_v26 = vsel %vm9287_vm3, %v8866_v31, -inf  ;;  %v8931_v47 = vrot.slane %v8930_v15, 4  ;;  %v8938_v8 = vrot.slane %v8937_v4, 4  ;;  %v8944_v35 = vsel %vm8838_vm4, %v8569_v22, -inf }
 0x5f5   :  { %v8925_v54 = vmax.f32 %v8923_v10, %v8924_v18  ;;  %v8945_v58 = vrot.slane %v8944_v35, 4  ;;  %v8533_v37 = vrot.slane %v8519_v46, %v17092_v61  ;;  %v8534_v63 = vcombine.high %v8526_v21, %v8526_v21 }
 0x5f6   :  { %v8932_v9 = vmax.f32 %v8930_v15, %v8931_v47  ;;  %v8939_v23 = vmax.f32 %v8937_v4, %v8938_v8  ;;  %v8867_v49 = vsel %vm8838_vm4, %v8526_v21, -inf  ;;  %v19537_v25 = vmul.f32 %v19467_v42, %v19442_v55 }
 0x5f7   :  { %v8926_v17 = vrot.slane %v8925_v54, 2  ;;  %v8946_v19 = vmax.f32 %v8944_v35, %v8945_v58  ;;  %v8535_v44 = vcombine.high %v8533_v37, %v8533_v37  ;;  %v8868_v50 = vrot.slane %v8867_v49, 4  ;;  %v19544_v35 = vpop.f32.mrb[69].mxu1 }
 0x5f8   :  { %v8933_v0 = vrot.slane %v8932_v9, 2  ;;  %v8940_v3 = vrot.slane %v8939_v23, 2  ;;  %v8874_v1 = vsel %vm8838_vm4, %v8534_v63, -inf  ;;  %v8881_v29 = vsel %vm8838_vm4, %v8533_v37, -inf }
 0x5f9   :  { %v8927_v28 = vmax.f32 %v8925_v54, %v8926_v17  ;;  %v8947_v56 = vrot.slane %v8946_v19, 2  ;;  %v8869_v7 = vmax.f32 %v8867_v49, %v8868_v50  ;;  %v8875_v32 = vrot.slane %v8874_v1, 4 }
 0x5fa   :  { %v8934_v12 = vmax.f32 %v8932_v9, %v8933_v0  ;;  %v8941_v43 = vmax.f32 %v8939_v23, %v8940_v3  ;;  %v8882_v16 = vrot.slane %v8881_v29, 4  ;;  %v8888_v42 = vsel %vm8838_vm4, %v8535_v44, -inf }
 0x5fb   :  { %v8928_v6 = vrot.slane %v8927_v28, 1  ;;  %v8948_v5 = vmax.f32 %v8946_v19, %v8947_v56  ;;  %v8870_v45 = vrot.slane %v8869_v7, 2  ;;  %v8876_v13 = vmax.f32 %v8874_v1, %v8875_v32 }
 0x5fc   :  { %v8935_v48 = vrot.slane %v8934_v12, 1  ;;  %v8942_v14 = vrot.slane %v8941_v43, 1  ;;  %v8883_v10 = vmax.f32 %v8881_v29, %v8882_v16  ;;  %v8889_v46 = vrot.slane %v8888_v42, 4 }
 0x5fd   :  { %v8929_v31 = vmax.f32 %v8927_v28, %v8928_v6  ;;  %v8949_v22 = vrot.slane %v8948_v5, 1  ;;  %v8871_v18 = vmax.f32 %v8869_v7, %v8870_v45  ;;  %v8877_v15 = vrot.slane %v8876_v13, 2 }
 0x5fe   :  { %v8936_v4 = vmax.f32 %v8934_v12, %v8935_v48  ;;  %v8943_v21 = vmax.f32 %v8941_v43, %v8942_v14  ;;  %v8884_v47 = vrot.slane %v8883_v10, 2  ;;  %v8890_v8 = vmax.f32 %v8888_v42, %v8889_v46 }
 0x5ff   :  { %v8950_v54 = vmax.f32 %v8948_v5, %v8949_v22  ;;  %v9301_v58 = vsel %vm9287_vm3, %v8929_v31, -inf  ;;  %v8872_v37 = vrot.slane %v8871_v18, 1  ;;  %v8878_v63 = vmax.f32 %v8876_v13, %v8877_v15 }
 0x600   :  { %v9302_v9 = vmax.f32 %v19494_v40, %v9301_v58  ;;  %v9304_v23 = vsel %vm9287_vm3, %v8936_v4, -inf  ;;  %v9307_v49 = vsel %vm9287_vm3, %v8943_v21, -inf  ;;  %v8885_v17 = vmax.f32 %v8883_v10, %v8884_v47  ;;  %v9591_v21 = vld [vmem:[#allocation3 + $0x8] sm:$0x7] }
 0x601   :  { %v9305_v19 = vmax.f32 %v19502_v39, %v9304_v23  ;;  %v9308_v44 = vmax.f32 %v19505_v34, %v9307_v49  ;;  %v9310_v50 = vsel %vm9287_vm3, %v8950_v54, -inf  ;;  %v8873_v0 = vmax.f32 %v8871_v18, %v8872_v37 }
 0x602   :  { %v9311_v3 = vmax.f32 %v19514_v30, %v9310_v50  ;;  %v15579_v1 = vpack.c.bf16 %v9302_v9, %v9302_v9  ;;  %v8879_v29 = vrot.slane %v8878_v63, 1  ;;  %v8886_v28 = vrot.slane %v8885_v17, 1 }
 0x603   :  { %v15580_v56 = vpack.c.bf16 %v9305_v19, %v9305_v19  ;;  %v15581_v7 = vpack.c.bf16 %v9308_v44, %v9308_v44  ;;  %v8891_v40 = vrot.slane %v8890_v8, 2  ;;  %v9289_v32 = vsel %vm9287_vm3, %v8873_v0, -inf }
 0x604   :  { %v15582_v12 = vpack.c.bf16 %v9311_v3, %v9311_v3  ;;  %v9516_v43 = vunpack.c.l.b16 %v15579_v1  ;;  %v8880_v16 = vmax.f32 %v8878_v63, %v8879_v29  ;;  %v8887_v42 = vmax.f32 %v8885_v17, %v8886_v28 }
 0x605   :  { %v9517_v39 = vunpack.c.l.b16 %v15580_v56  ;;  %v9518_v6 = vunpack.c.l.b16 %v15581_v7  ;;  %v8892_v34 = vmax.f32 %v8890_v8, %v8891_v40  ;;  %v9290_v5 = vmax.f32 %v19497_v60, %v9289_v32 }
 0x606   :  { %v9519_v45 = vunpack.c.l.b16 %v15582_v12  ;;  %v9292_v30 = vsel %vm9287_vm3, %v8880_v16, -inf  ;;  %v9295_v13 = vsel %vm9287_vm3, %v8887_v42, -inf  ;;  %v8460_v48 = vadd.f32 %v19447_v11, %v19537_v25 }
 0x607   :  { %v9547_v14 = vsel %vm5399_vm10, %v9517_v39, %v9516_v43  ;;  %v8893_v10 = vrot.slane %v8892_v34, 1  ;;  %v9293_v46 = vmax.f32 %v19520_v38, %v9292_v30  ;;  %v9296_v31 = vmax.f32 %v19523_v20, %v9295_v13  ;;  %v19573_v20 = vpop.f32.mrb[70].mxu1  ;;  %v9588_v13 = vld [vmem:[#allocation3 + $0x4] sm:$0x7] }
 0x608   :  { %v9548_v22 = vsel %vm5401_vm11, %v9518_v6, %v9547_v14  ;;  %v15575_v18 = vpack.c.bf16 %v9290_v5, %v9290_v5  ;;  %v8476_v15 = vmax.f32 %v8460_v48, 0.0  ;;  %v8435_v60 = vmul.f32 %v19442_v55, %v19473_v57 }
 0x609   :  { %v9549_v4 = vsel %vm5403_vm12, %v9519_v45, %v9548_v22  ;;  %v8894_v47 = vmax.f32 %v8892_v34, %v8893_v10  ;;  %v15576_v38 = vpack.c.bf16 %v9293_v46, %v9293_v46  ;;  %v15577_v8 = vpack.c.bf16 %v9296_v31, %v9296_v31 }
 0x60a   :  { %v9569_v54 = vpack.c.b16 %v9549_v4, %v9549_v4  ;;  %v9512_v58 = vunpack.c.l.b16 %v15575_v18  ;;  %v8604_v37 = vcombine.high %v8476_v15, %v8476_v15  ;;  %v8611_v63 = vrot.slane %v8476_v15, %v17092_v61 }
 0x60b   :  { %v9298_v57 = vsel %vm9287_vm3, %v8894_v47, -inf  ;;  %v9513_v9 = vunpack.c.l.b16 %v15576_v38  ;;  %v9514_v23 = vunpack.c.l.b16 %v15577_v8  ;;  %v8458_v49 = vadd.f32 %v19447_v11, %v8435_v60 }
 0x60c   :  { %v9592_v17 = vsel %vm19569_vm13, %v9569_v54, %v9591_v21  ;;  %v9299_v19 = vmax.f32 %v19530_v26, %v9298_v57  ;;  %v8618_v44 = vrot.slane %v8604_v37, %v17092_v61  ;;  %v8619_v50 = vcombine.high %v8611_v63, %v8611_v63 }
 0x60d   :  { %9593 = vst [vmem:[#allocation3 + $0x8] sm:$0x7] %v9592_v17  ;;  %v9544_v0 = vsel %vm5399_vm10, %v9513_v9, %v9512_v58  ;;  %v9007_v3 = vsel %vm8838_vm4, %v8611_v63, -inf  ;;  %v8474_v1 = vmax.f32 %v8458_v49, 0.0  ;;  %v8438_v29 = vmul.f32 %v19477_v33, %v19442_v55 }
 0x60e   :  { %v15578_v28 = vpack.c.bf16 %v9299_v19, %v9299_v19  ;;  %v9545_v56 = vsel %vm5401_vm11, %v9514_v23, %v9544_v0  ;;  %v8620_v7 = vcombine.high %v8618_v44, %v8618_v44  ;;  %v9008_v40 = vrot.slane %v9007_v3, 4 }
 0x60f   :  { %v9014_v32 = vsel %vm8838_vm4, %v8619_v50, -inf  ;;  %v9021_v26 = vsel %vm8838_vm4, %v8618_v44, -inf  ;;  %v8570_v12 = vcombine.high %v8474_v1, %v8474_v1  ;;  %v8577_v43 = vrot.slane %v8474_v1, %v17092_v61 }
 0x610   :  { %v9515_v16 = vunpack.c.l.b16 %v15578_v28  ;;  %v9009_v42 = vmax.f32 %v9007_v3, %v9008_v40  ;;  %v9015_v39 = vrot.slane %v9014_v32, 4  ;;  %v9022_v6 = vrot.slane %v9021_v26, 4 }
 0x611   :  { %v9028_v34 = vsel %vm8838_vm4, %v8620_v7, -inf  ;;  %v8584_v33 = vrot.slane %v8570_v12, %v17092_v61  ;;  %v8585_v5 = vcombine.high %v8577_v43, %v8577_v43  ;;  %v8951_v45 = vsel %vm8838_vm4, %v8577_v43, -inf }
 0x612   :  { %v9546_v30 = vsel %vm5403_vm12, %v9515_v16, %v9545_v56  ;;  %v9010_v48 = vrot.slane %v9009_v42, 2  ;;  %v9016_v14 = vmax.f32 %v9014_v32, %v9015_v39  ;;  %v9023_v10 = vmax.f32 %v9021_v26, %v9022_v6 }
 0x613   :  { %v9568_v46 = vpack.c.b16 %v9546_v30, %v9546_v30  ;;  %v9029_v31 = vrot.slane %v9028_v34, 4  ;;  %v8586_v22 = vcombine.high %v8584_v33, %v8584_v33  ;;  %v8952_v18 = vrot.slane %v8951_v45, 4 }
 0x614   :  { %v9011_v15 = vmax.f32 %v9009_v42, %v9010_v48  ;;  %v9017_v60 = vrot.slane %v9016_v14, 2  ;;  %v9024_v4 = vrot.slane %v9023_v10, 2  ;;  %v8958_v21 = vsel %vm8838_vm4, %v8585_v5, -inf  ;;  %v19609_v48 = vpop.f32.mrb[71].mxu1 }
 0x615   :  { %v9589_v47 = vsel %vm19569_vm13, %v9568_v46, %v9588_v13  ;;  %v9030_v38 = vmax.f32 %v9028_v34, %v9029_v31  ;;  %v8953_v8 = vmax.f32 %v8951_v45, %v8952_v18  ;;  %v8959_v54 = vrot.slane %v8958_v21, 4 }
 0x616   :  { %9590 = vst [vmem:[#allocation3 + $0x4] sm:$0x7] %v9589_v47  ;;  %v9012_v58 = vrot.slane %v9011_v15, 1  ;;  %v9018_v37 = vmax.f32 %v9016_v14, %v9017_v60  ;;  %v9025_v63 = vmax.f32 %v9023_v10, %v9024_v4  ;;  %v8965_v57 = vsel %vm8838_vm4, %v8584_v33, -inf }
 0x617   :  { %v9031_v9 = vrot.slane %v9030_v38, 2  ;;  %v8954_v23 = vrot.slane %v8953_v8, 2  ;;  %v8960_v49 = vmax.f32 %v8958_v21, %v8959_v54  ;;  %v8966_v17 = vrot.slane %v8965_v57, 4 }
 0x618   :  { %v9013_v19 = vmax.f32 %v9011_v15, %v9012_v58  ;;  %v9019_v44 = vrot.slane %v9018_v37, 1  ;;  %v9026_v50 = vrot.slane %v9025_v63, 1  ;;  %v8972_v0 = vsel %vm8838_vm4, %v8586_v22, -inf }
 0x619   :  { %v9032_v3 = vmax.f32 %v9030_v38, %v9031_v9  ;;  %v8955_v1 = vmax.f32 %v8953_v8, %v8954_v23  ;;  %v8961_v28 = vrot.slane %v8960_v49, 2  ;;  %v8967_v56 = vmax.f32 %v8965_v57, %v8966_v17 }
 0x61a   :  { %v9020_v7 = vmax.f32 %v9018_v37, %v9019_v44  ;;  %v9027_v40 = vmax.f32 %v9025_v63, %v9026_v50  ;;  %v19600_v32 = vsel %vm9287_vm3, %v9013_v19, -inf  ;;  %v8973_v26 = vrot.slane %v8972_v0, 4 }
 0x61b   :  { %v9033_v12 = vrot.slane %v9032_v3, 1  ;;  %v8956_v43 = vrot.slane %v8955_v1, 1  ;;  %v8962_v16 = vmax.f32 %v8960_v49, %v8961_v28  ;;  %v8968_v42 = vrot.slane %v8967_v56, 2 }
 0x61c   :  { %v19603_v39 = vsel %vm9287_vm3, %v9020_v7, -inf  ;;  %v19606_v6 = vsel %vm9287_vm3, %v9027_v40, -inf  ;;  %v8974_v34 = vmax.f32 %v8972_v0, %v8973_v26  ;;  %v8461_v33 = vadd.f32 %v19447_v11, %v8438_v29 }
 0x61d   :  { %v9034_v5 = vmax.f32 %v9032_v3, %v9033_v12  ;;  %v8957_v45 = vmax.f32 %v8955_v1, %v8956_v43  ;;  %v8963_v30 = vrot.slane %v8962_v16, 1  ;;  %v8969_v13 = vmax.f32 %v8967_v56, %v8968_v42 }
 0x61e   :  { %v8975_v14 = vrot.slane %v8974_v34, 2  ;;  %v8477_v10 = vmax.f32 %v8461_v33, 0.0  ;;  %v8436_v46 = vmul.f32 %v19442_v55, %v19481_v27  ;;  %v8441_v31 = vmul.f32 %v19487_v36, %v19442_v55 }
 0x61f   :  { %v19616_v22 = vsel %vm9287_vm3, %v9034_v5, -inf  ;;  %v8964_v18 = vmax.f32 %v8962_v16, %v8963_v30  ;;  %v8970_v15 = vrot.slane %v8969_v13, 1  ;;  %v19619_v29 = vsel %vm9287_vm3, %v8957_v45, -inf }
 0x620   :  { %v8976_v60 = vmax.f32 %v8974_v34, %v8975_v14  ;;  %v8621_v4 = vcombine.high %v8477_v10, %v8477_v10  ;;  %v8628_v21 = vrot.slane %v8477_v10, %v17092_v61  ;;  %v8459_v47 = vadd.f32 %v19447_v11, %v8436_v46 }
 0x621   :  { %v8971_v38 = vmax.f32 %v8969_v13, %v8970_v15  ;;  %v19624_v27 = vsel %vm9287_vm3, %v8964_v18, -inf  ;;  %v8464_v36 = vadd.f32 %v19447_v11, %v8441_v31  ;;  %v19629_v8 = vmul.f32 %v19442_v55, %v19489_v2 }
 0x622   :  { %v8977_v54 = vrot.slane %v8976_v60, 1  ;;  %v8635_v58 = vrot.slane %v8621_v4, %v17092_v61  ;;  %v8636_v37 = vcombine.high %v8628_v21, %v8628_v21  ;;  %v9035_v63 = vsel %vm8838_vm4, %v8628_v21, -inf }
 0x623   :  { %v19634_v57 = vsel %vm9287_vm3, %v8971_v38, -inf  ;;  %v9036_v9 = vrot.slane %v9035_v63, 4  ;;  %v8475_v23 = vmax.f32 %v8459_v47, 0.0  ;;  %v19636_v49 = vmax.f32 %v8464_v36, 0.0 }
 0x624   :  { %v8978_v17 = vmax.f32 %v8976_v60, %v8977_v54  ;;  %v8637_v19 = vcombine.high %v8635_v58, %v8635_v58  ;;  %v9042_v44 = vsel %vm8838_vm4, %v8636_v37, -inf  ;;  %v9049_v2 = vsel %vm8838_vm4, %v8635_v58, -inf  ;;  %v16470_v58 = vld [vmem:[%s21033_s7 + $0x20] sm:$0xff]  }
 0x625   :  { %v9037_v50 = vmax.f32 %v9035_v63, %v9036_v9  ;;  %v9043_v0 = vrot.slane %v9042_v44, 4  ;;  %v9050_v3 = vrot.slane %v9049_v2, 4  ;;  %v8587_v1 = vcombine.high %v8475_v23, %v8475_v23  ;;  %16064 = vmatprep.subr.bf16.mxu0 %v16470_v58 }
 0x626   :  { %v19641_v28 = vsel %vm9287_vm3, %v8978_v17, -inf  ;;  %v9056_v56 = vsel %vm8838_vm4, %v8637_v19, -inf  ;;  %v8594_v7 = vrot.slane %v8475_v23, %v17092_v61  ;;  %v8672_v40 = vcombine.high %v19636_v49, %v19636_v49  ;;  %16065 = vmatpush3.bf16.msra.mxu0 %v16470_v58  ;;  %v16471_v58 = vld [vmem:[%s21033_s7 + $0x28] sm:$0xff]  }
 0x627   :  { %v9038_v26 = vrot.slane %v9037_v50, 2  ;;  %v9044_v12 = vmax.f32 %v9042_v44, %v9043_v0  ;;  %v9051_v43 = vmax.f32 %v9049_v2, %v9050_v3  ;;  %v9057_v16 = vrot.slane %v9056_v56, 4  ;;  %16066 = vmatprep.subr.bf16.mxu0 %v16471_v58 }
 0x628   :  { %v8601_v42 = vrot.slane %v8587_v1, %v17092_v61  ;;  %v8602_v34 = vcombine.high %v8594_v7, %v8594_v7  ;;  %v8979_v33 = vsel %vm8838_vm4, %v8594_v7, -inf  ;;  %v19651_v5 = vrot.slane %v19636_v49, %v17092_v61 }
 0x629   :  { %v9039_v45 = vmax.f32 %v9037_v50, %v9038_v26  ;;  %v9045_v30 = vrot.slane %v9044_v12, 2  ;;  %v9052_v13 = vrot.slane %v9051_v43, 2  ;;  %v9058_v14 = vmax.f32 %v9056_v56, %v9057_v16 }
 0x62a   :  { %v8603_v10 = vcombine.high %v8601_v42, %v8601_v42  ;;  %v8980_v46 = vrot.slane %v8979_v33, 4  ;;  %v8986_v31 = vsel %vm8838_vm4, %v8602_v34, -inf  ;;  %v8993_v18 = vsel %vm8838_vm4, %v8601_v42, -inf  ;;  %16067 = vmatpush3.bf16.msra.mxu0 %v16471_v58 }
 0x62b   :  { %v9040_v15 = vrot.slane %v9039_v45, 1  ;;  %v9046_v60 = vmax.f32 %v9044_v12, %v9045_v30  ;;  %v9053_v4 = vmax.f32 %v9051_v43, %v9052_v13  ;;  %v9059_v21 = vrot.slane %v9058_v14, 2 }
 0x62c   :  { %v8981_v47 = vmax.f32 %v8979_v33, %v8980_v46  ;;  %v8987_v38 = vrot.slane %v8986_v31, 4  ;;  %v8994_v36 = vrot.slane %v8993_v18, 4  ;;  %v9000_v54 = vsel %vm8838_vm4, %v8603_v10, -inf }
 0x62d   :  { %v9041_v37 = vmax.f32 %v9039_v45, %v9040_v15  ;;  %v9047_v63 = vrot.slane %v9046_v60, 1  ;;  %v9054_v9 = vrot.slane %v9053_v4, 1  ;;  %v9060_v23 = vmax.f32 %v9058_v14, %v9059_v21 }
 0x62e   :  { %v8982_v17 = vrot.slane %v8981_v47, 2  ;;  %v8988_v19 = vmax.f32 %v8986_v31, %v8987_v38  ;;  %v8995_v44 = vmax.f32 %v8993_v18, %v8994_v36  ;;  %v9001_v2 = vrot.slane %v9000_v54, 4 }
 0x62f   :  { %v9048_v50 = vmax.f32 %v9046_v60, %v9047_v63  ;;  %v9055_v0 = vmax.f32 %v9053_v4, %v9054_v9  ;;  %v9061_v3 = vrot.slane %v9060_v23, 1  ;;  %v9325_v1 = vsel %vm9287_vm3, %v9041_v37, -inf }
 0x630   :  { %v9326_v56 = vmax.f32 %v19600_v32, %v9325_v1  ;;  %v8983_v7 = vmax.f32 %v8981_v47, %v8982_v17  ;;  %v8989_v26 = vrot.slane %v8988_v19, 2  ;;  %v8996_v12 = vrot.slane %v8995_v44, 2  ;;  %v9597_v1 = vld [vmem:[#allocation3 + $0x10] sm:$0x7] }
 0x631   :  { %v9062_v43 = vmax.f32 %v9060_v23, %v9061_v3  ;;  %v9328_v16 = vsel %vm9287_vm3, %v9048_v50, -inf  ;;  %v9331_v42 = vsel %vm9287_vm3, %v9055_v0, -inf  ;;  %v9002_v34 = vmax.f32 %v9000_v54, %v9001_v2 }
 0x632   :  { %v9329_v33 = vmax.f32 %v19603_v39, %v9328_v16  ;;  %v9332_v45 = vmax.f32 %v19606_v6, %v9331_v42  ;;  %v15587_v30 = vpack.c.bf16 %v9326_v56, %v9326_v56  ;;  %v8984_v13 = vrot.slane %v8983_v7, 1 }
 0x633   :  { %v9334_v14 = vsel %vm9287_vm3, %v9062_v43, -inf  ;;  %v8990_v10 = vmax.f32 %v8988_v19, %v8989_v26  ;;  %v8997_v46 = vmax.f32 %v8995_v44, %v8996_v12  ;;  %v9003_v32 = vrot.slane %v9002_v34, 2  ;;  %v16473_v26 = vld [vmem:[%s21033_s7 + $0x38] sm:$0xff]  }
 0x634   :  { %v9335_v31 = vmax.f32 %v19616_v22, %v9334_v14  ;;  %v15588_v18 = vpack.c.bf16 %v9329_v33, %v9329_v33  ;;  %v15589_v15 = vpack.c.bf16 %v9332_v45, %v9332_v45  ;;  %v9524_v60 = vunpack.c.l.b16 %v15587_v30  ;;  %v16472_v22 = vld [vmem:[%s21033_s7 + $0x30] sm:$0xff]  }
 0x635   :  { %v8985_v4 = vmax.f32 %v8983_v7, %v8984_v13  ;;  %v8991_v21 = vrot.slane %v8990_v10, 1  ;;  %v8998_v47 = vrot.slane %v8997_v46, 1  ;;  %v9004_v38 = vmax.f32 %v9002_v34, %v9003_v32  ;;  %16068 = vmatprep.subr.bf16.mxu0 %v16472_v22 }
 0x636   :  { %v15590_v36 = vpack.c.bf16 %v9335_v31, %v9335_v31  ;;  %v9525_v39 = vunpack.c.l.b16 %v15588_v18  ;;  %v9526_v54 = vunpack.c.l.b16 %v15589_v15  ;;  %v8686_v6 = vrot.slane %v8672_v40, %v17092_v61  ;;  %16069 = vmatpush3.bf16.msra.mxu0 %v16472_v22  ;;  %v9594_v22 = vld [vmem:[#allocation3 + $0xc] sm:$0x7] }
 0x637   :  { %v8992_v37 = vmax.f32 %v8990_v10, %v8991_v21  ;;  %v8999_v63 = vmax.f32 %v8997_v46, %v8998_v47  ;;  %v9005_v9 = vrot.slane %v9004_v38, 1  ;;  %v9313_v23 = vsel %vm9287_vm3, %v8985_v4, -inf  ;;  %16070 = vmatprep.subr.bf16.mxu0 %v16473_v26 }
 0x638   :  { %v9527_v17 = vunpack.c.l.b16 %v15590_v36  ;;  %v9553_v19 = vsel %vm5399_vm10, %v9525_v39, %v9524_v60  ;;  %v9314_v44 = vmax.f32 %v19619_v29, %v9313_v23  ;;  %v8687_v49 = vcombine.high %v19651_v5, %v19651_v5 }
 0x639   :  { %v9554_v40 = vsel %vm5401_vm11, %v9526_v54, %v9553_v19  ;;  %v9006_v2 = vmax.f32 %v9004_v38, %v9005_v9  ;;  %v9316_v50 = vsel %vm9287_vm3, %v8992_v37, -inf  ;;  %v9319_v0 = vsel %vm9287_vm3, %v8999_v63, -inf }
 0x63a   :  { %v9555_v3 = vsel %vm5403_vm12, %v9527_v17, %v9554_v40  ;;  %v9317_v56 = vmax.f32 %v19624_v27, %v9316_v50  ;;  %v9320_v7 = vmax.f32 %v19634_v57, %v9319_v0  ;;  %v15583_v29 = vpack.c.bf16 %v9314_v44, %v9314_v44  ;;  %16071 = vmatpush3.bf16.msra.mxu0 %v16473_v26 }
 0x63b   :  { %v9571_v12 = vpack.c.b16 %v9555_v3, %v9555_v3  ;;  %v9322_v43 = vsel %vm9287_vm3, %v9006_v2, -inf  ;;  %v8688_v16 = vcombine.high %v8686_v6, %v8686_v6  ;;  %v9119_v42 = vsel %vm8838_vm4, %v19651_v5, -inf }
 0x63c   :  { %v9323_v34 = vmax.f32 %v19641_v28, %v9322_v43  ;;  %v15584_v33 = vpack.c.bf16 %v9317_v56, %v9317_v56  ;;  %v15585_v45 = vpack.c.bf16 %v9320_v7, %v9320_v7  ;;  %v9520_v27 = vunpack.c.l.b16 %v15583_v29  ;;  %v16474_v28 = vld [vmem:[%s21033_s7] sm:$0xff]  }
 0x63d   :  { %v9598_v57 = vsel %vm19569_vm13, %v9571_v12, %v9597_v1  ;;  %v9120_v30 = vrot.slane %v9119_v42, 4  ;;  %v9126_v13 = vsel %vm8838_vm4, %v8687_v49, -inf  ;;  %v9133_v14 = vsel %vm8838_vm4, %v8686_v6, -inf  ;;  %16076 = vmatprep.subr.bf16.mxu0 %v16474_v28 }
 0x63e   :  { %9599 = vst [vmem:[#allocation3 + $0x10] sm:$0x7] %v9598_v57  ;;  %v15586_v10 = vpack.c.bf16 %v9323_v34, %v9323_v34  ;;  %v9521_v46 = vunpack.c.l.b16 %v15584_v33  ;;  %v9522_v32 = vunpack.c.l.b16 %v15585_v45  ;;  %v9127_v31 = vrot.slane %v9126_v13, 4 }
 0x63f   :  { %v9121_v5 = vmax.f32 %v9119_v42, %v9120_v30  ;;  %v9134_v18 = vrot.slane %v9133_v14, 4  ;;  %v9140_v15 = vsel %vm8838_vm4, %v8688_v16, -inf  ;;  %v8462_v60 = vadd.f32 %v19447_v11, %v19629_v8  ;;  %v223_v30 = vld [vmem:[#allocation3 + $0x1c] sm:$0x1] }
 0x640   :  { %v9523_v4 = vunpack.c.l.b16 %v15586_v10  ;;  %v9550_v21 = vsel %vm5399_vm10, %v9521_v46, %v9520_v27  ;;  %v9128_v47 = vmax.f32 %v9126_v13, %v9127_v31  ;;  %v9141_v38 = vrot.slane %v9140_v15, 4 }
 0x641   :  { %v9551_v36 = vsel %vm5401_vm11, %v9522_v32, %v9550_v21  ;;  %v9122_v39 = vrot.slane %v9121_v5, 2  ;;  %v9135_v54 = vmax.f32 %v9133_v14, %v9134_v18  ;;  %v8478_v6 = vmax.f32 %v8462_v60, 0.0  ;;  %v262_v32 = vld [vmem:[#allocation3 + $0x1c] sm:$0x4] }
 0x642   :  { %v9552_v58 = vsel %vm5403_vm12, %v9523_v4, %v9551_v36  ;;  %v9129_v37 = vrot.slane %v9128_v47, 2  ;;  %v9142_v63 = vmax.f32 %v9140_v15, %v9141_v38  ;;  %v8442_v9 = vmul.f32 %v19491_v59, %v19442_v55 }
 0x643   :  { %v9570_v8 = vpack.c.b16 %v9552_v58, %v9552_v58  ;;  %v9123_v23 = vmax.f32 %v9121_v5, %v9122_v39  ;;  %v9136_v17 = vrot.slane %v9135_v54, 2  ;;  %v8638_v19 = vcombine.high %v8478_v6, %v8478_v6 }
 0x644   :  { %v9130_v44 = vmax.f32 %v9128_v47, %v9129_v37  ;;  %v9143_v49 = vrot.slane %v9142_v63, 2  ;;  %v8645_v40 = vrot.slane %v8478_v6, %v17092_v61  ;;  %v8465_v2 = vadd.f32 %v19447_v11, %v8442_v9 }
 0x645   :  { %v9595_v50 = vsel %vm19569_vm13, %v9570_v8, %v9594_v22  ;;  %v9124_v0 = vrot.slane %v9123_v23, 1  ;;  %v9137_v3 = vmax.f32 %v9135_v54, %v9136_v17  ;;  %v8652_v1 = vrot.slane %v8638_v19, %v17092_v61  ;;  %v19739_v22 = vld [vmem:[%s21031_s5] ss:$0 sm:$0xff] }
 0x646   :  { %9596 = vst [vmem:[#allocation3 + $0xc] sm:$0x7] %v9595_v50  ;;  %v9131_v55 = vrot.slane %v9130_v44, 1  ;;  %v9144_v59 = vmax.f32 %v9142_v63, %v9143_v49  ;;  %v8653_v56 = vcombine.high %v8645_v40, %v8645_v40  ;;  %v9063_v7 = vsel %vm8838_vm4, %v8645_v40, -inf }
 0x647   :  { %v9125_v29 = vmax.f32 %v9123_v23, %v9124_v0  ;;  %v9138_v26 = vrot.slane %v9137_v3, 1  ;;  %v8654_v12 = vcombine.high %v8652_v1, %v8652_v1  ;;  %v9064_v43 = vrot.slane %v9063_v7, 4 }
 0x648   :  { %v9132_v16 = vmax.f32 %v9130_v44, %v9131_v55  ;;  %v9145_v42 = vrot.slane %v9144_v59, 1  ;;  %v9070_v11 = vsel %vm8838_vm4, %v8653_v56, -inf  ;;  %v9077_v34 = vsel %vm8838_vm4, %v8652_v1, -inf }
 0x649   :  { %v9139_v33 = vmax.f32 %v9137_v3, %v9138_v26  ;;  %v19719_v45 = vsel %vm9287_vm3, %v9125_v29, -inf  ;;  %v9065_v27 = vmax.f32 %v9063_v7, %v9064_v43  ;;  %v9071_v57 = vrot.slane %v9070_v11, 4 }
 0x64a   :  { %v9146_v13 = vmax.f32 %v9144_v59, %v9145_v42  ;;  %v19722_v14 = vsel %vm9287_vm3, %v9132_v16, -inf  ;;  %v9078_v10 = vrot.slane %v9077_v34, 4  ;;  %v9084_v46 = vsel %vm8838_vm4, %v8654_v12, -inf }
 0x64b   :  { %v19726_v31 = vsel %vm9287_vm3, %v9139_v33, -inf  ;;  %v9066_v28 = vrot.slane %v9065_v27, 2  ;;  %v9072_v5 = vmax.f32 %v9070_v11, %v9071_v57  ;;  %v9085_v18 = vrot.slane %v9084_v46, 4 }
 0x64c   :  { %v19729_v15 = vsel %vm9287_vm3, %v9146_v13, -inf  ;;  %v9079_v60 = vmax.f32 %v9077_v34, %v9078_v10  ;;  %v8481_v4 = vmax.f32 %v8465_v2, 0.0  ;;  %v224_v21 = vsel %vm19409_vm1, 0, %v223_v30  ;;  %v19762_v30 = vld [vmem:[%s21032_s6] ss:$0 sm:$0xff] }
 0x64d   :  { %v9067_v47 = vmax.f32 %v9065_v27, %v9066_v28  ;;  %v9073_v38 = vrot.slane %v9072_v5, 2  ;;  %v9086_v36 = vmax.f32 %v9084_v46, %v9085_v18  ;;  %225 = vst [vmem:[#allocation3 + $0x1c] sm:$0x1] %v224_v21  ;;  %v263_v39 = vsel %vm19421_vm9, 0, %v262_v32  ;;  %v232_v10 = vld [vmem:[#allocation3 + $0x28] sm:$0x1] }
 0x64e   :  { %v9080_v54 = vrot.slane %v9079_v60, 2  ;;  %v8689_v6 = vcombine.high %v8481_v4, %v8481_v4  ;;  %v8696_v58 = vrot.slane %v8481_v4, %v17092_v61  ;;  %264 = vst [vmem:[#allocation3 + $0x1c] sm:$0x4] %v263_v39  ;;  %v8440_v37 = vmul.f32 %v19739_v22, %v19499_v51 }
 0x64f   :  { %v9068_v63 = vrot.slane %v9067_v47, 1  ;;  %v9074_v9 = vmax.f32 %v9072_v5, %v9073_v38  ;;  %v9087_v8 = vrot.slane %v9086_v36, 2  ;;  %v8445_v23 = vmul.f32 %v19739_v22, %v19542_v62 }
 0x650   :  { %v9081_v17 = vmax.f32 %v9079_v60, %v9080_v54  ;;  %v8703_v19 = vrot.slane %v8689_v6, %v17092_v61  ;;  %v8704_v44 = vcombine.high %v8696_v58, %v8696_v58  ;;  %v9147_v49 = vsel %vm8838_vm4, %v8696_v58, -inf }
 0x651   :  { %v9069_v40 = vmax.f32 %v9067_v47, %v9068_v63  ;;  %v9075_v2 = vrot.slane %v9074_v9, 1  ;;  %v9088_v50 = vmax.f32 %v9086_v36, %v9087_v8  ;;  %v9148_v0 = vrot.slane %v9147_v49, 4 }
 0x652   :  { %v9082_v3 = vrot.slane %v9081_v17, 1  ;;  %v8705_v1 = vcombine.high %v8703_v19, %v8703_v19  ;;  %v9154_v51 = vsel %vm8838_vm4, %v8704_v44, -inf  ;;  %v9161_v55 = vsel %vm8838_vm4, %v8703_v19, -inf }
 0x653   :  { %v9076_v59 = vmax.f32 %v9074_v9, %v9075_v2  ;;  %v9089_v56 = vrot.slane %v9088_v50, 1  ;;  %v19750_v62 = vsel %vm9287_vm3, %v9069_v40, -inf  ;;  %v9149_v7 = vmax.f32 %v9147_v49, %v9148_v0 }
 0x654   :  { %v9083_v29 = vmax.f32 %v9081_v17, %v9082_v3  ;;  %v9155_v26 = vrot.slane %v9154_v51, 4  ;;  %v9162_v12 = vrot.slane %v9161_v55, 4  ;;  %v9168_v43 = vsel %vm8838_vm4, %v8705_v1, -inf }
 0x655   :  { %v9090_v16 = vmax.f32 %v9088_v50, %v9089_v56  ;;  %v19754_v42 = vsel %vm9287_vm3, %v9076_v59, -inf  ;;  %v9150_v11 = vrot.slane %v9149_v7, 2  ;;  %v9169_v34 = vrot.slane %v9168_v43, 4 }
 0x656   :  { %v19757_v33 = vsel %vm9287_vm3, %v9083_v29, -inf  ;;  %v9156_v27 = vmax.f32 %v9154_v51, %v9155_v26  ;;  %v9163_v57 = vmax.f32 %v9161_v55, %v9162_v12  ;;  %v8463_v13 = vadd.f32 %v19762_v30, %v8440_v37 }
 0x657   :  { %v19766_v46 = vsel %vm9287_vm3, %v9090_v16, -inf  ;;  %v9151_v32 = vmax.f32 %v9149_v7, %v9150_v11  ;;  %v9170_v28 = vmax.f32 %v9168_v43, %v9169_v34  ;;  %v8468_v5 = vadd.f32 %v19762_v30, %v8445_v23 }
 0x658   :  { %v9157_v18 = vrot.slane %v9156_v27, 2  ;;  %v9164_v60 = vrot.slane %v9163_v57, 2  ;;  %v8479_v4 = vmax.f32 %v8463_v13, 0.0  ;;  %v19771_v21 = vmul.f32 %v19739_v22, %v19544_v35 }
 0x659   :  { %v9152_v47 = vrot.slane %v9151_v32, 1  ;;  %v9171_v38 = vrot.slane %v9170_v28, 2  ;;  %v8484_v36 = vmax.f32 %v8468_v5, 0.0  ;;  %v233_v39 = vsel %vm19409_vm1, 0, %v232_v10 }
 0x65a   :  { %v9158_v54 = vmax.f32 %v9156_v27, %v9157_v18  ;;  %v9165_v6 = vmax.f32 %v9163_v57, %v9164_v60  ;;  %v8655_v58 = vcombine.high %v8479_v4, %v8479_v4  ;;  %v8662_v37 = vrot.slane %v8479_v4, %v17092_v61  ;;  %234 = vst [vmem:[#allocation3 + $0x28] sm:$0x1] %v233_v39 }
 0x65b   :  { %v9153_v63 = vmax.f32 %v9151_v32, %v9152_v47  ;;  %v9172_v9 = vmax.f32 %v9170_v28, %v9171_v38  ;;  %v8740_v8 = vcombine.high %v8484_v36, %v8484_v36  ;;  %v8747_v23 = vrot.slane %v8484_v36, %v17092_v61 }
 0x65c   :  { %v9159_v17 = vrot.slane %v9158_v54, 1  ;;  %v9166_v35 = vrot.slane %v9165_v6, 1  ;;  %v8669_v19 = vrot.slane %v8655_v58, %v17092_v61  ;;  %v8670_v44 = vcombine.high %v8662_v37, %v8662_v37 }
 0x65d   :  { %v9173_v49 = vrot.slane %v9172_v9, 1  ;;  %v9349_v40 = vsel %vm9287_vm3, %v9153_v63, -inf  ;;  %v9091_v2 = vsel %vm8838_vm4, %v8662_v37, -inf  ;;  %v19781_v50 = vrot.slane %v8740_v8, %v17092_v61 }
 0x65e   :  { %v9160_v0 = vmax.f32 %v9158_v54, %v9159_v17  ;;  %v9167_v3 = vmax.f32 %v9165_v6, %v9166_v35  ;;  %v9350_v1 = vmax.f32 %v19719_v45, %v9349_v40  ;;  %v8671_v51 = vcombine.high %v8669_v19, %v8669_v19  ;;  %v9603_v40 = vld [vmem:[#allocation3 + $0x20] sm:$0x7] }
 0x65f   :  { %v9174_v55 = vmax.f32 %v9172_v9, %v9173_v49  ;;  %v9092_v59 = vrot.slane %v9091_v2, 4  ;;  %v9098_v56 = vsel %vm8838_vm4, %v8670_v44, -inf  ;;  %v9105_v7 = vsel %vm8838_vm4, %v8669_v19, -inf }
 0x660   :  { %v9352_v29 = vsel %vm9287_vm3, %v9160_v0, -inf  ;;  %v9355_v26 = vsel %vm9287_vm3, %v9167_v3, -inf  ;;  %v15595_v12 = vpack.c.bf16 %v9350_v1, %v9350_v1  ;;  %v9099_v43 = vrot.slane %v9098_v56, 4 }
 0x661   :  { %v9353_v16 = vmax.f32 %v19722_v14, %v9352_v29  ;;  %v9356_v11 = vmax.f32 %v19726_v31, %v9355_v26  ;;  %v9358_v34 = vsel %vm9287_vm3, %v9174_v55, -inf  ;;  %v9093_v45 = vmax.f32 %v9091_v2, %v9092_v59 }
 0x662   :  { %v9359_v27 = vmax.f32 %v19729_v15, %v9358_v34  ;;  %v9532_v57 = vunpack.c.l.b16 %v15595_v12  ;;  %v9100_v13 = vmax.f32 %v9098_v56, %v9099_v43  ;;  %v9106_v10 = vrot.slane %v9105_v7, 4 }
 0x663   :  { %v15596_v32 = vpack.c.bf16 %v9353_v16, %v9353_v16  ;;  %v15597_v28 = vpack.c.bf16 %v9356_v11, %v9356_v11  ;;  %v9094_v5 = vrot.slane %v9093_v45, 2  ;;  %v9112_v18 = vsel %vm8838_vm4, %v8671_v51, -inf }
 0x664   :  { %v15598_v60 = vpack.c.bf16 %v9359_v27, %v9359_v27  ;;  %v9101_v4 = vrot.slane %v9100_v13, 2  ;;  %v9107_v47 = vmax.f32 %v9105_v7, %v9106_v10  ;;  %v9113_v38 = vrot.slane %v9112_v18, 4 }
 0x665   :  { %v9533_v14 = vunpack.c.l.b16 %v15596_v32  ;;  %v9534_v36 = vunpack.c.l.b16 %v15597_v28  ;;  %v9095_v31 = vmax.f32 %v9093_v45, %v9094_v5  ;;  %v8755_v39 = vcombine.high %v8747_v23, %v8747_v23 }
 0x666   :  { %v9535_v54 = vunpack.c.l.b16 %v15598_v60  ;;  %v9102_v6 = vmax.f32 %v9100_v13, %v9101_v4  ;;  %v9108_v58 = vrot.slane %v9107_v47, 2  ;;  %v9114_v15 = vmax.f32 %v9112_v18, %v9113_v38 }
 0x667   :  { %v9559_v37 = vsel %vm5399_vm10, %v9533_v14, %v9532_v57  ;;  %v9096_v63 = vrot.slane %v9095_v31, 1  ;;  %v8756_v9 = vcombine.high %v19781_v50, %v19781_v50  ;;  %v9231_v8 = vsel %vm8838_vm4, %v8747_v23, -inf }
 0x668   :  { %v9560_v17 = vsel %vm5401_vm11, %v9534_v36, %v9559_v37  ;;  %v9103_v35 = vrot.slane %v9102_v6, 1  ;;  %v9109_v19 = vmax.f32 %v9107_v47, %v9108_v58  ;;  %v9115_v44 = vrot.slane %v9114_v15, 2 }
 0x669   :  { %v9561_v49 = vsel %vm5403_vm12, %v9535_v54, %v9560_v17  ;;  %v9097_v2 = vmax.f32 %v9095_v31, %v9096_v63  ;;  %v9232_v0 = vrot.slane %v9231_v8, 4  ;;  %v9238_v3 = vsel %vm8838_vm4, %v8755_v39, -inf  ;;  %v271_v17 = vld [vmem:[#allocation3 + $0x28] sm:$0x4] }
 0x66a   :  { %v9573_v1 = vpack.c.b16 %v9561_v49, %v9561_v49  ;;  %v9104_v51 = vmax.f32 %v9102_v6, %v9103_v35  ;;  %v9110_v55 = vrot.slane %v9109_v19, 1  ;;  %v9116_v59 = vmax.f32 %v9114_v15, %v9115_v44 }
 0x66b   :  { %v9337_v56 = vsel %vm9287_vm3, %v9097_v2, -inf  ;;  %v9233_v7 = vmax.f32 %v9231_v8, %v9232_v0  ;;  %v9239_v23 = vrot.slane %v9238_v3, 4  ;;  %v9245_v29 = vsel %vm8838_vm4, %v19781_v50, -inf  ;;  %v229_v2 = vld [vmem:[#allocation3 + $0x24] sm:$0x1] }
 0x66c   :  { %v9604_v26 = vsel %vm19569_vm13, %v9573_v1, %v9603_v40  ;;  %v9111_v12 = vmax.f32 %v9109_v19, %v9110_v55  ;;  %v9117_v43 = vrot.slane %v9116_v59, 1  ;;  %v9338_v16 = vmax.f32 %v19750_v62, %v9337_v56  ;;  %v9600_v0 = vld [vmem:[#allocation3 + $0x1c] sm:$0x7] }
 0x66d   :  { %9605 = vst [vmem:[#allocation3 + $0x20] sm:$0x7] %v9604_v26  ;;  %v9340_v11 = vsel %vm9287_vm3, %v9104_v51, -inf  ;;  %v9234_v34 = vrot.slane %v9233_v7, 2  ;;  %v9240_v45 = vmax.f32 %v9238_v3, %v9239_v23  ;;  %v9246_v27 = vrot.slane %v9245_v29, 4 }
 0x66e   :  { %v9118_v57 = vmax.f32 %v9116_v59, %v9117_v43  ;;  %v9341_v13 = vmax.f32 %v19754_v42, %v9340_v11  ;;  %v9343_v10 = vsel %vm9287_vm3, %v9111_v12, -inf  ;;  %v15591_v32 = vpack.c.bf16 %v9338_v16, %v9338_v16 }
 0x66f   :  { %v9344_v50 = vmax.f32 %v19757_v33, %v9343_v10  ;;  %v9235_v28 = vmax.f32 %v9233_v7, %v9234_v34  ;;  %v9241_v5 = vrot.slane %v9240_v45, 2  ;;  %v9247_v18 = vmax.f32 %v9245_v29, %v9246_v27 }
 0x670   :  { %v9346_v60 = vsel %vm9287_vm3, %v9118_v57, -inf  ;;  %v15592_v62 = vpack.c.bf16 %v9341_v13, %v9341_v13  ;;  %v9528_v4 = vunpack.c.l.b16 %v15591_v32  ;;  %v9252_v47 = vsel %vm8838_vm4, %v8756_v9, -inf  ;;  %v268_v57 = vld [vmem:[#allocation3 + $0x24] sm:$0x4] }
 0x671   :  { %v9347_v38 = vmax.f32 %v19766_v46, %v9346_v60  ;;  %v15593_v14 = vpack.c.bf16 %v9344_v50, %v9344_v50  ;;  %v9236_v36 = vrot.slane %v9235_v28, 1  ;;  %v9242_v31 = vmax.f32 %v9240_v45, %v9241_v5 }
 0x672   :  { %v9529_v42 = vunpack.c.l.b16 %v15592_v62  ;;  %v9248_v39 = vrot.slane %v9247_v18, 2  ;;  %v9253_v54 = vrot.slane %v9252_v47, 4  ;;  %v8466_v33 = vadd.f32 %v19762_v30, %v19771_v21 }
 0x673   :  { %v15594_v6 = vpack.c.bf16 %v9347_v38, %v9347_v38  ;;  %v9530_v58 = vunpack.c.l.b16 %v15593_v14  ;;  %v9243_v37 = vrot.slane %v9242_v31, 1  ;;  %v9237_v35 = vmax.f32 %v9235_v28, %v9236_v36 }
 0x674   :  { %v9556_v15 = vsel %vm5399_vm10, %v9529_v42, %v9528_v4  ;;  %v9254_v63 = vmax.f32 %v9252_v47, %v9253_v54  ;;  %v8482_v8 = vmax.f32 %v8466_v33, 0.0  ;;  %v9249_v19 = vmax.f32 %v9247_v18, %v9248_v39 }
 0x675   :  { %v9531_v9 = vunpack.c.l.b16 %v15594_v6  ;;  %v9557_v46 = vsel %vm5401_vm11, %v9530_v58, %v9556_v15  ;;  %v272_v3 = vsel %vm19421_vm9, 0, %v271_v17  ;;  %v8446_v1 = vmul.f32 %v19739_v22, %v19573_v20 }
 0x676   :  { %v9255_v44 = vrot.slane %v9254_v63, 2  ;;  %v8706_v49 = vcombine.high %v8482_v8, %v8482_v8  ;;  %v8713_v40 = vrot.slane %v8482_v8, %v17092_v61  ;;  %v9244_v55 = vmax.f32 %v9242_v31, %v9243_v37  ;;  %273 = vst [vmem:[#allocation3 + $0x28] sm:$0x4] %v272_v3 }
 0x677   :  { %v9558_v21 = vsel %vm5403_vm12, %v9531_v9, %v9557_v46  ;;  %v8469_v29 = vadd.f32 %v19762_v30, %v8446_v1  ;;  %v230_v26 = vsel %vm19409_vm1, 0, %v229_v2  ;;  %v9250_v43 = vrot.slane %v9249_v19, 1 }
 0x678   :  { %v9572_v51 = vpack.c.b16 %v9558_v21, %v9558_v21  ;;  %v9256_v59 = vmax.f32 %v9254_v63, %v9255_v44  ;;  %v8720_v56 = vrot.slane %v8706_v49, %v17092_v61  ;;  %v8721_v7 = vcombine.high %v8713_v40, %v8713_v40  ;;  %231 = vst [vmem:[#allocation3 + $0x24] sm:$0x1] %v230_v26 }
 0x679   :  { %v9175_v23 = vsel %vm8838_vm4, %v8713_v40, -inf  ;;  %v19831_v20 = vsel %vm9287_vm3, %v9237_v35, -inf  ;;  %v8485_v27 = vmax.f32 %v8469_v29, 0.0  ;;  %v9251_v62 = vmax.f32 %v9249_v19, %v9250_v43 }
 0x67a   :  { %v9601_v12 = vsel %vm19569_vm13, %v9572_v51, %v9600_v0  ;;  %v8722_v16 = vcombine.high %v8720_v56, %v8720_v56  ;;  %v9176_v11 = vrot.slane %v9175_v23, 4  ;;  %v9182_v34 = vsel %vm8838_vm4, %v8721_v7, -inf }
 0x67b   :  { %9602 = vst [vmem:[#allocation3 + $0x1c] sm:$0x7] %v9601_v12  ;;  %v9189_v45 = vsel %vm8838_vm4, %v8720_v56, -inf  ;;  %v9257_v13 = vrot.slane %v9256_v59, 1  ;;  %v9183_v10 = vrot.slane %v9182_v34, 4  ;;  %v8757_v18 = vcombine.high %v8485_v27, %v8485_v27 }
 0x67c   :  { %v9190_v32 = vrot.slane %v9189_v45, 4  ;;  %v9196_v50 = vsel %vm8838_vm4, %v8722_v16, -inf  ;;  %v9177_v28 = vmax.f32 %v9175_v23, %v9176_v11  ;;  %v8764_v60 = vrot.slane %v8485_v27, %v17092_v61  ;;  %v202_v11 = vld [vmem:[#allocation3] sm:$0x1] }
 0x67d   :  { %v9197_v5 = vrot.slane %v9196_v50, 4  ;;  %v9184_v4 = vmax.f32 %v9182_v34, %v9183_v10  ;;  %v269_v38 = vsel %vm19421_vm9, 0, %v268_v57  ;;  %v8771_v31 = vrot.slane %v8757_v18, %v17092_v61  ;;  %v241_v34 = vld [vmem:[#allocation3] sm:$0x4] }
 0x67e   :  { %v9191_v47 = vmax.f32 %v9189_v45, %v9190_v32  ;;  %v9178_v14 = vrot.slane %v9177_v28, 2  ;;  %v8772_v42 = vcombine.high %v8764_v60, %v8764_v60  ;;  %270 = vst [vmem:[#allocation3 + $0x24] sm:$0x4] %v269_v38  ;;  %v9258_v39 = vmax.f32 %v9256_v59, %v9257_v13 }
 0x67f   :  { %v9198_v36 = vmax.f32 %v9196_v50, %v9197_v5  ;;  %v9185_v54 = vrot.slane %v9184_v4, 2  ;;  %v9259_v6 = vsel %vm8838_vm4, %v8764_v60, -inf  ;;  %v8773_v37 = vcombine.high %v8771_v31, %v8771_v31 }
 0x680   :  { %v9192_v33 = vrot.slane %v9191_v47, 2  ;;  %v9179_v58 = vmax.f32 %v9177_v28, %v9178_v14  ;;  %v9260_v63 = vrot.slane %v9259_v6, 4  ;;  %v9266_v9 = vsel %vm8838_vm4, %v8772_v42, -inf }
 0x681   :  { %v9199_v15 = vrot.slane %v9198_v36, 2  ;;  %v9186_v8 = vmax.f32 %v9184_v4, %v9185_v54  ;;  %v9273_v46 = vsel %vm8838_vm4, %v8771_v31, -inf  ;;  %v9267_v49 = vrot.slane %v9266_v9, 4 }
 0x682   :  { %v9193_v17 = vmax.f32 %v9191_v47, %v9192_v33  ;;  %v9180_v35 = vrot.slane %v9179_v58, 1  ;;  %v9261_v44 = vmax.f32 %v9259_v6, %v9260_v63  ;;  %v9274_v21 = vrot.slane %v9273_v46, 4 }
 0x683   :  { %v9200_v19 = vmax.f32 %v9198_v36, %v9199_v15  ;;  %v9187_v40 = vrot.slane %v9186_v8, 1  ;;  %v9280_v0 = vsel %vm8838_vm4, %v8773_v37, -inf  ;;  %v9268_v51 = vmax.f32 %v9266_v9, %v9267_v49 }
 0x684   :  { %v9194_v2 = vrot.slane %v9193_v17, 1  ;;  %v9262_v1 = vrot.slane %v9261_v44, 2  ;;  %v8444_v59 = vmul.f32 %v19739_v22, %v19609_v48  ;;  %v9375_v56 = vsel %vm9287_vm3, %v9244_v55, -inf }
 0x685   :  { %v9201_v3 = vrot.slane %v9200_v19, 1  ;;  %v9378_v7 = vsel %vm9287_vm3, %v9251_v62, -inf  ;;  %v9275_v23 = vmax.f32 %v9273_v46, %v9274_v21  ;;  %v9281_v29 = vrot.slane %v9280_v0, 4 }
 0x686   :  { %v9381_v26 = vsel %vm9287_vm3, %v9258_v39, -inf  ;;  %v9181_v12 = vmax.f32 %v9179_v58, %v9180_v35  ;;  %v9263_v43 = vmax.f32 %v9261_v44, %v9262_v1  ;;  %v9269_v16 = vrot.slane %v9268_v51, 2 }
 0x687   :  { %v9188_v45 = vmax.f32 %v9186_v8, %v9187_v40  ;;  %v9195_v27 = vmax.f32 %v9193_v17, %v9194_v2  ;;  %v9276_v57 = vrot.slane %v9275_v23, 2  ;;  %v9282_v13 = vmax.f32 %v9280_v0, %v9281_v29 }
 0x688   :  { %v9202_v10 = vmax.f32 %v9200_v19, %v9201_v3  ;;  %v9264_v32 = vrot.slane %v9263_v43, 1  ;;  %v9270_v48 = vmax.f32 %v9268_v51, %v9269_v16  ;;  %v8467_v22 = vadd.f32 %v19762_v30, %v8444_v59  ;;  %v19875_v3 = vld.sshfl [vmem:[#allocation3 + $0x4] sm:$0x13 pattern:$0x76325410] }
 0x689   :  { %v9277_v55 = vmax.f32 %v9275_v23, %v9276_v57  ;;  %v9283_v50 = vrot.slane %v9282_v13, 2  ;;  %v203_v28 = vsel %vm19409_vm1, 0, %v202_v11  ;;  %v242_v5 = vsel %vm19421_vm9, 0, %v241_v34 }
 0x68a   :  { %v19855_v18 = vsel %vm9287_vm3, %v9181_v12, -inf  ;;  %v9265_v60 = vmax.f32 %v9263_v43, %v9264_v32  ;;  %v9271_v62 = vrot.slane %v9270_v48, 1  ;;  %v8483_v4 = vmax.f32 %v8467_v22, 0.0  ;;  %204 = vst [vmem:[#allocation3] sm:$0x1] %v203_v28 }
 0x68b   :  { %243 = vst [vmem:[#allocation3] sm:$0x4] %v242_v5  ;;  %v19858_v47 = vsel %vm9287_vm3, %v9188_v45, -inf  ;;  %v19861_v30 = vsel %vm9287_vm3, %v9195_v27, -inf  ;;  %v9278_v38 = vrot.slane %v9277_v55, 1  ;;  %v9284_v14 = vmax.f32 %v9282_v13, %v9283_v50 }
 0x68c   :  { %v9272_v36 = vmax.f32 %v9270_v48, %v9271_v62  ;;  %v9373_v31 = vsel %vm9287_vm3, %v9265_v60, -inf  ;;  %v8723_v42 = vcombine.high %v8483_v4, %v8483_v4  ;;  %v8730_v39 = vrot.slane %v8483_v4, %v17092_v61  ;;  %v19879_v45 = vld.sshfl [vmem:[#allocation3 + $0x8] sm:$0x13 pattern:$0x76325410] }
 0x68d   :  { %v19866_v54 = vsel %vm9287_vm3, %v9202_v10, -inf  ;;  %v9279_v33 = vmax.f32 %v9277_v55, %v9278_v38  ;;  %v9285_v6 = vrot.slane %v9284_v14, 1  ;;  %v9374_v58 = vmax.f32 %v19831_v20, %v9373_v31  ;;  %v9609_v4 = vld [vmem:[#allocation3 + $0x28] sm:$0x7] }
 0x68e   :  { %v9376_v15 = vsel %vm9287_vm3, %v9272_v36, -inf  ;;  %v8737_v37 = vrot.slane %v8723_v42, %v17092_v61  ;;  %v8738_v63 = vcombine.high %v8730_v39, %v8730_v39  ;;  %v9203_v8 = vsel %vm8838_vm4, %v8730_v39, -inf }
 0x68f   :  { %v9286_v17 = vmax.f32 %v9284_v14, %v9285_v6  ;;  %v9377_v9 = vmax.f32 %v9375_v56, %v9376_v15  ;;  %v9379_v46 = vsel %vm9287_vm3, %v9279_v33, -inf  ;;  %v15603_v35 = vpack.c.bf16 %v9374_v58, %v9374_v58 }
 0x690   :  { %v9380_v19 = vmax.f32 %v9378_v7, %v9379_v46  ;;  %v8739_v44 = vcombine.high %v8737_v37, %v8737_v37  ;;  %v9204_v49 = vrot.slane %v9203_v8, 4  ;;  %v9210_v40 = vsel %vm8838_vm4, %v8738_v63, -inf }
 0x691   :  { %v9382_v2 = vsel %vm9287_vm3, %v9286_v17, -inf  ;;  %v15604_v20 = vpack.c.bf16 %v9377_v9, %v9377_v9  ;;  %v9540_v21 = vunpack.c.l.b16 %v15603_v35  ;;  %v9211_v0 = vrot.slane %v9210_v40, 4 }
 0x692   :  { %v9383_v1 = vmax.f32 %v9381_v26, %v9382_v2  ;;  %v15605_v51 = vpack.c.bf16 %v9380_v19, %v9380_v19  ;;  %v9205_v59 = vmax.f32 %v9203_v8, %v9204_v49  ;;  %v9217_v56 = vsel %vm8838_vm4, %v8737_v37, -inf  ;;  %v14897_v55 = vld.sshfl [vmem:[#allocation3] sm:$0x13 pattern:$0x76325410] }
 0x693   :  { %v9541_v23 = vunpack.c.l.b16 %v15604_v20  ;;  %v9212_v29 = vmax.f32 %v9210_v40, %v9211_v0  ;;  %v9218_v12 = vrot.slane %v9217_v56, 4  ;;  %v9224_v7 = vsel %vm8838_vm4, %v8739_v44, -inf  ;;  %v14900_v8 = vld.sshfl [vmem:[#allocation3 + $0xc] sm:$0x13 pattern:$0x76325410]  ;;  %vm19907_vm4 = vmor %vm9710_vm0, %vm9711_vm7 }
 0x694   :  { %v15606_v43 = vpack.c.bf16 %v9383_v1, %v9383_v1  ;;  %v9542_v16 = vunpack.c.l.b16 %v15605_v51  ;;  %v9206_v11 = vrot.slane %v9205_v59, 2  ;;  %v9225_v34 = vrot.slane %v9224_v7, 4  ;;  %vm19917_vm8 = vmor %vm19907_vm4, %vm9713_vm2 }
 0x695   :  { %v9565_v27 = vsel %vm5399_vm10, %v9541_v23, %v9540_v21  ;;  %v9213_v57 = vrot.slane %v9212_v29, 2  ;;  %v9219_v13 = vmax.f32 %v9217_v56, %v9218_v12  ;;  %v9659_v26 = vcombine.high %v19875_v3, %v19875_v3 }
 0x696   :  { %v9543_v10 = vunpack.c.l.b16 %v15606_v43  ;;  %v9566_v32 = vsel %vm5401_vm11, %v9542_v16, %v9565_v27  ;;  %v9207_v48 = vmax.f32 %v9205_v59, %v9206_v11  ;;  %v9226_v22 = vmax.f32 %v9224_v7, %v9225_v34 }
 0x697   :  { %v9214_v50 = vmax.f32 %v9212_v29, %v9213_v57  ;;  %v9220_v28 = vrot.slane %v9219_v13, 2  ;;  %v9651_v5 = vcombine.high %v14897_v55, %v14897_v55  ;;  %v9667_v60 = vcombine.high %v19879_v45, %v19879_v45 }
 0x698   :  { %v9567_v62 = vsel %vm5403_vm12, %v9543_v10, %v9566_v32  ;;  %v9208_v38 = vrot.slane %v9207_v48, 1  ;;  %v9227_v14 = vrot.slane %v9226_v22, 2  ;;  %v9716_v39 = vshrl.u32 %v14897_v55, 16 }
 0x699   :  { %v9575_v36 = vpack.c.b16 %v9567_v62, %v9567_v62  ;;  %v9215_v31 = vrot.slane %v9214_v50, 1  ;;  %v9221_v42 = vmax.f32 %v9219_v13, %v9220_v28  ;;  %v9719_v58 = vshll.u32 %v14897_v55, 16  ;;  %v220_v55 = vld [vmem:[#allocation3 + $0x18] sm:$0x1] }
 0x69a   :  { %v9209_v33 = vmax.f32 %v9207_v48, %v9208_v38  ;;  %v9228_v6 = vmax.f32 %v9226_v22, %v9227_v14  ;;  %v19890_v17 = vshll.u32 %v9651_v5, 16  ;;  %v9718_v35 = vrot.slane %v9716_v39, 6  ;;  %v9606_v39 = vld [vmem:[#allocation3 + $0x24] sm:$0x7] }
 0x69b   :  { %v9610_v15 = vsel %vm19569_vm13, %v9575_v36, %v9609_v4  ;;  %v9216_v37 = vmax.f32 %v9214_v50, %v9215_v31  ;;  %v9222_v63 = vrot.slane %v9221_v42, 1  ;;  %v9721_v19 = vrot.slane %v9719_v58, 7  ;;  %v259_v4 = vld [vmem:[#allocation3 + $0x18] sm:$0x4] }
 0x69c   :  { %9611 = vst [vmem:[#allocation3 + $0x28] sm:$0x7] %v9610_v15  ;;  %v9229_v9 = vrot.slane %v9228_v6, 1  ;;  %v9361_v46 = vsel %vm9287_vm3, %v9209_v33, -inf  ;;  %v9730_v2 = vshrl.u32 %v19875_v3, 16  ;;  %v9675_v0 = vcombine.high %v14900_v8, %v14900_v8 }
 0x69d   :  { %v9223_v44 = vmax.f32 %v9221_v42, %v9222_v63  ;;  %v9362_v49 = vmax.f32 %v19855_v18, %v9361_v46  ;;  %v9364_v40 = vsel %vm9287_vm3, %v9216_v37, -inf  ;;  %v9733_v1 = vshll.u32 %v19875_v3, 16  ;;  %v14902_v31 = vld.sshfl [vmem:[#allocation3 + $0x1c] sm:$0x13 pattern:$0x76325410] }
 0x69e   :  { %v9230_v20 = vmax.f32 %v9228_v6, %v9229_v9  ;;  %v9365_v21 = vmax.f32 %v19858_v47, %v9364_v40  ;;  %v9732_v56 = vrot.slane %v9730_v2, 6  ;;  %v9722_v47 = vor.u32 %v9721_v19, %v9718_v35 }
 0x69f   :  { %v9367_v51 = vsel %vm9287_vm3, %v9223_v44, -inf  ;;  %v15599_v59 = vpack.c.bf16 %v9362_v49, %v9362_v49  ;;  %v9727_v7 = vrot.slane %v19890_v17, 7  ;;  %v9735_v3 = vrot.slane %v9733_v1, 7 }
 0x6a0   :  { %v9368_v23 = vmax.f32 %v19861_v30, %v9367_v51  ;;  %v9370_v29 = vsel %vm9287_vm3, %v9230_v20, -inf  ;;  %v15600_v18 = vpack.c.bf16 %v9365_v21, %v9365_v21  ;;  %v9744_v34 = vshrl.u32 %v19879_v45, 16 }
 0x6a1   :  { %v9371_v12 = vmax.f32 %v19866_v54, %v9370_v29  ;;  %v9536_v16 = vunpack.c.l.b16 %v15599_v59  ;;  %v9736_v57 = vor.u32 %v9735_v3, %v9732_v56  ;;  %v9739_v13 = vshll.u32 %v9659_v26, 16 }
 0x6a2   :  { %v15601_v43 = vpack.c.bf16 %v9368_v23, %v9368_v23  ;;  %v9537_v11 = vunpack.c.l.b16 %v15600_v18  ;;  %v9747_v10 = vshll.u32 %v19879_v45, 16  ;;  %v9746_v48 = vrot.slane %v9744_v34, 6  ;;  %v14903_v45 = vld.sshfl [vmem:[#allocation3 + $0x20] sm:$0x13 pattern:$0x76325410] }
 0x6a3   :  { %v15602_v27 = vpack.c.bf16 %v9371_v12, %v9371_v12  ;;  %v9758_v22 = vshrl.u32 %v14900_v8, 16  ;;  %v9723_v28 = vrot.slane %v9722_v47, 2  ;;  %v9737_v5 = vrot.slane %v9736_v57, 2 }
 0x6a4   :  { %v9538_v54 = vunpack.c.l.b16 %v15601_v43  ;;  %v9562_v32 = vsel %vm5399_vm10, %v9537_v11, %v9536_v16  ;;  %v9749_v62 = vrot.slane %v9747_v10, 7  ;;  %v9761_v36 = vshll.u32 %v14900_v8, 16 }
 0x6a5   :  { %v9539_v50 = vunpack.c.l.b16 %v15602_v27  ;;  %v9760_v14 = vrot.slane %v9758_v22, 6  ;;  %v9741_v33 = vrot.slane %v9739_v13, 7  ;;  %v221_v58 = vsel %vm19409_vm1, 0, %v220_v55 }
 0x6a6   :  { %v9563_v38 = vsel %vm5401_vm11, %v9538_v54, %v9562_v32  ;;  %v9750_v6 = vor.u32 %v9749_v62, %v9746_v48  ;;  %v9753_v37 = vshll.u32 %v9667_v60, 16  ;;  %v9763_v63 = vrot.slane %v9761_v36, 7  ;;  %222 = vst [vmem:[#allocation3 + $0x18] sm:$0x1] %v221_v58 }
 0x6a7   :  { %v9564_v42 = vsel %vm5403_vm12, %v9539_v50, %v9563_v38  ;;  %v9767_v17 = vshll.u32 %v9675_v0, 16  ;;  %v9728_v8 = vsel %vm19917_vm8, %v9723_v28, %v9727_v7  ;;  %v19931_v9 = vsel %vm19917_vm8, %v9737_v5, %v9741_v33 }
 0x6a8   :  { %v9574_v15 = vpack.c.b16 %v9564_v42, %v9564_v42  ;;  %v260_v46 = vsel %vm19421_vm9, 0, %v259_v4  ;;  %v9751_v19 = vrot.slane %v9750_v6, 2  ;;  %v9764_v44 = vor.u32 %v9763_v63, %v9760_v14 }
 0x6a9   :  { %261 = vst [vmem:[#allocation3 + $0x18] sm:$0x4] %v260_v46  ;;  %v9786_v60 = vshrl.u32 %v14902_v31, 16  ;;  %v9789_v49 = vshll.u32 %v14902_v31, 16  ;;  %v9755_v40 = vrot.slane %v9753_v37, 7  ;;  %v9769_v20 = vrot.slane %v9767_v17, 7 }
 0x6aa   :  { %v9607_v35 = vsel %vm19569_vm13, %v9574_v15, %v9606_v39  ;;  %v9765_v2 = vrot.slane %v9764_v44, 2  ;;  %v9836_v21 = vcombine.low %v9728_v8, %v19931_v9  ;;  %v9800_v51 = vshrl.u32 %v14903_v45, 16  ;;  %v16790_v17 = vld.sshfl [vmem:[#allocation3 + $0x8] sm:$0xf pattern:$0x76325410] }
 0x6ab   :  { %9608 = vst [vmem:[#allocation3 + $0x24] sm:$0x7] %v9607_v35  ;;  %v9788_v0 = vrot.slane %v9786_v60, 6  ;;  %v9791_v1 = vrot.slane %v9789_v49, 7  ;;  %v9803_v59 = vshll.u32 %v14903_v45, 16  ;;  %v19940_v25 = vsel %vm19917_vm8, %v9751_v19, %v9755_v40 }
 0x6ac   :  { %v19944_v56 = vsel %vm19917_vm8, %v9765_v2, %v9769_v20  ;;  %v9691_v29 = vcombine.high %v14902_v31, %v14902_v31  ;;  %v9844_v18 = vrot.slane %v9836_v21, %v17092_v61  ;;  %v9802_v3 = vrot.slane %v9800_v51, 6  ;;  %v14928_v8 = vld.sshfl [vmem:[#allocation3 + $0xc] sm:$0x12 pattern:$0x76325410] }
 0x6ad   :  { %v9837_v23 = vcombine.low %v19940_v25, %v19944_v56  ;;  %v9792_v7 = vor.u32 %v9791_v1, %v9788_v0  ;;  %v9805_v43 = vrot.slane %v9803_v59, 7  ;;  %v9699_v57 = vcombine.high %v14903_v45, %v14903_v45  ;;  %v14925_v35 = vld.sshfl [vmem:[#allocation3] sm:$0x12 pattern:$0x76325410] }
 0x6ae   :  { %v9795_v10 = vshll.u32 %v9691_v29, 16  ;;  %v14926_v19 = vld.sshfl [vmem:[#allocation3 + $0x4] sm:$0x12 pattern:$0x76325410]  ;;  %vm282_vm11 = vcmask 1040384   ;;  %v10093_v2 = vcombine.high %v14925_v35, %v14925_v35  ;;  %v10117_v0 = vcombine.high %v14928_v8, %v14928_v8 }
 0x6af   :  { %v9851_v12 = vrot.slane %v9837_v23, %v17092_v61  ;;  %v9793_v55 = vrot.slane %v9792_v7, 2  ;;  %v9806_v50 = vor.u32 %v9805_v43, %v9802_v3  ;;  %v9809_v14 = vshll.u32 %v9699_v57, 16  ;;  %v16791_v60 = vld.sshfl [vmem:[#allocation3] sm:$0xf pattern:$0x76325410]  ;;  %vm10151_vm13 = vmor %vm282_vm11, %vm5399_vm10 }
 0x6b0   :  { %v14901_v47 = vld.sshfl [vmem:[#allocation3 + $0x18] sm:$0x13 pattern:$0x76325410]  ;;  %v9797_v38 = vrot.slane %v9795_v10, 7  ;;  %v10101_v51 = vcombine.high %v14926_v19, %v14926_v19  ;;  %v16477_v29 = vld [vmem:[%s21033_s7 + $0x8] sm:$0xff]   ;;  %vm19976_vm15 = vmor %vm10151_vm13, %vm5403_vm12 }
 0x6b1   :  { %v9683_v11 = vcombine.high %v14901_v47, %v14901_v47  ;;  %v9772_v34 = vshrl.u32 %v14901_v47, 16  ;;  %v9775_v27 = vshll.u32 %v14901_v47, 16  ;;  %v9852_v30 = vcombine.low %v9844_v18, %v9851_v12  ;;  %v14927_v40 = vld.sshfl [vmem:[#allocation3 + $0x8] sm:$0x12 pattern:$0x76325410]  ;;  %vm19993_vm12 = vmor %vm19976_vm15, %vm5407_vm14 }
 0x6b2   :  { %v14904_v16 = vld.sshfl [vmem:[#allocation3 + $0x24] sm:$0x13 pattern:$0x76325410]  ;;  %v19953_v39 = vsel %vm19917_vm8, %v9793_v55, %v9797_v38  ;;  %v9807_v33 = vrot.slane %v9806_v50, 2  ;;  %v9811_v15 = vrot.slane %v9809_v14, 7  ;;  %v10109_v59 = vcombine.high %v14927_v40, %v14927_v40  ;;  %vm20100_vm14 = vmand %vm282_vm11, %vm70_vm6 }
 0x6b3   :  { %v9707_v13 = vcombine.high %v14904_v16, %v14904_v16  ;;  %v9774_v54 = vrot.slane %v9772_v34, 6  ;;  %v9777_v32 = vrot.slane %v9775_v27, 7  ;;  %v9781_v48 = vshll.u32 %v9683_v11, 16  ;;  %16072 = vmatprep.mubr.msk.bf16.mxu0 %vm9287_vm3, %v9852_v30  ;;  %v16789_v30 = vld [vmem:[%s21033_s7] sm:$0xff]  }
 0x6b4   :  { %v9814_v22 = vshrl.u32 %v14904_v16, 16  ;;  %v9817_v28 = vshll.u32 %v14904_v16, 16  ;;  %v19960_v44 = vsel %vm19917_vm8, %v9807_v33, %v9811_v15  ;;  %v14972_v1 = vld.sshfl [vmem:[#allocation3 + $0x10] sm:$0x13 pattern:$0x76325410]  ;;  %v9973_v12 = vcombine.low %v16791_v60, %v16790_v17 }
 0x6b5   :  { %v9778_v5 = vor.u32 %v9777_v32, %v9774_v54  ;;  %v9783_v62 = vrot.slane %v9781_v48, 7  ;;  %v9823_v31 = vshll.u32 %v9707_v13, 16  ;;  %v14976_v18 = vld.sshfl [vmem:[#allocation3 + $0x28] sm:$0x13 pattern:$0x76325410]  ;;  %v10503_v43 = vcombine.high %v14972_v1, %v14972_v1 }
 0x6b6   :  { %v9816_v4 = vrot.slane %v9814_v22, 6  ;;  %v9819_v36 = vrot.slane %v9817_v28, 7  ;;  %v14933_v7 = vrot.slane %v14925_v35, 9  ;;  %v10158_v3 = vrot.slane %v10093_v2, 7  ;;  %v16478_v32 = vld [vmem:[%s21033_s7 + $0x10] sm:$0xff]  }
 0x6b7   :  { %v9779_v42 = vrot.slane %v9778_v5, 2  ;;  %v9825_v63 = vrot.slane %v9823_v31, 7  ;;  %v10170_v16 = vrot.slane %v10117_v0, 7  ;;  %v10579_v11 = vshrl.u32 %v14972_v1, 16  ;;  %v217_v33 = vld [vmem:[#allocation3 + $0x14] sm:$0x1] }
 0x6b8   :  { %v9820_v6 = vor.u32 %v9819_v36, %v9816_v4  ;;  %v10582_v34 = vshll.u32 %v14972_v1, 16  ;;  %v10657_v27 = vcombine.low %v19931_v9, %v19940_v25  ;;  %v10162_v57 = vrot.slane %v10101_v51, 7  ;;  %v235_v35 = vld [vmem:[#allocation3 + $0x2c] sm:$0x1]  ;;  %v16482_v51 = vld [vmem:[%s21033_s7 + $0x40] sm:$0xff]   ;;  %v16491_v9 = vld [vmem:[%s21033_s7 + $0x78] sm:$0xff]  }
 0x6b9   :  { %v9784_v58 = vsel %vm19917_vm8, %v9779_v42, %v9783_v62  ;;  %v10166_v13 = vrot.slane %v10109_v59, 7  ;;  %v14936_v10 = vrot.slane %v14928_v8, 9  ;;  %v10535_v54 = vcombine.high %v14976_v18, %v14976_v18  ;;  %v14932_v8 = vld.sshfl [vmem:[#allocation3 + $0x24] sm:$0x12 pattern:$0x76325410] }
 0x6ba   :  { %v9821_v37 = vrot.slane %v9820_v6, 2  ;;  %v9853_v46 = vcombine.low %v9784_v58, %v19953_v39  ;;  %v10581_v25 = vrot.slane %v10579_v11, 6  ;;  %v10584_v48 = vrot.slane %v10582_v34, 7  ;;  %v16479_v6 = vld [vmem:[%s21033_s7 + $0x18] sm:$0xff]  }
 0x6bb   :  { %v10588_v22 = vshll.u32 %v10503_v43, 16  ;;  %v10635_v55 = vshrl.u32 %v14976_v18, 16  ;;  %v14934_v50 = vrot.slane %v14926_v19, 9  ;;  %v14935_v28 = vrot.slane %v14927_v40, 9  ;;  %v256_v40 = vld [vmem:[#allocation3 + $0x14] sm:$0x4] }
 0x6bc   :  { %v19964_v45 = vsel %vm19917_vm8, %v9821_v37, %v9825_v63  ;;  %v9861_v20 = vrot.slane %v9853_v46, %v17092_v61  ;;  %v10638_v5 = vshll.u32 %v14976_v18, 16  ;;  %v19999_v62 = vsel %vm19993_vm12, %v14936_v10, %v10170_v16  ;;  %v16792_v58 = vld.sshfl [vmem:[#allocation3 + $0x20] sm:$0xf pattern:$0x76325410] }
 0x6bd   :  { %v9854_v49 = vcombine.low %v19960_v44, %v19964_v45  ;;  %v10585_v4 = vor.u32 %v10584_v48, %v10581_v25  ;;  %v10637_v38 = vrot.slane %v10635_v55, 6  ;;  %v10674_v14 = vcombine.low %v19953_v39, %v19960_v44  ;;  %v16793_v19 = vld.sshfl [vmem:[#allocation3 + $0x18] sm:$0xf pattern:$0x76325410] }
 0x6be   :  { %v10159_v36 = vsel %vm19993_vm12, %v14933_v7, %v10158_v3  ;;  %v10640_v31 = vrot.slane %v10638_v5, 7  ;;  %v10644_v42 = vshll.u32 %v10535_v54, 16  ;;  %v20010_v15 = vsel %vm19993_vm12, %v14934_v50, %v10162_v57  ;;  %v14931_v44 = vld.sshfl [vmem:[#allocation3 + $0x20] sm:$0x12 pattern:$0x76325410] }
 0x6bf   :  { %v9868_v21 = vrot.slane %v9854_v49, %v17092_v61  ;;  %v20014_v39 = vsel %vm19993_vm12, %v14935_v28, %v10166_v13  ;;  %v10586_v37 = vrot.slane %v10585_v4, 2  ;;  %v10590_v63 = vrot.slane %v10588_v22, 7  ;;  %v14930_v59 = vld.sshfl [vmem:[#allocation3 + $0x1c] sm:$0x12 pattern:$0x76325410] }
 0x6c0   :  { %v10198_v17 = vcombine.low %v20014_v39, %v19999_v62  ;;  %v10641_v46 = vor.u32 %v10640_v31, %v10637_v38  ;;  %v218_v49 = vsel %vm19409_vm1, 0, %v217_v33  ;;  %v10197_v2 = vcombine.low %v10159_v36, %v20010_v15  ;;  %v274_v13 = vld [vmem:[#allocation3 + $0x2c] sm:$0x4]  ;;  %v16484_v22 = vld [vmem:[%s21033_s7 + $0x50] sm:$0xff]  }
 0x6c1   :  { %v9869_v23 = vcombine.low %v9861_v20, %v9868_v21  ;;  %v20020_v60 = vsel %vm19917_vm8, %v10586_v37, %v10590_v63  ;;  %v14929_v20 = vld.sshfl [vmem:[#allocation3 + $0x18] sm:$0x12 pattern:$0x76325410]  ;;  %v10646_v1 = vrot.slane %v10644_v42, 7  ;;  %v257_v24 = vsel %vm19421_vm9, 0, %v256_v40 }
 0x6c2   :  { %v10658_v21 = vcombine.low %v19944_v56, %v20020_v60  ;;  %v10642_v0 = vrot.slane %v10641_v46, 2  ;;  %219 = vst [vmem:[#allocation3 + $0x14] sm:$0x1] %v218_v49  ;;  %v20033_v18 = vrot.slane %v10198_v17, %v17092_v61  ;;  %v10125_v7 = vcombine.high %v14929_v20, %v14929_v20  ;;  %258 = vst [vmem:[#allocation3 + $0x14] sm:$0x4] %v257_v24  ;;  %v16486_v40 = vld [vmem:[%s21033_s7 + $0x60] sm:$0xff]  }
 0x6c3   :  { %16073 = vmatmul.mubr.msk.bf16.vlgmr.msra.gmra.mrb[8].mxu0 %vm9287_vm3, %v9869_v23  ;;  %v10149_v23 = vcombine.high %v14932_v8, %v14932_v8  ;;  %v10205_v43 = vrot.slane %v10197_v2, %v17092_v61  ;;  %v10133_v16 = vcombine.high %v14930_v59, %v14930_v59  ;;  %v10141_v11 = vcombine.high %v14931_v44, %v14931_v44  ;;  %v14994_v4 = vld.sshfl [vmem:[#allocation3 + $0x10] sm:$0x12 pattern:$0x76325410] }
 0x6c4   :  { %16077 = vmatpush3.bf16.msra.mxu0 %v16789_v30  ;;  %16084 = vmatprep.mubr.msk.bf16.mxu0 %vm9287_vm3, %v9973_v12  ;;  %v20036_v12 = vrot.slane %v10657_v27, %v17092_v61  ;;  %v20039_v56 = vrot.slane %v10658_v21, %v17092_v61  ;;  %v20043_v47 = vsel %vm19917_vm8, %v10642_v0, %v10646_v1  ;;  %v16483_v30 = vld [vmem:[%s21033_s7 + $0x48] sm:$0xff]   ;;  %v10174_v25 = vrot.slane %v10125_v7, 7 }
 0x6c5   :  { %16078 = vmatprep.subr.bf16.mxu0 %v16477_v29  ;;  %v10675_v3 = vcombine.low %v19964_v45, %v20043_v47  ;;  %v9990_v27 = vcombine.low %v16793_v19, %v16792_v58  ;;  %v20056_v45 = vrot.slane %v10674_v14, %v17092_v61  ;;  %v10213_v10 = vcombine.low %v10205_v43, %v20033_v18  ;;  %v16485_v58 = vld [vmem:[%s21033_s7 + $0x58] sm:$0xff]   ;;  %v16794_v17 = vld.sshfl [vmem:[#allocation3 + $0xc] sm:$0xf pattern:$0x76325410] }
 0x6c6   :  { %v10673_v34 = vcombine.low %v20036_v12, %v20039_v56  ;;  %v10186_v54 = vrot.slane %v10149_v23, 7  ;;  %v10178_v55 = vrot.slane %v10133_v16, 7  ;;  %v10182_v50 = vrot.slane %v10141_v11, 7  ;;  %v16498_v12 = vld [vmem:[%s21033_s7 + $0xa0] sm:$0xff]  }
 0x6c7   :  { %v20059_v57 = vrot.slane %v10675_v3, %v17092_v61  ;;  %v14940_v28 = vrot.slane %v14932_v8, 9  ;;  %v275_v5 = vsel %vm19421_vm9, 0, %v274_v13  ;;  %v14938_v38 = vrot.slane %v14930_v59, 9  ;;  %v299_v59 = vld [vmem:[#allocation4 + $0xa] sm:$0x1]  ;;  %v16489_v3 = vld [vmem:[%s21033_s7 + $0x68] sm:$0xff]  }
 0x6c8   :  { %16079 = vmatpush3.bf16.msra.mxu0 %v16477_v29  ;;  %v236_v29 = vsel %vm19409_vm1, 0, %v235_v35  ;;  %276 = vst [vmem:[#allocation3 + $0x2c] sm:$0x4] %v275_v5  ;;  %v14939_v14 = vrot.slane %v14931_v44, 9  ;;  %v10821_v33 = vcombine.high %v14994_v4, %v14994_v4  ;;  %v15002_v2 = vrot.slane %v14994_v4, 9 }
 0x6c9   :  { %16080 = vmatprep.subr.bf16.mxu0 %v16478_v32  ;;  %237 = vst [vmem:[#allocation3 + $0x2c] sm:$0x1] %v236_v29  ;;  %v10690_v48 = vcombine.low %v20056_v45, %v20059_v57  ;;  %v20073_v36 = vsel %vm19993_vm12, %v14940_v28, %v10186_v54  ;;  %v20079_v42 = vsel %vm19993_vm12, %v14938_v38, %v10178_v55  ;;  %v15060_v63 = vld.sshfl [vmem:[#allocation3 + $0x14] sm:$0x12 pattern:$0x76325410] }
 0x6ca   :  { %v20083_v52 = vsel %vm19993_vm12, %v14939_v14, %v10182_v50  ;;  %v16795_v35 = vld.sshfl [vmem:[#allocation3 + $0x4] sm:$0xf pattern:$0x76325410]  ;;  %v10868_v19 = vrot.slane %v10821_v33, 7  ;;  %v11520_v44 = vcombine.high %v15060_v63, %v15060_v63  ;;  %v15068_v1 = vrot.slane %v15060_v63, 9 }
 0x6cb   :  { %v10215_v37 = vcombine.low %v20083_v52, %v20073_v36  ;;  %v10355_v16 = vcombine.low %v16795_v35, %v16794_v17  ;;  %vm308_vm1 = vcmask 1041409   ;;  %vm309_vm9 = vsmask.f32 7942  ;;  %v16496_v63 = vld [vmem:[%s21033_s7 + $0x90] sm:$0xff]   ;;  %v16497_v17 = vld [vmem:[%s21033_s7 + $0x98] sm:$0xff]   ;;  %v16499_v35 = vld [vmem:[%s21033_s7 + $0xa8] sm:$0xff]  }
 0x6cc   :  { %16081 = vmatpush3.bf16.msra.mxu0 %v16478_v32  ;;  %v14937_v32 = vrot.slane %v14929_v20, 9  ;;  %v10869_v23 = vsel %vm19993_vm12, %v15002_v2, %v10868_v19  ;;  %v11567_v29 = vrot.slane %v11520_v44, 7  ;;  %vm20129_vm5 = vmand %vm308_vm1, %vm309_vm9  ;;  %v16796_v14 = vld.sshfl [vmem:[#allocation3 + $0x24] sm:$0xf pattern:$0x76325410] }
 0x6cd   :  { %16082 = vmatprep.subr.bf16.mxu0 %v16479_v6  ;;  %v20092_v49 = vrot.slane %v10215_v37, %v17092_v61  ;;  %v16797_v33 = vld.sshfl [vmem:[#allocation3 + $0x1c] sm:$0xf pattern:$0x76325410]  ;;  %v16495_v37 = vld [vmem:[%s21033_s7 + $0x88] sm:$0xff]   ;;  %v16500_v19 = vld [vmem:[%s21033_s7 + $0xb0] sm:$0xff]  }
 0x6ce   :  { %v10175_v31 = vsel %vm19993_vm12, %v14937_v32, %v10174_v25  ;;  %v11568_v11 = vsel %vm19993_vm12, %v15068_v1, %v11567_v29  ;;  %v326_v32 = vld [vmem:[#allocation4 + $0xa] sm:$0x2]  ;;  %v16490_v25 = vld [vmem:[%s21033_s7 + $0x70] sm:$0xff]   ;;  %vm12206_vm7 = vsmask.f32 1284 }
 0x6cf   :  { %v10214_v8 = vcombine.low %v10175_v31, %v20079_v42  ;;  %v15064_v20 = vld.sshfl [vmem:[#allocation3 + $0x2c] sm:$0x12 pattern:$0x76325410]  ;;  %v327_v5 = vsel %vm20129_vm5, 0, %v326_v32  ;;  %v16501_v57 = vld [vmem:[%s21033_s7 + $0xb8] sm:$0xff]   ;;  %vm12207_vm11 = vmor %vm70_vm6, %vm12206_vm7 }
 0x6d0   :  { %16083 = vmatpush3.bf16.msra.mxu0 %v16479_v6  ;;  %v14998_v6 = vld.sshfl [vmem:[#allocation3 + $0x28] sm:$0x12 pattern:$0x76325410]  ;;  %v11552_v43 = vcombine.high %v15064_v20, %v15064_v20  ;;  %328 = vst [vmem:[#allocation4 + $0xa] sm:$0x2] %v327_v5 }
 0x6d1   :  { %16088 = vmatprep.subr.bf16.mxu0 %v16482_v51  ;;  %v10853_v46 = vcombine.high %v14998_v6, %v14998_v6  ;;  %v10222_v21 = vrot.slane %v10214_v8, %v17092_v61  ;;  %v15006_v24 = vrot.slane %v14998_v6, 9  ;;  %v16494_v6 = vld [vmem:[%s21033_s7 + $0x80] sm:$0xff]   ;;  %v10896_v8 = vcombine.low %v19999_v62, %v10869_v23  ;;  %v15035_v44 = vld.sshfl [vmem:[#allocation3 + $0x8] sm:$0x13 pattern:$0x76325410] }
 0x6d2   :  { %v11583_v54 = vrot.slane %v11552_v43, 7  ;;  %v11239_v45 = vshll.u32 %v15035_v44, 16  ;;  %v16798_v1 = vld.sshfl [vmem:[#allocation3 + $0x8] sm:$0xf pattern:$0x76325410] }
 0x6d3   :  { %16085 = vmatmul.mubr.msk.bf16.vlgmr.msra.gmra.mrb[8].mxu0 %vm9287_vm3, %v9990_v27  ;;  %v10884_v0 = vrot.slane %v10853_v46, 7  ;;  %v10230_v7 = vcombine.low %v10222_v21, %v20092_v49  ;;  %v15072_v27 = vrot.slane %v15064_v20, 9  ;;  %v10895_v46 = vcombine.low %v20010_v15, %v20014_v39  ;;  %v15036_v15 = vld.sshfl [vmem:[#allocation3 + $0xc] sm:$0x13 pattern:$0x76325410] }
 0x6d4   :  { %16089 = vmatpush3.bf16.msra.mxu0 %v16482_v51  ;;  %16096 = vmatprep.mubr.msk.bf16.mxu0 %vm9287_vm3, %v10213_v10  ;;  %v11595_v10 = vcombine.low %v10869_v23, %v11568_v11  ;;  %v10910_v56 = vrot.slane %v10896_v8, %v17092_v61  ;;  %v15038_v39 = vld.sshfl [vmem:[#allocation3 + $0x14] sm:$0x13 pattern:$0x76325410]  ;;  %v11253_v2 = vshll.u32 %v15036_v15, 16 }
 0x6d5   :  { %16090 = vmatprep.subr.bf16.mxu0 %v16483_v30  ;;  %v20117_v13 = vsel %vm19993_vm12, %v15006_v24, %v10884_v0  ;;  %v11584_v55 = vsel %vm19993_vm12, %v15072_v27, %v11583_v54  ;;  %v11278_v20 = vshrl.u32 %v15038_v39, 16  ;;  %v11281_v21 = vshll.u32 %v15038_v39, 16  ;;  %v15039_v8 = vld.sshfl [vmem:[#allocation3 + $0x20] sm:$0x13 pattern:$0x76325410] }
 0x6d6   :  { %v11612_v28 = vcombine.low %v20117_v13, %v11584_v55  ;;  %v11236_v0 = vshrl.u32 %v15035_v44, 16  ;;  %v11255_v29 = vrot.slane %v11253_v2, 7  ;;  %v11241_v27 = vrot.slane %v11239_v45, 7  ;;  %v16507_v2 = vld [vmem:[%s21033_s7 + $0xd8] sm:$0xff]  }
 0x6d7   :  { %v11280_v24 = vrot.slane %v11278_v20, 6  ;;  %v11283_v43 = vrot.slane %v11281_v21, 7  ;;  %v16800_v20 = vld.sshfl [vmem:[#allocation3 + $0x20] sm:$0xf pattern:$0x76325410] }
 0x6d8   :  { %16091 = vmatpush3.bf16.msra.mxu0 %v16483_v30  ;;  %v300_v30 = vsel %vm20100_vm14, 0, %v299_v59  ;;  %v20139_v38 = vrot.slane %v11612_v28, %v17092_v61  ;;  %v16799_v59 = vld.sshfl [vmem:[#allocation3 + $0x10] sm:$0xf pattern:$0x76325410]  ;;  %v11238_v11 = vrot.slane %v11236_v0, 6 }
 0x6d9   :  { %16092 = vmatprep.subr.bf16.mxu0 %v16484_v22  ;;  %301 = vst [vmem:[#allocation4 + $0xa] sm:$0x1] %v300_v30  ;;  %v11284_v32 = vor.u32 %v11283_v43, %v11280_v24  ;;  %v16505_v28 = vld [vmem:[%s21033_s7 + $0xc8] sm:$0xff]   ;;  %v16510_v24 = vld [vmem:[%s21033_s7 + $0xe0] sm:$0xff]   ;;  %vm12208_vm0 = vsmask.f32 2312 }
 0x6da   :  { %v11627_v31 = vcombine.low %v20092_v49, %v20139_v38  ;;  %v16801_v21 = vld.sshfl [vmem:[#allocation3 + $0x28] sm:$0xf pattern:$0x76325410]  ;;  %v290_v38 = vld [vmem:[#allocation4 + $0x4] sm:$0x1]  ;;  %vm12209_vm6 = vmor %vm12207_vm11, %vm12208_vm0 }
 0x6db   :  { %vm12210_vm2 = vsmask.f32 3340  ;;  %vm12132_vm4 = vsmask.f32 1282  ;;  %vm12214_vm13 = vsmask.f32 5396 }
 0x6dc   :  { %16093 = vmatpush3.bf16.msra.mxu0 %v16484_v22  ;;  %v20124_v22 = vrot.slane %v11595_v10, %v17092_v61  ;;  %vm12216_vm15 = vsmask.f32 6424  ;;  %vm20391_vm12 = vmor %vm12209_vm6, %vm12210_vm2 }
 0x6dd   :  { %16094 = vmatprep.subr.bf16.mxu0 %v16485_v58 }
 0x6de   :  { %v11610_v4 = vcombine.low %v20033_v18, %v20124_v22  ;;  %v287_v18 = vld [vmem:[#allocation4 + $0x2] sm:$0x1]  ;;  %v314_v22 = vld [vmem:[#allocation4 + $0x2] sm:$0x2] }
 0x6e0   :  { %16095 = vmatpush3.bf16.msra.mxu0 %v16485_v58  ;;  %v10372_v58 = vcombine.low %v16797_v33, %v16796_v14  ;;  %v15040_v33 = vld.sshfl [vmem:[#allocation3 + $0x24] sm:$0x13 pattern:$0x76325410] }
 0x6e1   :  { %16100 = vmatprep.subr.bf16.mxu0 %v16486_v40 }
 0x6e3   :  { %16097 = vmatmul.mubr.msk.bf16.vlgmr.msra.gmra.mrb[8].mxu0 %vm9287_vm3, %v10230_v7  ;;  %v10912_v7 = vcombine.low %v20079_v42, %v20083_v52  ;;  %v11242_v52 = vor.u32 %v11241_v27, %v11238_v11 }
 0x6e4   :  { %16101 = vmatpush3.bf16.msra.mxu0 %v16486_v40  ;;  %16108 = vmatprep.mubr.msk.bf16.mxu0 %vm9287_vm3, %v10355_v16  ;;  %v11250_v40 = vshrl.u32 %v15036_v15, 16  ;;  %v11186_v16 = vcombine.high %v15036_v15, %v15036_v15 }
 0x6e5   :  { %16102 = vmatprep.subr.bf16.mxu0 %v16489_v3  ;;  %v10920_v54 = vrot.slane %v10912_v7, %v17092_v61 }
 0x6e6   :  { %v11252_v23 = vrot.slane %v11250_v40, 6  ;;  %v11295_v40 = vshll.u32 %v15039_v8, 16 }
 0x6e8   :  { %16103 = vmatpush3.bf16.msra.mxu0 %v16489_v3  ;;  %v11202_v3 = vcombine.high %v15038_v39, %v15038_v39  ;;  %v11256_v10 = vor.u32 %v11255_v29, %v11252_v23  ;;  %v11218_v29 = vcombine.high %v15040_v33, %v15040_v33 }
 0x6e9   :  { %16104 = vmatprep.subr.bf16.mxu0 %v16490_v25 }
 0x6ea   :  { %v11287_v42 = vshll.u32 %v11202_v3, 16  ;;  %v11257_v14 = vrot.slane %v11256_v10, 2  ;;  %v11297_v3 = vrot.slane %v11295_v40, 7  ;;  %v11071_v10 = vcombine.low %v16800_v20, %v16801_v21  ;;  %v16518_v40 = vld [vmem:[%s21036_s10 + $0x80] ss:$8 sps:$4 sm:$0xff]  }
 0x6eb   :  { %v16523_v20 = vld [vmem:[%s21036_s10 + $0x94] ss:$8 sps:$4 sm:$0xff]   ;;  %v16521_v21 = vld [vmem:[%s21036_s10 + $0x90] ss:$8 sps:$4 sm:$0xff]  }
 0x6ec   :  { %16105 = vmatpush3.bf16.msra.mxu0 %v16490_v25  ;;  %v11259_v25 = vshll.u32 %v11186_v16, 16  ;;  %v11210_v16 = vcombine.high %v15039_v8, %v15039_v8 }
 0x6ed   :  { %16106 = vmatprep.subr.bf16.mxu0 %v16491_v9 }
 0x6f0   :  { %16107 = vmatpush3.bf16.msra.mxu0 %v16491_v9  ;;  %v11054_v9 = vcombine.low %v16798_v1, %v16799_v59 }
 0x6f1   :  { %16112 = vmatprep.subr.bf16.mxu0 %v16494_v6 }
 0x6f3   :  { %16109 = vmatmul.mubr.msk.bf16.vlgmr.msra.gmra.mrb[8].mxu0 %vm9287_vm3, %v10372_v58  ;;  %v11289_v58 = vrot.slane %v11287_v42, 7 }
 0x6f4   :  { %16113 = vmatpush3.bf16.msra.mxu0 %v16494_v6  ;;  %16120 = vmatprep.mubr.msk.bf16.mxu0 %vm9287_vm3, %v10673_v34  ;;  %v10903_v34 = vrot.slane %v10895_v46, %v17092_v61  ;;  %v11285_v6 = vrot.slane %v11284_v32, 2  ;;  %v16506_v46 = vld [vmem:[%s21033_s7 + $0xd0] sm:$0xff]   ;;  %v11301_v32 = vshll.u32 %v11210_v16, 16  ;;  %v16532_v16 = vld [vmem:[%s21036_s10 + $0xc4] ss:$8 sps:$4 sm:$0xff]  }
 0x6f5   :  { %16114 = vmatprep.subr.bf16.mxu0 %v16495_v37 }
 0x6f6   :  { %v10911_v62 = vcombine.low %v10903_v34, %v10910_v56  ;;  %v11306_v56 = vshrl.u32 %v15040_v33, 16  ;;  %v11290_v39 = vsel %vm19917_vm8, %v11285_v6, %v11289_v58 }
 0x6f8   :  { %16115 = vmatpush3.bf16.msra.mxu0 %v16495_v37  ;;  %v15042_v37 = vld.sshfl [vmem:[#allocation3 + $0x2c] sm:$0x13 pattern:$0x76325410] }
 0x6f9   :  { %16116 = vmatprep.subr.bf16.mxu0 %v16496_v63  ;;  %v11337_v15 = vshll.u32 %v15042_v37, 16  ;;  %v11234_v45 = vcombine.high %v15042_v37, %v15042_v37 }
 0x6fb   :  { %v11339_v23 = vrot.slane %v11337_v15, 7  ;;  %v329_v15 = vld [vmem:[#allocation4 + $0xc] sm:$0x2] }
 0x6fc   :  { %16117 = vmatpush3.bf16.msra.mxu0 %v16496_v63  ;;  %v11243_v63 = vrot.slane %v11242_v52, 2  ;;  %v330_v49 = vsel %vm20129_vm5, 0, %v329_v15 }
 0x6fd   :  { %16118 = vmatprep.subr.bf16.mxu0 %v16497_v17  ;;  %331 = vst [vmem:[#allocation4 + $0xc] sm:$0x2] %v330_v49 }
 0x700   :  { %16119 = vmatpush3.bf16.msra.mxu0 %v16497_v17  ;;  %v11261_v17 = vrot.slane %v11259_v25, 7 }
 0x701   :  { %16124 = vmatprep.subr.bf16.mxu0 %v16498_v12 }
 0x702   :  { %v11262_v34 = vsel %vm19917_vm8, %v11257_v14, %v11261_v17  ;;  %v11303_v14 = vrot.slane %v11301_v32, 7  ;;  %v305_v32 = vld [vmem:[#allocation4 + $0xe] sm:$0x1] }
 0x703   :  { %16121 = vmatmul.mubr.msk.bf16.vlgmr.msra.gmra.mrb[8].mxu0 %vm9287_vm3, %v10690_v48  ;;  %v10913_v48 = vcombine.low %v20073_v36, %v20117_v13  ;;  %v16502_v36 = vld [vmem:[%s21033_s7 + $0xc0] sm:$0xff]   ;;  %v11178_v13 = vcombine.high %v15035_v44, %v15035_v44  ;;  %v11292_v44 = vshrl.u32 %v15039_v8, 16 }
 0x704   :  { %16125 = vmatpush3.bf16.msra.mxu0 %v16498_v12  ;;  %16132 = vmatprep.mubr.msk.bf16.mxu0 %vm9287_vm3, %v10911_v62  ;;  %v11334_v62 = vshrl.u32 %v15042_v37, 16  ;;  %v16513_v37 = vld [vmem:[%s21033_s7 + $0xf8] sm:$0xff]  }
 0x705   :  { %16126 = vmatprep.subr.bf16.mxu0 %v16499_v35  ;;  %v10927_v30 = vrot.slane %v10913_v48, %v17092_v61  ;;  %v11245_v5 = vshll.u32 %v11178_v13, 16  ;;  %v11357_v48 = vcombine.low %v20020_v60, %v11290_v39  ;;  %v11294_v7 = vrot.slane %v11292_v44, 6 }
 0x706   :  { %v11336_v59 = vrot.slane %v11334_v62, 6  ;;  %v11343_v60 = vshll.u32 %v11234_v45, 16  ;;  %v11315_v13 = vshll.u32 %v11218_v29, 16  ;;  %v302_v62 = vld [vmem:[#allocation4 + $0xc] sm:$0x1] }
 0x707   :  { %v10928_v55 = vcombine.low %v10920_v54, %v10927_v30  ;;  %v11247_v12 = vrot.slane %v11245_v5, 7  ;;  %v11371_v11 = vrot.slane %v11357_v48, %v17092_v61  ;;  %v16511_v54 = vld [vmem:[%s21033_s7 + $0xe8] sm:$0xff]   ;;  %v303_v39 = vsel %vm20100_vm14, 0, %v302_v62  ;;  %v296_v48 = vld [vmem:[#allocation4 + $0x8] sm:$0x1] }
 0x708   :  { %16127 = vmatpush3.bf16.msra.mxu0 %v16499_v35  ;;  %v11309_v35 = vshll.u32 %v15040_v33, 16  ;;  %v11340_v30 = vor.u32 %v11339_v23, %v11336_v59  ;;  %v11317_v5 = vrot.slane %v11315_v13, 7  ;;  %304 = vst [vmem:[#allocation4 + $0xc] sm:$0x1] %v303_v39  ;;  %v16524_v45 = vld [vmem:[%s21036_s10 + $0xa0] ss:$8 sps:$4 sm:$0xff]  }
 0x709   :  { %16128 = vmatprep.subr.bf16.mxu0 %v16500_v19  ;;  %v297_v23 = vsel %vm20100_vm14, 0, %v296_v48  ;;  %v16541_v13 = vld [vmem:[%s21036_s10 + $0xf4] ss:$8 sps:$4 sm:$0xff]  }
 0x70a   :  { %v11311_v1 = vrot.slane %v11309_v35, 7  ;;  %v11341_v25 = vrot.slane %v11340_v30, 2  ;;  %v315_v35 = vsel %vm20129_vm5, 0, %v314_v22  ;;  %298 = vst [vmem:[#allocation4 + $0x8] sm:$0x1] %v297_v23 }
 0x70b   :  { %316 = vst [vmem:[#allocation4 + $0x2] sm:$0x2] %v315_v35  ;;  %v16533_v30 = vld [vmem:[%s21036_s10 + $0xd0] ss:$8 sps:$4 sm:$0xff]  }
 0x70c   :  { %16129 = vmatpush3.bf16.msra.mxu0 %v16500_v19  ;;  %v11248_v19 = vsel %vm19917_vm8, %v11243_v63, %v11247_v12  ;;  %v16514_v12 = vld [vmem:[%s21033_s7 + $0x100] sm:$0xff]  }
 0x70d   :  { %16130 = vmatprep.subr.bf16.mxu0 %v16501_v57  ;;  %v11356_v0 = vcombine.low %v11248_v19, %v11262_v34  ;;  %v16517_v34 = vld [vmem:[%s21033_s7 + $0x118] sm:$0xff]   ;;  %v291_v19 = vsel %vm20100_vm14, 0, %v290_v38 }
 0x70e   :  { %292 = vst [vmem:[#allocation4 + $0x4] sm:$0x1] %v291_v19 }
 0x70f   :  { %v11364_v43 = vrot.slane %v11356_v0, %v17092_v61  ;;  %v16526_v0 = vld [vmem:[%s21036_s10 + $0xa4] ss:$8 sps:$4 sm:$0xff]  }
 0x710   :  { %16131 = vmatpush3.bf16.msra.mxu0 %v16501_v57  ;;  %v11308_v57 = vrot.slane %v11306_v56, 6  ;;  %v16515_v56 = vld [vmem:[%s21033_s7 + $0x108] sm:$0xff]  }
 0x711   :  { %16136 = vmatprep.subr.bf16.mxu0 %v16502_v36  ;;  %v11372_v42 = vcombine.low %v11364_v43, %v11371_v11  ;;  %v16527_v43 = vld [vmem:[%s21036_s10 + $0xb0] ss:$8 sps:$4 sm:$0xff]   ;;  %v16530_v11 = vld [vmem:[%s21036_s10 + $0xc0] ss:$8 sps:$4 sm:$0xff]  }
 0x712   :  { %v11312_v27 = vor.u32 %v11311_v1, %v11308_v57  ;;  %v284_v57 = vld [vmem:[#allocation4] sm:$0x1]  ;;  %v311_v1 = vld [vmem:[#allocation4] sm:$0x2] }
 0x713   :  { %16133 = vmatmul.mubr.msk.bf16.vlgmr.msra.gmra.mrb[8].mxu0 %vm9287_vm3, %v10928_v55  ;;  %v11345_v55 = vrot.slane %v11343_v60, 7  ;;  %v285_v59 = vsel %vm20100_vm14, 0, %v284_v57  ;;  %v312_v29 = vsel %vm20129_vm5, 0, %v311_v1  ;;  %v16538_v60 = vld [vmem:[%s21036_s10 + $0xe4] ss:$8 sps:$4 sm:$0xff]  }
 0x714   :  { %16137 = vmatpush3.bf16.msra.mxu0 %v16502_v36  ;;  %16144 = vmatprep.mubr.msk.bf16.mxu0 %vm9287_vm3, %v11054_v9  ;;  %v11298_v36 = vor.u32 %v11297_v3, %v11294_v7  ;;  %v11313_v52 = vrot.slane %v11312_v27, 2  ;;  %v16512_v9 = vld [vmem:[%s21033_s7 + $0xf0] sm:$0xff]   ;;  %v323_v7 = vld [vmem:[#allocation4 + $0x8] sm:$0x2]  ;;  %286 = vst [vmem:[#allocation4] sm:$0x1] %v285_v59 }
 0x715   :  { %16138 = vmatprep.subr.bf16.mxu0 %v16505_v28  ;;  %v11346_v6 = vsel %vm19917_vm8, %v11341_v25, %v11345_v55  ;;  %v16529_v3 = vld [vmem:[%s21036_s10 + $0xb4] ss:$8 sps:$4 sm:$0xff]   ;;  %313 = vst [vmem:[#allocation4] sm:$0x2] %v312_v29  ;;  %v306_v25 = vsel %vm20100_vm14, 0, %v305_v32 }
 0x716   :  { %v11318_v33 = vsel %vm19917_vm8, %v11313_v52, %v11317_v5  ;;  %v11374_v17 = vcombine.low %v20043_v47, %v11346_v6  ;;  %v16516_v47 = vld [vmem:[%s21033_s7 + $0x110] sm:$0xff]   ;;  %307 = vst [vmem:[#allocation4 + $0xe] sm:$0x1] %v306_v25  ;;  %v15088_v6 = vld [vmem:[%s21035_s9] ss:$0 sm:$0xff] }
 0x717   :  { %v16535_v27 = vld [vmem:[%s21036_s10 + $0xd4] ss:$8 sps:$4 sm:$0xff]  }
 0x718   :  { %16139 = vmatpush3.bf16.msra.mxu0 %v16505_v28  ;;  %v11299_v28 = vrot.slane %v11298_v36, 2  ;;  %v16536_v36 = vld [vmem:[%s21036_s10 + $0xe0] ss:$8 sps:$4 sm:$0xff]   ;;  %v293_v52 = vld [vmem:[#allocation4 + $0x6] sm:$0x1] }
 0x719   :  { %16140 = vmatprep.subr.bf16.mxu0 %v16506_v46  ;;  %v320_v55 = vld [vmem:[#allocation4 + $0x6] sm:$0x2]  ;;  %v294_v5 = vsel %vm20100_vm14, 0, %v293_v52 }
 0x71a   :  { %v11304_v58 = vsel %vm19917_vm8, %v11299_v28, %v11303_v14  ;;  %295 = vst [vmem:[#allocation4 + $0x6] sm:$0x1] %v294_v5  ;;  %v15087_v14 = vld [vmem:[%s21034_s8] ss:$0 sm:$0xff]  ;;  %vm12212_vm8 = vsmask.f32 4368 }
 0x71b   :  { %v11373_v63 = vcombine.low %v11304_v58, %v11318_v33 }
 0x71c   :  { %16141 = vmatpush3.bf16.msra.mxu0 %v16506_v46  ;;  %v11388_v46 = vrot.slane %v11374_v17, %v17092_v61 }
 0x71d   :  { %16142 = vmatprep.subr.bf16.mxu0 %v16507_v2  ;;  %v11381_v8 = vrot.slane %v11373_v63, %v17092_v61 }
 0x71f   :  { %v11389_v26 = vcombine.low %v11381_v8, %v11388_v46 }
 0x720   :  { %16143 = vmatpush3.bf16.msra.mxu0 %v16507_v2  ;;  %v16520_v2 = vld [vmem:[%s21036_s10 + $0x84] ss:$8 sps:$4 sm:$0xff]  }
 0x721   :  { %16148 = vmatprep.subr.bf16.mxu0 %v16510_v24 }
 0x723   :  { %16145 = vmatmul.mubr.msk.bf16.vlgmr.msra.gmra.mrb[8].mxu0 %vm9287_vm3, %v11071_v10  ;;  %v16539_v10 = vld [vmem:[%s21036_s10 + $0xf0] ss:$8 sps:$4 sm:$0xff]  }
 0x724   :  { %16149 = vmatpush3.bf16.msra.mxu0 %v16510_v24  ;;  %16156 = vmatprep.mubr.msk.bf16.mxu0 %vm9287_vm3, %v11372_v42  ;;  %v324_v24 = vsel %vm20129_vm5, 0, %v323_v7  ;;  %v332_v42 = vld [vmem:[#allocation4 + $0xe] sm:$0x2] }
 0x725   :  { %16150 = vmatprep.subr.bf16.mxu0 %v16511_v54  ;;  %325 = vst [vmem:[#allocation4 + $0x8] sm:$0x2] %v324_v24  ;;  %v333_v28 = vsel %vm20129_vm5, 0, %v332_v42 }
 0x726   :  { %334 = vst [vmem:[#allocation4 + $0xe] sm:$0x2] %v333_v28 }
 0x728   :  { %16151 = vmatpush3.bf16.msra.mxu0 %v16511_v54  ;;  %v16544_v54 = vld [vmem:[%s21036_s10 + $0x4] ss:$8 sps:$4 sm:$0xff]  }
 0x729   :  { %16152 = vmatprep.subr.bf16.mxu0 %v16512_v9 }
 0x72c   :  { %16153 = vmatpush3.bf16.msra.mxu0 %v16512_v9  ;;  %v321_v9 = vsel %vm20129_vm5, 0, %v320_v55 }
 0x72d   :  { %16154 = vmatprep.subr.bf16.mxu0 %v16513_v37  ;;  %322 = vst [vmem:[#allocation4 + $0x6] sm:$0x2] %v321_v9 }
 0x730   :  { %16155 = vmatpush3.bf16.msra.mxu0 %v16513_v37 }
 0x731   :  { %16160 = vmatprep.subr.bf16.mxu0 %v16514_v12 }
 0x733   :  { %16157 = vmatmul.mubr.msk.bf16.vlgmr.msra.gmra.mrb[8].mxu0 %vm9287_vm3, %v11389_v26 }
 0x734   :  { %16161 = vmatpush3.bf16.msra.mxu0 %v16514_v12  ;;  %16168 = vmatprep.mubr.msk.bf16.mxu0 %vm9287_vm3, %v11610_v4  ;;  %v288_v4 = vsel %vm20100_vm14, 0, %v287_v18  ;;  %vm12218_vm14 = vsmask.f32 7452 }
 0x735   :  { %16162 = vmatprep.subr.bf16.mxu0 %v16515_v56  ;;  %289 = vst [vmem:[#allocation4 + $0x2] sm:$0x1] %v288_v4 }
 0x738   :  { %16163 = vmatpush3.bf16.msra.mxu0 %v16515_v56 }
 0x739   :  { %16164 = vmatprep.subr.bf16.mxu0 %v16516_v47 }
 0x73c   :  { %16165 = vmatpush3.bf16.msra.mxu0 %v16516_v47 }
 0x73d   :  { %16166 = vmatprep.subr.bf16.mxu0 %v16517_v34 }
 0x740   :  { %16167 = vmatpush3.bf16.msra.mxu0 %v16517_v34 }
 0x741   :  { %12378 = vmatprep.subr.bf16.mxu0 %v16520_v2 }
 0x743   :  { %16169 = vmatmul.mubr.msk.bf16.vlgmr.msra.gmra.mrb[8].mxu0 %vm9287_vm3, %v11627_v31  ;;  %v317_v31 = vld [vmem:[#allocation4 + $0x4] sm:$0x2]  ;;  %vm11825_vm3 = vcmask 1041408  }
 0x744   :  { %12410 = vmatprep.mubr.bf16.mxu0 %v16828_v41  ;;  %v318_v44 = vsel %vm20129_vm5, 0, %v317_v31  ;;  %12379 = vmatpush1.bf16.msra.mxu0 %v16518_v40  ;;  %vm20397_vm9 = vmand %vm11825_vm3, %vm12132_vm4 }
 0x745   :  { %319 = vst [vmem:[#allocation4 + $0x4] sm:$0x2] %v318_v44  ;;  %12380 = vmatprep.subr.bf16.mxu0 %v16523_v20  ;;  %vm20407_vm5 = vmor %vm20391_vm12, %vm12212_vm8 }
 0x746   :  { %vm20421_vm7 = vmor %vm20407_vm5, %vm12214_vm13 }
 0x748   :  { %12381 = vmatpush1.bf16.msra.mxu0 %v16521_v21 }
 0x749   :  { %12382 = vmatprep.subr.bf16.mxu0 %v16526_v0 }
 0x74c   :  { %12383 = vmatpush1.bf16.msra.mxu0 %v16524_v45 }
 0x74d   :  { %12384 = vmatprep.subr.bf16.mxu0 %v16529_v3 }
 0x750   :  { %12385 = vmatpush1.bf16.msra.mxu0 %v16527_v43 }
 0x751   :  { %12386 = vmatprep.subr.bf16.mxu0 %v16532_v16 }
 0x754   :  { %12387 = vmatpush1.bf16.msra.mxu0 %v16530_v11 }
 0x755   :  { %12388 = vmatprep.subr.bf16.mxu0 %v16535_v27 }
 0x758   :  { %12389 = vmatpush1.bf16.msra.mxu0 %v16533_v30 }
 0x759   :  { %12390 = vmatprep.subr.bf16.mxu0 %v16538_v60 }
 0x75c   :  { %12391 = vmatpush1.bf16.msra.mxu0 %v16536_v36 }
 0x75d   :  { %12392 = vmatprep.subr.bf16.mxu0 %v16541_v13 }
 0x760   :  { %12393 = vmatpush1.bf16.msra.mxu0 %v16539_v10 }
 0x761   :  { %12528 = vmatprep.subr.bf16.mxu0 %v16544_v54 }
 0x816   :  { %v16170_v33 = vpop.f32.mrb[8].mxu0 }
 0x817   :  { %v11720_v58 = vmul.f32 %v16170_v33, %v15087_v14  ;;  %v11692_v37 = vpop.f32.mrb[9].mxu0 }
 0x818   :  { %v11718_v51 = vmul.f32 %v15087_v14, %v11692_v37  ;;  %v16171_v63 = vpop.f32.mrb[10].mxu0 }
 0x819   :  { %v11731_v17 = vadd.f32 %v15088_v6, %v11720_v58  ;;  %v11721_v8 = vmul.f32 %v16171_v63, %v15087_v14  ;;  %v11695_v50 = vpop.f32.mrb[11].mxu0 }
 0x81a   :  { %v11729_v46 = vadd.f32 %v15088_v6, %v11718_v51  ;;  %v11719_v12 = vmul.f32 %v15087_v14, %v11695_v50 }
 0x81b   :  { %v11735_v26 = vmax.f32 %v11731_v17, 0.0  ;;  %v11732_v56 = vadd.f32 %v15088_v6, %v11721_v8 }
 0x81c   :  { %v11733_v47 = vmax.f32 %v11729_v46, 0.0  ;;  %v11730_v34 = vadd.f32 %v15088_v6, %v11719_v12 }
 0x81d   :  { %v11775_v18 = vcombine.high %v11735_v26, %v11735_v26  ;;  %v11782_v22 = vrot.slane %v11735_v26, %v17092_v61  ;;  %v20345_v4 = vmax.f32 %v11732_v56, 0.0 }
 0x81e   :  { %v11741_v35 = vcombine.high %v11733_v47, %v11733_v47  ;;  %v11748_v62 = vrot.slane %v11733_v47, %v17092_v61  ;;  %v20348_v15 = vmax.f32 %v11730_v34, 0.0 }
 0x81f   :  { %v11789_v39 = vrot.slane %v11775_v18, %v17092_v61  ;;  %v11790_v49 = vcombine.high %v11782_v22, %v11782_v22  ;;  %v11882_v38 = vsel %vm11825_vm3, %v11782_v22, -inf  ;;  %v11792_v31 = vcombine.high %v20345_v4, %v20345_v4 }
 0x820   :  { %v11883_v19 = vrot.slane %v11882_v38, 4  ;;  %v11755_v44 = vrot.slane %v11741_v35, %v17092_v61  ;;  %v11756_v40 = vcombine.high %v11748_v62, %v11748_v62  ;;  %v11826_v2 = vsel %vm11825_vm3, %v11748_v62, -inf }
 0x821   :  { %v11791_v20 = vcombine.high %v11789_v39, %v11789_v39  ;;  %v11889_v21 = vsel %vm11825_vm3, %v11790_v49, -inf  ;;  %v11896_v0 = vsel %vm11825_vm3, %v11789_v39, -inf  ;;  %v11827_v45 = vrot.slane %v11826_v2, 4 }
 0x822   :  { %v11884_v57 = vmax.f32 %v11882_v38, %v11883_v19  ;;  %v11890_v48 = vrot.slane %v11889_v21, 4  ;;  %v11897_v1 = vrot.slane %v11896_v0, 4  ;;  %v11757_v59 = vcombine.high %v11755_v44, %v11755_v44 }
 0x823   :  { %v11903_v23 = vsel %vm11825_vm3, %v11791_v20, -inf  ;;  %v11828_v29 = vmax.f32 %v11826_v2, %v11827_v45  ;;  %v11833_v7 = vsel %vm11825_vm3, %v11756_v40, -inf  ;;  %v11840_v3 = vsel %vm11825_vm3, %v11755_v44, -inf }
 0x824   :  { %v11885_v24 = vrot.slane %v11884_v57, 2  ;;  %v11891_v43 = vmax.f32 %v11889_v21, %v11890_v48  ;;  %v11898_v16 = vmax.f32 %v11896_v0, %v11897_v1  ;;  %v11904_v11 = vrot.slane %v11903_v23, 4 }
 0x825   :  { %v11829_v27 = vrot.slane %v11828_v29, 2  ;;  %v11834_v30 = vrot.slane %v11833_v7, 4  ;;  %v11841_v60 = vrot.slane %v11840_v3, 4  ;;  %v11847_v36 = vsel %vm11825_vm3, %v11757_v59, -inf }
 0x826   :  { %v11886_v13 = vmax.f32 %v11884_v57, %v11885_v24  ;;  %v11892_v10 = vrot.slane %v11891_v43, 2  ;;  %v11899_v54 = vrot.slane %v11898_v16, 2  ;;  %v11905_v32 = vmax.f32 %v11903_v23, %v11904_v11 }
 0x827   :  { %v11830_v42 = vmax.f32 %v11828_v29, %v11829_v27  ;;  %v11835_v52 = vmax.f32 %v11833_v7, %v11834_v30  ;;  %v11842_v25 = vmax.f32 %v11840_v3, %v11841_v60  ;;  %v11848_v55 = vrot.slane %v11847_v36, 4 }
 0x828   :  { %v11887_v28 = vrot.slane %v11886_v13, 1  ;;  %v11893_v5 = vmax.f32 %v11891_v43, %v11892_v10  ;;  %v11900_v9 = vmax.f32 %v11898_v16, %v11899_v54  ;;  %v11906_v14 = vrot.slane %v11905_v32, 2 }
 0x829   :  { %v11831_v33 = vrot.slane %v11830_v42, 1  ;;  %v11836_v6 = vrot.slane %v11835_v52, 2  ;;  %v11843_v58 = vrot.slane %v11842_v25, 2  ;;  %v11849_v37 = vmax.f32 %v11847_v36, %v11848_v55 }
 0x82a   :  { %v11888_v51 = vmax.f32 %v11886_v13, %v11887_v28  ;;  %v11894_v63 = vrot.slane %v11893_v5, 1  ;;  %v11901_v17 = vrot.slane %v11900_v9, 1  ;;  %v11907_v8 = vmax.f32 %v11905_v32, %v11906_v14 }
 0x82b   :  { %v11832_v50 = vmax.f32 %v11830_v42, %v11831_v33  ;;  %v11837_v46 = vmax.f32 %v11835_v52, %v11836_v6  ;;  %v11844_v12 = vmax.f32 %v11842_v25, %v11843_v58  ;;  %v11850_v26 = vrot.slane %v11849_v37, 2  ;;  %v20373_v42 = vld.sshfl [vmem:[#allocation4 + $0x8] sm:$0x11 pattern:$0x75316420] }
 0x82c   :  { %v11895_v56 = vmax.f32 %v11893_v5, %v11894_v63  ;;  %v11902_v47 = vmax.f32 %v11900_v9, %v11901_v17  ;;  %v11908_v34 = vrot.slane %v11907_v8, 1  ;;  %v11799_v18 = vrot.slane %v20345_v4, %v17092_v61 }
 0x82d   :  { %v11838_v22 = vrot.slane %v11837_v46, 1  ;;  %v11845_v35 = vrot.slane %v11844_v12, 1  ;;  %v11851_v62 = vmax.f32 %v11849_v37, %v11850_v26  ;;  %v11806_v39 = vrot.slane %v11792_v31, %v17092_v61 }
 0x82e   :  { %v11909_v49 = vmax.f32 %v11907_v8, %v11908_v34  ;;  %v11942_v38 = vmax.f32 %v11888_v51, %v11902_v47  ;;  %v11807_v19 = vcombine.high %v11799_v18, %v11799_v18  ;;  %v11910_v44 = vsel %vm11825_vm3, %v11799_v18, -inf }
 0x82f   :  { %v11839_v40 = vmax.f32 %v11837_v46, %v11838_v22  ;;  %v11846_v2 = vmax.f32 %v11844_v12, %v11845_v35  ;;  %v11852_v20 = vrot.slane %v11851_v62, 1  ;;  %v11808_v21 = vcombine.high %v11806_v39, %v11806_v39 }
 0x830   :  { %v11943_v0 = vmax.f32 %v11895_v56, %v11909_v49  ;;  %v11950_v45 = vpack.c.bf16 %v11942_v38, %v11942_v38  ;;  %v11911_v57 = vrot.slane %v11910_v44, 4  ;;  %v11917_v4 = vsel %vm11825_vm3, %v11807_v19, -inf }
 0x831   :  { %v11853_v48 = vmax.f32 %v11851_v62, %v11852_v20  ;;  %v11938_v1 = vmax.f32 %v11832_v50, %v11846_v2  ;;  %v11918_v59 = vrot.slane %v11917_v4, 4  ;;  %v11924_v31 = vsel %vm11825_vm3, %v11806_v39, -inf  ;;  %v16551_v20 = vld [vmem:[%s21036_s10 + $0x30] ss:$8 sps:$4 sm:$0xff]  }
 0x832   :  { %v11951_v23 = vpack.c.bf16 %v11943_v0, %v11943_v0  ;;  %v11996_v29 = vrot.slane %v11950_v45, %v17092_v61  ;;  %v11912_v7 = vmax.f32 %v11910_v44, %v11911_v57  ;;  %v11925_v3 = vrot.slane %v11924_v31, 4 }
 0x833   :  { %v11939_v24 = vmax.f32 %v11839_v40, %v11853_v48  ;;  %v11946_v43 = vpack.c.bf16 %v11938_v1, %v11938_v1  ;;  %v11919_v16 = vmax.f32 %v11917_v4, %v11918_v59  ;;  %v11931_v11 = vsel %vm11825_vm3, %v11808_v21, -inf  ;;  %v12140_v21 = vld [vmem:[#allocation4 + $0xa] sm:$0x3] }
 0x834   :  { %v12003_v27 = vrot.slane %v11951_v23, %v17092_v61  ;;  %v12052_v30 = vrot.slane %v11996_v29, %v17092_v61  ;;  %v11913_v60 = vrot.slane %v11912_v7, 2  ;;  %v11926_v36 = vmax.f32 %v11924_v31, %v11925_v3 }
 0x835   :  { %v11947_v13 = vpack.c.bf16 %v11939_v24, %v11939_v24  ;;  %v11968_v10 = vrot.slane %v11946_v43, %v17092_v61  ;;  %v11920_v54 = vrot.slane %v11919_v16, 2  ;;  %v11932_v32 = vrot.slane %v11931_v11, 4  ;;  %v12134_v43 = vld [vmem:[#allocation4 + $0x2] sm:$0x3] }
 0x836   :  { %v12059_v52 = vrot.slane %v12003_v27, %v17092_v61  ;;  %v12078_v25 = vunpack.c.l.b16 %v12052_v30  ;;  %v11914_v55 = vmax.f32 %v11912_v7, %v11913_v60  ;;  %v11927_v28 = vrot.slane %v11926_v36, 2 }
 0x837   :  { %v11975_v5 = vrot.slane %v11947_v13, %v17092_v61  ;;  %v12024_v9 = vrot.slane %v11968_v10, %v17092_v61  ;;  %v11921_v14 = vmax.f32 %v11919_v16, %v11920_v54  ;;  %v11933_v33 = vmax.f32 %v11931_v11, %v11932_v32 }
 0x838   :  { %v12079_v6 = vunpack.c.l.b16 %v12059_v52  ;;  %v11915_v58 = vrot.slane %v11914_v55, 1  ;;  %v11928_v37 = vmax.f32 %v11926_v36, %v11927_v28  ;;  %v12197_v51 = vcombine.high %v20373_v42, %v20373_v42 }
 0x839   :  { %v12031_v63 = vrot.slane %v11975_v5, %v17092_v61  ;;  %v12074_v17 = vunpack.c.l.b16 %v12024_v9  ;;  %v11922_v8 = vrot.slane %v11921_v14, 1  ;;  %v11934_v50 = vrot.slane %v11933_v33, 2 }
 0x83a   :  { %v12088_v46 = vrot.slane %v12078_v25, 7  ;;  %v12089_v12 = vrot.slane %v12079_v6, 6  ;;  %v11929_v26 = vrot.slane %v11928_v37, 1  ;;  %v11758_v56 = vcombine.high %v20348_v15, %v20348_v15 }
 0x83b   :  { %v12075_v47 = vunpack.c.l.b16 %v12031_v63  ;;  %v12082_v34 = vrot.slane %v12074_v17, 7  ;;  %v11916_v18 = vmax.f32 %v11914_v55, %v11915_v58  ;;  %v11935_v22 = vmax.f32 %v11933_v33, %v11934_v50  ;;  %v15089_v55 = vld.sshfl [vmem:[#allocation4] sm:$0x11 pattern:$0x75316420] }
 0x83c   :  { %v12090_v35 = vsel %vm5399_vm10, %v12089_v12, %v12088_v46  ;;  %v11930_v62 = vmax.f32 %v11928_v37, %v11929_v26  ;;  %v11765_v39 = vrot.slane %v20348_v15, %v17092_v61  ;;  %v11772_v49 = vrot.slane %v11758_v56, %v17092_v61 }
 0x83d   :  { %v12096_v19 = vpack.c.b16 %v12090_v35, %v12090_v35  ;;  %v12083_v44 = vrot.slane %v12075_v47, 6  ;;  %v11923_v40 = vmax.f32 %v11921_v14, %v11922_v8  ;;  %v11936_v2 = vrot.slane %v11935_v22, 1 }
 0x83e   :  { %v11944_v15 = vmax.f32 %v11916_v18, %v11930_v62  ;;  %v11773_v0 = vcombine.high %v11765_v39, %v11765_v39  ;;  %v11774_v45 = vcombine.high %v11772_v49, %v11772_v49  ;;  %v11854_v57 = vsel %vm11825_vm3, %v11765_v39, -inf }
 0x83f   :  { %v12118_v4 = vrot.slane %v12096_v19, %v17092_v61  ;;  %v12084_v48 = vsel %vm5399_vm10, %v12083_v44, %v12082_v34  ;;  %v11937_v1 = vmax.f32 %v11935_v22, %v11936_v2  ;;  %v11855_v59 = vrot.slane %v11854_v57, 4  ;;  %v16565_v22 = vld [vmem:[%s21036_s10 + $0x74] ss:$8 sps:$4 sm:$0xff]  }
 0x840   :  { %v12094_v23 = vpack.c.b16 %v12084_v48, %v12084_v48  ;;  %v11952_v29 = vpack.c.bf16 %v11944_v15, %v11944_v15  ;;  %v11861_v7 = vsel %vm11825_vm3, %v11773_v0, -inf  ;;  %v11868_v3 = vsel %vm11825_vm3, %v11772_v49, -inf }
 0x841   :  { %v12141_v24 = vsel %vm20397_vm9, %v12118_v4, %v12140_v21  ;;  %v11945_v16 = vmax.f32 %v11923_v40, %v11937_v1  ;;  %v11856_v11 = vmax.f32 %v11854_v57, %v11855_v59  ;;  %v11862_v27 = vrot.slane %v11861_v7, 4 }
 0x842   :  { %12142 = vst [vmem:[#allocation4 + $0xa] sm:$0x3] %v12141_v24  ;;  %v12104_v30 = vrot.slane %v12094_v23, %v17092_v61  ;;  %v12010_v60 = vrot.slane %v11952_v29, %v17092_v61  ;;  %v11869_v36 = vrot.slane %v11868_v3, 4  ;;  %v11875_v13 = vsel %vm11825_vm3, %v11774_v45, -inf  ;;  %vm12217_vm3 = vmor %vm20421_vm7, %vm12216_vm15 }
 0x843   :  { %v11953_v54 = vpack.c.bf16 %v11945_v16, %v11945_v16  ;;  %v11857_v32 = vrot.slane %v11856_v11, 2  ;;  %v11863_v52 = vmax.f32 %v11861_v7, %v11862_v27  ;;  %v11876_v25 = vrot.slane %v11875_v13, 4  ;;  %vm20438_vm0 = vmor %vm12217_vm3, %vm12218_vm14 }
 0x844   :  { %v12135_v28 = vsel %vm20397_vm9, %v12104_v30, %v12134_v43  ;;  %v12066_v5 = vrot.slane %v12010_v60, %v17092_v61  ;;  %v11870_v9 = vmax.f32 %v11868_v3, %v11869_v36  ;;  %v16829_v14 = vmov 1966171168   ;;  %v12143_v43 = vld [vmem:[#allocation4 + $0xc] sm:$0x3] }
 0x845   :  { %v12276_v33 = vunpack.c.l.s4 %v16829_v14  ;;  %12136 = vst [vmem:[#allocation4 + $0x2] sm:$0x3] %v12135_v28  ;;  %v12017_v6 = vrot.slane %v11953_v54, %v17092_v61  ;;  %v11858_v58 = vmax.f32 %v11856_v11, %v11857_v32  ;;  %v11864_v37 = vrot.slane %v11863_v52, 2 }
 0x846   :  { %v11877_v63 = vmax.f32 %v11875_v13, %v11876_v25  ;;  %v11871_v17 = vrot.slane %v11870_v9, 2  ;;  %v12181_v8 = vcombine.high %v15089_v55, %v15089_v55  ;;  %v12239_v50 = vshrl.u32 %v20373_v42, 16  ;;  %v15328_v28 = vld.sshfl [vmem:[#allocation4 + $0xe] sm:$0x11 pattern:$0x75316420] }
 0x847   :  { %v12244_v46 = vshll.u32 %v12197_v51, 16  ;;  %v12073_v12 = vrot.slane %v12017_v6, %v17092_v61  ;;  %v12080_v26 = vunpack.c.l.b16 %v12066_v5  ;;  %v11865_v56 = vmax.f32 %v11863_v52, %v11864_v37 }
 0x848   :  { %v11878_v47 = vrot.slane %v11877_v63, 2  ;;  %v11859_v34 = vrot.slane %v11858_v58, 1  ;;  %v11872_v18 = vmax.f32 %v11870_v9, %v11871_v17  ;;  %v12277_v38 = vunpack.c.0.s8 %v12276_v33  ;;  %v16542_v17 = vld [vmem:[%s21036_s10] ss:$8 sps:$4 sm:$0xff]  }
 0x849   :  { %v12081_v35 = vunpack.c.l.b16 %v12073_v12  ;;  %v11866_v62 = vrot.slane %v11865_v56, 1  ;;  %v15092_v49 = vld.sshfl [vmem:[#allocation4 + $0xa] sm:$0x11 pattern:$0x75316420]  ;;  %v12221_v51 = vshrl.u32 %v15089_v55, 16  ;;  %v12246_v15 = vsel %vm20438_vm0, %v12239_v50, %v12244_v46 }
 0x84a   :  { %v11879_v39 = vmax.f32 %v11877_v63, %v11878_v47  ;;  %v11873_v19 = vrot.slane %v11872_v18, 1  ;;  %v12205_v42 = vcombine.high %v15092_v49, %v15092_v49  ;;  %v12226_v44 = vshll.u32 %v12181_v8, 16  ;;  %v16547_v50 = vld [vmem:[%s21036_s10 + $0x14] ss:$8 sps:$4 sm:$0xff]  }
 0x84b   :  { %v12091_v40 = vrot.slane %v12080_v26, 7  ;;  %v12092_v2 = vrot.slane %v12081_v35, 6  ;;  %v11860_v0 = vmax.f32 %v11858_v58, %v11859_v34  ;;  %v12248_v4 = vshrl.u32 %v15092_v49, 16  ;;  %v16545_v35 = vld [vmem:[%s21036_s10 + $0x10] ss:$8 sps:$4 sm:$0xff]  }
 0x84c   :  { %v11880_v21 = vrot.slane %v11879_v39, 1  ;;  %v11874_v45 = vmax.f32 %v11872_v18, %v11873_v19  ;;  %v15090_v57 = vld.sshfl [vmem:[#allocation4 + $0x2] sm:$0x11 pattern:$0x75316420]  ;;  %v12253_v48 = vshll.u32 %v12205_v42, 16  ;;  %v11867_v59 = vmax.f32 %v11865_v56, %v11866_v62 }
 0x84d   :  { %v12093_v1 = vsel %vm5399_vm10, %v12092_v2, %v12091_v40  ;;  %v12189_v23 = vcombine.high %v15090_v57, %v15090_v57  ;;  %v12228_v3 = vsel %vm20438_vm0, %v12221_v51, %v12226_v44  ;;  %v12230_v11 = vshrl.u32 %v15090_v57, 16  ;;  %v12137_v18 = vld [vmem:[#allocation4 + $0x4] sm:$0x3] }
 0x84e   :  { %v11881_v31 = vmax.f32 %v11879_v39, %v11880_v21  ;;  %v12097_v29 = vpack.c.b16 %v12093_v1, %v12093_v1  ;;  %v11940_v7 = vmax.f32 %v11860_v0, %v11874_v45  ;;  %v20449_v24 = vsel %vm20438_vm0, %v12248_v4, %v12253_v48  ;;  %v15368_v39 = vld.sshfl [vmem:[#allocation4 + $0xe] sm:$0x10 pattern:$0x75316420]  ;;  %v16548_v0 = vld [vmem:[%s21036_s10 + $0x20] ss:$8 sps:$4 sm:$0xff]  }
 0x84f   :  { %v12235_v27 = vshll.u32 %v12189_v23, 16  ;;  %v12274_v30 = vcombine.low %v12246_v15, %v20449_v24  ;;  %v20454_v13 = vsub.s32 %v12277_v38, %v17082_v53  ;;  %v13606_v6 = vcombine.high %v15328_v28, %v15328_v28  ;;  %v16550_v38 = vld [vmem:[%s21036_s10 + $0x24] ss:$8 sps:$4 sm:$0xff]  }
 0x850   :  { %v11941_v16 = vmax.f32 %v11867_v59, %v11881_v31  ;;  %v12125_v60 = vrot.slane %v12097_v29, %v17092_v61  ;;  %v11948_v36 = vpack.c.bf16 %v11940_v7, %v11940_v7  ;;  %v13635_v26 = vshrl.u32 %v15328_v28, 16  ;;  %v20484_v19 = vld.sshfl [vmem:[#allocation4 + $0xa] sm:$0x10 pattern:$0x75316420] }
 0x851   :  { %v20458_v54 = vsel %vm20438_vm0, %v12230_v11, %v12235_v27  ;;  %v12288_v55 = vrot.slane %v12274_v30, %v20454_v13  ;;  %v13640_v56 = vshll.u32 %v13606_v6, 16  ;;  %v15326_v57 = vld.sshfl [vmem:[#allocation4 + $0x6] sm:$0x11 pattern:$0x75316420] }
 0x852   :  { %v11949_v10 = vpack.c.bf16 %v11941_v16, %v11941_v16  ;;  %v12144_v32 = vsel %vm20397_vm9, %v12125_v60, %v12143_v43  ;;  %v11982_v52 = vrot.slane %v11948_v36, %v17092_v61  ;;  %v12273_v25 = vcombine.low %v12228_v3, %v20458_v54  ;;  %v16556_v3 = vld [vmem:[%s21036_s10 + $0x44] ss:$8 sps:$4 sm:$0xff]   ;;  %v16559_v43 = vld [vmem:[%s21036_s10 + $0x54] ss:$8 sps:$4 sm:$0xff]   ;;  %v12146_v16 = vld [vmem:[#allocation4] sm:$0x1] }
 0x853   :  { %12145 = vst [vmem:[#allocation4 + $0xc] sm:$0x3] %v12144_v32  ;;  %v13642_v40 = vsel %vm20438_vm0, %v13635_v26, %v13640_v56  ;;  %v13590_v29 = vcombine.high %v15326_v57, %v15326_v57  ;;  %v12148_v11 = vld [vmem:[#allocation4 + $0x8] sm:$0x1]  ;;  %v13617_v27 = vshrl.u32 %v15326_v57, 16 }
 0x854   :  { %v11989_v5 = vrot.slane %v11949_v10, %v17092_v61  ;;  %v12038_v9 = vrot.slane %v11982_v52, %v17092_v61  ;;  %v12281_v14 = vrot.slane %v12273_v25, %v20454_v13  ;;  %v15366_v60 = vld.sshfl [vmem:[#allocation4 + $0x6] sm:$0x10 pattern:$0x75316420]  ;;  %v12149_v36 = vld [vmem:[#allocation4 + $0xa] sm:$0x1] }
 0x855   :  { %v13622_v30 = vshll.u32 %v13590_v29, 16  ;;  %v20517_v10 = vld.sshfl [vmem:[#allocation4 + $0x2] sm:$0x10 pattern:$0x75316420]  ;;  %v12424_v6 = vcombine.low %v12148_v11, %v12149_v36 }
 0x856   :  { %v12045_v33 = vrot.slane %v11989_v5, %v17092_v61  ;;  %v12076_v58 = vunpack.c.l.b16 %v12038_v9  ;;  %v12289_v37 = vcombine.low %v12281_v14, %v12288_v55  ;;  %v12147_v32 = vld [vmem:[#allocation4 + $0x2] sm:$0x1]  ;;  %v16574_v57 = vld [vmem:[%s21036_s10 + $0x124] ss:$8 sps:$4 sm:$0xff]   ;;  %v16590_v36 = vld [vmem:[%s21036_s10 + $0x180] ss:$8 sps:$4 sm:$0xff]  }
 0x857   :  { %v13624_v5 = vsel %vm20438_vm0, %v13617_v27, %v13622_v30  ;;  %v16557_v14 = vld [vmem:[%s21036_s10 + $0x50] ss:$8 sps:$4 sm:$0xff]  }
 0x858   :  { %v12077_v63 = vunpack.c.l.b16 %v12045_v33  ;;  %v12296_v8 = vrot.slane %v12289_v37, %v20454_v13  ;;  %v12085_v46 = vrot.slane %v12076_v58, 7  ;;  %v12423_v33 = vcombine.low %v12146_v16, %v12147_v32  ;;  %v15147_v29 = vld.sshfl [vmem:[#allocation4 + $0x8] sm:$0x10 pattern:$0x75316420] }
 0x859   :  { %v16589_v16 = vld [vmem:[%s21036_s10 + $0x174] ss:$8 sps:$4 sm:$0xff]   ;;  %v16587_v30 = vld [vmem:[%s21036_s10 + $0x170] ss:$8 sps:$4 sm:$0xff]  }
 0x85a   :  { %v12086_v12 = vrot.slane %v12077_v63, 6  ;;  %12411 = vmatmul.mubr.bf16.vlgmr.msra.gmra.mrb[12].mxu0 %v12296_v8  ;;  %v15218_v47 = vld.sshfl [vmem:[#allocation4 + $0xc] sm:$0x11 pattern:$0x75316420] }
 0x85b   :  { %12529 = vmatpush1.bf16.msra.mxu0 %v16542_v17  ;;  %12560 = vmatprep.mubr.bf16.mxu0 %v16828_v41  ;;  %v12986_v62 = vcombine.high %v15218_v47, %v15218_v47  ;;  %v13015_v42 = vshrl.u32 %v15218_v47, 16  ;;  %v15258_v44 = vld.sshfl [vmem:[#allocation4 + $0xc] sm:$0x10 pattern:$0x75316420] }
 0x85c   :  { %v12087_v34 = vsel %vm5399_vm10, %v12086_v12, %v12085_v46  ;;  %12530 = vmatprep.subr.bf16.mxu0 %v16547_v50  ;;  %v15276_v21 = vcombine.high %v20484_v19, %v15258_v44  ;;  %v15386_v15 = vcombine.high %v15258_v44, %v15368_v39  ;;  %v16562_v63 = vld [vmem:[%s21036_s10 + $0x64] ss:$8 sps:$4 sm:$0xff]   ;;  %v16560_v47 = vld [vmem:[%s21036_s10 + $0x60] ss:$8 sps:$4 sm:$0xff]   ;;  %v16595_v32 = vld [vmem:[%s21036_s10 + $0x194] ss:$8 sps:$4 sm:$0xff]  }
 0x85d   :  { %v12095_v49 = vpack.c.b16 %v12087_v34, %v12087_v34  ;;  %v13020_v51 = vshll.u32 %v12986_v62, 16  ;;  %v12431_v34 = vrot.slane %v12423_v33, %v20454_v13  ;;  %v16568_v44 = vld [vmem:[%s21036_s10 + $0x104] ss:$8 sps:$4 sm:$0xff]   ;;  %v16607_v33 = vld [vmem:[%s21036_s10 + $0x1d4] ss:$8 sps:$4 sm:$0xff]   ;;  %vm14053_vm10 = vcmask 1043456  }
 0x85e   :  { %v13260_v1 = vrot.slane %v15276_v21, %v20454_v13  ;;  %v13880_v31 = vrot.slane %v15386_v15, %v20454_v13  ;;  %v16566_v21 = vld [vmem:[%s21036_s10 + $0x100] ss:$8 sps:$4 sm:$0xff]  }
 0x85f   :  { %v12111_v2 = vrot.slane %v12095_v49, %v17092_v61  ;;  %12531 = vmatpush1.bf16.msra.mxu0 %v16545_v35  ;;  %v13022_v45 = vsel %vm20438_vm0, %v13015_v42, %v13020_v51  ;;  %v16553_v61 = vld [vmem:[%s21036_s10 + $0x34] ss:$8 sps:$4 sm:$0xff]   ;;  %v16563_v42 = vld [vmem:[%s21036_s10 + $0x70] ss:$8 sps:$4 sm:$0xff]  }
 0x860   :  { %12532 = vmatprep.subr.bf16.mxu0 %v16550_v38  ;;  %v13041_v48 = vcombine.low %v20449_v24, %v13022_v45  ;;  %v13661_v59 = vcombine.low %v13022_v45, %v13642_v40  ;;  %v16554_v24 = vld [vmem:[%s21036_s10 + $0x40] ss:$8 sps:$4 sm:$0xff]   ;;  %v16569_v45 = vld [vmem:[%s21036_s10 + $0x110] ss:$8 sps:$4 sm:$0xff]  }
 0x861   :  { %v12138_v4 = vsel %vm20397_vm9, %v12111_v2, %v12137_v18  ;;  %v12438_v18 = vrot.slane %v12424_v6, %v20454_v13 }
 0x862   :  { %12139 = vst [vmem:[#allocation4 + $0x4] sm:$0x3] %v12138_v4  ;;  %v13055_v23 = vrot.slane %v13041_v48, %v20454_v13  ;;  %v13675_v7 = vrot.slane %v13661_v59, %v20454_v13  ;;  %v16572_v4 = vld [vmem:[%s21036_s10 + $0x120] ss:$8 sps:$4 sm:$0xff]   ;;  %v16575_v48 = vld [vmem:[%s21036_s10 + $0x130] ss:$8 sps:$4 sm:$0xff]  }
 0x863   :  { %12533 = vmatpush1.bf16.msra.mxu0 %v16548_v0  ;;  %v12439_v51 = vcombine.low %v12431_v34, %v12438_v18  ;;  %v16571_v0 = vld [vmem:[%s21036_s10 + $0x114] ss:$8 sps:$4 sm:$0xff]   ;;  %v16578_v59 = vld [vmem:[%s21036_s10 + $0x140] ss:$8 sps:$4 sm:$0xff]   ;;  %v16611_v34 = vld [vmem:[%s21036_s10 + $0x1f0] ss:$8 sps:$4 sm:$0xff]  }
 0x864   :  { %12534 = vmatprep.subr.bf16.mxu0 %v16553_v61  ;;  %v16577_v61 = vld [vmem:[%s21036_s10 + $0x134] ss:$8 sps:$4 sm:$0xff]  }
 0x865   :  { %v12446_v15 = vrot.slane %v12439_v51, %v20454_v13  ;;  %v16620_v51 = vld [vmem:[%s21036_s10 + $0x220] ss:$8 sps:$4 sm:$0xff]  }
 0x867   :  { %12535 = vmatpush1.bf16.msra.mxu0 %v16551_v20  ;;  %v16586_v20 = vld [vmem:[%s21036_s10 + $0x164] ss:$8 sps:$4 sm:$0xff]  }
 0x868   :  { %12536 = vmatprep.subr.bf16.mxu0 %v16556_v3 }
 0x869   :  { %v15216_v52 = vld.sshfl [vmem:[#allocation4 + $0x4] sm:$0x11 pattern:$0x75316420] }
 0x86a   :  { %v12970_v25 = vcombine.high %v15216_v52, %v15216_v52  ;;  %v15256_v55 = vld.sshfl [vmem:[#allocation4 + $0x4] sm:$0x10 pattern:$0x75316420]  ;;  %v12997_v58 = vshrl.u32 %v15216_v52, 16 }
 0x86b   :  { %v15275_v28 = vcombine.high %v20517_v10, %v15256_v55  ;;  %v15385_v9 = vcombine.high %v15256_v55, %v15366_v60  ;;  %12537 = vmatpush1.bf16.msra.mxu0 %v16554_v24  ;;  %v15166_v24 = vcombine.high %v15147_v29, %v20484_v19  ;;  %v16592_v60 = vld [vmem:[%s21036_s10 + $0x184] ss:$8 sps:$4 sm:$0xff]   ;;  %v16593_v52 = vld [vmem:[%s21036_s10 + $0x190] ss:$8 sps:$4 sm:$0xff]   ;;  %v16596_v55 = vld [vmem:[%s21036_s10 + $0x1a0] ss:$8 sps:$4 sm:$0xff]  }
 0x86c   :  { %v13002_v37 = vshll.u32 %v12970_v25, 16  ;;  %12538 = vmatprep.subr.bf16.mxu0 %v16559_v43  ;;  %v16584_v43 = vld [vmem:[%s21036_s10 + $0x160] ss:$8 sps:$4 sm:$0xff]   ;;  %v16598_v25 = vld [vmem:[%s21036_s10 + $0x1a4] ss:$8 sps:$4 sm:$0xff]  }
 0x86d   :  { %v13253_v17 = vrot.slane %v15275_v28, %v20454_v13  ;;  %v13873_v8 = vrot.slane %v15385_v9, %v20454_v13  ;;  %v12641_v27 = vrot.slane %v15166_v24, %v20454_v13  ;;  %v16601_v28 = vld [vmem:[%s21036_s10 + $0x1b4] ss:$8 sps:$4 sm:$0xff]   ;;  %v16604_v9 = vld [vmem:[%s21036_s10 + $0x1c4] ss:$8 sps:$4 sm:$0xff]   ;;  %v16641_v29 = vld [vmem:[%s21036_s10 + $0x290] ss:$8 sps:$4 sm:$0xff]  }
 0x86e   :  { %v13004_v50 = vsel %vm20438_vm0, %v12997_v58, %v13002_v37  ;;  %v12775_v6 = vld [vmem:[#allocation4 + $0x4] sm:$0x1]  ;;  %v12777_v58 = vld [vmem:[#allocation4 + $0xc] sm:$0x1]  ;;  %v16605_v37 = vld [vmem:[%s21036_s10 + $0x1d0] ss:$8 sps:$4 sm:$0xff]  }
 0x86f   :  { %v13040_v46 = vcombine.low %v20458_v54, %v13004_v50  ;;  %v13261_v12 = vcombine.low %v13253_v17, %v13260_v1  ;;  %v13660_v26 = vcombine.low %v13004_v50, %v13624_v5  ;;  %v13881_v56 = vcombine.low %v13873_v8, %v13880_v31  ;;  %12539 = vmatpush1.bf16.msra.mxu0 %v16557_v14  ;;  %v16580_v1 = vld [vmem:[%s21036_s10 + $0x144] ss:$8 sps:$4 sm:$0xff]   ;;  %v16583_v31 = vld [vmem:[%s21036_s10 + $0x154] ss:$8 sps:$4 sm:$0xff]   ;;  %v16599_v5 = vld [vmem:[%s21036_s10 + $0x1b0] ss:$8 sps:$4 sm:$0xff]  }
 0x870   :  { %12540 = vmatprep.subr.bf16.mxu0 %v16562_v63  ;;  %v16602_v14 = vld [vmem:[%s21036_s10 + $0x1c0] ss:$8 sps:$4 sm:$0xff]   ;;  %v12774_v63 = vld [vmem:[#allocation4 + $0x2] sm:$0x1]  ;;  %v12776_v17 = vld [vmem:[#allocation4 + $0xa] sm:$0x1] }
 0x871   :  { %v13048_v35 = vrot.slane %v13040_v46, %v20454_v13  ;;  %v20543_v54 = vrot.slane %v13261_v12, %v20454_v13  ;;  %v13668_v62 = vrot.slane %v13660_v26, %v20454_v13  ;;  %v20547_v39 = vrot.slane %v13881_v56, %v20454_v13  ;;  %v16610_v8 = vld [vmem:[%s21036_s10 + $0x1e4] ss:$8 sps:$4 sm:$0xff]   ;;  %v16608_v12 = vld [vmem:[%s21036_s10 + $0x1e0] ss:$8 sps:$4 sm:$0xff]   ;;  %v16613_v26 = vld [vmem:[%s21036_s10 + $0x1f4] ss:$8 sps:$4 sm:$0xff]  }
 0x872   :  { %v12799_v50 = vcombine.low %v12774_v63, %v12775_v6  ;;  %v12800_v46 = vcombine.low %v12776_v17, %v12777_v58  ;;  %v16652_v24 = vld [vmem:[%s21036_s10 + $0x2c4] ss:$8 sps:$4 sm:$0xff]   ;;  %v13394_v6 = vld [vmem:[#allocation4 + $0x4] sm:$0x1]  ;;  %v13395_v58 = vld [vmem:[#allocation4 + $0x6] sm:$0x1] }
 0x873   :  { %v13056_v49 = vcombine.low %v13048_v35, %v13055_v23  ;;  %v13676_v38 = vcombine.low %v13668_v62, %v13675_v7  ;;  %12541 = vmatpush1.bf16.msra.mxu0 %v16560_v47  ;;  %v15145_v23 = vld.sshfl [vmem:[#allocation4] sm:$0x10 pattern:$0x75316420]  ;;  %v16614_v35 = vld [vmem:[%s21036_s10 + $0x200] ss:$8 sps:$4 sm:$0xff]  }
 0x874   :  { %12542 = vmatprep.subr.bf16.mxu0 %v16565_v22  ;;  %v16581_v7 = vld [vmem:[%s21036_s10 + $0x150] ss:$8 sps:$4 sm:$0xff]   ;;  %v15165_v3 = vcombine.high %v15145_v23, %v20517_v10  ;;  %v12807_v56 = vrot.slane %v12799_v50, %v20454_v13  ;;  %v12814_v47 = vrot.slane %v12800_v46, %v20454_v13  ;;  %v16616_v22 = vld [vmem:[%s21036_s10 + $0x204] ss:$8 sps:$4 sm:$0xff]   ;;  %v16643_v23 = vld [vmem:[%s21036_s10 + $0x294] ss:$8 sps:$4 sm:$0xff]  }
 0x875   :  { %v20556_v40 = vrot.slane %v13056_v49, %v20454_v13  ;;  %v20559_v2 = vrot.slane %v13676_v38, %v20454_v13  ;;  %v16619_v49 = vld [vmem:[%s21036_s10 + $0x214] ss:$8 sps:$4 sm:$0xff]   ;;  %v16617_v38 = vld [vmem:[%s21036_s10 + $0x210] ss:$8 sps:$4 sm:$0xff]   ;;  %v16682_v17 = vld [vmem:[%s21036_s10 + $0x364] ss:$8 sps:$4 sm:$0xff]  }
 0x876   :  { %v12634_v11 = vrot.slane %v15165_v3, %v20454_v13  ;;  %v12815_v18 = vcombine.low %v12807_v56, %v12814_v47  ;;  %v16647_v3 = vld [vmem:[%s21036_s10 + $0x2b0] ss:$8 sps:$4 sm:$0xff]   ;;  %v16680_v46 = vld [vmem:[%s21036_s10 + $0x360] ss:$8 sps:$4 sm:$0xff]  }
 0x877   :  { %12543 = vmatpush1.bf16.msra.mxu0 %v16563_v42  ;;  %v16622_v42 = vld [vmem:[%s21036_s10 + $0x224] ss:$8 sps:$4 sm:$0xff]   ;;  %v16677_v63 = vld [vmem:[%s21036_s10 + $0x350] ss:$8 sps:$4 sm:$0xff]  }
 0x878   :  { %12731 = vmatprep.subr.bf16.mxu0 %v16568_v44  ;;  %v12642_v19 = vcombine.low %v12634_v11, %v12641_v27  ;;  %v12822_v62 = vrot.slane %v12815_v18, %v20454_v13  ;;  %v16625_v44 = vld [vmem:[%s21036_s10 + $0x234] ss:$8 sps:$4 sm:$0xff]   ;;  %v16653_v11 = vld [vmem:[%s21036_s10 + $0x2d0] ss:$8 sps:$4 sm:$0xff]   ;;  %v16658_v27 = vld [vmem:[%s21036_s10 + $0x2e4] ss:$8 sps:$4 sm:$0xff]  }
 0x879   :  { %v16683_v47 = vld [vmem:[%s21036_s10 + $0x370] ss:$8 sps:$4 sm:$0xff]   ;;  %v16688_v18 = vld [vmem:[%s21036_s10 + $0x384] ss:$8 sps:$4 sm:$0xff]  }
 0x87a   :  { %12561 = vmatmul.mubr.bf16.vlgmr.msra.gmra.mrb[12].mxu0 %v12446_v15  ;;  %v12649_v10 = vrot.slane %v12642_v19, %v20454_v13  ;;  %v16628_v15 = vld [vmem:[%s21036_s10 + $0x244] ss:$8 sps:$4 sm:$0xff]   ;;  %v16661_v19 = vld [vmem:[%s21036_s10 + $0x2f4] ss:$8 sps:$4 sm:$0xff]  }
 0x87b   :  { %12732 = vmatpush1.bf16.msra.mxu0 %v16566_v21  ;;  %12763 = vmatprep.mubr.bf16.mxu0 %v16828_v41  ;;  %v16623_v21 = vld [vmem:[%s21036_s10 + $0x230] ss:$8 sps:$4 sm:$0xff]  }
 0x87c   :  { %12733 = vmatprep.subr.bf16.mxu0 %v16571_v0  ;;  %v16626_v0 = vld [vmem:[%s21036_s10 + $0x240] ss:$8 sps:$4 sm:$0xff]  }
 0x87f   :  { %12734 = vmatpush1.bf16.msra.mxu0 %v16569_v45  ;;  %v16631_v45 = vld [vmem:[%s21036_s10 + $0x254] ss:$8 sps:$4 sm:$0xff]  }
 0x880   :  { %12735 = vmatprep.subr.bf16.mxu0 %v16574_v57  ;;  %v16629_v57 = vld [vmem:[%s21036_s10 + $0x250] ss:$8 sps:$4 sm:$0xff]  }
 0x883   :  { %12736 = vmatpush1.bf16.msra.mxu0 %v16572_v4  ;;  %v16634_v4 = vld [vmem:[%s21036_s10 + $0x264] ss:$8 sps:$4 sm:$0xff]  }
 0x884   :  { %12737 = vmatprep.subr.bf16.mxu0 %v16577_v61  ;;  %v16632_v61 = vld [vmem:[%s21036_s10 + $0x260] ss:$8 sps:$4 sm:$0xff]  }
 0x887   :  { %12738 = vmatpush1.bf16.msra.mxu0 %v16575_v48  ;;  %v16637_v48 = vld [vmem:[%s21036_s10 + $0x274] ss:$8 sps:$4 sm:$0xff]  }
 0x888   :  { %12739 = vmatprep.subr.bf16.mxu0 %v16580_v1  ;;  %v16635_v1 = vld [vmem:[%s21036_s10 + $0x270] ss:$8 sps:$4 sm:$0xff]  }
 0x88b   :  { %12740 = vmatpush1.bf16.msra.mxu0 %v16578_v59  ;;  %v16640_v59 = vld [vmem:[%s21036_s10 + $0x284] ss:$8 sps:$4 sm:$0xff]  }
 0x88c   :  { %12741 = vmatprep.subr.bf16.mxu0 %v16583_v31  ;;  %v16638_v31 = vld [vmem:[%s21036_s10 + $0x280] ss:$8 sps:$4 sm:$0xff]  }
 0x88f   :  { %12742 = vmatpush1.bf16.msra.mxu0 %v16581_v7  ;;  %v16646_v7 = vld [vmem:[%s21036_s10 + $0x2a4] ss:$8 sps:$4 sm:$0xff]  }
 0x890   :  { %12743 = vmatprep.subr.bf16.mxu0 %v16586_v20  ;;  %v16644_v20 = vld [vmem:[%s21036_s10 + $0x2a0] ss:$8 sps:$4 sm:$0xff]  }
 0x893   :  { %12744 = vmatpush1.bf16.msra.mxu0 %v16584_v43  ;;  %v16650_v43 = vld [vmem:[%s21036_s10 + $0x2c0] ss:$8 sps:$4 sm:$0xff]  }
 0x894   :  { %12745 = vmatprep.subr.bf16.mxu0 %v16589_v16  ;;  %v16655_v16 = vld [vmem:[%s21036_s10 + $0x2d4] ss:$8 sps:$4 sm:$0xff]  }
 0x897   :  { %12746 = vmatpush1.bf16.msra.mxu0 %v16587_v30  ;;  %v16656_v30 = vld [vmem:[%s21036_s10 + $0x2e0] ss:$8 sps:$4 sm:$0xff]  }
 0x898   :  { %12904 = vmatprep.subr.bf16.mxu0 %v16592_v60  ;;  %v16659_v60 = vld [vmem:[%s21036_s10 + $0x2f0] ss:$8 sps:$4 sm:$0xff]  }
 0x89a   :  { %12764 = vmatmul.mubr.bf16.vlgmr.msra.gmra.mrb[12].mxu0 %v12649_v10  ;;  %v16662_v10 = vld [vmem:[%s21036_s10 + $0x300] ss:$8 sps:$4 sm:$0xff]  }
 0x89b   :  { %12905 = vmatpush1.bf16.msra.mxu0 %v16590_v36  ;;  %12936 = vmatprep.mubr.bf16.mxu0 %v16828_v41  ;;  %v16664_v36 = vld [vmem:[%s21036_s10 + $0x304] ss:$8 sps:$4 sm:$0xff]  }
 0x89c   :  { %12906 = vmatprep.subr.bf16.mxu0 %v16595_v32  ;;  %v16667_v32 = vld [vmem:[%s21036_s10 + $0x314] ss:$8 sps:$4 sm:$0xff]  }
 0x89f   :  { %12907 = vmatpush1.bf16.msra.mxu0 %v16593_v52  ;;  %v16665_v52 = vld [vmem:[%s21036_s10 + $0x310] ss:$8 sps:$4 sm:$0xff]  }
 0x8a0   :  { %12908 = vmatprep.subr.bf16.mxu0 %v16598_v25  ;;  %v16670_v25 = vld [vmem:[%s21036_s10 + $0x324] ss:$8 sps:$4 sm:$0xff]  }
 0x8a3   :  { %12909 = vmatpush1.bf16.msra.mxu0 %v16596_v55  ;;  %v16668_v55 = vld [vmem:[%s21036_s10 + $0x320] ss:$8 sps:$4 sm:$0xff]  }
 0x8a4   :  { %12910 = vmatprep.subr.bf16.mxu0 %v16601_v28  ;;  %v16671_v28 = vld [vmem:[%s21036_s10 + $0x330] ss:$8 sps:$4 sm:$0xff]  }
 0x8a7   :  { %12911 = vmatpush1.bf16.msra.mxu0 %v16599_v5  ;;  %v16676_v5 = vld [vmem:[%s21036_s10 + $0x344] ss:$8 sps:$4 sm:$0xff]  }
 0x8a8   :  { %12912 = vmatprep.subr.bf16.mxu0 %v16604_v9  ;;  %v16674_v9 = vld [vmem:[%s21036_s10 + $0x340] ss:$8 sps:$4 sm:$0xff]  }
 0x8ab   :  { %12913 = vmatpush1.bf16.msra.mxu0 %v16602_v14  ;;  %v16679_v14 = vld [vmem:[%s21036_s10 + $0x354] ss:$8 sps:$4 sm:$0xff]  }
 0x8ac   :  { %12914 = vmatprep.subr.bf16.mxu0 %v16607_v33  ;;  %v13397_v33 = vld [vmem:[#allocation4 + $0xe] sm:$0x1] }
 0x8af   :  { %12915 = vmatpush1.bf16.msra.mxu0 %v16605_v37  ;;  %v13396_v37 = vld [vmem:[#allocation4 + $0xc] sm:$0x1] }
 0x8b0   :  { %12916 = vmatprep.subr.bf16.mxu0 %v16610_v8  ;;  %v13419_v8 = vcombine.low %v13394_v6, %v13395_v58  ;;  %v13420_v50 = vcombine.low %v13396_v37, %v13397_v33  ;;  %v16830_v33 = vmov 0.0   ;;  %v14017_v6 = vsub.s32 0, %v17082_v53  ;;  %v14013_v58 = vld [vmem:[%s21037_s11] sm:$0x3] }
 0x8b1   :  { %v14021_v37 = vsub.s32 1, %v17082_v53 }
 0x8b2   :  { %v13434_v56 = vrot.slane %v13420_v50, %v20454_v13 }
 0x8b3   :  { %12917 = vmatpush1.bf16.msra.mxu0 %v16608_v12  ;;  %v16685_v12 = vld [vmem:[%s21036_s10 + $0x374] ss:$8 sps:$4 sm:$0xff]  }
 0x8b4   :  { %12918 = vmatprep.subr.bf16.mxu0 %v16613_v26  ;;  %v13427_v26 = vrot.slane %v13419_v8, %v20454_v13  ;;  %v14022_v8 = vrot.slane %v14013_v58, %v14021_v37 }
 0x8b7   :  { %12919 = vmatpush1.bf16.msra.mxu0 %v16611_v34  ;;  %v13435_v34 = vcombine.low %v13427_v26, %v13434_v56 }
 0x8b8   :  { %13145 = vmatprep.subr.bf16.mxu0 %v16616_v22  ;;  %v16686_v22 = vld [vmem:[%s21036_s10 + $0x380] ss:$8 sps:$4 sm:$0xff]  }
 0x8ba   :  { %12937 = vmatmul.mubr.bf16.vlgmr.msra.gmra.mrb[12].mxu0 %v12822_v62  ;;  %v16691_v62 = vld [vmem:[%s21036_s10 + $0x394] ss:$8 sps:$4 sm:$0xff]  }
 0x8bb   :  { %13146 = vmatpush1.bf16.msra.mxu0 %v16614_v35  ;;  %13177 = vmatprep.mubr.bf16.mxu0 %v16828_v41  ;;  %v13442_v35 = vrot.slane %v13435_v34, %v20454_v13  ;;  %v16692_v13 = vld [vmem:[%s21036_s10 + $0x3a0] ss:$8 sps:$4 sm:$0xff]  }
 0x8bc   :  { %13147 = vmatprep.subr.bf16.mxu0 %v16619_v49  ;;  %v16689_v49 = vld [vmem:[%s21036_s10 + $0x390] ss:$8 sps:$4 sm:$0xff]  }
 0x8bf   :  { %13148 = vmatpush1.bf16.msra.mxu0 %v16617_v38  ;;  %v16694_v38 = vld [vmem:[%s21036_s10 + $0x3a4] ss:$8 sps:$4 sm:$0xff]  }
 0x8c0   :  { %13149 = vmatprep.subr.bf16.mxu0 %v16622_v42  ;;  %v16697_v42 = vld [vmem:[%s21036_s10 + $0x3b4] ss:$8 sps:$4 sm:$0xff]  }
 0x8c3   :  { %13150 = vmatpush1.bf16.msra.mxu0 %v16620_v51  ;;  %v16695_v51 = vld [vmem:[%s21036_s10 + $0x3b0] ss:$8 sps:$4 sm:$0xff]  }
 0x8c4   :  { %13151 = vmatprep.subr.bf16.mxu0 %v16625_v44  ;;  %v16700_v44 = vld [vmem:[%s21036_s10 + $0x3c4] ss:$8 sps:$4 sm:$0xff]  }
 0x8c7   :  { %13152 = vmatpush1.bf16.msra.mxu0 %v16623_v21  ;;  %v16698_v21 = vld [vmem:[%s21036_s10 + $0x3c0] ss:$8 sps:$4 sm:$0xff]  }
 0x8c8   :  { %13153 = vmatprep.subr.bf16.mxu0 %v16628_v15  ;;  %v16703_v15 = vld [vmem:[%s21036_s10 + $0x3d4] ss:$8 sps:$4 sm:$0xff]  }
 0x8cb   :  { %13154 = vmatpush1.bf16.msra.mxu0 %v16626_v0  ;;  %v16701_v0 = vld [vmem:[%s21036_s10 + $0x3d0] ss:$8 sps:$4 sm:$0xff]  }
 0x8cc   :  { %13155 = vmatprep.subr.bf16.mxu0 %v16631_v45  ;;  %v16706_v45 = vld [vmem:[%s21036_s10 + $0x3e4] ss:$8 sps:$4 sm:$0xff]  }
 0x8cf   :  { %13156 = vmatpush1.bf16.msra.mxu0 %v16629_v57  ;;  %v16704_v57 = vld [vmem:[%s21036_s10 + $0x3e0] ss:$8 sps:$4 sm:$0xff]  }
 0x8d0   :  { %13157 = vmatprep.subr.bf16.mxu0 %v16634_v4  ;;  %v16709_v4 = vld [vmem:[%s21036_s10 + $0x3f4] ss:$8 sps:$4 sm:$0xff]  }
 0x8d3   :  { %13158 = vmatpush1.bf16.msra.mxu0 %v16632_v61  ;;  %v16707_v61 = vld [vmem:[%s21036_s10 + $0x3f0] ss:$8 sps:$4 sm:$0xff]  }
 0x8d4   :  { %13159 = vmatprep.subr.bf16.mxu0 %v16637_v48  ;;  %v16712_v48 = vld [vmem:[%s21036_s10 + $0x404] ss:$8 sps:$4 sm:$0xff]  }
 0x8d7   :  { %13160 = vmatpush1.bf16.msra.mxu0 %v16635_v1  ;;  %v16710_v1 = vld [vmem:[%s21036_s10 + $0x400] ss:$8 sps:$4 sm:$0xff]  }
 0x8d8   :  { %13350 = vmatprep.subr.bf16.mxu0 %v16640_v59  ;;  %v16715_v59 = vld [vmem:[%s21036_s10 + $0x414] ss:$8 sps:$4 sm:$0xff]  }
 0x8da   :  { %13178 = vmatmul.mubr.bf16.vlgmr.msra.gmra.mrb[12].mxu0 %v20556_v40  ;;  %v16649_v40 = vld [vmem:[%s21036_s10 + $0x2b4] ss:$8 sps:$4 sm:$0xff]  }
 0x8db   :  { %13351 = vmatpush1.bf16.msra.mxu0 %v16638_v31  ;;  %13382 = vmatprep.mubr.bf16.mxu0 %v16828_v41  ;;  %v16713_v31 = vld [vmem:[%s21036_s10 + $0x410] ss:$8 sps:$4 sm:$0xff]  }
 0x8dc   :  { %13352 = vmatprep.subr.bf16.mxu0 %v16643_v23  ;;  %v16718_v23 = vld [vmem:[%s21036_s10 + $0x424] ss:$8 sps:$4 sm:$0xff]  }
 0x8df   :  { %13353 = vmatpush1.bf16.msra.mxu0 %v16641_v29  ;;  %v16716_v29 = vld [vmem:[%s21036_s10 + $0x420] ss:$8 sps:$4 sm:$0xff]  }
 0x8e0   :  { %13354 = vmatprep.subr.bf16.mxu0 %v16646_v7  ;;  %v16724_v7 = vld [vmem:[%s21036_s10 + $0x444] ss:$8 sps:$4 sm:$0xff]  }
 0x8e3   :  { %13355 = vmatpush1.bf16.msra.mxu0 %v16644_v20  ;;  %v16722_v20 = vld [vmem:[%s21036_s10 + $0x440] ss:$8 sps:$4 sm:$0xff]  }
 0x8e4   :  { %13356 = vmatprep.subr.bf16.mxu0 %v16649_v40  ;;  %v16727_v40 = vld [vmem:[%s21036_s10 + $0x454] ss:$8 sps:$4 sm:$0xff]  }
 0x8e7   :  { %13357 = vmatpush1.bf16.msra.mxu0 %v16647_v3  ;;  %v16725_v3 = vld [vmem:[%s21036_s10 + $0x450] ss:$8 sps:$4 sm:$0xff]  }
 0x8e8   :  { %13358 = vmatprep.subr.bf16.mxu0 %v16652_v24  ;;  %v16730_v24 = vld [vmem:[%s21036_s10 + $0x464] ss:$8 sps:$4 sm:$0xff]  }
 0x8eb   :  { %13359 = vmatpush1.bf16.msra.mxu0 %v16650_v43  ;;  %v16728_v43 = vld [vmem:[%s21036_s10 + $0x460] ss:$8 sps:$4 sm:$0xff]  }
 0x8ec   :  { %13360 = vmatprep.subr.bf16.mxu0 %v16655_v16  ;;  %v16733_v16 = vld [vmem:[%s21036_s10 + $0x474] ss:$8 sps:$4 sm:$0xff]  }
 0x8ef   :  { %13361 = vmatpush1.bf16.msra.mxu0 %v16653_v11  ;;  %v16731_v11 = vld [vmem:[%s21036_s10 + $0x470] ss:$8 sps:$4 sm:$0xff]  }
 0x8f0   :  { %13362 = vmatprep.subr.bf16.mxu0 %v16658_v27  ;;  %v16734_v27 = vld [vmem:[%s21039_s13 + $0x40] sm:$0xff]  }
 0x8f1   :  { %15785 = vmatprep.subr.bf16.mxu1 %v16734_v27 }
 0x8f3   :  { %13363 = vmatpush1.bf16.msra.mxu0 %v16656_v30  ;;  %v16735_v30 = vld [vmem:[%s21039_s13] sm:$0xff]  }
 0x8f4   :  { %13364 = vmatprep.subr.bf16.mxu0 %v16661_v19  ;;  %v16736_v19 = vld [vmem:[%s21039_s13 + $0x48] sm:$0xff]   ;;  %15786 = vmatpush3.bf16.msra.mxu1 %v16735_v30 }
 0x8f5   :  { %15787 = vmatprep.subr.bf16.mxu1 %v16736_v19 }
 0x8f7   :  { %13365 = vmatpush1.bf16.msra.mxu0 %v16659_v60  ;;  %v16737_v60 = vld [vmem:[%s21039_s13 + $0x8] sm:$0xff]  }
 0x8f8   :  { %13524 = vmatprep.subr.bf16.mxu0 %v16664_v36  ;;  %15788 = vmatpush3.bf16.msra.mxu1 %v16737_v60  ;;  %v16739_v36 = vld [vmem:[%s21039_s13 + $0x10] sm:$0xff]  }
 0x8fa   :  { %13383 = vmatmul.mubr.bf16.vlgmr.msra.gmra.mrb[12].mxu0 %v20543_v54  ;;  %v16673_v54 = vld [vmem:[%s21036_s10 + $0x334] ss:$8 sps:$4 sm:$0xff]  }
 0x8fb   :  { %13525 = vmatpush1.bf16.msra.mxu0 %v16662_v10  ;;  %13556 = vmatprep.mubr.bf16.mxu0 %v16828_v41  ;;  %v16740_v10 = vld [vmem:[%s21039_s13 + $0x58] sm:$0xff]  }
 0x8fc   :  { %13526 = vmatprep.subr.bf16.mxu0 %v16667_v32  ;;  %v16741_v32 = vld [vmem:[%s21039_s13 + $0x18] sm:$0xff]  }
 0x8ff   :  { %13527 = vmatpush1.bf16.msra.mxu0 %v16665_v52  ;;  %v16742_v52 = vld [vmem:[%s21039_s13 + $0x60] sm:$0xff]  }
 0x900   :  { %13528 = vmatprep.subr.bf16.mxu0 %v16670_v25  ;;  %v16743_v25 = vld [vmem:[%s21039_s13 + $0x20] sm:$0xff]  }
 0x903   :  { %13529 = vmatpush1.bf16.msra.mxu0 %v16668_v55  ;;  %v16744_v55 = vld [vmem:[%s21039_s13 + $0x68] sm:$0xff]  }
 0x904   :  { %13530 = vmatprep.subr.bf16.mxu0 %v16673_v54  ;;  %v16745_v54 = vld [vmem:[%s21039_s13 + $0x28] sm:$0xff]  }
 0x907   :  { %13531 = vmatpush1.bf16.msra.mxu0 %v16671_v28  ;;  %v16746_v28 = vld [vmem:[%s21039_s13 + $0x70] sm:$0xff]  }
 0x908   :  { %13532 = vmatprep.subr.bf16.mxu0 %v16676_v5  ;;  %v16747_v5 = vld [vmem:[%s21039_s13 + $0x30] sm:$0xff]  }
 0x90b   :  { %13533 = vmatpush1.bf16.msra.mxu0 %v16674_v9  ;;  %v16748_v9 = vld [vmem:[%s21039_s13 + $0x78] sm:$0xff]  }
 0x90c   :  { %13534 = vmatprep.subr.bf16.mxu0 %v16679_v14  ;;  %v16749_v14 = vld [vmem:[%s21039_s13 + $0x38] sm:$0xff]  }
 0x90f   :  { %13535 = vmatpush1.bf16.msra.mxu0 %v16677_v63  ;;  %v14027_v63 = vld [vmem:[%s21038_s12] sm:$0x3] }
 0x910   :  { %13536 = vmatprep.subr.bf16.mxu0 %v16682_v17  ;;  %v14018_v17 = vrot.slane %v14013_v58, %v14017_v6  ;;  %v14032_v50 = vrot.slane %v14027_v63, %v14017_v6 }
 0x913   :  { %13537 = vmatpush1.bf16.msra.mxu0 %v16680_v46 }
 0x914   :  { %13538 = vmatprep.subr.bf16.mxu0 %v16685_v12  ;;  %v14036_v12 = vrot.slane %v14027_v63, %v14021_v37  ;;  %v16750_v63 = vld [vmem:[%s21041_s15] sm:$0xff]  }
 0x917   :  { %13539 = vmatpush1.bf16.msra.mxu0 %v16683_v47 }
 0x918   :  { %13765 = vmatprep.subr.bf16.mxu0 %v16688_v18 }
 0x91a   :  { %13557 = vmatmul.mubr.bf16.vlgmr.msra.gmra.mrb[12].mxu0 %v13442_v35 }
 0x91b   :  { %13766 = vmatpush1.bf16.msra.mxu0 %v16686_v22  ;;  %13797 = vmatprep.mubr.bf16.mxu0 %v16828_v41 }
 0x91c   :  { %13767 = vmatprep.subr.bf16.mxu0 %v16691_v62 }
 0x91f   :  { %13768 = vmatpush1.bf16.msra.mxu0 %v16689_v49 }
 0x920   :  { %13769 = vmatprep.subr.bf16.mxu0 %v16694_v38 }
 0x923   :  { %13770 = vmatpush1.bf16.msra.mxu0 %v16692_v13 }
 0x924   :  { %13771 = vmatprep.subr.bf16.mxu0 %v16697_v42 }
 0x927   :  { %13772 = vmatpush1.bf16.msra.mxu0 %v16695_v51 }
 0x928   :  { %13773 = vmatprep.subr.bf16.mxu0 %v16700_v44 }
 0x92b   :  { %13774 = vmatpush1.bf16.msra.mxu0 %v16698_v21 }
 0x92c   :  { %13775 = vmatprep.subr.bf16.mxu0 %v16703_v15 }
 0x92f   :  { %13776 = vmatpush1.bf16.msra.mxu0 %v16701_v0 }
 0x930   :  { %13777 = vmatprep.subr.bf16.mxu0 %v16706_v45 }
 0x933   :  { %13778 = vmatpush1.bf16.msra.mxu0 %v16704_v57 }
 0x934   :  { %13779 = vmatprep.subr.bf16.mxu0 %v16709_v4 }
 0x937   :  { %13780 = vmatpush1.bf16.msra.mxu0 %v16707_v61 }
 0x938   :  { %13970 = vmatprep.subr.bf16.mxu0 %v16712_v48 }
 0x93a   :  { %13798 = vmatmul.mubr.bf16.vlgmr.msra.gmra.mrb[12].mxu0 %v20559_v2  ;;  %v16721_v2 = vld [vmem:[%s21036_s10 + $0x434] ss:$8 sps:$4 sm:$0xff]  }
 0x93b   :  { %13971 = vmatpush1.bf16.msra.mxu0 %v16710_v1  ;;  %14002 = vmatprep.mubr.bf16.mxu0 %v16828_v41  ;;  %v16719_v41 = vld [vmem:[%s21036_s10 + $0x430] ss:$8 sps:$4 sm:$0xff]  }
 0x93c   :  { %13972 = vmatprep.subr.bf16.mxu0 %v16715_v59 }
 0x93f   :  { %13973 = vmatpush1.bf16.msra.mxu0 %v16713_v31 }
 0x940   :  { %13974 = vmatprep.subr.bf16.mxu0 %v16718_v23 }
 0x943   :  { %13975 = vmatpush1.bf16.msra.mxu0 %v16716_v29 }
 0x944   :  { %13976 = vmatprep.subr.bf16.mxu0 %v16721_v2 }
 0x947   :  { %13977 = vmatpush1.bf16.msra.mxu0 %v16719_v41 }
 0x948   :  { %13978 = vmatprep.subr.bf16.mxu0 %v16724_v7 }
 0x94b   :  { %13979 = vmatpush1.bf16.msra.mxu0 %v16722_v20 }
 0x94c   :  { %13980 = vmatprep.subr.bf16.mxu0 %v16727_v40 }
 0x94f   :  { %13981 = vmatpush1.bf16.msra.mxu0 %v16725_v3 }
 0x950   :  { %13982 = vmatprep.subr.bf16.mxu0 %v16730_v24 }
 0x953   :  { %13983 = vmatpush1.bf16.msra.mxu0 %v16728_v43 }
 0x954   :  { %13984 = vmatprep.subr.bf16.mxu0 %v16733_v16 }
 0x957   :  { %13985 = vmatpush1.bf16.msra.mxu0 %v16731_v11 }
 0x95a   :  { %14003 = vmatmul.mubr.bf16.vlgmr.msra.gmra.mrb[12].mxu0 %v20547_v39  ;;  %v16738_v39 = vld [vmem:[%s21039_s13 + $0x50] sm:$0xff]  }
 0x95b   :  { %15789 = vmatprep.subr.bf16.mxu1 %v16738_v39 }
 0x95c   :  { %15790 = vmatpush3.bf16.msra.mxu1 %v16739_v36 }
 0x95d   :  { %15791 = vmatprep.subr.bf16.mxu1 %v16740_v10 }
 0x960   :  { %15792 = vmatpush3.bf16.msra.mxu1 %v16741_v32 }
 0x961   :  { %15793 = vmatprep.subr.bf16.mxu1 %v16742_v52 }
 0x964   :  { %15794 = vmatpush3.bf16.msra.mxu1 %v16743_v25 }
 0x965   :  { %15795 = vmatprep.subr.bf16.mxu1 %v16744_v55 }
 0x968   :  { %15796 = vmatpush3.bf16.msra.mxu1 %v16745_v54 }
 0x969   :  { %15797 = vmatprep.subr.bf16.mxu1 %v16746_v28 }
 0x96c   :  { %15798 = vmatpush3.bf16.msra.mxu1 %v16747_v5 }
 0x96d   :  { %15799 = vmatprep.subr.bf16.mxu1 %v16748_v9 }
 0x970   :  { %15800 = vmatpush3.bf16.msra.mxu1 %v16749_v14 }
 0x971   :  { %16172 = vmatprep.subr.bf16.mxu1 %v16830_v33 }
 0xa2d   :  { %v14004_v46 = vpop.f32.mrb[12].mxu0 }
 0xa2e   :  { %v14025_v26 = vmul.f32 %v14018_v17, %v14004_v46  ;;  %v14006_v56 = vpop.f32.mrb[13].mxu0  ;;  %v16751_v17 = vld [vmem:[%s21041_s15 + $0x8] sm:$0xff]   ;;  %v16754_v46 = vld [vmem:[%s21041_s15 + $0x20] sm:$0xff]  }
 0xa2f   :  { %v14026_v47 = vmul.f32 %v14022_v8, %v14006_v56  ;;  %v14008_v34 = vpop.f32.mrb[14].mxu0  ;;  %v16752_v8 = vld [vmem:[%s21041_s15 + $0x10] sm:$0xff]   ;;  %v16757_v56 = vld [vmem:[%s21041_s15 + $0x38] sm:$0xff]  }
 0xa30   :  { %v14039_v18 = vadd.f32 %v14032_v50, %v14025_v26  ;;  %v14009_v22 = vpop.f32.mrb[15].mxu0  ;;  %v16753_v50 = vld [vmem:[%s21041_s15 + $0x18] sm:$0xff]   ;;  %v16756_v26 = vld [vmem:[%s21041_s15 + $0x30] sm:$0xff]   ;;  %v15405_v34 = vld [vmem:[%s21040_s14] ss:$0 sm:$0xff] }
 0xa31   :  { %v14040_v35 = vadd.f32 %v14036_v12, %v14026_v47  ;;  %v16755_v12 = vld [vmem:[%s21041_s15 + $0x28] sm:$0xff]   ;;  %s16832_s15 = smov [#allocation5]  }
 0xa32   :  { %v14041_v62 = vmax.f32 %v14039_v18, 0.0  ;;  %s14401_s7 = sshll.u32 %s16832_s15, 4  ;;  %s14402_s7 = int_to_ptr.vmem [resolvable:$true] %s14401_s7 }
 0xa33   :  { %v14042_v49 = vmax.f32 %v14040_v35, 0.0  ;;  %s16802_s14 = scalar_lea.vmem %s14402_s7, 32  ;;  %p16807_p1 = scmp.lt.s32.totalorder %s14402_s7, %s14402_s7 }
 0xa34   :  { %p16803_p0 = scmp.ne.s32.totalorder %s14402_s7, %s16802_s14  ;;  %p16808_p2 = scmp.lt.s32.totalorder %s16802_s14, %s16802_s14 }
 0xa35   :  { %v14045_v53 = vcombine.low %v14041_v62, %v14042_v49  ;;  %v14046_v38 = vcombine.high %v14041_v62, %v14042_v49  ;;  %v15403_v13 = vcombine.low %v14042_v49, %v14042_v49  ;;  %v15404_v42 = vcombine.high %v14042_v49, %v14042_v49 }
 0xa36   :  { %p16809_p3 = por %p16808_p2, %p16807_p1 }
 0xa37   :  { %v14054_v51 = vsel %vm14053_vm10, %v14045_v53, 0.0  ;;  %v14061_v44 = vsel %vm14053_vm10, %v15403_v13, 0.0  ;;  %v14068_v21 = vsel %vm14053_vm10, %v14046_v38, 0.0  ;;  %v14075_v15 = vsel %vm14053_vm10, %v15404_v42, 0.0  ;;  %v15422_v13 = vld [vmem:[%s21042_s16] ss:$0 sm:$0xff] }
 0xa38   :  { %v14055_v0 = vrot.slane %v14054_v51, 4  ;;  %v14062_v45 = vrot.slane %v14061_v44, 4  ;;  %v14069_v57 = vrot.slane %v14068_v21, 4  ;;  %v14076_v4 = vrot.slane %v14075_v15, 4  ;;  %p16810_p4 = pnand %p16809_p3, %p16803_p0 }
 0xa3a   :  { %v14056_v61 = vadd.f32 %v14055_v0, %v14054_v51  ;;  %v14063_v48 = vadd.f32 %v14062_v45, %v14061_v44  ;;  %v14070_v1 = vadd.f32 %v14069_v57, %v14068_v21  ;;  %v14077_v59 = vadd.f32 %v14076_v4, %v14075_v15 }
 0xa3c   :  { %v14057_v31 = vrot.slane %v14056_v61, 2  ;;  %v14071_v23 = vrot.slane %v14070_v1, 2  ;;  %v14064_v29 = vrot.slane %v14063_v48, 2  ;;  %v14078_v2 = vrot.slane %v14077_v59, 2 }
 0xa3e   :  { %v14058_v41 = vadd.f32 %v14057_v31, %v14056_v61  ;;  %v14072_v7 = vadd.f32 %v14071_v23, %v14070_v1  ;;  %v14065_v20 = vadd.f32 %v14064_v29, %v14063_v48  ;;  %v14079_v40 = vadd.f32 %v14078_v2, %v14077_v59 }
 0xa40   :  { %v14059_v3 = vrot.slane %v14058_v41, 1  ;;  %v14073_v24 = vrot.slane %v14072_v7, 1  ;;  %v14066_v43 = vrot.slane %v14065_v20, 1  ;;  %v14080_v16 = vrot.slane %v14079_v40, 1 }
 0xa42   :  { %v14060_v11 = vadd.f32 %v14059_v3, %v14058_v41  ;;  %v14074_v27 = vadd.f32 %v14073_v24, %v14072_v7  ;;  %v14067_v30 = vadd.f32 %v14066_v43, %v14065_v20  ;;  %v14081_v19 = vadd.f32 %v14080_v16, %v14079_v40 }
 0xa44   :  { %v14084_v60 = vmul.f32 0.25, %v14067_v30  ;;  %v14086_v39 = vmul.f32 0.25, %v14081_v19  ;;  %v14083_v36 = vmul.f32 0.25, %v14060_v11  ;;  %v14085_v10 = vmul.f32 0.25, %v14074_v27 }
 0xa46   :  { %v14088_v32 = vpack.c.bf16 %v14084_v60, %v14084_v60  ;;  %v14090_v52 = vpack.c.bf16 %v14086_v39, %v14086_v39  ;;  %v14087_v25 = vpack.c.bf16 %v14083_v36, %v14083_v36  ;;  %v14089_v55 = vpack.c.bf16 %v14085_v10, %v14085_v10 }
 0xa48   :  { %v14135_v54 = vunpack.c.l.b16 %v14088_v32  ;;  %v14137_v28 = vunpack.c.l.b16 %v14090_v52  ;;  %v14134_v5 = vunpack.c.l.b16 %v14087_v25  ;;  %v14136_v9 = vunpack.c.l.b16 %v14089_v55 }
 0xa4a   :  { %v14140_v14 = vsel %vm308_vm1, %v14137_v28, %v14135_v54  ;;  %v14139_v6 = vsel %vm308_vm1, %v14136_v9, %v14134_v5  ;;  %vm16831_vm1 = vmmov 0  }
 0xa4b   :  { %v14142_v58 = vpack.c.b16 %v14140_v14, %v14140_v14  ;;  %v14141_v37 = vpack.c.b16 %v14139_v6, %v14139_v6 }
 0xa4d   :  { %14273 = vmatprep.mubr.bf16.mxu1 %v14142_v58 }
 0xa4e   :  { %14274 = vmatmul.mubr.bf16.vlgmr.msra.gmra.mrb[72].mxu1 %v14141_v37 }
 0xa4f   :  { %16173 = vmatpush3.bf16.msra.mxu1 %v16750_v63  ;;  %16188 = vmatprep.mubr.msk.bf16.mxu1 %vm16831_vm1, %v16830_v33 }
 0xa50   :  { %16174 = vmatprep.subr.bf16.mxu1 %v16830_v33 }
 0xa53   :  { %16175 = vmatpush3.bf16.msra.mxu1 %v16751_v17 }
 0xa54   :  { %16176 = vmatprep.subr.bf16.mxu1 %v16830_v33 }
 0xa57   :  { %16177 = vmatpush3.bf16.msra.mxu1 %v16752_v8 }
 0xa58   :  { %16178 = vmatprep.subr.bf16.mxu1 %v16830_v33 }
 0xa5b   :  { %16179 = vmatpush3.bf16.msra.mxu1 %v16753_v50 }
 0xa5c   :  { %16180 = vmatprep.subr.bf16.mxu1 %v16830_v33 }
 0xa5f   :  { %16181 = vmatpush3.bf16.msra.mxu1 %v16754_v46 }
 0xa60   :  { %16182 = vmatprep.subr.bf16.mxu1 %v16830_v33 }
 0xa63   :  { %16183 = vmatpush3.bf16.msra.mxu1 %v16755_v12 }
 0xa64   :  { %16184 = vmatprep.subr.bf16.mxu1 %v16830_v33 }
 0xa67   :  { %16185 = vmatpush3.bf16.msra.mxu1 %v16756_v26 }
 0xa68   :  { %16186 = vmatprep.subr.bf16.mxu1 %v16830_v33 }
 0xa6b   :  { %16187 = vmatpush3.bf16.msra.mxu1 %v16757_v56 }
 0xb21   :  { %v15801_v47 = vpop.f32.mrb[72].mxu1 }
 0xb22   :  { %v15802_v18 = vpop.f32.mrb[73].mxu1 }
 0xb23   :  { %v15803_v22 = vadd.f32 %v15802_v18, %v15801_v47  ;;  %v15804_v35 = vpop.f32.mrb[74].mxu1 }
 0xb24   :  { %v15805_v62 = vpop.f32.mrb[75].mxu1 }
 0xb25   :  { %v14276_v49 = vadd.f32 %v15803_v22, %v15405_v34 }
 0xb27   :  { %v14281_v53 = vmax.f32 %v14276_v49, 0.0 }
 0xb29   :  { %v14282_v38 = vpack.c.bf16 %v14281_v53, %v14281_v53 }
 0xb2b   :  { %16189 = vmatmul.mubr.bf16.vlgmr.msra.gmra.mrb[76].mxu1 %v14282_v38 }
 0xbfe   :  { %v14388_v33 = vpop.f32.mrb[76].mxu1 }
 0xbff   :  { %v14389_v42 = vadd.f32 %v15422_v13, %v14388_v33  ;;  %v16190_v51 = vpop.f32.mrb[77].mxu1 }
 0xc00   :  { %v14391_v44 = vpop.f32.mrb[78].mxu1 }
 0xc01   :  { %14394 = vst [vmem:[#allocation5] sm:$0x3] %v14389_v42  ;;  %v16191_v21 = vpop.f32.mrb[79].mxu1 }
 0xc02   :  { %16813 = shalt.err (!%p16810_p4)
}
 0xc03   :  { %s16814_s16 = scalar_lea.hbm %s21043_s17, 32 }
 0xc04   :  { %p16815_p5 = scmp.ne.s32.totalorder %s21043_s17, %s16814_s16  ;;  %p16818_p6 = scmp.lt.u32.totalorder %s16814_s16, %s21043_s17 }
 0xc06   :  { %p16820_p7 = pnand %p16818_p6, %p16815_p5 }
 0xc08   :  { %16823 = shalt.err (!%p16820_p7)
}
 0xc09   :  { %14404 = dma.vmem_to_hbm [thread:$0]  %s14402_s7, 32, %s21043_s17, [#allocation6]  }
 0xc0a   :  { %16824 = dma.done.wait [#allocation6], 32  }
 0xc0b   :  { %16825 = vsyncadd [#allocation6], 4294967264 }
 0xc0c   :  { %14408 = vsyncpa [#allocation6], 1 }

</bundles_post_ra>
